<compile_context>
chip_gen: v7x
topology: tpu7x:2x2x1
jax: 0.10.0
libtpu: 0.0.40
codegen_flags: <defaults>
</compile_context>

<pallas_src>
import functools
import math

import jax
import jax.numpy as jnp
from jax.experimental import pallas as pl
from jax.experimental.pallas import tpu as pltpu

BN_EPS = 1e-5
_VMEM_LIMIT = 32 * 1024 * 1024   # safe on v5e/v6e/v7x
_VMEM_BUDGET = 20 * 1024 * 1024  # target working-set per grid step


# ----------------------------- in-kernel helpers ----------------------------


def _store_padded(pad_ref, interior):
    """Write `interior` into pad_ref's 1-pixel-halo interior and zero the halo.

    Every element of pad_ref is written exactly once per call (zeros on the
    thin border, data in the interior).  No cross-step scratch state, so it
    stays correct when the parallel batch axis is sharded across TensorCores.
    """
    b, hp, wp, c = pad_ref.shape
    h, w = hp - 2, wp - 2
    zrow = jnp.zeros((b, 1, wp, c), pad_ref.dtype)
    zcol = jnp.zeros((b, h, 1, c), pad_ref.dtype)
    pad_ref[:, 0:1, :, :] = zrow
    pad_ref[:, hp - 1:hp, :, :] = zrow
    pad_ref[:, 1:h + 1, 0:1, :] = zcol
    pad_ref[:, 1:h + 1, wp - 1:wp, :] = zcol
    pad_ref[:, 1:h + 1, 1:w + 1, :] = interior


def _phase_split(xp):
    """(B, Hp, Wp, C) -> ph[py][px] = xp[:, py::2, px::2, :]  (Hp, Wp even)."""
    b, hp, wp, c = xp.shape
    rows = xp.reshape(b, hp // 2, 2, wp, c)        # leading-dim split (cheap)
    r0, r1 = rows[:, :, 0], rows[:, :, 1]

    def _cols(t):
        b2, hh, ww, c2 = t.shape
        t = t.reshape(b2 * hh, ww, c2)             # merge leading dims
        t = t.reshape(b2 * hh, ww // 2, 2, c2)     # sublane split (once per plane)
        e = t[:, :, 0, :].reshape(b2, hh, ww // 2, c2)
        o = t[:, :, 1, :].reshape(b2, hh, ww // 2, c2)
        return e, o

    return (_cols(r0), _cols(r1))


def _conv3x3_taps(xp, ho, wo, stride):
    """9 im2col taps of a zero-padded (B, H+2, W+2, C) map, each (B*ho*wo, C).

    Tap order is (dy, dx) row-major, matching the (9, Cin, Cout) weights.
    For stride 2 the padded map is de-interleaved ONCE into its four stride
    phases so each tap (and the center tap reused by the 1x1 shortcut) is a
    plain static slice instead of a per-tap strided extraction.
    """
    b, _, _, c = xp.shape
    taps = []
    if stride == 1:
        for dy in range(3):
            for dx in range(3):
                taps.append(xp[:, dy:dy + ho, dx:dx + wo, :].reshape(b * ho * wo, c))
    else:  # stride == 2
        ph = _phase_split(xp)
        for dy in range(3):
            for dx in range(3):
                t = ph[dy % 2][dx % 2][:, dy // 2:dy // 2 + ho, dx // 2:dx // 2 + wo, :]
                taps.append(t.reshape(b * ho * wo, c))
    return taps


def _conv3x3_mm(taps, w_ref):
    """3x3 conv as matmul(s): taps are (M, C) bf16, w_ref is (9, C, Cout) bf16."""
    _, ck, cout = w_ref.shape
    if ck % 128 == 0:
        # lane-aligned taps: single im2col matmul, K = 9*C (concat at 128-lane
        # boundaries => no cross-lane relayout).
        p = jnp.concatenate(taps, axis=-1)
        wmat = w_ref[...].reshape(9 * ck, cout)
        return jnp.dot(p, wmat, preferred_element_type=jnp.float32)
    # misaligned channel count (e.g. 64): accumulate 9 aligned dots instead of
    # paying the XLU relayout of a 64-lane-boundary concat.
    acc = jnp.dot(taps[0], w_ref[0], preferred_element_type=jnp.float32)
    for t in range(1, 9):
        acc = acc + jnp.dot(taps[t], w_ref[t], preferred_element_type=jnp.float32)
    return acc


# --------------------------------- kernel -----------------------------------


def _simple_block_kernel(*refs, stride, has_proj):
    if has_proj:
        (x_ref, w1_ref, s1_ref, b1_ref, w2_ref, s2_ref, b2_ref,
         wsc_ref, ssc_ref, bsc_ref, o_ref, pad1_ref, pad2_ref) = refs
    else:
        (x_ref, w1_ref, s1_ref, b1_ref, w2_ref, s2_ref, b2_ref,
         o_ref, pad1_ref, pad2_ref) = refs

    bt, h, w, cin = x_ref.shape
    _, ho, wo, cout = o_ref.shape
    m = bt * ho * wo

    x = x_ref[...]                                        # (bt, h, w, cin)

    # ---- C1: 3x3 conv (stride s, pad 1) + BN1 + ReLU -----------------------
    _store_padded(pad1_ref, x.astype(jnp.bfloat16))       # bf16 halo-padded x
    taps1 = _conv3x3_taps(pad1_ref[...], ho, wo, stride)
    y1 = _conv3x3_mm(taps1, w1_ref)                       # (m, cout) f32
    y1 = jnp.maximum(y1 * s1_ref[...] + b1_ref[...], 0.0)

    # ---- shortcut -----------------------------------------------------------
    if has_proj:
        # center tap (dy=dx=1) is exactly the stride-decimated input -> reuse.
        sc = jnp.dot(taps1[4], wsc_ref[...], preferred_element_type=jnp.float32)
        sc = sc * ssc_ref[...] + bsc_ref[...]
    else:
        sc = x.reshape(m, cout).astype(jnp.float32)       # identity (stride == 1)

    # ---- C2: 3x3 conv (stride 1, pad 1) + BN2 ------------------------------
    _store_padded(pad2_ref, y1.reshape(bt, ho, wo, cout).astype(jnp.bfloat16))
    taps2 = _conv3x3_taps(pad2_ref[...], ho, wo, 1)
    y2 = _conv3x3_mm(taps2, w2_ref)
    y2 = y2 * s2_ref[...] + b2_ref[...]

    # ---- residual add + ReLU -------------------------------------------------
    o_ref[...] = jnp.maximum(y2 + sc, 0.0).reshape(bt, ho, wo, cout)


# ------------------------------ host-side wrapper ----------------------------


def _per_sample_vmem_bytes(h, w, cin, ho, wo, cout, x_itemsize):
    pad1 = (h + 2) * (w + 2) * cin * 2
    pad2 = (ho + 2) * (wo + 2) * cout * 2
    p1 = ho * wo * 9 * cin * 2
    p2 = ho * wo * 9 * cout * 2
    acts = 6 * ho * wo * cout * 4
    io = 2 * h * w * cin * x_itemsize + 2 * ho * wo * cout * 4
    return pad1 + pad2 + p1 + p2 + acts + io


def _pick_batch_tile(n, per_sample_bytes, budget=_VMEM_BUDGET):
    """Largest divisor of n fitting the VMEM budget; keep >= 2 grid steps when
    possible (v7x has 2 TensorCores to shard the parallel axis over)."""
    fits = [d for d in range(1, n + 1)
            if n % d == 0 and d * per_sample_bytes <= budget]
    if not fits:
        return 1
    pref = [d for d in fits if n // d >= 2]
    return max(pref) if pref else max(fits)


def simple_block_forward(x_nhwc, params, *, half_res):
    """SimpleBlock.forward.  Input/output are NHWC (C = lane dim); keep the
    whole backbone in NHWC and transpose NCHW<->NHWC only at the network
    boundary."""
    stride = 2 if half_res else 1
    n, h, w, cin = x_nhwc.shape
    cout = int(params["s1"].shape[-1])
    has_proj = "wsc" in params
    if not has_proj and stride != 1:
        raise ValueError("identity shortcut requires half_res=False "
                         "(as in the PyTorch module)")
    if h % stride or w % stride:
        raise ValueError("spatial dims must be divisible by the stride")
    ho, wo = h // stride, w // stride

    # Projection blocks use x only as a bf16 MXU operand -> ship bf16 (half
    # the input DMA).  Identity blocks keep f32 for the residual add.
    x = x_nhwc.astype(jnp.bfloat16 if has_proj else jnp.float32)

    bt = _pick_batch_tile(
        n, _per_sample_vmem_bytes(h, w, cin, ho, wo, cout, x.dtype.itemsize))
    grid = (n // bt,)

    ins = [x, params["w1"], params["s1"], params["b1"],
           params["w2"], params["s2"], params["b2"]]
    if has_proj:
        ins += [params["wsc"], params["ssc"], params["bsc"]]

    def _full(a):
        nd = a.ndim
        return pl.BlockSpec(a.shape, lambda g, _nd=nd: (0,) * _nd)

    in_specs = [pl.BlockSpec((bt, h, w, cin), lambda g: (g, 0, 0, 0))]
    in_specs += [_full(a) for a in ins[1:]]

    m_total = n * ho * wo
    flops = 2 * m_total * 9 * cin * cout + 2 * m_total * 9 * cout * cout
    if has_proj:
        flops += 2 * m_total * cin * cout
    bytes_accessed = sum(int(a.size) * a.dtype.itemsize for a in ins)
    bytes_accessed += n * ho * wo * cout * 4

    out = pl.pallas_call(
        functools.partial(_simple_block_kernel, stride=stride, has_proj=has_proj),
        grid=grid,                                        # bt samples per step
        out_shape=jax.ShapeDtypeStruct((n, ho, wo, cout), jnp.float32),
        in_specs=in_specs,
        out_specs=pl.BlockSpec((bt, ho, wo, cout), lambda g: (g, 0, 0, 0)),
        scratch_shapes=[
            pltpu.VMEM((bt, h + 2, w + 2, cin), jnp.bfloat16),     # padded x  (C1)
            pltpu.VMEM((bt, ho + 2, wo + 2, cout), jnp.bfloat16),  # padded y1 (C2)
        ],
        compiler_params=pltpu.CompilerParams(
            dimension_semantics=("parallel",),            # v7x: 2 TCs share batch
            vmem_limit_bytes=_VMEM_LIMIT),
        cost_estimate=pl.CostEstimate(flops=flops, transcendentals=0,
                                      bytes_accessed=bytes_accessed),
    )(*ins)
    return out


# ------------------------------ parameter setup ------------------------------


def _oihw_to_taps(w):
    """PyTorch (Cout, Cin, 3, 3) -> (9, Cin, Cout): tap-major, channel-minor."""
    co, ci, kh, kw = w.shape
    return jnp.transpose(w, (2, 3, 1, 0)).reshape(kh * kw, ci, co)


def _bn_fold(c, gamma=None, beta=None, running_mean=None, running_var=None):
    """Fold inference-mode BatchNorm into per-channel scale/bias.
    Defaults reproduce init_layer(): gamma=1, beta=0, mean=0, var=1."""
    gamma = jnp.ones((c,), jnp.float32) if gamma is None else gamma
    beta = jnp.zeros((c,), jnp.float32) if beta is None else beta
    running_mean = (jnp.zeros((c,), jnp.float32)
                    if running_mean is None else running_mean)
    running_var = (jnp.ones((c,), jnp.float32)
                   if running_var is None else running_var)
    scale = gamma / jnp.sqrt(running_var + BN_EPS)
    bias = beta - running_mean * scale
    return scale.reshape(1, c), bias.reshape(1, c)


def make_simple_block_params(key, indim, outdim):
    """init_layer() init: conv ~ N(0, sqrt(2/(k*k*Cout))), BN folded (inference)."""
    k1, k2, k3 = jax.random.split(key, 3)

    def conv_w(k, co, ci, kh, kw):
        std = math.sqrt(2.0 / float(kh * kw * co))
        return jax.random.normal(k, (co, ci, kh, kw), jnp.float32) * std

    w1_oihw = conv_w(k1, outdim, indim, 3, 3)
    w2_oihw = conv_w(k2, outdim, outdim, 3, 3)
    s1, b1 = _bn_fold(outdim)
    s2, b2 = _bn_fold(outdim)

    params = {
        "w1": _oihw_to_taps(w1_oihw).astype(jnp.bfloat16), "s1": s1, "b1": b1,
        "w2": _oihw_to_taps(w2_oihw).astype(jnp.bfloat16), "s2": s2, "b2": b2,
    }
    oihw = {"w1": w1_oihw, "w2": w2_oihw}
    if indim != outdim:
        wsc_oihw = conv_w(k3, outdim, indim, 1, 1)
        ssc, bsc = _bn_fold(outdim)
        params.update({"wsc": wsc_oihw[:, :, 0, 0].T.astype(jnp.bfloat16),
                       "ssc": ssc, "bsc": bsc})
        oihw["wsc"] = wsc_oihw
    # TODO(synk): maml=True fast-weight (Conv2d_fw/BatchNorm2d_fw) branch not modeled.
    return params, oihw


# ------------------------- plain-JAX f32 reference ---------------------------


def simple_block_reference(x_nchw, oihw, params, half_res):
    stride = 2 if half_res else 1
    dn = ("NCHW", "OIHW", "NCHW")
    hp = jax.lax.Precision.HIGHEST

    def bn(y, s, b):
        return y * s.reshape(1, -1, 1, 1) + b.reshape(1, -1, 1, 1)

    out = jax.lax.conv_general_dilated(x_nchw, oihw["w1"], (stride, stride),
                                       ((1, 1), (1, 1)), dimension_numbers=dn,
                                       precision=hp)
    out = jnp.maximum(bn(out, params["s1"], params["b1"]), 0.0)
    out = jax.lax.conv_general_dilated(out, oihw["w2"], (1, 1),
                                       ((1, 1), (1, 1)), dimension_numbers=dn,
                                       precision=hp)
    out = bn(out, params["s2"], params["b2"])
    if "wsc" in oihw:
        sc = jax.lax.conv_general_dilated(x_nchw, oihw["wsc"], (stride, stride),
                                          ((0, 0), (0, 0)), dimension_numbers=dn,
                                          precision=hp)
        sc = bn(sc, params["ssc"], params["bsc"])
    else:
        sc = x_nchw
    return jnp.maximum(out + sc, 0.0)


if __name__ == "__main__":
    key = jax.random.PRNGKey(0)

    configs = [
        # (indim, outdim, half_res, n, hw): downsampling block + identity block
        (64, 128, True, 4, 16),
        (64, 64, False, 4, 16),
    ]
    for i, (indim, outdim, half_res, n, hw) in enumerate(configs):
        kx, kp = jax.random.split(jax.random.fold_in(key, i))
        x_nchw = jax.random.normal(kx, (n, indim, hw, hw), jnp.float32)
        params, oihw = make_simple_block_params(kp, indim, outdim)

        # NCHW <-> NHWC only at the network boundary (not per block).
        x_nhwc = jnp.transpose(x_nchw, (0, 2, 3, 1))
        out_nhwc = jax.block_until_ready(
            simple_block_forward(x_nhwc, params, half_res=half_res))
        out_nchw = jnp.transpose(out_nhwc, (0, 3, 1, 2))

        stride = 2 if half_res else 1
        assert out_nchw.shape == (n, outdim, hw // stride, hw // stride), out_nchw.shape
        assert bool(jnp.all(jnp.isfinite(out_nchw)))

        ref = simple_block_reference(x_nchw, oihw, params, half_res)
        max_err = float(jnp.max(jnp.abs(out_nchw - ref)))
        assert max_err < 1e-1, f"config {i}: max abs err vs f32 reference: {max_err}"

    print("KERNEL_OK")
</pallas_src>

<mosaic_0001>
module attributes {stable_mosaic.version = 11 : i64} {
  func.func @_simple_block_kernel(%arg0: i32, %arg1: memref<2x16x16x64xbf16, #tpu.memory_space<vmem>>, %arg2: memref<9x64x128xbf16, #tpu.memory_space<vmem>>, %arg3: memref<1x128xf32, #tpu.memory_space<vmem>>, %arg4: memref<1x128xf32, #tpu.memory_space<vmem>>, %arg5: memref<9x128x128xbf16, #tpu.memory_space<vmem>>, %arg6: memref<1x128xf32, #tpu.memory_space<vmem>>, %arg7: memref<1x128xf32, #tpu.memory_space<vmem>>, %arg8: memref<64x128xbf16, #tpu.memory_space<vmem>>, %arg9: memref<1x128xf32, #tpu.memory_space<vmem>>, %arg10: memref<1x128xf32, #tpu.memory_space<vmem>>, %arg11: memref<2x8x8x128xf32, #tpu.memory_space<vmem>>, %arg12: memref<2x18x18x64xbf16, #tpu.memory_space<vmem>>, %arg13: memref<2x10x10x128xbf16, #tpu.memory_space<vmem>>) attributes {dimension_semantics = [#tpu.dimension_semantics<parallel>], iteration_bounds = array<i64: 2>, scalar_prefetch = 0 : i64, scratch_operands = 2 : i64, tpu.core_type = #tpu.core_type<tc>, window_params = [{transform_indices = @transform_0, window_bounds = array<i64: 2, 16, 16, 64>}, {pipeline_mode = #tpu.pipeline_mode<synchronous>, transform_indices = @transform_1, window_bounds = array<i64: 9, 64, 128>}, {pipeline_mode = #tpu.pipeline_mode<synchronous>, transform_indices = @transform_2, window_bounds = array<i64: 1, 128>}, {pipeline_mode = #tpu.pipeline_mode<synchronous>, transform_indices = @transform_3, window_bounds = array<i64: 1, 128>}, {pipeline_mode = #tpu.pipeline_mode<synchronous>, transform_indices = @transform_4, window_bounds = array<i64: 9, 128, 128>}, {pipeline_mode = #tpu.pipeline_mode<synchronous>, transform_indices = @transform_5, window_bounds = array<i64: 1, 128>}, {pipeline_mode = #tpu.pipeline_mode<synchronous>, transform_indices = @transform_6, window_bounds = array<i64: 1, 128>}, {pipeline_mode = #tpu.pipeline_mode<synchronous>, transform_indices = @transform_7, window_bounds = array<i64: 64, 128>}, {pipeline_mode = #tpu.pipeline_mode<synchronous>, transform_indices = @transform_8, window_bounds = array<i64: 1, 128>}, {pipeline_mode = #tpu.pipeline_mode<synchronous>, transform_indices = @transform_9, window_bounds = array<i64: 1, 128>}, {transform_indices = @transform_10, window_bounds = array<i64: 2, 8, 8, 128>}]} {
    %c0 = arith.constant 0 : index
    %c0_0 = arith.constant 0 : index
    %c0_1 = arith.constant 0 : index
    %c0_2 = arith.constant 0 : index
    %0 = vector.load %arg1[%c0, %c0_0, %c0_1, %c0_2] : memref<2x16x16x64xbf16, #tpu.memory_space<vmem>>, vector<2x16x16x64xbf16>
    %cst = arith.constant 0.000000e+00 : bf16
    %1 = vector.broadcast %cst : bf16 to vector<2x1x18x64xbf16>
    %cst_3 = arith.constant 0.000000e+00 : bf16
    %2 = vector.broadcast %cst_3 : bf16 to vector<2x16x1x64xbf16>
    %c0_4 = arith.constant 0 : index
    %c0_5 = arith.constant 0 : index
    %c0_6 = arith.constant 0 : index
    %c0_7 = arith.constant 0 : index
    %3 = vector.load %arg12[%c0_4, %c0_5, %c0_6, %c0_7] : memref<2x18x18x64xbf16, #tpu.memory_space<vmem>>, vector<2x1x18x64xbf16>
    tpu.vector_store %arg12[%c0_4, %c0_5, %c0_6, %c0_7], %1 {strides = array<i32>} : memref<2x18x18x64xbf16, #tpu.memory_space<vmem>>, vector<2x1x18x64xbf16>,
    %c0_8 = arith.constant 0 : index
    %c17 = arith.constant 17 : index
    %c0_9 = arith.constant 0 : index
    %c0_10 = arith.constant 0 : index
    %4 = vector.load %arg12[%c0_8, %c17, %c0_9, %c0_10] : memref<2x18x18x64xbf16, #tpu.memory_space<vmem>>, vector<2x1x18x64xbf16>
    tpu.vector_store %arg12[%c0_8, %c17, %c0_9, %c0_10], %1 {strides = array<i32>} : memref<2x18x18x64xbf16, #tpu.memory_space<vmem>>, vector<2x1x18x64xbf16>,
    %c0_11 = arith.constant 0 : index
    %c1 = arith.constant 1 : index
    %c0_12 = arith.constant 0 : index
    %c0_13 = arith.constant 0 : index
    %5 = vector.load %arg12[%c0_11, %c1, %c0_12, %c0_13] : memref<2x18x18x64xbf16, #tpu.memory_space<vmem>>, vector<2x16x1x64xbf16>
    tpu.vector_store %arg12[%c0_11, %c1, %c0_12, %c0_13], %2 {strides = array<i32>} : memref<2x18x18x64xbf16, #tpu.memory_space<vmem>>, vector<2x16x1x64xbf16>,
    %c0_14 = arith.constant 0 : index
    %c1_15 = arith.constant 1 : index
    %c17_16 = arith.constant 17 : index
    %c0_17 = arith.constant 0 : index
    %6 = vector.load %arg12[%c0_14, %c1_15, %c17_16, %c0_17] : memref<2x18x18x64xbf16, #tpu.memory_space<vmem>>, vector<2x16x1x64xbf16>
    tpu.vector_store %arg12[%c0_14, %c1_15, %c17_16, %c0_17], %2 {strides = array<i32>} : memref<2x18x18x64xbf16, #tpu.memory_space<vmem>>, vector<2x16x1x64xbf16>,
    %c0_18 = arith.constant 0 : index
    %c1_19 = arith.constant 1 : index
    %c1_20 = arith.constant 1 : index
    %c0_21 = arith.constant 0 : index
    %7 = vector.load %arg12[%c0_18, %c1_19, %c1_20, %c0_21] : memref<2x18x18x64xbf16, #tpu.memory_space<vmem>>, vector<2x16x16x64xbf16>
    tpu.vector_store %arg12[%c0_18, %c1_19, %c1_20, %c0_21], %0 {strides = array<i32>} : memref<2x18x18x64xbf16, #tpu.memory_space<vmem>>, vector<2x16x16x64xbf16>,
    %c0_22 = arith.constant 0 : index
    %c0_23 = arith.constant 0 : index
    %c0_24 = arith.constant 0 : index
    %c0_25 = arith.constant 0 : index
    %8 = vector.load %arg12[%c0_22, %c0_23, %c0_24, %c0_25] : memref<2x18x18x64xbf16, #tpu.memory_space<vmem>>, vector<2x18x18x64xbf16>
    %9 = vector.shape_cast %8 : vector<2x18x18x64xbf16> to vector<2x9x2x18x64xbf16>
    %10 = vector.extract_strided_slice %9 {offsets = [0, 0, 0, 0, 0], sizes = [2, 9, 1, 18, 64], strides = [1, 1, 1, 1, 1]} : vector<2x9x2x18x64xbf16> to vector<2x9x1x18x64xbf16>
    %11 = vector.shape_cast %10 : vector<2x9x1x18x64xbf16> to vector<2x9x18x64xbf16>
    %12 = vector.extract_strided_slice %9 {offsets = [0, 0, 1, 0, 0], sizes = [2, 9, 1, 18, 64], strides = [1, 1, 1, 1, 1]} : vector<2x9x2x18x64xbf16> to vector<2x9x1x18x64xbf16>
    %13 = vector.shape_cast %12 : vector<2x9x1x18x64xbf16> to vector<2x9x18x64xbf16>
    %14 = vector.shape_cast %11 : vector<2x9x18x64xbf16> to vector<18x18x64xbf16>
    %15 = vector.shape_cast %14 : vector<18x18x64xbf16> to vector<18x9x2x64xbf16>
    %16 = vector.extract_strided_slice %15 {offsets = [0, 0, 0, 0], sizes = [18, 9, 1, 64], strides = [1, 1, 1, 1]} : vector<18x9x2x64xbf16> to vector<18x9x1x64xbf16>
    %17 = vector.shape_cast %16 : vector<18x9x1x64xbf16> to vector<18x9x64xbf16>
    %18 = vector.shape_cast %17 : vector<18x9x64xbf16> to vector<2x9x9x64xbf16>
    %19 = vector.extract_strided_slice %15 {offsets = [0, 0, 1, 0], sizes = [18, 9, 1, 64], strides = [1, 1, 1, 1]} : vector<18x9x2x64xbf16> to vector<18x9x1x64xbf16>
    %20 = vector.shape_cast %19 : vector<18x9x1x64xbf16> to vector<18x9x64xbf16>
    %21 = vector.shape_cast %20 : vector<18x9x64xbf16> to vector<2x9x9x64xbf16>
    %22 = vector.shape_cast %13 : vector<2x9x18x64xbf16> to vector<18x18x64xbf16>
    %23 = vector.shape_cast %22 : vector<18x18x64xbf16> to vector<18x9x2x64xbf16>
    %24 = vector.extract_strided_slice %23 {offsets = [0, 0, 0, 0], sizes = [18, 9, 1, 64], strides = [1, 1, 1, 1]} : vector<18x9x2x64xbf16> to vector<18x9x1x64xbf16>
    %25 = vector.shape_cast %24 : vector<18x9x1x64xbf16> to vector<18x9x64xbf16>
    %26 = vector.shape_cast %25 : vector<18x9x64xbf16> to vector<2x9x9x64xbf16>
    %27 = vector.extract_strided_slice %23 {offsets = [0, 0, 1, 0], sizes = [18, 9, 1, 64], strides = [1, 1, 1, 1]} : vector<18x9x2x64xbf16> to vector<18x9x1x64xbf16>
    %28 = vector.shape_cast %27 : vector<18x9x1x64xbf16> to vector<18x9x64xbf16>
    %29 = vector.shape_cast %28 : vector<18x9x64xbf16> to vector<2x9x9x64xbf16>
    %30 = vector.extract_strided_slice %18 {offsets = [0, 0, 0, 0], sizes = [2, 8, 8, 64], strides = [1, 1, 1, 1]} : vector<2x9x9x64xbf16> to vector<2x8x8x64xbf16>
    %31 = vector.shape_cast %30 : vector<2x8x8x64xbf16> to vector<128x64xbf16>
    %32 = vector.extract_strided_slice %21 {offsets = [0, 0, 0, 0], sizes = [2, 8, 8, 64], strides = [1, 1, 1, 1]} : vector<2x9x9x64xbf16> to vector<2x8x8x64xbf16>
    %33 = vector.shape_cast %32 : vector<2x8x8x64xbf16> to vector<128x64xbf16>
    %34 = vector.extract_strided_slice %18 {offsets = [0, 0, 1, 0], sizes = [2, 8, 8, 64], strides = [1, 1, 1, 1]} : vector<2x9x9x64xbf16> to vector<2x8x8x64xbf16>
    %35 = vector.shape_cast %34 : vector<2x8x8x64xbf16> to vector<128x64xbf16>
    %36 = vector.extract_strided_slice %26 {offsets = [0, 0, 0, 0], sizes = [2, 8, 8, 64], strides = [1, 1, 1, 1]} : vector<2x9x9x64xbf16> to vector<2x8x8x64xbf16>
    %37 = vector.shape_cast %36 : vector<2x8x8x64xbf16> to vector<128x64xbf16>
    %38 = vector.extract_strided_slice %29 {offsets = [0, 0, 0, 0], sizes = [2, 8, 8, 64], strides = [1, 1, 1, 1]} : vector<2x9x9x64xbf16> to vector<2x8x8x64xbf16>
    %39 = vector.shape_cast %38 : vector<2x8x8x64xbf16> to vector<128x64xbf16>
    %40 = vector.extract_strided_slice %26 {offsets = [0, 0, 1, 0], sizes = [2, 8, 8, 64], strides = [1, 1, 1, 1]} : vector<2x9x9x64xbf16> to vector<2x8x8x64xbf16>
    %41 = vector.shape_cast %40 : vector<2x8x8x64xbf16> to vector<128x64xbf16>
    %42 = vector.extract_strided_slice %18 {offsets = [0, 1, 0, 0], sizes = [2, 8, 8, 64], strides = [1, 1, 1, 1]} : vector<2x9x9x64xbf16> to vector<2x8x8x64xbf16>
    %43 = vector.shape_cast %42 : vector<2x8x8x64xbf16> to vector<128x64xbf16>
    %44 = vector.extract_strided_slice %21 {offsets = [0, 1, 0, 0], sizes = [2, 8, 8, 64], strides = [1, 1, 1, 1]} : vector<2x9x9x64xbf16> to vector<2x8x8x64xbf16>
    %45 = vector.shape_cast %44 : vector<2x8x8x64xbf16> to vector<128x64xbf16>
    %46 = vector.extract_strided_slice %18 {offsets = [0, 1, 1, 0], sizes = [2, 8, 8, 64], strides = [1, 1, 1, 1]} : vector<2x9x9x64xbf16> to vector<2x8x8x64xbf16>
    %47 = vector.shape_cast %46 : vector<2x8x8x64xbf16> to vector<128x64xbf16>
    %c0_26 = arith.constant 0 : index
    %c0_27 = arith.constant 0 : index
    %c0_28 = arith.constant 0 : index
    %48 = vector.load %arg2[%c0_26, %c0_27, %c0_28] : memref<9x64x128xbf16, #tpu.memory_space<vmem>>, vector<1x64x128xbf16>
    %49 = vector.shape_cast %48 : vector<1x64x128xbf16> to vector<64x128xbf16>
    %cst_29 = arith.constant dense<0.000000e+00> : vector<128x128xf32>
    %50 = tpu.matmul %31, %49, %cst_29 {dimension_numbers = #tpu.dot_dimension_numbers<[1], [0], [0], [1], [0, 0, 1, 1], [], []>} : vector<128x64xbf16>, vector<64x128xbf16>, vector<128x128xf32> -> vector<128x128xf32>
    %c1_30 = arith.constant 1 : index
    %c0_31 = arith.constant 0 : index
    %c0_32 = arith.constant 0 : index
    %51 = vector.load %arg2[%c1_30, %c0_31, %c0_32] : memref<9x64x128xbf16, #tpu.memory_space<vmem>>, vector<1x64x128xbf16>
    %52 = vector.shape_cast %51 : vector<1x64x128xbf16> to vector<64x128xbf16>
    %cst_33 = arith.constant dense<0.000000e+00> : vector<128x128xf32>
    %53 = tpu.matmul %33, %52, %cst_33 {dimension_numbers = #tpu.dot_dimension_numbers<[1], [0], [0], [1], [0, 0, 1, 1], [], []>} : vector<128x64xbf16>, vector<64x128xbf16>, vector<128x128xf32> -> vector<128x128xf32>
    %54 = arith.addf %50, %53 : vector<128x128xf32>
    %c2 = arith.constant 2 : index
    %c0_34 = arith.constant 0 : index
    %c0_35 = arith.constant 0 : index
    %55 = vector.load %arg2[%c2, %c0_34, %c0_35] : memref<9x64x128xbf16, #tpu.memory_space<vmem>>, vector<1x64x128xbf16>
    %56 = vector.shape_cast %55 : vector<1x64x128xbf16> to vector<64x128xbf16>
    %cst_36 = arith.constant dense<0.000000e+00> : vector<128x128xf32>
    %57 = tpu.matmul %35, %56, %cst_36 {dimension_numbers = #tpu.dot_dimension_numbers<[1], [0], [0], [1], [0, 0, 1, 1], [], []>} : vector<128x64xbf16>, vector<64x128xbf16>, vector<128x128xf32> -> vector<128x128xf32>
    %58 = arith.addf %54, %57 : vector<128x128xf32>
    %c3 = arith.constant 3 : index
    %c0_37 = arith.constant 0 : index
    %c0_38 = arith.constant 0 : index
    %59 = vector.load %arg2[%c3, %c0_37, %c0_38] : memref<9x64x128xbf16, #tpu.memory_space<vmem>>, vector<1x64x128xbf16>
    %60 = vector.shape_cast %59 : vector<1x64x128xbf16> to vector<64x128xbf16>
    %cst_39 = arith.constant dense<0.000000e+00> : vector<128x128xf32>
    %61 = tpu.matmul %37, %60, %cst_39 {dimension_numbers = #tpu.dot_dimension_numbers<[1], [0], [0], [1], [0, 0, 1, 1], [], []>} : vector<128x64xbf16>, vector<64x128xbf16>, vector<128x128xf32> -> vector<128x128xf32>
    %62 = arith.addf %58, %61 : vector<128x128xf32>
    %c4 = arith.constant 4 : index
    %c0_40 = arith.constant 0 : index
    %c0_41 = arith.constant 0 : index
    %63 = vector.load %arg2[%c4, %c0_40, %c0_41] : memref<9x64x128xbf16, #tpu.memory_space<vmem>>, vector<1x64x128xbf16>
    %64 = vector.shape_cast %63 : vector<1x64x128xbf16> to vector<64x128xbf16>
    %cst_42 = arith.constant dense<0.000000e+00> : vector<128x128xf32>
    %65 = tpu.matmul %39, %64, %cst_42 {dimension_numbers = #tpu.dot_dimension_numbers<[1], [0], [0], [1], [0, 0, 1, 1], [], []>} : vector<128x64xbf16>, vector<64x128xbf16>, vector<128x128xf32> -> vector<128x128xf32>
    %66 = arith.addf %62, %65 : vector<128x128xf32>
    %c5 = arith.constant 5 : index
    %c0_43 = arith.constant 0 : index
    %c0_44 = arith.constant 0 : index
    %67 = vector.load %arg2[%c5, %c0_43, %c0_44] : memref<9x64x128xbf16, #tpu.memory_space<vmem>>, vector<1x64x128xbf16>
    %68 = vector.shape_cast %67 : vector<1x64x128xbf16> to vector<64x128xbf16>
    %cst_45 = arith.constant dense<0.000000e+00> : vector<128x128xf32>
    %69 = tpu.matmul %41, %68, %cst_45 {dimension_numbers = #tpu.dot_dimension_numbers<[1], [0], [0], [1], [0, 0, 1, 1], [], []>} : vector<128x64xbf16>, vector<64x128xbf16>, vector<128x128xf32> -> vector<128x128xf32>
    %70 = arith.addf %66, %69 : vector<128x128xf32>
    %c6 = arith.constant 6 : index
    %c0_46 = arith.constant 0 : index
    %c0_47 = arith.constant 0 : index
    %71 = vector.load %arg2[%c6, %c0_46, %c0_47] : memref<9x64x128xbf16, #tpu.memory_space<vmem>>, vector<1x64x128xbf16>
    %72 = vector.shape_cast %71 : vector<1x64x128xbf16> to vector<64x128xbf16>
    %cst_48 = arith.constant dense<0.000000e+00> : vector<128x128xf32>
    %73 = tpu.matmul %43, %72, %cst_48 {dimension_numbers = #tpu.dot_dimension_numbers<[1], [0], [0], [1], [0, 0, 1, 1], [], []>} : vector<128x64xbf16>, vector<64x128xbf16>, vector<128x128xf32> -> vector<128x128xf32>
    %74 = arith.addf %70, %73 : vector<128x128xf32>
    %c7 = arith.constant 7 : index
    %c0_49 = arith.constant 0 : index
    %c0_50 = arith.constant 0 : index
    %75 = vector.load %arg2[%c7, %c0_49, %c0_50] : memref<9x64x128xbf16, #tpu.memory_space<vmem>>, vector<1x64x128xbf16>
    %76 = vector.shape_cast %75 : vector<1x64x128xbf16> to vector<64x128xbf16>
    %cst_51 = arith.constant dense<0.000000e+00> : vector<128x128xf32>
    %77 = tpu.matmul %45, %76, %cst_51 {dimension_numbers = #tpu.dot_dimension_numbers<[1], [0], [0], [1], [0, 0, 1, 1], [], []>} : vector<128x64xbf16>, vector<64x128xbf16>, vector<128x128xf32> -> vector<128x128xf32>
    %78 = arith.addf %74, %77 : vector<128x128xf32>
    %c8 = arith.constant 8 : index
    %c0_52 = arith.constant 0 : index
    %c0_53 = arith.constant 0 : index
    %79 = vector.load %arg2[%c8, %c0_52, %c0_53] : memref<9x64x128xbf16, #tpu.memory_space<vmem>>, vector<1x64x128xbf16>
    %80 = vector.shape_cast %79 : vector<1x64x128xbf16> to vector<64x128xbf16>
    %cst_54 = arith.constant dense<0.000000e+00> : vector<128x128xf32>
    %81 = tpu.matmul %47, %80, %cst_54 {dimension_numbers = #tpu.dot_dimension_numbers<[1], [0], [0], [1], [0, 0, 1, 1], [], []>} : vector<128x64xbf16>, vector<64x128xbf16>, vector<128x128xf32> -> vector<128x128xf32>
    %82 = arith.addf %78, %81 : vector<128x128xf32>
    %c0_55 = arith.constant 0 : index
    %c0_56 = arith.constant 0 : index
    %83 = vector.load %arg3[%c0_55, %c0_56] : memref<1x128xf32, #tpu.memory_space<vmem>>, vector<1x128xf32>
    %84 = vector.broadcast %83 : vector<1x128xf32> to vector<128x128xf32>
    %85 = arith.mulf %82, %84 : vector<128x128xf32>
    %c0_57 = arith.constant 0 : index
    %c0_58 = arith.constant 0 : index
    %86 = vector.load %arg4[%c0_57, %c0_58] : memref<1x128xf32, #tpu.memory_space<vmem>>, vector<1x128xf32>
    %87 = vector.broadcast %86 : vector<1x128xf32> to vector<128x128xf32>
    %88 = arith.addf %85, %87 : vector<128x128xf32>
    %cst_59 = arith.constant 0.000000e+00 : f32
    %89 = vector.broadcast %cst_59 : f32 to vector<128x128xf32>
    %90 = arith.maximumf %88, %89 : vector<128x128xf32>
    %c0_60 = arith.constant 0 : index
    %c0_61 = arith.constant 0 : index
    %91 = vector.load %arg8[%c0_60, %c0_61] : memref<64x128xbf16, #tpu.memory_space<vmem>>, vector<64x128xbf16>
    %cst_62 = arith.constant dense<0.000000e+00> : vector<128x128xf32>
    %92 = tpu.matmul %39, %91, %cst_62 {dimension_numbers = #tpu.dot_dimension_numbers<[1], [0], [0], [1], [0, 0, 1, 1], [], []>} : vector<128x64xbf16>, vector<64x128xbf16>, vector<128x128xf32> -> vector<128x128xf32>
    %c0_63 = arith.constant 0 : index
    %c0_64 = arith.constant 0 : index
    %93 = vector.load %arg9[%c0_63, %c0_64] : memref<1x128xf32, #tpu.memory_space<vmem>>, vector<1x128xf32>
    %94 = vector.broadcast %93 : vector<1x128xf32> to vector<128x128xf32>
    %95 = arith.mulf %92, %94 : vector<128x128xf32>
    %c0_65 = arith.constant 0 : index
    %c0_66 = arith.constant 0 : index
    %96 = vector.load %arg10[%c0_65, %c0_66] : memref<1x128xf32, #tpu.memory_space<vmem>>, vector<1x128xf32>
    %97 = vector.broadcast %96 : vector<1x128xf32> to vector<128x128xf32>
    %98 = arith.addf %95, %97 : vector<128x128xf32>
    %99 = vector.shape_cast %90 : vector<128x128xf32> to vector<2x8x8x128xf32>
    %100 = arith.truncf %99 : vector<2x8x8x128xf32> to vector<2x8x8x128xbf16>
    %cst_67 = arith.constant 0.000000e+00 : bf16
    %101 = vector.broadcast %cst_67 : bf16 to vector<2x1x10x128xbf16>
    %cst_68 = arith.constant 0.000000e+00 : bf16
    %102 = vector.broadcast %cst_68 : bf16 to vector<2x8x1x128xbf16>
    %c0_69 = arith.constant 0 : index
    %c0_70 = arith.constant 0 : index
    %c0_71 = arith.constant 0 : index
    %c0_72 = arith.constant 0 : index
    %103 = vector.load %arg13[%c0_69, %c0_70, %c0_71, %c0_72] : memref<2x10x10x128xbf16, #tpu.memory_space<vmem>>, vector<2x1x10x128xbf16>
    tpu.vector_store %arg13[%c0_69, %c0_70, %c0_71, %c0_72], %101 {strides = array<i32>} : memref<2x10x10x128xbf16, #tpu.memory_space<vmem>>, vector<2x1x10x128xbf16>,
    %c0_73 = arith.constant 0 : index
    %c9 = arith.constant 9 : index
    %c0_74 = arith.constant 0 : index
    %c0_75 = arith.constant 0 : index
    %104 = vector.load %arg13[%c0_73, %c9, %c0_74, %c0_75] : memref<2x10x10x128xbf16, #tpu.memory_space<vmem>>, vector<2x1x10x128xbf16>
    tpu.vector_store %arg13[%c0_73, %c9, %c0_74, %c0_75], %101 {strides = array<i32>} : memref<2x10x10x128xbf16, #tpu.memory_space<vmem>>, vector<2x1x10x128xbf16>,
    %c0_76 = arith.constant 0 : index
    %c1_77 = arith.constant 1 : index
    %c0_78 = arith.constant 0 : index
    %c0_79 = arith.constant 0 : index
    %105 = vector.load %arg13[%c0_76, %c1_77, %c0_78, %c0_79] : memref<2x10x10x128xbf16, #tpu.memory_space<vmem>>, vector<2x8x1x128xbf16>
    tpu.vector_store %arg13[%c0_76, %c1_77, %c0_78, %c0_79], %102 {strides = array<i32>} : memref<2x10x10x128xbf16, #tpu.memory_space<vmem>>, vector<2x8x1x128xbf16>,
    %c0_80 = arith.constant 0 : index
    %c1_81 = arith.constant 1 : index
    %c9_82 = arith.constant 9 : index
    %c0_83 = arith.constant 0 : index
    %106 = vector.load %arg13[%c0_80, %c1_81, %c9_82, %c0_83] : memref<2x10x10x128xbf16, #tpu.memory_space<vmem>>, vector<2x8x1x128xbf16>
    tpu.vector_store %arg13[%c0_80, %c1_81, %c9_82, %c0_83], %102 {strides = array<i32>} : memref<2x10x10x128xbf16, #tpu.memory_space<vmem>>, vector<2x8x1x128xbf16>,
    %c0_84 = arith.constant 0 : index
    %c1_85 = arith.constant 1 : index
    %c1_86 = arith.constant 1 : index
    %c0_87 = arith.constant 0 : index
    %107 = vector.load %arg13[%c0_84, %c1_85, %c1_86, %c0_87] : memref<2x10x10x128xbf16, #tpu.memory_space<vmem>>, vector<2x8x8x128xbf16>
    tpu.vector_store %arg13[%c0_84, %c1_85, %c1_86, %c0_87], %100 {strides = array<i32>} : memref<2x10x10x128xbf16, #tpu.memory_space<vmem>>, vector<2x8x8x128xbf16>,
    %c0_88 = arith.constant 0 : index
    %c0_89 = arith.constant 0 : index
    %c0_90 = arith.constant 0 : index
    %c0_91 = arith.constant 0 : index
    %108 = vector.load %arg13[%c0_88, %c0_89, %c0_90, %c0_91] : memref<2x10x10x128xbf16, #tpu.memory_space<vmem>>, vector<2x10x10x128xbf16>
    %109 = vector.extract_strided_slice %108 {offsets = [0, 0, 0, 0], sizes = [2, 8, 8, 128], strides = [1, 1, 1, 1]} : vector<2x10x10x128xbf16> to vector<2x8x8x128xbf16>
    %110 = vector.shape_cast %109 : vector<2x8x8x128xbf16> to vector<128x128xbf16>
    %111 = vector.extract_strided_slice %108 {offsets = [0, 0, 1, 0], sizes = [2, 8, 8, 128], strides = [1, 1, 1, 1]} : vector<2x10x10x128xbf16> to vector<2x8x8x128xbf16>
    %112 = vector.shape_cast %111 : vector<2x8x8x128xbf16> to vector<128x128xbf16>
    %113 = vector.extract_strided_slice %108 {offsets = [0, 0, 2, 0], sizes = [2, 8, 8, 128], strides = [1, 1, 1, 1]} : vector<2x10x10x128xbf16> to vector<2x8x8x128xbf16>
    %114 = vector.shape_cast %113 : vector<2x8x8x128xbf16> to vector<128x128xbf16>
    %115 = vector.extract_strided_slice %108 {offsets = [0, 1, 0, 0], sizes = [2, 8, 8, 128], strides = [1, 1, 1, 1]} : vector<2x10x10x128xbf16> to vector<2x8x8x128xbf16>
    %116 = vector.shape_cast %115 : vector<2x8x8x128xbf16> to vector<128x128xbf16>
    %117 = vector.extract_strided_slice %108 {offsets = [0, 1, 1, 0], sizes = [2, 8, 8, 128], strides = [1, 1, 1, 1]} : vector<2x10x10x128xbf16> to vector<2x8x8x128xbf16>
    %118 = vector.shape_cast %117 : vector<2x8x8x128xbf16> to vector<128x128xbf16>
    %119 = vector.extract_strided_slice %108 {offsets = [0, 1, 2, 0], sizes = [2, 8, 8, 128], strides = [1, 1, 1, 1]} : vector<2x10x10x128xbf16> to vector<2x8x8x128xbf16>
    %120 = vector.shape_cast %119 : vector<2x8x8x128xbf16> to vector<128x128xbf16>
    %121 = vector.extract_strided_slice %108 {offsets = [0, 2, 0, 0], sizes = [2, 8, 8, 128], strides = [1, 1, 1, 1]} : vector<2x10x10x128xbf16> to vector<2x8x8x128xbf16>
    %122 = vector.shape_cast %121 : vector<2x8x8x128xbf16> to vector<128x128xbf16>
    %123 = vector.extract_strided_slice %108 {offsets = [0, 2, 1, 0], sizes = [2, 8, 8, 128], strides = [1, 1, 1, 1]} : vector<2x10x10x128xbf16> to vector<2x8x8x128xbf16>
    %124 = vector.shape_cast %123 : vector<2x8x8x128xbf16> to vector<128x128xbf16>
    %125 = vector.extract_strided_slice %108 {offsets = [0, 2, 2, 0], sizes = [2, 8, 8, 128], strides = [1, 1, 1, 1]} : vector<2x10x10x128xbf16> to vector<2x8x8x128xbf16>
    %126 = vector.shape_cast %125 : vector<2x8x8x128xbf16> to vector<128x128xbf16>
    %127 = tpu.concatenate %110, %112, %114, %116, %118, %120, %122, %124, %126 in 1 : vector<128x128xbf16>, vector<128x128xbf16>, vector<128x128xbf16>, vector<128x128xbf16>, vector<128x128xbf16>, vector<128x128xbf16>, vector<128x128xbf16>, vector<128x128xbf16>, vector<128x128xbf16> -> vector<128x1152xbf16>
    %c0_92 = arith.constant 0 : index
    %c0_93 = arith.constant 0 : index
    %c0_94 = arith.constant 0 : index
    %128 = vector.load %arg5[%c0_92, %c0_93, %c0_94] : memref<9x128x128xbf16, #tpu.memory_space<vmem>>, vector<9x128x128xbf16>
    %129 = vector.shape_cast %128 : vector<9x128x128xbf16> to vector<1152x128xbf16>
    %cst_95 = arith.constant dense<0.000000e+00> : vector<128x128xf32>
    %130 = tpu.matmul %127, %129, %cst_95 {dimension_numbers = #tpu.dot_dimension_numbers<[1], [0], [0], [1], [0, 0, 1, 1], [], []>} : vector<128x1152xbf16>, vector<1152x128xbf16>, vector<128x128xf32> -> vector<128x128xf32>
    %c0_96 = arith.constant 0 : index
    %c0_97 = arith.constant 0 : index
    %131 = vector.load %arg6[%c0_96, %c0_97] : memref<1x128xf32, #tpu.memory_space<vmem>>, vector<1x128xf32>
    %132 = vector.broadcast %131 : vector<1x128xf32> to vector<128x128xf32>
    %133 = arith.mulf %130, %132 : vector<128x128xf32>
    %c0_98 = arith.constant 0 : index
    %c0_99 = arith.constant 0 : index
    %134 = vector.load %arg7[%c0_98, %c0_99] : memref<1x128xf32, #tpu.memory_space<vmem>>, vector<1x128xf32>
    %135 = vector.broadcast %134 : vector<1x128xf32> to vector<128x128xf32>
    %136 = arith.addf %133, %135 : vector<128x128xf32>
    %137 = arith.addf %136, %98 : vector<128x128xf32>
    %cst_100 = arith.constant 0.000000e+00 : f32
    %138 = vector.broadcast %cst_100 : f32 to vector<128x128xf32>
    %139 = arith.maximumf %137, %138 : vector<128x128xf32>
    %140 = vector.shape_cast %139 : vector<128x128xf32> to vector<2x8x8x128xf32>
    %c0_101 = arith.constant 0 : index
    %c0_102 = arith.constant 0 : index
    %c0_103 = arith.constant 0 : index
    %c0_104 = arith.constant 0 : index
    %141 = vector.load %arg11[%c0_101, %c0_102, %c0_103, %c0_104] : memref<2x8x8x128xf32, #tpu.memory_space<vmem>>, vector<2x8x8x128xf32>
    tpu.vector_store %arg11[%c0_101, %c0_102, %c0_103, %c0_104], %140 {strides = array<i32>} : memref<2x8x8x128xf32, #tpu.memory_space<vmem>>, vector<2x8x8x128xf32>,
    return
  }
  func.func @transform_0(%arg0: i32) -> (i32, i32, i32, i32) {
    %c0_i32 = arith.constant 0 : i32
    %c0_i32_0 = arith.constant 0 : i32
    %c0_i32_1 = arith.constant 0 : i32
    %c0_i32_2 = arith.constant 0 : i32
    return %arg0, %c0_i32, %c0_i32_0, %c0_i32_1 : i32, i32, i32, i32
  }
  func.func @transform_1(%arg0: i32) -> (i32, i32, i32) {
    %c0_i32 = arith.constant 0 : i32
    %c0_i32_0 = arith.constant 0 : i32
    %c0_i32_1 = arith.constant 0 : i32
    %c0_i32_2 = arith.constant 0 : i32
    return %c0_i32, %c0_i32_0, %c0_i32_1 : i32, i32, i32
  }
  func.func @transform_2(%arg0: i32) -> (i32, i32) {
    %c0_i32 = arith.constant 0 : i32
    %c0_i32_0 = arith.constant 0 : i32
    %c0_i32_1 = arith.constant 0 : i32
    return %c0_i32, %c0_i32_0 : i32, i32
  }
  func.func @transform_3(%arg0: i32) -> (i32, i32) {
    %c0_i32 = arith.constant 0 : i32
    %c0_i32_0 = arith.constant 0 : i32
    %c0_i32_1 = arith.constant 0 : i32
    return %c0_i32, %c0_i32_0 : i32, i32
  }
  func.func @transform_4(%arg0: i32) -> (i32, i32, i32) {
    %c0_i32 = arith.constant 0 : i32
    %c0_i32_0 = arith.constant 0 : i32
    %c0_i32_1 = arith.constant 0 : i32
    %c0_i32_2 = arith.constant 0 : i32
    return %c0_i32, %c0_i32_0, %c0_i32_1 : i32, i32, i32
  }
  func.func @transform_5(%arg0: i32) -> (i32, i32) {
    %c0_i32 = arith.constant 0 : i32
    %c0_i32_0 = arith.constant 0 : i32
    %c0_i32_1 = arith.constant 0 : i32
    return %c0_i32, %c0_i32_0 : i32, i32
  }
  func.func @transform_6(%arg0: i32) -> (i32, i32) {
    %c0_i32 = arith.constant 0 : i32
    %c0_i32_0 = arith.constant 0 : i32
    %c0_i32_1 = arith.constant 0 : i32
    return %c0_i32, %c0_i32_0 : i32, i32
  }
  func.func @transform_7(%arg0: i32) -> (i32, i32) {
    %c0_i32 = arith.constant 0 : i32
    %c0_i32_0 = arith.constant 0 : i32
    %c0_i32_1 = arith.constant 0 : i32
    return %c0_i32, %c0_i32_0 : i32, i32
  }
  func.func @transform_8(%arg0: i32) -> (i32, i32) {
    %c0_i32 = arith.constant 0 : i32
    %c0_i32_0 = arith.constant 0 : i32
    %c0_i32_1 = arith.constant 0 : i32
    return %c0_i32, %c0_i32_0 : i32, i32
  }
  func.func @transform_9(%arg0: i32) -> (i32, i32) {
    %c0_i32 = arith.constant 0 : i32
    %c0_i32_0 = arith.constant 0 : i32
    %c0_i32_1 = arith.constant 0 : i32
    return %c0_i32, %c0_i32_0 : i32, i32
  }
  func.func @transform_10(%arg0: i32) -> (i32, i32, i32, i32) {
    %c0_i32 = arith.constant 0 : i32
    %c0_i32_0 = arith.constant 0 : i32
    %c0_i32_1 = arith.constant 0 : i32
    %c0_i32_2 = arith.constant 0 : i32
    return %arg0, %c0_i32, %c0_i32_0, %c0_i32_1 : i32, i32, i32, i32
  }
}

</mosaic_0001>

<bundles_post_ra>
// kernel: tpu_custom_call.1
= control target key start
LH: loop header
LB: loop body
LE: loop exit
PB: predicated region body
PF: predicated region fallthrough
CT: control target
= control target key end

     0   :  { %s22028_s0 = inlined_call_operand.hbm [shape: bf16[4,16,16,64], index: 0, kind: input, shape index: {}]   ;;  %s22029_s1 = inlined_call_operand.hbm [shape: bf16[9,64,128], index: 1, kind: input, shape index: {}]   ;;  %s22030_s2 = inlined_call_operand.vmem [shape: f32[1,128], index: 2, kind: input, shape index: {}]   ;;  %s22031_s3 = inlined_call_operand.vmem [shape: f32[1,128], index: 3, kind: input, shape index: {}]   ;;  %s22032_s4 = inlined_call_operand.hbm [shape: bf16[9,128,128], index: 4, kind: input, shape index: {}]   ;;  %s22033_s5 = inlined_call_operand.vmem [shape: f32[1,128], index: 5, kind: input, shape index: {}]   ;;  %s22034_s6 = inlined_call_operand.vmem [shape: f32[1,128], index: 6, kind: input, shape index: {}]   ;;  %s22035_s7 = inlined_call_operand.hbm [shape: bf16[64,128], index: 7, kind: input, shape index: {}]   ;;  %s22036_s8 = inlined_call_operand.vmem [shape: f32[1,128], index: 8, kind: input, shape index: {}]   ;;  %s22037_s9 = inlined_call_operand.vmem [shape: f32[1,128], index: 9, kind: input, shape index: {}]   ;;  %s22038_s10 = inlined_call_operand.hbm [shape: f32[4,8,8,128], index: 10, kind: output, shape index: {}]  }
   0x1   :  { %22571 = sst [smem:[#allocation230_spill]] %s22034_s6 }
   0x2   :  { %22572 = sst [smem:[#allocation231_spill]] %s22038_s10 }
   0x3   :  { %15 = vsyncpa [#allocation5], 0 }
   0x4   :  { %17 = vsyncpa [#allocation5 + $0x1], 0 }
   0x5   :  { %18 = vsyncpa [#allocation8], 0 }
   0x6   :  { %19 = vsyncpa [#allocation11], 0 }
   0x7   :  { %20 = vsyncpa [#allocation6], 0 }
   0x8   :  { %22 = vsyncpa [#allocation6 + $0x1], 0  ;;  %s15535_s13 = smov 0   ;;  %s15537_s14 = smov 0  }
   0x9   :  { %s15539_s15 = smov 0   ;;  %s15541_s16 = smov 0  }
   0xa LB: > { %22573 = sst [smem:[#allocation17_spill]] %s15455_s13  ;;  %s15556_s17 = sadd.s32 4294967295, %s15467_s16   ;;  %s15467_s16 = sphi %s15541_s16, %s23800_s16   ;;  %s15463_s15 = sphi %s15539_s15, %s23799_s15   ;;  %s15459_s14 = sphi %s15537_s14, %s23798_s14   ;;  %s15455_s13 = sphi %s15535_s13, %s23797_s13  }
   0xb   : > { %s13828_s18 = sadd.s32 4294967294, %s15467_s16   ;;  %p48_p0 = scmp.ne.s32.totalorder %s15459_s14, %s15455_s13 }
   0xc   : > { %p22039_p1 = scmp.eq.s32.totalorder %s15556_s17, 0  ;;  %p267_p3 = scmp.eq.s32.totalorder %s13828_s18, 1 }
   0xd   : > { %p13829_p5 = scmp.ge.s32.totalorder %s15467_s16, 1  ;;  %p274_p7 = scmp.lt.s32.totalorder %s15467_s16, 3 }
   0xe   : > { %p15565_p4 = por %p22039_p1, %p48_p0  ;;  %p15570_p6 = por %p267_p3, %p48_p0 }
   0xf   : > { %p15575_p8 = pnand %p13829_p5, %p274_p7  ;;  %s15469_s22 = smov [#allocation7]  }
  0x10   : > { %s22574_s19 = scalar_select %p15565_p4, 1, 0 }
  0x11   : > { %s22575_s20 = scalar_select %p15570_p6, 1, 0 }
  0x12   : > { %s22577_s21 = scalar_select %p15575_p8, 1, 0 }
  0x13   : > { %22576 = sst [smem:[#allocation18_spill]] %s22575_s20  ;;  %s286_s23 = sshll.u32 %s15469_s22, 4  ;;  %s15579_s23 = int_to_ptr.vmem [resolvable:$true] %s286_s23 }
  0x14   : > { %p15076_p9 = pneg %p15575_p8  ;;  %s15470_s25 = smov [#allocation9]  }
  0x15   : > { %s305_s26 = sshll.u32 %s15470_s25, 4  ;;  %s15471_s27 = smov [#allocation10]   ;;  %s15590_s26 = int_to_ptr.vmem [resolvable:$true] %s305_s26 }
  0x16   : > { %p15586_p11 = pnand %p15076_p9, %p22039_p1  ;;  %s15592_s28 = sshll.u32 %s15471_s27, 4  ;;  %s325_s28 = int_to_ptr.vmem [resolvable:$true] %s15592_s28 }
  0x17   : > { %s15279_s11 = scalar_lea.hbm %s22029_s1, 4608 }
  0x18   : > { %p15280_p12 = scmp.ne.s32.totalorder %s22029_s1, %s15279_s11  ;;  %p15602_p13 = pneg %p15586_p11 }
  0x19   : > { %p15286_p5 = scmp.lt.u32.totalorder %s15279_s11, %s22029_s1 }
  0x1a   : > { %p15282_p0 = pnand %p15602_p13, %p15280_p12 }
  0x1c   : > { %p15283_p3 = pneg %p15282_p0 }
  0x1e   : > { %p15288_p7 = pnand %p15286_p5, %p15283_p3 }
  0x20   : > { %15291 = shalt.err (!%p15288_p7)
}
  0x21   : > { %s15292_s29 = scalar_lea.vmem %s15579_s23, 4608  ;;  %p15300_p2 = scmp.lt.s32.totalorder %s15579_s23, %s15579_s23 }
  0x22   : > { %p15293_p9 = scmp.ne.s32.totalorder %s15579_s23, %s15292_s29  ;;  %p15301_p6 = scmp.lt.s32.totalorder %s15292_s29, %s15292_s29 }
  0x24   : > { %p15295_p10 = pnand %p15293_p9, %p15602_p13  ;;  %p15302_p12 = por %p15301_p6, %p15300_p2 }
  0x26   : > { %p15296_p1 = pneg %p15295_p10 }
  0x28   : > { %p15303_p0 = pnand %p15302_p12, %p15296_p1 }
  0x2a   : > { %15306 = shalt.err (!%p15303_p0)
}
  0x2b   : > { %s15472_s30 = smov 64   ;;  %s15473_s11 = smov 4  }
  0x2c   : > { %15079 = dma.hbm_to_vmem [thread:$0]  (!%p15586_p11), %s22029_s1, 4608, %s15579_s23, [#allocation8], %s15472_s30, %s15472_s30, %s15473_s11  }
  0x2d   : > { %s15307_s29 = scalar_lea.hbm %s22032_s4, 9216 }
  0x2e   : > { %p15308_p1 = scmp.ne.s32.totalorder %s22032_s4, %s15307_s29  ;;  %p15314_p10 = scmp.lt.u32.totalorder %s15307_s29, %s22032_s4 }
  0x30   : > { %p15310_p2 = pnand %p15308_p1, %p15602_p13 }
  0x32   : > { %p15311_p6 = pneg %p15310_p2 }
  0x34   : > { %p15316_p3 = pnand %p15314_p10, %p15311_p6 }
  0x36   : > { %15319 = shalt.err (!%p15316_p3)
}
  0x37   : > { %s15320_s23 = scalar_lea.vmem %s15590_s26, 9216  ;;  %p15328_p12 = scmp.lt.s32.totalorder %s15590_s26, %s15590_s26 }
  0x38   : > { %p15321_p5 = scmp.ne.s32.totalorder %s15590_s26, %s15320_s23  ;;  %p15329_p0 = scmp.lt.s32.totalorder %s15320_s23, %s15320_s23 }
  0x3a   : > { %p15323_p7 = pnand %p15321_p5, %p15602_p13  ;;  %p15330_p1 = por %p15329_p0, %p15328_p12 }
  0x3c   : > { %p15324_p9 = pneg %p15323_p7 }
  0x3e   : > { %p15331_p2 = pnand %p15330_p1, %p15324_p9 }
  0x40   : > { %15334 = shalt.err (!%p15331_p2)
}
  0x41   : > { %15082 = dma.hbm_to_vmem [thread:$0]  (!%p15586_p11), %s22032_s4, 9216, %s15590_s26, [#allocation8], %s15472_s30, %s15472_s30, %s15473_s11  }
  0x42   : > { %s15335_s12 = scalar_lea.hbm %s22035_s7, 512 }
  0x43   : > { %p15336_p6 = scmp.ne.s32.totalorder %s22035_s7, %s15335_s12  ;;  %p15342_p5 = scmp.lt.u32.totalorder %s15335_s12, %s22035_s7 }
  0x45   : > { %p15338_p10 = pnand %p15336_p6, %p15602_p13 }
  0x47   : > { %p15339_p3 = pneg %p15338_p10 }
  0x49   : > { %p15344_p7 = pnand %p15342_p5, %p15339_p3 }
  0x4b   : > { %15347 = shalt.err (!%p15344_p7)
}
  0x4c   : > { %s15348_s23 = scalar_lea.vmem %s325_s28, 512  ;;  %p15356_p1 = scmp.lt.s32.totalorder %s325_s28, %s325_s28 }
  0x4d   : > { %p15349_p9 = scmp.ne.s32.totalorder %s325_s28, %s15348_s23  ;;  %p15357_p2 = scmp.lt.s32.totalorder %s15348_s23, %s15348_s23 }
  0x4f   : > { %p15351_p12 = pnand %p15349_p9, %p15602_p13  ;;  %p15358_p4 = por %p15357_p2, %p15356_p1 }
  0x51   : > { %p15352_p0 = pneg %p15351_p12 }
  0x53   : > { %p15359_p8 = pnand %p15358_p4, %p15352_p0 }
  0x55   : > { %15362 = shalt.err (!%p15359_p8)
}
  0x56   : > { %15085 = dma.hbm_to_vmem [thread:$0]  (!%p15586_p11), %s22035_s7, 512, %s325_s28, [#allocation11], %s15472_s30, %s15472_s30, %s15473_s11  }
  0x57   : > { %s15675_s22 = sadd.s32 1, %s15467_s16   ;;  %s35_s10 = sadd.s32 1, %s15463_s15 }
  0x58   : > { %s32_s24 = ssub.s32 %s15467_s16, %s15675_s22  ;;  %p42_p8 = scmp.ne.s32.totalorder %s15463_s15, %s15459_s14 }
  0x59   : > { %p33_p4 = scmp.eq.s32.totalorder %s32_s24, 0  ;;  %p43_p13 = scmp.eq.s32.totalorder %s15467_s16, 0 }
  0x5a   : > { %p15097_p6 = scmp.lt.s32.totalorder %s15467_s16, 2  ;;  %p22580_p3 = scmp.eq.s32.totalorder %s15556_s17, 1 }
  0x5b   : > { %s15685_s13 = scalar_select %p33_p4, %s15463_s15, %s35_s10  }
  0x5c   : > { %p44_p10 = por %p43_p13, %p42_p8  ;;  %p15689_p5 = por %p22580_p3, %p42_p8 }
  0x5d   : > { %s344_s12 = sand.u32 1, %s15463_s15   ;;  %s14241_s18 = sshll.u32 %s15467_s16, 12 }
  0x5e   : > { %s13834_s28 = sshll.u32 %s344_s12, 8  ;;  %s15698_s29 = scalar_lea.hbm %s22028_s0, %s14241_s18 }
  0x5f   : > { %s348_s23 = scalar_lea.vmem [#allocation4], %s13834_s28  ;;  %p15700_p11 = pnand %p15097_p6, %p44_p10 }
  0x60   : > { %s356_s26 = sshll.u32 %s348_s23, 4  ;;  %s15706_s24 = scalar_lea.sflag [#allocation5], %s344_s12  ;;  %s15704_s26 = int_to_ptr.vmem [resolvable:$true] %s356_s26 }
  0x61   : > { %s15363_s10 = scalar_lea.hbm %s15698_s29, 4096  ;;  %p15365_p9 = pneg %p15700_p11 }
  0x62   : > { %p15364_p7 = scmp.ne.s32.totalorder %s15698_s29, %s15363_s10  ;;  %s15368_s25 = scalar_lea.hbm %s22028_s0, 8192 }
  0x63   : > { %p15369_p1 = scmp.lt.u32.totalorder %s15698_s29, %s22028_s0  ;;  %p15370_p2 = scmp.lt.u32.totalorder %s15368_s25, %s15363_s10 }
  0x64   : > { %p15366_p12 = pnand %p15365_p9, %p15364_p7  ;;  %p15372_p8 = scmp.lt.u32.totalorder %s15363_s10, %s15698_s29 }
  0x65   : > { %p15371_p4 = por %p15370_p2, %p15369_p1 }
  0x66   : > { %p15367_p0 = pneg %p15366_p12 }
  0x67   : > { %p15373_p13 = por %p15372_p8, %p15371_p4 }
  0x69   : > { %p15374_p6 = pnand %p15373_p13, %p15367_p0 }
  0x6b   : > { %15377 = shalt.err (!%p15374_p6)
}
  0x6c   : > { %s15378_s12 = scalar_lea.vmem %s15704_s26, 4096  ;;  %s15474_s18 = smov [#allocation4]  }
  0x6d   : > { %p15379_p10 = scmp.ne.s32.totalorder %s15704_s26, %s15378_s12  ;;  %s15383_s28 = sshll.u32 %s15474_s18, 4  ;;  %s15384_s28 = int_to_ptr.vmem [resolvable:$false] %s15383_s28 }
  0x6e   : > { %s15385_s27 = scalar_lea.vmem %s15384_s28, 8192  ;;  %p15386_p12 = scmp.lt.s32.totalorder %s15704_s26, %s15384_s28 }
  0x6f   : > { %p15381_p3 = pnand %p15379_p10, %p15365_p9  ;;  %p15387_p1 = scmp.lt.s32.totalorder %s15385_s27, %s15378_s12 }
  0x71   : > { %p15382_p7 = pneg %p15381_p3  ;;  %p15388_p2 = por %p15387_p1, %p15386_p12 }
  0x73   : > { %p15389_p4 = pnand %p15388_p2, %p15382_p7 }
  0x75   : > { %15392 = shalt.err (!%p15389_p4)
}
  0x76   : > { %15089 = dma.hbm_to_vmem [thread:$0]  (!%p15700_p11), %s15698_s29, 4096, %s15704_s26, %s15706_s24, %s15472_s30, %s15472_s30, %s15473_s11  }
  0x77   : > { %p22583_p9 = scmp.ne.s32.totalorder %s22577_s21, 0 }
  0x79   : > { %368 = sbr.rel (%p22583_p9) target bundleno = 1783 (0x6f7), region = 60 }
  0x80   : > { %s15740_s10 = sand.u32 1, %s15459_s14   ;;  %p22584_p0 = scmp.ne.s32.totalorder %s22574_s19, 0 }
  0x81   : > { %s13839_s25 = sshll.u32 %s15740_s10, 8  ;;  %s371_s23 = scalar_lea.sflag [#allocation5], %s15740_s10 }
  0x82   : > { %s15744_s12 = scalar_lea.vmem [#allocation4], %s13839_s25 }
  0x83   : > { %15438 = dma.done.wait (%p22584_p0), %s371_s23, 4096  }
  0x84   : > { %15440 = vsyncadd (%p22584_p0), %s371_s23, 4294963200  ;;  %p22585_p11 = scmp.eq.s32.totalorder %s15556_s17, 0 }
  0x86   : > { %15442 = dma.done.wait (%p22585_p11), [#allocation8], 13824   ;;  %p22586_p8 = pmov %p22585_p11 }
  0x88   : > { %15444 = vsyncadd (%p22586_p8), [#allocation8], 4294953472  ;;  %p22587_p13 = pmov %p22586_p8 }
  0x89   : > { %p22588_p6 = pmov %p22586_p8 }
  0x8a   : > { %15446 = dma.done.wait (%p22587_p13), [#allocation11], 512  }
  0x8b   : > { %15448 = vsyncadd (%p22588_p6), [#allocation11], 4294966784  ;;  %vm490_vm0 = vcmask 519168   ;;  %vm493_vm1 = vcmask 516096   ;;  %v15475_v0 = vmov 0   ;;  %v15143_v1 = vld [vmem:[#allocation7 + $0x20] sm:$0xff]   ;;  %v1738_v4 = vlaneseq }
  0x8c   : > { %491 = vst.msk [vmem:[#allocation2] sm:$0xf] %vm490_vm0, %v15475_v0  ;;  %492 = vst.msk [vmem:[#allocation2 + $0x4] sm:$0xf] %vm490_vm0, %v15475_v0  ;;  %vm507_vm2 = vsmask.f32 256  ;;  %14652 = vmatprep.subr.bf16.mxu0 %v15143_v1  ;;  %14924 = vmatprep.subr.bf16.mxu1 %v15143_v1 }
  0x8d   : > { %494 = vst.msk [vmem:[#allocation2 + $0x8] sm:$0x1] %vm493_vm1, %v15475_v0  ;;  %497 = vst.msk [vmem:[#allocation2 + $0xe0] sm:$0x1] %vm493_vm1, %v15475_v0  ;;  %v15476_v2 = vmov 1966171168   ;;  %14653 = vmatpush3.bf16.msra.mxu0 %v15143_v1  ;;  %14928 = vmatpush3.bf16.msra.mxu1 %v15143_v1 }
  0x8e   : > { %495 = vst.msk [vmem:[#allocation2 + $0xd8] sm:$0xf] %vm490_vm0, %v15475_v0  ;;  %496 = vst.msk [vmem:[#allocation2 + $0xdc] sm:$0xf] %vm490_vm0, %v15475_v0  ;;  %v1736_v3 = vunpack.c.l.s4 %v15476_v2  ;;  %v15144_v5 = vld [vmem:[#allocation7 + $0x28] sm:$0xff]   ;;  %v15145_v6 = vld [vmem:[#allocation7 + $0x30] sm:$0xff]  }
  0x8f   : > { %11527 = vst [vmem:[#allocation3] sm:$0xf] %v15475_v0  ;;  %11528 = vst [vmem:[#allocation3 + $0x4] sm:$0x1] %v15475_v0  ;;  %14654 = vmatprep.subr.bf16.mxu0 %v15144_v5  ;;  %v428_v7 = vld [vmem:[%s15744_s12 + $0x8] sm:$0xf]  ;;  %14925 = vmatprep.subr.bf16.mxu1 %v15144_v5 }
  0x90   : > { %11529 = vst [vmem:[#allocation3 + $0x50] sm:$0xf] %v15475_v0  ;;  %11530 = vst [vmem:[#allocation3 + $0x54] sm:$0x1] %v15475_v0  ;;  %v22589_v8 = vmov 0  ;;  %v1737_v9 = vunpack.c.0.s8 %v1736_v3  ;;  %v1739_v10 = vshrl.u32 %v1738_v4, 7 }
  0x91   : > { %11532 = vst [vmem:[#allocation3 + $0x48] sm:$0xf] %v15475_v0  ;;  %11533 = vst [vmem:[#allocation3 + $0x4c] sm:$0x1] %v15475_v0  ;;  %vm605_vm4 = vsmask.f32 7938  ;;  %14655 = vmatpush3.bf16.msra.mxu0 %v15144_v5  ;;  %14929 = vmatpush3.bf16.msra.mxu1 %v15144_v5 }
  0x92   : > { %11534 = vst [vmem:[#allocation3 + $0x98] sm:$0xf] %v15475_v0  ;;  %11535 = vst [vmem:[#allocation3 + $0x9c] sm:$0x1] %v15475_v0  ;;  %v429_v11 = vld [vmem:[%s15744_s12 + $0xc] sm:$0xf]  ;;  %14656 = vmatprep.subr.bf16.mxu0 %v15145_v6  ;;  %v15794_v27 = vsub.s32 %v1737_v9, %v1739_v10  ;;  %14926 = vmatprep.subr.bf16.mxu1 %v15145_v6 }
  0x93   : > { %vm15767_vm3 = vmand %vm493_vm1, %vm507_vm2  ;;  %v22592_v12 = vmov 0  ;;  %vm703_vm6 = vsmask.f32 4368  ;;  %v15778_v13 = vld [vmem:[#allocation7 + $0x38] sm:$0xff]   ;;  %v512_v16 = vld [vmem:[#allocation2 + $0x18] sm:$0x1] }
  0x94   : > { %v22590_v8 = vsel %vm15767_vm3, 4294967295, %v22589_v8  ;;  %vm15774_vm5 = vmand %vm493_vm1, %vm605_vm4  ;;  %v432_v14 = vld [vmem:[%s15744_s12 + $0x18] sm:$0xf]  ;;  %v433_v15 = vld [vmem:[%s15744_s12 + $0x1c] sm:$0xf]  ;;  %v513_v18 = vsel %vm15767_vm3, 0, %v512_v16 }
  0x95   : > { %22591 = vst [vmem:[#allocation19_spill] sm:$0xff] %v22590_v8  ;;  %v22593_v12 = vsel %vm15774_vm5, 4294967295, %v22592_v12  ;;  %v15783_v17 = vld [vmem:[%s15744_s12 + $0x28] sm:$0xf]  ;;  %v518_v19 = vld [vmem:[#allocation2 + $0x30] sm:$0x1]  ;;  %14657 = vmatpush3.bf16.msra.mxu0 %v15145_v6  ;;  %14930 = vmatpush3.bf16.msra.mxu1 %v15145_v6  ;;  %vm15813_vm7 = vmor %vm507_vm2, %vm703_vm6 }
  0x96   : > { %22594 = vst [vmem:[#allocation20_spill] sm:$0xff] %v22593_v12  ;;  %v524_v20 = vld [vmem:[#allocation2 + $0x48] sm:$0x1]  ;;  %v723_v21 = vshrl.u32 %v428_v7, 16  ;;  %v15788_v22 = vld [vmem:[%s15744_s12 + $0x2c] sm:$0xf]  ;;  %14658 = vmatprep.subr.bf16.mxu0 %v15778_v13  ;;  %14927 = vmatprep.subr.bf16.mxu1 %v15778_v13  ;;  %vm15828_vm8 = vmand %vm490_vm0, %vm605_vm4 }
  0x97   : > { %514 = vst [vmem:[#allocation2 + $0x18] sm:$0x1] %v513_v18  ;;  %v519_v23 = vsel %vm15767_vm3, 0, %v518_v19  ;;  %v525_v24 = vsel %vm15767_vm3, 0, %v524_v20  ;;  %v530_v25 = vld [vmem:[#allocation2 + $0x60] sm:$0x1] }
  0x98   : > { %v616_v26 = vld [vmem:[#allocation2 + $0x38] sm:$0x1]  ;;  %22595 = vst [vmem:[#allocation21_spill] sm:$0xff] %v15794_v27  ;;  %520 = vst [vmem:[#allocation2 + $0x30] sm:$0x1] %v519_v23  ;;  %v531_v28 = vsel %vm15767_vm3, 0, %v530_v25 }
  0x99   : > { %526 = vst [vmem:[#allocation2 + $0x48] sm:$0x1] %v525_v24  ;;  %v617_v29 = vsel %vm15774_vm5, 0, %v616_v26  ;;  %v622_v30 = vld [vmem:[#allocation2 + $0x50] sm:$0x1]  ;;  %v725_v31 = vrot.slane %v723_v21, 7  ;;  %14659 = vmatpush3.bf16.msra.mxu0 %v15778_v13  ;;  %14931 = vmatpush3.bf16.msra.mxu1 %v15778_v13 }
  0x9a   : > { %v726_v32 = vshll.u32 %v428_v7, 16  ;;  %532 = vst [vmem:[#allocation2 + $0x60] sm:$0x1] %v531_v28  ;;  %618 = vst [vmem:[#allocation2 + $0x38] sm:$0x1] %v617_v29  ;;  %v623_v33 = vsel %vm15774_vm5, 0, %v622_v30 }
  0x9b   : > { %v731_v34 = vshrl.u32 %v429_v11, 16  ;;  %v734_v35 = vshll.u32 %v429_v11, 16  ;;  %v757_v36 = vshrl.u32 %v432_v14, 16  ;;  %v440_v37 = vld [vmem:[%s15744_s12 + $0x38] sm:$0xf]  ;;  %v729_v40 = vrot.slane %v725_v31, 4 }
  0x9c   : > { %v441_v38 = vld [vmem:[%s15744_s12 + $0x3c] sm:$0xf]  ;;  %624 = vst [vmem:[#allocation2 + $0x50] sm:$0x1] %v623_v33  ;;  %v728_v39 = vor.u32 %v726_v32, %v725_v31  ;;  %v760_v41 = vshll.u32 %v432_v14, 16  ;;  %v765_v42 = vshrl.u32 %v433_v15, 16 }
  0x9d   : > { %v15804_v43 = vld [vmem:[#allocation7] sm:$0xff]   ;;  %v15807_v44 = vrot.slane %v731_v34, 7  ;;  %v759_v45 = vrot.slane %v757_v36, 7  ;;  %v768_v46 = vshll.u32 %v433_v15, 16  ;;  %v791_v47 = vshrl.u32 %v15783_v17, 16  ;;  %s23785_s23 = sld [smem:[#allocation230_spill]] }
  0x9e   : > { %v22597_v48 = vmov 0  ;;  %v767_v49 = vrot.slane %v765_v42, 7  ;;  %v794_v50 = vshll.u32 %v15783_v17, 16  ;;  %v799_v51 = vshrl.u32 %v15788_v22, 16  ;;  %v1354_v61 = vld [vmem:[#allocation2 + $0x18] sm:$0xf]  ;;  %14676 = vmatprep.subr.bf16.mxu0 %v15804_v43 }
  0x9f   : > { %22596 = vst [vmem:[#allocation22_spill] sm:$0xff] %v15807_v44  ;;  %v22598_v48 = vsel %vm15813_vm7, 4294967295, %v22597_v48  ;;  %v802_v52 = vshll.u32 %v15788_v22, 16  ;;  %v736_v53 = vor.u32 %v734_v35, %v15807_v44  ;;  %v762_v55 = vor.u32 %v760_v41, %v759_v45  ;;  %v1368_v3 = vld [vmem:[#allocation2 + $0x30] sm:$0xf]  ;;  %s14259_s21 = sshll.u32 %s15556_s17, 11 }
  0xa0   : > { %22599 = vst [vmem:[#allocation23_spill] sm:$0xff] %v22598_v48  ;;  %v763_v56 = vrot.slane %v759_v45, 4  ;;  %v770_v57 = vor.u32 %v768_v46, %v767_v49  ;;  %v772_v58 = vrot.slane %v767_v49, 4  ;;  %v793_v59 = vrot.slane %v791_v47, 7  ;;  %v1382_v11 = vld [vmem:[#allocation2 + $0x48] sm:$0xf] }
  0xa1   : > { %v801_v60 = vrot.slane %v799_v51, 7  ;;  %v737_v62 = vsel %vm15813_vm7, %v729_v40, %v736_v53  ;;  %v825_v63 = vshrl.u32 %v440_v37, 16  ;;  %v828_v0 = vshll.u32 %v440_v37, 16  ;;  %v1372_v10 = vld [vmem:[#allocation2 + $0x38] sm:$0x1]  ;;  %s23791_s26 = sld [smem:[#allocation231_spill]] }
  0xa2   : > { %v833_v1 = vshrl.u32 %v441_v38, 16  ;;  %v22600_v2 = vmov 0  ;;  %v13844_v4 = vld.sshfl [vmem:[#allocation2] sm:$0x33 pattern:$0x75316420]  ;;  %v771_v5 = vsel %vm15813_vm7, %v763_v56, %v770_v57  ;;  %v796_v6 = vor.u32 %v794_v50, %v793_v59 }
  0xa3   : > { %v22601_v2 = vsel %vm15828_vm8, 4294967295, %v22600_v2  ;;  %v797_v7 = vrot.slane %v793_v59, 4  ;;  %v804_v9 = vor.u32 %v802_v52, %v801_v60  ;;  %1357 = vst.msk [vmem:[#allocation2 + $0x1c] sm:$0xf] %vm490_vm0, %v737_v62  ;;  %v806_v13 = vrot.slane %v801_v60, 4  ;;  %s13712_s24 = scalar_lea.sflag [#allocation6], %s15740_s10 }
  0xa4   : > { %22602 = vst [vmem:[#allocation24_spill] sm:$0xff] %v22601_v2  ;;  %v827_v14 = vrot.slane %v825_v63, 7  ;;  %v15836_v15 = vrot.slane %v833_v1, 7  ;;  %v836_v16 = vshll.u32 %v441_v38, 16  ;;  %1371 = vst.msk [vmem:[#allocation2 + $0x34] sm:$0xf] %vm490_vm0, %v771_v5  ;;  %v1355_v19 = vsel %vm15828_vm8, %v728_v39, %v1354_v61 }
  0xa5   : > { %v1386_v17 = vld [vmem:[#allocation2 + $0x50] sm:$0x1]  ;;  %v805_v18 = vsel %vm15813_vm7, %v797_v7, %v804_v9  ;;  %v1369_v20 = vsel %vm15828_vm8, %v762_v55, %v1368_v3  ;;  %v1373_v21 = vsel %vm15767_vm3, %v772_v58, %v1372_v10  ;;  %v1396_v22 = vld [vmem:[#allocation2 + $0x60] sm:$0xf]  ;;  %1356 = vst [vmem:[#allocation2 + $0x18] sm:$0xf] %v1355_v19  ;;  %v1383_v28 = vsel %vm15828_vm8, %v796_v6, %v1382_v11 }
  0xa6   : > { %22603 = vst [vmem:[#allocation25_spill] sm:$0xff] %v15836_v15  ;;  %v13845_v23 = vld.sshfl [vmem:[#allocation2 + $0x4] sm:$0x33 pattern:$0x75316420]  ;;  %v830_v24 = vor.u32 %v828_v0, %v827_v14  ;;  %v831_v25 = vrot.slane %v827_v14, 4  ;;  %v838_v26 = vor.u32 %v836_v16, %v15836_v15  ;;  %v1387_v30 = vsel %vm15767_vm3, %v806_v13, %v1386_v17 }
  0xa7   : > { %1370 = vst [vmem:[#allocation2 + $0x30] sm:$0xf] %v1369_v20  ;;  %1374 = vst [vmem:[#allocation2 + $0x38] sm:$0x1] %v1373_v21  ;;  %v15852_v29 = vld [vmem:[%s15744_s12 + $0x48] sm:$0xf]  ;;  %v1734_v31 = vcombine.high %v13844_v4, %v13844_v4  ;;  %v1741_v32 = vrot.slane %v13844_v4, %v15794_v27  ;;  %v1758_v33 = vcombine.high %v13845_v23, %v13845_v23  ;;  %s21980_s6 = scalar_lea.hbm %s23791_s26, %s14259_s21 }
  0xa8   : > { %1385 = vst.msk [vmem:[#allocation2 + $0x4c] sm:$0xf] %vm490_vm0, %v805_v18  ;;  %1384 = vst [vmem:[#allocation2 + $0x48] sm:$0xf] %v1383_v28  ;;  %v536_v34 = vld [vmem:[#allocation2 + $0x78] sm:$0x1]  ;;  %v839_v35 = vsel %vm15813_vm7, %v831_v25, %v838_v26  ;;  %v1397_v36 = vsel %vm15828_vm8, %v830_v24, %v1396_v22  ;;  %v15862_v37 = vrot.slane %v13845_v23, %v15794_v27 }
  0xa9   : > { %1388 = vst [vmem:[#allocation2 + $0x50] sm:$0x1] %v1387_v30  ;;  %v537_v38 = vsel %vm15767_vm3, 0, %v536_v34  ;;  %1398 = vst [vmem:[#allocation2 + $0x60] sm:$0xf] %v1397_v36  ;;  %v1748_v39 = vrot.slane %v1734_v31, %v15794_v27  ;;  %v1749_v40 = vcombine.high %v1741_v32, %v1741_v32  ;;  %v15869_v41 = vrot.slane %v1758_v33, %v15794_v27  ;;  %s15477_s17 = smov [#allocation12]  }
  0xaa   : > { %1399 = vst.msk [vmem:[#allocation2 + $0x64] sm:$0xf] %vm490_vm0, %v839_v35  ;;  %v3906_v42 = vrot.slane %v1741_v32, %v15794_v27  ;;  %538 = vst [vmem:[#allocation2 + $0x78] sm:$0x1] %v537_v38  ;;  %v1773_v46 = vcombine.high %v15862_v37, %v15862_v37  ;;  %v3962_v47 = vrot.slane %v15862_v37, %v15794_v27  ;;  %vm5821_vm9 = vcmask 1041409   ;;  %s15397_s28 = sshll.u32 %s15477_s17, 4  ;;  %s15398_s28 = int_to_ptr.vmem [resolvable:$false] %s15397_s28 }
  0xab   : > { %v13848_v45 = vld.sshfl [vmem:[#allocation2 + $0x1c] sm:$0x33 pattern:$0x75316420]  ;;  %v1750_v52 = vcombine.high %v1748_v39, %v1748_v39  ;;  %v1774_v53 = vcombine.high %v15869_v41, %v15869_v41  ;;  %v3920_v60 = vrot.slane %v1748_v39, %v15794_v27  ;;  %v15896_v0 = vrot.slane %v1749_v40, %v15794_v27  ;;  %s15399_s27 = scalar_lea.vmem %s15398_s28, 4096 }
  0xac   : > { %v13851_v51 = vld.sshfl [vmem:[#allocation2 + $0x34] sm:$0x33 pattern:$0x75316420]  ;;  %v1820_v55 = vcombine.high %v13848_v45, %v13848_v45  ;;  %v15881_v56 = vrot.slane %v13848_v45, %v15794_v27  ;;  %v15887_v59 = vrot.slane %v3906_v42, %v15794_v27  ;;  %vm5824_vm10 = vcmask 1042434  }
  0xad   : > { %v1882_v57 = vcombine.high %v13851_v51, %v13851_v51  ;;  %v15884_v58 = vrot.slane %v13851_v51, %v15794_v27  ;;  %v13847_v61 = vld.sshfl [vmem:[#allocation2 + $0x18] sm:$0x33 pattern:$0x75316420]  ;;  %v15899_v1 = vrot.slane %v1750_v52, %v15794_v27  ;;  %v15915_v14 = vrot.slane %v3920_v60, %v15794_v27 }
  0xae   : > { %22604 = vst [vmem:[#allocation26_spill] sm:$0xff] %v15887_v59  ;;  %v15891_v62 = vrot.slane %v1820_v55, %v15794_v27  ;;  %v1835_v63 = vcombine.high %v15881_v56, %v15881_v56  ;;  %v13850_v3 = vld.sshfl [vmem:[#allocation2 + $0x30] sm:$0x33 pattern:$0x75316420]  ;;  %v1796_v4 = vcombine.high %v13847_v61, %v13847_v61  ;;  %v1803_v5 = vrot.slane %v13847_v61, %v15794_v27 }
  0xaf   : > { %v15903_v6 = vrot.slane %v1882_v57, %v15794_v27  ;;  %v1897_v7 = vcombine.high %v15884_v58, %v15884_v58  ;;  %v15907_v9 = vld.sshfl [vmem:[#allocation2 + $0x38] sm:$0x1 pattern:$0x75316420]  ;;  %v1858_v11 = vcombine.high %v13850_v3, %v13850_v3  ;;  %v15912_v13 = vrot.slane %v13850_v3, %v15794_v27 }
  0xb0   : > { %v1836_v10 = vcombine.high %v15891_v62, %v15891_v62  ;;  %v13853_v16 = vld.sshfl [vmem:[#allocation2 + $0x48] sm:$0x33 pattern:$0x75316420]  ;;  %v1810_v17 = vrot.slane %v1796_v4, %v15794_v27  ;;  %v1811_v18 = vcombine.high %v1803_v5, %v1803_v5  ;;  %v3941_v32 = vrot.slane %v15896_v0, %v15794_v27 }
  0xb1   : > { %v1898_v19 = vcombine.high %v15903_v6, %v15903_v6  ;;  %v13854_v21 = vld.sshfl [vmem:[#allocation2 + $0x4c] sm:$0x33 pattern:$0x75316420]  ;;  %v1872_v22 = vrot.slane %v1858_v11, %v15794_v27  ;;  %v1873_v23 = vcombine.high %v15912_v13, %v15912_v13  ;;  %v1920_v24 = vcombine.high %v13853_v16, %v13853_v16 }
  0xb2   : > { %v15926_v25 = vrot.slane %v13853_v16, %v15794_v27  ;;  %v15928_v26 = vld.sshfl [vmem:[#allocation2 + $0x50] sm:$0x1 pattern:$0x75316420]  ;;  %v1812_v28 = vcombine.high %v1810_v17, %v1810_v17  ;;  %v1944_v30 = vcombine.high %v13854_v21, %v13854_v21  ;;  %v15931_v31 = vrot.slane %v13854_v21, %v15794_v27 }
  0xb3   : > { %v13856_v33 = vld.sshfl [vmem:[#allocation2 + $0x60] sm:$0x33 pattern:$0x75316420]  ;;  %v1874_v34 = vcombine.high %v1872_v22, %v1872_v22  ;;  %v15936_v35 = vrot.slane %v1920_v24, %v15794_v27  ;;  %v3955_v60 = vrot.slane %v15899_v1, %v15794_v27  ;;  %v15965_v11 = vrot.slane %v3962_v47, %v15794_v27 }
  0xb4   : > { %v1935_v36 = vcombine.high %v15926_v25, %v15926_v25  ;;  %v13857_v39 = vld.sshfl [vmem:[#allocation2 + $0x64] sm:$0x33 pattern:$0x75316420]  ;;  %v15943_v40 = vrot.slane %v1944_v30, %v15794_v27  ;;  %v1959_v42 = vcombine.high %v15931_v31, %v15931_v31  ;;  %v1982_v45 = vcombine.high %v13856_v33, %v13856_v33 }
  0xb5   : > { %v15948_v51 = vrot.slane %v13856_v33, %v15794_v27  ;;  %v1936_v52 = vcombine.high %v15936_v35, %v15936_v35  ;;  %v2006_v55 = vcombine.high %v13857_v39, %v13857_v39  ;;  %v15953_v57 = vrot.slane %v13857_v39, %v15794_v27 }
  0xb6   : > { %v1960_v61 = vcombine.high %v15943_v40, %v15943_v40  ;;  %v15960_v3 = vrot.slane %v1982_v45, %v15794_v27  ;;  %v3976_v24 = vrot.slane %v15869_v41, %v15794_v27  ;;  %v15978_v30 = vrot.slane %v1773_v46, %v15794_v27 }
  0xb7   : > { %v1997_v4 = vcombine.high %v15948_v51, %v15948_v51  ;;  %v15968_v16 = vrot.slane %v2006_v55, %v15794_v27  ;;  %v2021_v21 = vcombine.high %v15953_v57, %v15953_v57  ;;  %v15983_v47 = vrot.slane %v1774_v53, %v15794_v27 }
  0xb8   : > { %v1998_v33 = vcombine.high %v15960_v3, %v15960_v3  ;;  %v4018_v39 = vrot.slane %v1803_v5, %v15794_v27  ;;  %v4032_v45 = vrot.slane %v1810_v17, %v15794_v27  ;;  %v15990_v41 = vrot.slane %v3976_v24, %v15794_v27 }
  0xb9   : > { %v2022_v55 = vcombine.high %v15968_v16, %v15968_v16  ;;  %v3997_v37 = vrot.slane %v15978_v30, %v15794_v27  ;;  %v15995_v46 = vrot.slane %v1811_v18, %v15794_v27  ;;  %v4011_v53 = vrot.slane %v15983_v47, %v15794_v27 }
  0xba   : > { %v16000_v54 = vrot.slane %v4018_v39, %v15794_v27  ;;  %v16003_v5 = vrot.slane %v4032_v45, %v15794_v27  ;;  %v16006_v17 = vrot.slane %v1812_v28, %v15794_v27  ;;  %v4074_v50 = vrot.slane %v15881_v56, %v15794_v27 }
  0xbb   : > { %v4088_v18 = vrot.slane %v15891_v62, %v15794_v27  ;;  %v16018_v39 = vrot.slane %v1835_v63, %v15794_v27  ;;  %v16023_v28 = vrot.slane %v1836_v10, %v15794_v27  ;;  %v4130_v49 = vrot.slane %v15912_v13, %v15794_v27 }
  0xbc   : > { %22605 = vst [vmem:[#allocation27_spill] sm:$0xff] %v16000_v54  ;;  %v4144_v38 = vrot.slane %v1872_v22, %v15794_v27  ;;  %v16029_v20 = vrot.slane %v4074_v50, %v15794_v27  ;;  %v16037_v63 = vrot.slane %v1873_v23, %v15794_v27  ;;  %v16048_v50 = vrot.slane %v1874_v34, %v15794_v27 }
  0xbd   : > { %v16032_v62 = vrot.slane %v4088_v18, %v15794_v27  ;;  %v16042_v45 = vrot.slane %v4130_v49, %v15794_v27  ;;  %v4186_v18 = vrot.slane %v15884_v58, %v15794_v27  ;;  %v4200_v23 = vrot.slane %v15903_v6, %v15794_v27 }
  0xbe   : > { %v16045_v13 = vrot.slane %v4144_v38, %v15794_v27  ;;  %v16060_v49 = vrot.slane %v1897_v7, %v15794_v27  ;;  %v4179_v38 = vrot.slane %v16048_v50, %v15794_v27  ;;  %v16068_v34 = vrot.slane %v1898_v19, %v15794_v27 }
  0xbf   : > { %v4242_v22 = vrot.slane %v15926_v25, %v15794_v27  ;;  %v4256_v10 = vrot.slane %v15936_v35, %v15794_v27  ;;  %v16075_v56 = vrot.slane %v4186_v18, %v15794_v27  ;;  %v16078_v58 = vrot.slane %v4200_v23, %v15794_v27 }
  0xc0   : > { %v4221_v7 = vrot.slane %v16060_v49, %v15794_v27  ;;  %v16083_v50 = vrot.slane %v1935_v36, %v15794_v27  ;;  %v4235_v6 = vrot.slane %v16068_v34, %v15794_v27  ;;  %v4284_v35 = vrot.slane %v1936_v52, %v15794_v27 }
  0xc1   : > { %v16088_v19 = vrot.slane %v4242_v22, %v15794_v27  ;;  %v4263_v25 = vrot.slane %v4256_v10, %v15794_v27  ;;  %v4298_v23 = vrot.slane %v15931_v31, %v15794_v27  ;;  %v4312_v36 = vrot.slane %v15943_v40, %v15794_v27 }
  0xc2   : > { %v4277_v18 = vrot.slane %v16083_v50, %v15794_v27  ;;  %v4326_v49 = vrot.slane %v1959_v42, %v15794_v27  ;;  %v4291_v34 = vrot.slane %v4284_v35, %v15794_v27  ;;  %v4340_v22 = vrot.slane %v1960_v61, %v15794_v27 }
  0xc3   : > { %v4354_v10 = vrot.slane %v15948_v51, %v15794_v27  ;;  %v4368_v52 = vrot.slane %v15960_v3, %v15794_v27  ;;  %v16106_v50 = vrot.slane %v4298_v23, %v15794_v27  ;;  %v16109_v31 = vrot.slane %v4312_v36, %v15794_v27 }
  0xc4   : > { %v4333_v40 = vrot.slane %v4326_v49, %v15794_v27  ;;  %v4382_v42 = vrot.slane %v1997_v4, %v15794_v27  ;;  %v4347_v35 = vrot.slane %v4340_v22, %v15794_v27  ;;  %v4396_v24 = vrot.slane %v1998_v33, %v15794_v27 }
  0xc5   : > { %v16115_v61 = vrot.slane %v4354_v10, %v15794_v27  ;;  %v4375_v51 = vrot.slane %v4368_v52, %v15794_v27  ;;  %v4410_v23 = vrot.slane %v15953_v57, %v15794_v27  ;;  %v4424_v36 = vrot.slane %v15968_v16, %v15794_v27 }
  0xc6   : > { %v4389_v3 = vrot.slane %v4382_v42, %v15794_v27  ;;  %v4438_v4 = vrot.slane %v2021_v21, %v15794_v27  ;;  %v4403_v49 = vrot.slane %v4396_v24, %v15794_v27  ;;  %v4452_v22 = vrot.slane %v2022_v55, %v15794_v27 }
  0xc7   : > { %22606 = vst [vmem:[#allocation28_spill] sm:$0xff] %v16115_v61  ;;  %v22045_v10 = vunpack.c.l.b16 %v15887_v59  ;;  %v16132_v33 = vunpack.c.l.b16 %v15915_v14  ;;  %v16135_v52 = vrot.slane %v4410_v23, %v15794_v27  ;;  %v16138_v42 = vrot.slane %v4424_v36, %v15794_v27 }
  0xc8   : > { %v4445_v16 = vrot.slane %v4438_v4, %v15794_v27  ;;  %v16144_v57 = vunpack.c.l.b16 %v3941_v32  ;;  %v4459_v21 = vrot.slane %v4452_v22, %v15794_v27  ;;  %v16150_v14 = vunpack.c.l.b16 %v3955_v60 }
  0xc9   : > { %22607 = vst [vmem:[#allocation29_spill] sm:$0xff] %v16135_v52  ;;  %22608 = vst [vmem:[#allocation30_spill] sm:$0xff] %v16138_v42  ;;  %v22046_v55 = vunpack.c.l.b16 %v15965_v11  ;;  %v22047_v24 = vunpack.c.l.b16 %v15990_v41  ;;  %v16157_v23 = vunpack.c.l.b16 %v3997_v37  ;;  %v16162_v0 = vunpack.c.l.b16 %v4011_v53 }
  0xca   : > { %v16166_v1 = vunpack.c.l.b16 %v16003_v5  ;;  %v22609_v60 = vrot.slane %v15995_v46, %v15794_v27  ;;  %v22610_v30 = vrot.slane %v16006_v17, %v15794_v27  ;;  %vm5827_vm11 = vcmask 1043459  }
  0xcb   : > { %v22611_v5 = vrot.slane %v16018_v39, %v15794_v27  ;;  %v22613_v46 = vrot.slane %v16023_v28, %v15794_v27  ;;  %v16192_v17 = vunpack.c.l.b16 %v16045_v13  ;;  %vm5830_vm12 = vcmask 1044484  }
  0xcc   : > { %v16171_v36 = vunpack.c.l.b16 %v22609_v60  ;;  %v16176_v37 = vunpack.c.l.b16 %v22610_v30  ;;  %v22615_v30 = vrot.slane %v16037_v63, %v15794_v27  ;;  %v16199_v47 = vunpack.c.l.b16 %v4179_v38 }
  0xcd   : > { %v16183_v4 = vunpack.c.l.b16 %v22611_v5  ;;  %v16188_v22 = vunpack.c.l.b16 %v22613_v46  ;;  %vm5833_vm13 = vcmask 1045509   ;;  %v16203_v28 = vunpack.c.l.b16 %v4221_v7 }
  0xce   : > { %v16197_v53 = vunpack.c.l.b16 %v22615_v30  ;;  %v16205_v46 = vunpack.c.l.b16 %v4235_v6  ;;  %v16208_v60 = vunpack.c.l.b16 %v4263_v25  ;;  %vm5836_vm14 = vcmask 1046534  }
  0xcf   : > { %22612 = vst [vmem:[#allocation31_spill] sm:$0xff] %v16183_v4  ;;  %22614 = vst [vmem:[#allocation32_spill] sm:$0xff] %v16188_v22  ;;  %v16210_v32 = vunpack.c.l.b16 %v4277_v18  ;;  %v16212_v63 = vunpack.c.l.b16 %v4291_v34  ;;  %vm5839_vm15 = vcmask 1047559   ;;  %v16216_v5 = vunpack.c.l.b16 %v4333_v40 }
  0xd0   : > { %v16218_v7 = vunpack.c.l.b16 %v4347_v35  ;;  %v16221_v39 = vunpack.c.l.b16 %v4375_v51  ;;  %v16223_v25 = vunpack.c.l.b16 %v4389_v3  ;;  %v16225_v13 = vunpack.c.l.b16 %v4403_v49 }
  0xd1   : > { %v16229_v38 = vunpack.c.l.b16 %v4445_v16  ;;  %v16231_v30 = vunpack.c.l.b16 %v4459_v21  ;;  %v5820_v40 = vrot.slane %v22045_v10, 1  ;;  %v22051_v35 = vrot.slane %v16144_v57, 7 }
  0xd2   : > { %22616 = vst [vmem:[#allocation33_spill] sm:$0xff] %v16225_v13  ;;  %v16239_v3 = vrot.slane %v22046_v55, 5  ;;  %v16243_v49 = vrot.slane %v22047_v24, 4  ;;  %v22621_v10 = vunpack.c.l.b16 %v16000_v54  ;;  %v22622_v24 = vunpack.c.l.b16 %v16029_v20 }
  0xd3   : > { %22617 = vst [vmem:[#allocation34_spill] sm:$0xff] %v16229_v38  ;;  %22618 = vst [vmem:[#allocation35_spill] sm:$0xff] %v16231_v30  ;;  %v5822_v21 = vsel %vm5821_vm9, %v16132_v33, %v5820_v40  ;;  %v22624_v16 = vunpack.c.l.b16 %v16032_v62  ;;  %v22626_v34 = vrot.slane %v16150_v14, 6  ;;  %v22632_v54 = vunpack.c.l.b16 %v16078_v58 }
  0xd4   : > { %22619 = vst [vmem:[#allocation36_spill] sm:$0xff] %v16239_v3  ;;  %22620 = vst [vmem:[#allocation37_spill] sm:$0xff] %v16243_v49  ;;  %v5841_v18 = vrot.slane %v22621_v10, 1  ;;  %v5825_v55 = vsel %vm5824_vm10, %v22051_v35, %v5822_v21  ;;  %v16258_v44 = vrot.slane %v22622_v24, 5  ;;  %v22627_v24 = vrot.slane %v16171_v36, 7 }
  0xd5   : > { %v16262_v40 = vrot.slane %v22624_v16, 4  ;;  %v5828_v10 = vsel %vm5827_vm11, %v22626_v34, %v5825_v55  ;;  %v22628_v16 = vunpack.c.l.b16 %v16042_v45  ;;  %vm6083_vm1 = vcmask 523264  }
  0xd6   : > { %22623 = vst [vmem:[#allocation38_spill] sm:$0xff] %v16258_v44  ;;  %v5842_v6 = vsel %vm5821_vm9, %v16166_v1, %v5841_v18  ;;  %v5831_v35 = vsel %vm5830_vm12, %v16239_v3, %v5828_v10  ;;  %v22629_v18 = vrot.slane %v16176_v37, 6  ;;  %v22630_v10 = vunpack.c.l.b16 %v16075_v56 }
  0xd7   : > { %22625 = vst [vmem:[#allocation39_spill] sm:$0xff] %v16262_v40  ;;  %v5844_v51 = vsel %vm5824_vm10, %v22627_v24, %v5842_v6  ;;  %v5855_v12 = vrot.slane %v22628_v16, 1  ;;  %v5834_v55 = vsel %vm5833_vm13, %v16243_v49, %v5831_v35  ;;  %v22631_v6 = vrot.slane %v16157_v23, 3 }
  0xd8   : > { %v5846_v34 = vsel %vm5827_vm11, %v22629_v18, %v5844_v51  ;;  %v16287_v15 = vrot.slane %v22630_v10, 5  ;;  %v16298_v49 = vrot.slane %v22632_v54, 4  ;;  %v22633_v51 = vrot.slane %v16162_v0, 2 }
  0xd9   : > { %v5837_v24 = vsel %vm5836_vm14, %v22631_v6, %v5834_v55  ;;  %v5848_v16 = vsel %vm5830_vm12, %v16258_v44, %v5846_v34  ;;  %v5856_v35 = vsel %vm5821_vm9, %v16192_v17, %v5855_v12  ;;  %v22634_v55 = vrot.slane %v16197_v53, 7 }
  0xda   : > { %v5840_v18 = vsel %vm5839_vm15, %v22633_v51, %v5837_v24  ;;  %v5850_v10 = vsel %vm5833_vm13, %v16262_v40, %v5848_v16  ;;  %v22062_v34 = vrot.slane %v16203_v28, 3  ;;  %v22635_v12 = vrot.slane %v16183_v4, 3 }
  0xdb   : > { %v5858_v6 = vsel %vm5824_vm10, %v22634_v55, %v5856_v35  ;;  %v22636_v54 = vrot.slane %v16199_v47, 6  ;;  %v22064_v3 = vrot.slane %v16205_v46, 2  ;;  %v22637_v24 = vunpack.c.l.b16 %v16088_v19 }
  0xdc   : > { %v5852_v21 = vsel %vm5836_vm14, %v22635_v12, %v5850_v10  ;;  %v22638_v16 = vrot.slane %v16188_v22, 2  ;;  %v22063_v55 = vrot.slane %v16210_v32, 7  ;;  %v22644_v48 = vunpack.c.l.b16 %v16115_v61 }
  0xdd   : > { %v5860_v44 = vsel %vm5827_vm11, %v22636_v54, %v5858_v6  ;;  %v5869_v51 = vrot.slane %v22637_v24, 1  ;;  %v22640_v54 = vunpack.c.l.b16 %v16106_v50  ;;  %v22651_v61 = vrot.slane %v16218_v7, 2 }
  0xde   : > { %v16321_v40 = vsel %vm5839_vm15, %v22638_v16, %v5852_v21  ;;  %v5862_v35 = vsel %vm5830_vm12, %v16287_v15, %v5860_v44  ;;  %v22641_v21 = vunpack.c.l.b16 %v16109_v31  ;;  %vm11983_vm6 = vsmask.f32 7440 }
  0xdf   : > { %22639 = vst [vmem:[#allocation40_spill] sm:$0xff] %v16321_v40  ;;  %v5864_v6 = vsel %vm5833_vm13, %v16298_v49, %v5862_v35  ;;  %v5870_v12 = vsel %vm5821_vm9, %v16208_v60, %v5869_v51  ;;  %v16333_v24 = vrot.slane %v22640_v54, 5  ;;  %v22645_v51 = vunpack.c.l.b16 %v16135_v52 }
  0xe0   : > { %v16337_v16 = vrot.slane %v22641_v21, 4  ;;  %v5866_v44 = vsel %vm5836_vm14, %v22062_v34, %v5864_v6  ;;  %v5872_v10 = vsel %vm5824_vm10, %v22063_v55, %v5870_v12  ;;  %v22643_v21 = vrot.slane %v16212_v63, 6 }
  0xe1   : > { %v16350_v54 = vsel %vm5839_vm15, %v22064_v3, %v5866_v44  ;;  %v5883_v6 = vrot.slane %v22644_v48, 1  ;;  %v16363_v35 = vrot.slane %v22645_v51, 5  ;;  %v22647_v44 = vunpack.c.l.b16 %v16138_v42 }
  0xe2   : > { %22642 = vst [vmem:[#allocation41_spill] sm:$0xff] %v16350_v54  ;;  %v5874_v59 = vsel %vm5827_vm11, %v22643_v21, %v5872_v10  ;;  %v22649_v55 = vrot.slane %v16216_v5, 3  ;;  %v22650_v51 = vrot.slane %v16223_v25, 7 }
  0xe3   : > { %v5876_v12 = vsel %vm5830_vm12, %v16333_v24, %v5874_v59  ;;  %22646 = vst [vmem:[#allocation42_spill] sm:$0xff] %v16363_v35  ;;  %v16367_v3 = vrot.slane %v22647_v44, 4  ;;  %v5884_v48 = vsel %vm5821_vm9, %v16221_v39, %v5883_v6  ;;  %v6051_v44 = vpack.c.b16 %v16321_v40, %v5840_v18 }
  0xe4   : > { %v5878_v10 = vsel %vm5833_vm13, %v16337_v16, %v5876_v12  ;;  %v5886_v42 = vsel %vm5824_vm10, %v22650_v51, %v5884_v48  ;;  %v15148_v12 = vld [vmem:[#allocation7 + $0x8] sm:$0xff]   ;;  %v22653_v59 = vrot.slane %v16225_v13, 6  ;;  %v22654_v51 = vunpack.c.l.b16 %v15965_v11 }
  0xe5   : > { %22648 = vst [vmem:[#allocation43_spill] sm:$0xff] %v16367_v3  ;;  %v5880_v34 = vsel %vm5836_vm14, %v22649_v55, %v5878_v10  ;;  %14660 = vmatprep.mubr.msk.bf16.mxu0 %vm6083_vm1, %v6051_v44  ;;  %v22656_v55 = vrot.slane %v16229_v38, 3  ;;  %v22663_v11 = vunpack.c.l.b16 %v16042_v45  ;;  %v22666_v13 = vunpack.c.l.b16 %v16109_v31  ;;  %v445_v31 = vld [vmem:[%s15744_s12 + $0x4c] sm:$0xf] }
  0xe6   : > { %v16386_v6 = vsel %vm5839_vm15, %v22651_v61, %v5880_v34  ;;  %v5888_v21 = vsel %vm5827_vm11, %v22653_v59, %v5886_v42  ;;  %v16400_v61 = vrot.slane %v22654_v51, 4  ;;  %v22655_v34 = vunpack.c.l.b16 %v15990_v41 }
  0xe7   : > { %22652 = vst [vmem:[#allocation44_spill] sm:$0xff] %v16386_v6  ;;  %v5890_v48 = vsel %vm5830_vm12, %v16363_v35, %v5888_v21  ;;  %v6052_v18 = vpack.c.b16 %v16386_v6, %v16350_v54  ;;  %v22657_v41 = vunpack.c.l.b16 %v16029_v20  ;;  %v22660_v59 = vunpack.c.l.b16 %v16032_v62  ;;  %v15149_v20 = vld [vmem:[#allocation7 + $0x10] sm:$0xff]  }
  0xe8   : > { %v16404_v52 = vrot.slane %v22655_v34, 3  ;;  %v5892_v42 = vsel %vm5833_vm13, %v16367_v3, %v5890_v48  ;;  %v22658_v48 = vrot.slane %v16231_v30, 2  ;;  %v6237_v51 = vrot.slane %v16199_v47, 5 }
  0xe9   : > { %v5894_v44 = vsel %vm5836_vm14, %v22656_v55, %v5892_v42  ;;  %v16418_v34 = vrot.slane %v22657_v41, 4  ;;  %14661 = vmatmul.mubr.msk.bf16.vlgmr.msra.gmra.mrb[0].mxu0 %vm6083_vm1, %v6052_v18  ;;  %v16428_v10 = vrot.slane %v22660_v59, 3  ;;  %v6233_v41 = vrot.slane %v16192_v17, 7 }
  0xea   : > { %v16424_v21 = vsel %vm5839_vm15, %v22658_v48, %v5894_v44  ;;  %14677 = vmatpush3.bf16.msra.mxu0 %v15804_v43  ;;  %v6235_v18 = vrot.slane %v16197_v53, 6  ;;  %v22661_v44 = vunpack.c.l.b16 %v16075_v56  ;;  %v22662_v62 = vunpack.c.l.b16 %v16078_v58 }
  0xeb   : > { %22659 = vst [vmem:[#allocation45_spill] sm:$0xff] %v16424_v21  ;;  %14678 = vmatprep.subr.bf16.mxu0 %v15148_v12  ;;  %v6243_v55 = vrot.slane %v16203_v28, 2  ;;  %v6245_v42 = vrot.slane %v16205_v46, 1  ;;  %v6247_v43 = vrot.slane %v16208_v60, 7  ;;  %v6234_v3 = vsel %vm5821_vm9, %v6233_v41, %v22663_v11 }
  0xec   : > { %v6239_v48 = vrot.slane %v22661_v44, 4  ;;  %v6241_v59 = vrot.slane %v22662_v62, 3  ;;  %v6249_v35 = vrot.slane %v16210_v32, 6  ;;  %v6251_v56 = vrot.slane %v16212_v63, 5 }
  0xed   : > { %v22664_v44 = vunpack.c.l.b16 %v16106_v50  ;;  %v6236_v58 = vsel %vm5824_vm10, %v6235_v18, %v6234_v3  ;;  %v22665_v62 = vunpack.c.l.b16 %v16088_v19  ;;  %v16460_v45 = vrot.slane %v22666_v13, 3  ;;  %v15150_v13 = vld [vmem:[#allocation7 + $0x18] sm:$0xff]  }
  0xee   : > { %14679 = vmatpush3.bf16.msra.mxu0 %v15148_v12  ;;  %v6238_v41 = vsel %vm5827_vm11, %v6237_v51, %v6236_v58  ;;  %v22667_v3 = vrot.slane %v15907_v9, %v15794_v27  ;;  %v22668_v19 = vrot.slane %v15928_v26, %v15794_v27  ;;  %v22669_v12 = vrot.slane %v16197_v53, 7 }
  0xef   : > { %v16450_v30 = vrot.slane %v22664_v44, 4  ;;  %v16456_v38 = vsel %vm5821_vm9, %v6247_v43, %v22665_v62  ;;  %14680 = vmatprep.subr.bf16.mxu0 %v15149_v20  ;;  %v6240_v44 = vsel %vm5830_vm12, %v6239_v48, %v6238_v41  ;;  %v22670_v58 = vrot.slane %v16210_v32, 7  ;;  %v452_v62 = vld [vmem:[%s15744_s12 + $0x68] sm:$0xf] }
  0xf0   : > { %v6625_v18 = vrot.slane %v22667_v3, %v15794_v27  ;;  %v6639_v43 = vrot.slane %v22668_v19, %v15794_v27  ;;  %v6847_v51 = vsel %vm5821_vm9, %v22669_v12, %v16192_v17  ;;  %v6242_v26 = vsel %vm5833_vm13, %v6241_v59, %v6240_v44 }
  0xf1   : > { %v6855_v9 = vsel %vm5821_vm9, %v22670_v58, %v16208_v60  ;;  %v22671_v41 = vrot.slane %v16199_v47, 6  ;;  %v6244_v17 = vsel %vm5836_vm14, %v6243_v55, %v6242_v26  ;;  %v22672_v60 = vrot.slane %v16212_v63, 6  ;;  %v448_v58 = vld [vmem:[%s15744_s12 + $0x58] sm:$0xf] }
  0xf2   : > { %v6632_v3 = vrot.slane %v6625_v18, %v15794_v27  ;;  %v6646_v48 = vrot.slane %v6639_v43, %v15794_v27  ;;  %v542_v18 = vld [vmem:[#allocation2 + $0x90] sm:$0x1]  ;;  %14681 = vmatpush3.bf16.msra.mxu0 %v15149_v20  ;;  %v16502_v47 = vsel %vm5839_vm15, %v6245_v42, %v6244_v17  ;;  %v22674_v26 = vrot.slane %v16203_v28, 3 }
  0xf3   : > { %v6848_v53 = vsel %vm5824_vm10, %v22671_v41, %v6847_v51  ;;  %v6856_v12 = vsel %vm5824_vm10, %v22672_v60, %v6855_v9  ;;  %v16499_v43 = vld [vmem:[#allocation7 + $0x40] sm:$0xff]   ;;  %22673 = vst [vmem:[#allocation46_spill] sm:$0xff] %v16502_v47  ;;  %v1410_v51 = vld [vmem:[#allocation2 + $0x78] sm:$0xf]  ;;  %v548_v9 = vld [vmem:[#allocation2 + $0xa8] sm:$0x1]  ;;  %14682 = vmatprep.subr.bf16.mxu0 %v15150_v13 }
  0xf4   : > { %v6849_v19 = vsel %vm5827_vm11, %v16287_v15, %v6848_v53  ;;  %v6817_v44 = vunpack.c.l.b16 %v6632_v3  ;;  %v16504_v55 = vunpack.c.l.b16 %v6646_v48  ;;  %v6857_v42 = vsel %vm5827_vm11, %v16333_v24, %v6856_v12  ;;  %v449_v53 = vld [vmem:[%s15744_s12 + $0x5c] sm:$0xf] }
  0xf5   : > { %v6850_v15 = vsel %vm5830_vm12, %v16298_v49, %v6849_v19  ;;  %v22675_v3 = vshrl.u32 %v15852_v29, 16  ;;  %v867_v41 = vshrl.u32 %v445_v31, 16  ;;  %v22676_v49 = vrot.slane %v16205_v46, 2  ;;  %v453_v46 = vld [vmem:[%s15744_s12 + $0x6c] sm:$0xf] }
  0xf6   : > { %v6851_v20 = vsel %vm5833_vm13, %v22674_v26, %v6850_v15  ;;  %v6853_v19 = vrot.slane %v6817_v44, 1  ;;  %v6858_v60 = vsel %vm5830_vm12, %v16337_v16, %v6857_v42  ;;  %v22677_v15 = vrot.slane %v16216_v5, 3  ;;  %14683 = vmatpush3.bf16.msra.mxu0 %v15150_v13 }
  0xf7   : > { %v861_v48 = vrot.slane %v22675_v3, 7  ;;  %v6852_v17 = vsel %vm5836_vm14, %v22676_v49, %v6851_v20  ;;  %v22678_v24 = vshll.u32 %v15852_v29, 16  ;;  %v16528_v59 = vrot.slane %v867_v41, 7  ;;  %14700 = vmatprep.subr.bf16.mxu0 %v16499_v43 }
  0xf8   : > { %v6859_v26 = vsel %vm5833_vm13, %v22677_v15, %v6858_v60  ;;  %v22680_v44 = vrot.slane %v16218_v7, 2  ;;  %v870_v16 = vshll.u32 %v445_v31, 16  ;;  %v543_v42 = vsel %vm15767_vm3, 0, %v542_v18 }
  0xf9   : > { %v864_v12 = vor.u32 %v22678_v24, %v861_v48  ;;  %v865_v3 = vrot.slane %v861_v48, 4  ;;  %22679 = vst [vmem:[#allocation47_spill] sm:$0xff] %v16528_v59  ;;  %544 = vst [vmem:[#allocation2 + $0x90] sm:$0x1] %v543_v42  ;;  %v549_v48 = vsel %vm15767_vm3, 0, %v548_v9  ;;  %v893_v41 = vshrl.u32 %v448_v58, 16 }
  0xfa   : > { %v16535_v20 = vsel %vm5836_vm14, %v22680_v44, %v6859_v26  ;;  %v16545_v13 = vsel %vm5839_vm15, %v6853_v19, %v6852_v17  ;;  %v872_v49 = vor.u32 %v870_v16, %v16528_v59  ;;  %550 = vst [vmem:[#allocation2 + $0xa8] sm:$0x1] %v549_v48  ;;  %v896_v31 = vshll.u32 %v448_v58, 16 }
  0xfb   : > { %v1411_v29 = vsel %vm15828_vm8, %v864_v12, %v1410_v51  ;;  %22681 = vst [vmem:[#allocation48_spill] sm:$0xff] %v16545_v13  ;;  %v901_v60 = vshrl.u32 %v449_v53, 16  ;;  %v895_v18 = vrot.slane %v893_v41, 7  ;;  %v904_v15 = vshll.u32 %v449_v53, 16 }
  0xfc   : > { %1412 = vst [vmem:[#allocation2 + $0x78] sm:$0xf] %v1411_v29  ;;  %v927_v26 = vshrl.u32 %v452_v62, 16  ;;  %v930_v24 = vshll.u32 %v452_v62, 16  ;;  %v873_v51 = vsel %vm15813_vm7, %v865_v3, %v872_v49  ;;  %v935_v9 = vshrl.u32 %v453_v46, 16  ;;  %v22684_v29 = vld [vmem:[#allocation26_spill] sm:$0xff] }
  0xfd   : > { %v16550_v12 = vrot.slane %v901_v60, 7  ;;  %v938_v42 = vshll.u32 %v453_v46, 16  ;;  %1413 = vst.msk [vmem:[#allocation2 + $0x7c] sm:$0xf] %vm490_vm0, %v873_v51  ;;  %v898_v17 = vor.u32 %v896_v31, %v895_v18  ;;  %v899_v19 = vrot.slane %v895_v18, 4  ;;  %v22689_v46 = vld [vmem:[#allocation27_spill] sm:$0xff] }
  0xfe   : > { %v929_v16 = vrot.slane %v927_v26, 7  ;;  %v22685_v48 = vunpack.c.l.b16 %v22684_v29  ;;  %v22686_v58 = vrot.slane %v16132_v33, 7  ;;  %v16559_v41 = vrot.slane %v935_v9, 7 }
  0xff   : > { %22683 = vst [vmem:[#allocation49_spill] sm:$0xff] %v16550_v12  ;;  %v906_v62 = vor.u32 %v904_v15, %v16550_v12  ;;  %v22688_v3 = vrot.slane %v16144_v57, 6  ;;  %v22690_v60 = vunpack.c.l.b16 %v22689_v46  ;;  %v22691_v31 = vrot.slane %v16166_v1, 7 }
 0x100   : > { %v6206_v53 = vsel %vm5821_vm9, %v22686_v58, %v22685_v48  ;;  %22687 = vst [vmem:[#allocation26_spill] sm:$0xff] %v16559_v41  ;;  %v932_v26 = vor.u32 %v930_v24, %v929_v16  ;;  %v933_v51 = vrot.slane %v929_v16, 4  ;;  %v22692_v29 = vrot.slane %v16150_v14, 5 }
 0x101   : > { %v6208_v49 = vsel %vm5824_vm10, %v22688_v3, %v6206_v53  ;;  %v6220_v18 = vsel %vm5821_vm9, %v22691_v31, %v22690_v60  ;;  %v22693_v15 = vrot.slane %v16171_v36, 6  ;;  %v907_v58 = vsel %vm15813_vm7, %v899_v19, %v906_v62  ;;  %v1424_v3 = vld [vmem:[#allocation2 + $0x90] sm:$0xf]  ;;  %v1438_v31 = vld [vmem:[#allocation2 + $0xa8] sm:$0xf] }
 0x102   : > { %v6210_v48 = vsel %vm5827_vm11, %v22692_v29, %v6208_v49  ;;  %v940_v53 = vor.u32 %v938_v42, %v16559_v41  ;;  %v22694_v24 = vrot.slane %v16176_v37, 5  ;;  %v1425_v49 = vsel %vm15828_vm8, %v898_v17, %v1424_v3  ;;  %1427 = vst.msk [vmem:[#allocation2 + $0x94] sm:$0xf] %vm490_vm0, %v907_v58 }
 0x103   : > { %v6222_v9 = vsel %vm5824_vm10, %v22693_v15, %v6220_v18  ;;  %v6212_v46 = vsel %vm5830_vm12, %v16400_v61, %v6210_v48  ;;  %v13859_v60 = vld.sshfl [vmem:[#allocation2 + $0x78] sm:$0x33 pattern:$0x75316420]  ;;  %v6250_v61 = vsel %vm5824_vm10, %v6249_v35, %v16456_v38  ;;  %1426 = vst [vmem:[#allocation2 + $0x90] sm:$0xf] %v1425_v49  ;;  %v1439_v29 = vsel %vm15828_vm8, %v932_v26, %v1438_v31 }
 0x104   : > { %v6224_v16 = vsel %vm5827_vm11, %v22694_v24, %v6222_v9  ;;  %v6214_v19 = vsel %vm5833_vm13, %v16404_v52, %v6212_v46  ;;  %v2044_v62 = vcombine.high %v13859_v60, %v13859_v60  ;;  %v2051_v18 = vrot.slane %v13859_v60, %v15794_v27  ;;  %1440 = vst [vmem:[#allocation2 + $0xa8] sm:$0xf] %v1439_v29 }
 0x105   : > { %v6226_v42 = vsel %vm5830_vm12, %v16418_v34, %v6224_v16  ;;  %v941_v17 = vsel %vm15813_vm7, %v933_v51, %v940_v53  ;;  %v22695_v52 = vrot.slane %v16157_v23, 2  ;;  %v6252_v38 = vsel %vm5827_vm11, %v6251_v56, %v6250_v61  ;;  %v13860_v51 = vld.sshfl [vmem:[#allocation2 + $0x7c] sm:$0x33 pattern:$0x75316420] }
 0x106   : > { %1441 = vst.msk [vmem:[#allocation2 + $0xac] sm:$0xf] %vm490_vm0, %v941_v17  ;;  %v6228_v32 = vsel %vm5833_vm13, %v16428_v10, %v6226_v42  ;;  %v2058_v48 = vrot.slane %v2044_v62, %v15794_v27  ;;  %v2059_v26 = vcombine.high %v2051_v18, %v2051_v18  ;;  %v4466_v15 = vrot.slane %v2051_v18, %v15794_v27 }
 0x107   : > { %v6216_v34 = vsel %vm5836_vm14, %v22695_v52, %v6214_v19  ;;  %v22696_v9 = vrot.slane %v16162_v0, 1  ;;  %v2068_v53 = vcombine.high %v13860_v51, %v13860_v51  ;;  %v2075_v10 = vrot.slane %v13860_v51, %v15794_v27 }
 0x108   : > { %v22697_v63 = vrot.slane %v16183_v4, 2  ;;  %v16622_v3 = vsel %vm5830_vm12, %v16450_v30, %v6252_v38  ;;  %v2060_v46 = vcombine.high %v2058_v48, %v2058_v48  ;;  %v16625_v24 = vrot.slane %v4466_v15, %v15794_v27 }
 0x109   : > { %v16614_v58 = vsel %vm5839_vm15, %v22696_v9, %v6216_v34  ;;  %v4480_v16 = vrot.slane %v2058_v48, %v15794_v27  ;;  %v4494_v60 = vrot.slane %v2059_v26, %v15794_v27  ;;  %v2082_v49 = vrot.slane %v2068_v53, %v15794_v27 }
 0x10a   : > { %v6230_v56 = vsel %vm5836_vm14, %v22697_v63, %v6228_v32  ;;  %v2083_v31 = vcombine.high %v2075_v10, %v2075_v10  ;;  %v4522_v19 = vrot.slane %v2075_v10, %v15794_v27  ;;  %v22698_v42 = vrot.slane %v16188_v22, 1  ;;  %v13862_v38 = vld.sshfl [vmem:[#allocation2 + $0x90] sm:$0x33 pattern:$0x75316420] }
 0x10b   : > { %v4487_v30 = vrot.slane %v4480_v16, %v15794_v27  ;;  %v4501_v62 = vrot.slane %v4494_v60, %v15794_v27  ;;  %v4508_v18 = vrot.slane %v2060_v46, %v15794_v27  ;;  %v22076_v17 = vunpack.c.l.b16 %v16625_v24 }
 0x10c   : > { %v16634_v61 = vsel %vm5839_vm15, %v22698_v42, %v6230_v56  ;;  %v2084_v29 = vcombine.high %v2082_v49, %v2082_v49  ;;  %v16641_v52 = vrot.slane %v4522_v19, %v15794_v27  ;;  %v4536_v34 = vrot.slane %v2082_v49, %v15794_v27  ;;  %v13863_v56 = vld.sshfl [vmem:[#allocation2 + $0x94] sm:$0x33 pattern:$0x75316420] }
 0x10d   : > { %22699 = vst [vmem:[#allocation27_spill] sm:$0xff] %v16634_v61  ;;  %v4550_v32 = vrot.slane %v2083_v31, %v15794_v27  ;;  %v4515_v51 = vrot.slane %v4508_v18, %v15794_v27  ;;  %v16646_v48 = vunpack.c.l.b16 %v4487_v30  ;;  %v16648_v26 = vunpack.c.l.b16 %v4501_v62  ;;  %v13865_v49 = vld.sshfl [vmem:[#allocation2 + $0xa8] sm:$0x33 pattern:$0x75316420] }
 0x10e   : > { %v5897_v15 = vrot.slane %v22076_v17, 1  ;;  %v16653_v9 = vrot.slane %v4536_v34, %v15794_v27  ;;  %v4564_v10 = vrot.slane %v2084_v29, %v15794_v27  ;;  %v22078_v63 = vunpack.c.l.b16 %v16641_v52  ;;  %v13866_v18 = vld.sshfl [vmem:[#allocation2 + $0xac] sm:$0x33 pattern:$0x75316420] }
 0x10f   : > { %v4557_v53 = vrot.slane %v4550_v32, %v15794_v27  ;;  %v16658_v46 = vunpack.c.l.b16 %v4515_v51  ;;  %v22077_v60 = vrot.slane %v16648_v26, 7  ;;  %v2106_v31 = vcombine.high %v13862_v38, %v13862_v38 }
 0x110   : > { %v5898_v16 = vsel %vm5821_vm9, %v16646_v48, %v5897_v15  ;;  %v4571_v19 = vrot.slane %v4564_v10, %v15794_v27  ;;  %v22079_v42 = vunpack.c.l.b16 %v16653_v9  ;;  %v16669_v62 = vrot.slane %v22078_v63, 5 }
 0x111   : > { %v16665_v30 = vunpack.c.l.b16 %v4557_v53  ;;  %v5900_v29 = vsel %vm5824_vm10, %v22077_v60, %v5898_v16  ;;  %v22080_v34 = vrot.slane %v16658_v46, 6  ;;  %v2113_v32 = vrot.slane %v13862_v38, %v15794_v27 }
 0x112   : > { %22700 = vst [vmem:[#allocation50_spill] sm:$0xff] %v16669_v62  ;;  %v2120_v51 = vrot.slane %v2106_v31, %v15794_v27  ;;  %v16677_v15 = vunpack.c.l.b16 %v4571_v19  ;;  %v16681_v53 = vrot.slane %v22079_v42, 4  ;;  %v2130_v28 = vcombine.high %v13863_v56, %v13863_v56 }
 0x113   : > { %v5902_v17 = vsel %vm5827_vm11, %v22080_v34, %v5900_v29  ;;  %v2121_v16 = vcombine.high %v2113_v32, %v2113_v32  ;;  %v2137_v63 = vrot.slane %v13863_v56, %v15794_v27  ;;  %v2168_v42 = vcombine.high %v13865_v49, %v13865_v49 }
 0x114   : > { %22701 = vst [vmem:[#allocation51_spill] sm:$0xff] %v16681_v53  ;;  %v2122_v60 = vcombine.high %v2120_v51, %v2120_v51  ;;  %v5904_v38 = vsel %vm5830_vm12, %v16669_v62, %v5902_v17  ;;  %v22086_v31 = vrot.slane %v16677_v15, 2  ;;  %v2144_v19 = vrot.slane %v2130_v28, %v15794_v27 }
 0x115   : > { %v5906_v50 = vsel %vm5833_vm13, %v16681_v53, %v5904_v38  ;;  %v2145_v11 = vcombine.high %v2137_v63, %v2137_v63  ;;  %v2175_v35 = vrot.slane %v13865_v49, %v15794_v27  ;;  %v2192_v10 = vcombine.high %v13866_v18, %v13866_v18 }
 0x116   : > { %v22702_v29 = vrot.slane %v16665_v30, 3  ;;  %v2146_v56 = vcombine.high %v2144_v19, %v2144_v19  ;;  %v2182_v6 = vrot.slane %v2168_v42, %v15794_v27  ;;  %v2199_v17 = vrot.slane %v13866_v18, %v15794_v27 }
 0x117   : > { %v2183_v40 = vcombine.high %v2175_v35, %v2175_v35  ;;  %v2206_v38 = vrot.slane %v2192_v10, %v15794_v27  ;;  %v4578_v49 = vrot.slane %v2113_v32, %v15794_v27  ;;  %v4606_v12 = vrot.slane %v2121_v16, %v15794_v27 }
 0x118   : > { %v5908_v34 = vsel %vm5836_vm14, %v22702_v29, %v5906_v50  ;;  %v2184_v41 = vcombine.high %v2182_v6, %v2182_v6  ;;  %v2207_v50 = vcombine.high %v2199_v17, %v2199_v17  ;;  %v4592_v29 = vrot.slane %v2120_v51, %v15794_v27 }
 0x119   : > { %v16703_v28 = vsel %vm5839_vm15, %v22086_v31, %v5908_v34  ;;  %v2208_v42 = vcombine.high %v2206_v38, %v2206_v38  ;;  %v16711_v18 = vrot.slane %v4578_v49, %v15794_v27  ;;  %v4620_v34 = vrot.slane %v2122_v60, %v15794_v27 }
 0x11a   : > { %22703 = vst [vmem:[#allocation52_spill] sm:$0xff] %v16703_v28  ;;  %v6053_v54 = vpack.c.b16 %v16703_v28, %v16424_v21  ;;  %v4599_v10 = vrot.slane %v4592_v29, %v15794_v27  ;;  %v4634_v32 = vrot.slane %v2137_v63, %v15794_v27  ;;  %v4648_v31 = vrot.slane %v2144_v19, %v15794_v27 }
 0x11b   : > { %v4662_v21 = vrot.slane %v2145_v11, %v15794_v27  ;;  %v4613_v51 = vrot.slane %v4606_v12, %v15794_v27  ;;  %v4627_v28 = vrot.slane %v4620_v34, %v15794_v27  ;;  %v4676_v49 = vrot.slane %v2146_v56, %v15794_v27 }
 0x11c   : > { %14664 = vmatprep.mubr.msk.bf16.mxu0 %vm6083_vm1, %v6053_v54  ;;  %v4690_v16 = vrot.slane %v2175_v35, %v15794_v27  ;;  %v16725_v60 = vrot.slane %v4634_v32, %v15794_v27  ;;  %v16728_v54 = vrot.slane %v4648_v31, %v15794_v27  ;;  %v4704_v19 = vrot.slane %v2182_v6, %v15794_v27 }
 0x11d   : > { %v4669_v63 = vrot.slane %v4662_v21, %v15794_v27  ;;  %v4683_v11 = vrot.slane %v4676_v49, %v15794_v27  ;;  %v4718_v29 = vrot.slane %v2183_v40, %v15794_v27  ;;  %v4732_v56 = vrot.slane %v2184_v41, %v15794_v27 }
 0x11e   : > { %v16734_v12 = vrot.slane %v4690_v16, %v15794_v27  ;;  %v4711_v35 = vrot.slane %v4704_v19, %v15794_v27  ;;  %v4746_v34 = vrot.slane %v2199_v17, %v15794_v27  ;;  %v4760_v31 = vrot.slane %v2206_v38, %v15794_v27 }
 0x11f   : > { %v4774_v32 = vrot.slane %v2207_v50, %v15794_v27  ;;  %v4725_v21 = vrot.slane %v4718_v29, %v15794_v27  ;;  %v4739_v6 = vrot.slane %v4732_v56, %v15794_v27  ;;  %v4788_v49 = vrot.slane %v2208_v42, %v15794_v27 }
 0x120   : > { %v16747_v40 = vrot.slane %v4746_v34, %v15794_v27  ;;  %v16750_v41 = vrot.slane %v4760_v31, %v15794_v27  ;;  %v16753_v19 = vunpack.c.l.b16 %v4599_v10  ;;  %v16756_v50 = vunpack.c.l.b16 %v4613_v51 }
 0x121   : > { %v4781_v17 = vrot.slane %v4774_v32, %v15794_v27  ;;  %v4795_v38 = vrot.slane %v4788_v49, %v15794_v27  ;;  %v16758_v29 = vunpack.c.l.b16 %v4627_v28  ;;  %v16762_v16 = vunpack.c.l.b16 %v4669_v63 }
 0x122   : > { %v16764_v34 = vunpack.c.l.b16 %v4683_v11  ;;  %v16767_v53 = vunpack.c.l.b16 %v4711_v35  ;;  %v16769_v10 = vunpack.c.l.b16 %v4725_v21  ;;  %v16771_v32 = vunpack.c.l.b16 %v4739_v6 }
 0x123   : > { %v16775_v49 = vunpack.c.l.b16 %v4781_v17  ;;  %v16777_v42 = vunpack.c.l.b16 %v4795_v38  ;;  %v22707_v63 = vunpack.c.l.b16 %v16711_v18  ;;  %v22708_v21 = vunpack.c.l.b16 %v16725_v60 }
 0x124   : > { %22704 = vst [vmem:[#allocation53_spill] sm:$0xff] %v16764_v34  ;;  %v22710_v6 = vunpack.c.l.b16 %v16728_v54  ;;  %v22713_v35 = vrot.slane %v16756_v50, 7  ;;  %v22723_v62 = vrot.slane %v16762_v16, 3 }
 0x125   : > { %22705 = vst [vmem:[#allocation54_spill] sm:$0xff] %v16775_v49  ;;  %22706 = vst [vmem:[#allocation55_spill] sm:$0xff] %v16777_v42  ;;  %v5911_v11 = vrot.slane %v22707_v63, 1  ;;  %v16785_v31 = vrot.slane %v22708_v21, 5  ;;  %v22712_v63 = vunpack.c.l.b16 %v16734_v12  ;;  %v22096_v21 = vrot.slane %v16769_v10, 7 }
 0x126   : > { %v16789_v51 = vrot.slane %v22710_v6, 4  ;;  %v22714_v6 = vunpack.c.l.b16 %v16747_v40 }
 0x127   : > { %22709 = vst [vmem:[#allocation56_spill] sm:$0xff] %v16785_v31  ;;  %v5912_v17 = vsel %vm5821_vm9, %v16753_v19, %v5911_v11  ;;  %v5925_v56 = vrot.slane %v22712_v63, 1  ;;  %v22716_v11 = vrot.slane %v16758_v29, 6  ;;  %v22717_v63 = vunpack.c.l.b16 %v16750_v41 }
 0x128   : > { %22711 = vst [vmem:[#allocation57_spill] sm:$0xff] %v16789_v51  ;;  %v5914_v22 = vsel %vm5824_vm10, %v22713_v35, %v5912_v17  ;;  %v16804_v59 = vrot.slane %v22714_v6, 5  ;;  %v22720_v35 = vld [vmem:[#allocation28_spill] sm:$0xff] }
 0x129   : > { %v5916_v38 = vsel %vm5827_vm11, %v22716_v11, %v5914_v22  ;;  %v5926_v28 = vsel %vm5821_vm9, %v16767_v53, %v5925_v56  ;;  %v16813_v4 = vrot.slane %v22717_v63, 4  ;;  %v6429_v22 = vpack.c.b16 %v16634_v61, %v16614_v58 }
 0x12a   : > { %22715 = vst [vmem:[#allocation58_spill] sm:$0xff] %v16804_v59  ;;  %v5918_v17 = vsel %vm5830_vm12, %v16785_v31, %v5916_v38  ;;  %v5928_v6 = vsel %vm5824_vm10, %v22096_v21, %v5926_v28  ;;  %v22719_v11 = vrot.slane %v16771_v32, 6  ;;  %v6256_v38 = vsel %vm5833_vm13, %v16460_v45, %v16622_v3 }
 0x12b   : > { %22718 = vst [vmem:[#allocation59_spill] sm:$0xff] %v16813_v4  ;;  %v5920_v56 = vsel %vm5833_vm13, %v16789_v51, %v5918_v17  ;;  %v22721_v31 = vunpack.c.l.b16 %v22720_v35  ;;  %v22722_v28 = vrot.slane %v16221_v39, 7  ;;  %v22724_v61 = vrot.slane %v16216_v5, 2 }
 0x12c   : > { %v5930_v63 = vsel %vm5827_vm11, %v22719_v11, %v5928_v6  ;;  %v5922_v58 = vsel %vm5836_vm14, %v22723_v62, %v5920_v56  ;;  %v6263_v11 = vrot.slane %v16223_v25, 6  ;;  %v22725_v45 = vrot.slane %v16764_v34, 2  ;;  %v22729_v56 = vld [vmem:[#allocation33_spill] sm:$0xff] }
 0x12d   : > { %v6262_v21 = vsel %vm5821_vm9, %v22722_v28, %v22721_v31  ;;  %v5932_v17 = vsel %vm5830_vm12, %v16804_v59, %v5930_v63  ;;  %v6258_v6 = vsel %vm5836_vm14, %v22724_v61, %v6256_v38  ;;  %v22727_v35 = vrot.slane %v16218_v7, 1 }
 0x12e   : > { %v16849_v3 = vsel %vm5839_vm15, %v22725_v45, %v5922_v58  ;;  %v5934_v31 = vsel %vm5833_vm13, %v16813_v4, %v5932_v17  ;;  %v6265_v63 = vrot.slane %v22729_v56, 5  ;;  %v22730_v5 = vrot.slane %v16775_v49, 3  ;;  %v22731_v58 = vld [vmem:[#allocation29_spill] sm:$0xff]  ;;  %v22737_v56 = vld [vmem:[#allocation34_spill] sm:$0xff] }
 0x12f   : > { %22726 = vst [vmem:[#allocation28_spill] sm:$0xff] %v16849_v3  ;;  %v16856_v62 = vsel %vm5839_vm15, %v22727_v35, %v6258_v6  ;;  %v6264_v28 = vsel %vm5824_vm10, %v6263_v11, %v6262_v21  ;;  %v22732_v45 = vunpack.c.l.b16 %v22731_v58  ;;  %v22733_v17 = vrot.slane %v16777_v42, 2  ;;  %v22735_v35 = vld [vmem:[#allocation30_spill] sm:$0xff]  ;;  %v22738_v11 = vld [vmem:[#allocation35_spill] sm:$0xff] }
 0x130   : > { %22728 = vst [vmem:[#allocation60_spill] sm:$0xff] %v16856_v62  ;;  %v5936_v61 = vsel %vm5836_vm14, %v22730_v5, %v5934_v31  ;;  %v6430_v38 = vpack.c.b16 %v16856_v62, %v16502_v47  ;;  %v6266_v6 = vsel %vm5827_vm11, %v6265_v63, %v6264_v28  ;;  %v22736_v4 = vunpack.c.l.b16 %v22735_v35 }
 0x131   : > { %v6267_v59 = vrot.slane %v22732_v45, 4  ;;  %v16870_v7 = vsel %vm5839_vm15, %v22733_v17, %v5936_v61  ;;  %v6271_v31 = vrot.slane %v22737_v56, 2  ;;  %v6273_v58 = vrot.slane %v22738_v11, 1 }
 0x132   : > { %22734 = vst [vmem:[#allocation29_spill] sm:$0xff] %v16870_v7  ;;  %v6269_v51 = vrot.slane %v22736_v4, 3  ;;  %v6054_v5 = vpack.c.b16 %v16870_v7, %v16849_v3  ;;  %v6275_v45 = vrot.slane %v16646_v48, 7  ;;  %v6277_v61 = vrot.slane %v16648_v26, 6 }
 0x133   : > { %v6268_v21 = vsel %vm5830_vm12, %v6267_v59, %v6266_v6  ;;  %v6279_v63 = vrot.slane %v16658_v46, 5  ;;  %v22739_v28 = vunpack.c.l.b16 %v16641_v52  ;;  %v22740_v35 = vunpack.c.l.b16 %v16625_v24  ;;  %v13871_v3 = vld.sshfl [vmem:[#allocation2 + $0xd8] sm:$0x33 pattern:$0x75316420] }
 0x134   : > { %v6270_v47 = vsel %vm5833_vm13, %v6269_v51, %v6268_v21  ;;  %14665 = vmatmul.mubr.msk.bf16.gmra.mrb[4].mxu0 %vm6083_vm1, %v6054_v5  ;;  %v22741_v6 = vunpack.c.l.b16 %v16653_v9  ;;  %v6285_v51 = vrot.slane %v16665_v30, 2  ;;  %v6287_v5 = vrot.slane %v16677_v15, 1 }
 0x135   : > { %v6281_v4 = vrot.slane %v22739_v28, 4  ;;  %v6272_v17 = vsel %vm5836_vm14, %v6271_v31, %v6270_v47  ;;  %v6276_v59 = vsel %vm5821_vm9, %v6275_v45, %v22740_v35  ;;  %14684 = vmatprep.mubr.msk.bf16.mxu0 %vm6083_vm1, %v6429_v22  ;;  %v6289_v47 = vrot.slane %v16753_v19, 7 }
 0x136   : > { %v6283_v7 = vrot.slane %v22741_v6, 3  ;;  %v16896_v21 = vsel %vm5839_vm15, %v6273_v58, %v6272_v17  ;;  %v6278_v52 = vsel %vm5824_vm10, %v6277_v61, %v6276_v59  ;;  %v6291_v31 = vrot.slane %v16756_v50, 6 }
 0x137   : > { %22742 = vst [vmem:[#allocation30_spill] sm:$0xff] %v16896_v21  ;;  %v6280_v24 = vsel %vm5827_vm11, %v6279_v63, %v6278_v52  ;;  %v6293_v45 = vrot.slane %v16758_v29, 5  ;;  %v22743_v58 = vunpack.c.l.b16 %v16711_v18  ;;  %v22744_v28 = vunpack.c.l.b16 %v16725_v60 }
 0x138   : > { %v6282_v22 = vsel %vm5830_vm12, %v6281_v4, %v6280_v24  ;;  %v22745_v35 = vunpack.c.l.b16 %v16728_v54  ;;  %v6299_v52 = vrot.slane %v16762_v16, 2  ;;  %v6301_v9 = vrot.slane %v16764_v34, 1  ;;  %v460_v24 = vld [vmem:[%s15744_s12 + $0x88] sm:$0xf] }
 0x139   : > { %v6290_v61 = vsel %vm5821_vm9, %v6289_v47, %v22743_v58  ;;  %v6295_v17 = vrot.slane %v22744_v28, 4  ;;  %v6284_v59 = vsel %vm5833_vm13, %v6283_v7, %v6282_v22  ;;  %v6303_v47 = vrot.slane %v16767_v53, 7  ;;  %v15152_v7 = vld [vmem:[#allocation7 + $0x48] sm:$0xff]   ;;  %v560_v28 = vld [vmem:[#allocation2 + $0xf0] sm:$0x1] }
 0x13a   : > { %v6297_v63 = vrot.slane %v22745_v35, 3  ;;  %v6292_v6 = vsel %vm5824_vm10, %v6291_v31, %v6290_v61  ;;  %v6286_v4 = vsel %vm5836_vm14, %v6285_v51, %v6284_v59  ;;  %v6305_v60 = vrot.slane %v16769_v10, 6 }
 0x13b   : > { %v6294_v18 = vsel %vm5827_vm11, %v6293_v45, %v6292_v6  ;;  %v16924_v54 = vsel %vm5839_vm15, %v6287_v5, %v6286_v4  ;;  %v6307_v22 = vrot.slane %v16771_v32, 5  ;;  %v22747_v58 = vunpack.c.l.b16 %v16747_v40  ;;  %v461_v4 = vld [vmem:[%s15744_s12 + $0x8c] sm:$0xf] }
 0x13c   : > { %22746 = vst [vmem:[#allocation34_spill] sm:$0xff] %v16924_v54  ;;  %v6296_v31 = vsel %vm5830_vm12, %v6295_v17, %v6294_v18  ;;  %v6431_v51 = vpack.c.b16 %v16924_v54, %v16896_v21  ;;  %v22748_v35 = vunpack.c.l.b16 %v16734_v12  ;;  %v22749_v5 = vunpack.c.l.b16 %v16750_v41  ;;  %14685 = vmatmul.mubr.msk.bf16.vlgmr.msra.gmra.mrb[0].mxu0 %vm6083_vm1, %v6430_v38 }
 0x13d   : > { %v6309_v61 = vrot.slane %v22747_v58, 4  ;;  %v6298_v45 = vsel %vm5833_vm13, %v6297_v63, %v6296_v31  ;;  %v6313_v18 = vrot.slane %v16775_v49, 2  ;;  %v6315_v58 = vrot.slane %v16777_v42, 1  ;;  %14701 = vmatpush3.bf16.msra.mxu0 %v16499_v43  ;;  %v15153_v43 = vld [vmem:[#allocation7 + $0x50] sm:$0xff]  }
 0x13e   : > { %v6304_v59 = vsel %vm5821_vm9, %v6303_v47, %v22748_v35  ;;  %v6311_v6 = vrot.slane %v22749_v5, 3  ;;  %v6300_v17 = vsel %vm5836_vm14, %v6299_v52, %v6298_v45  ;;  %14688 = vmatprep.mubr.msk.bf16.mxu0 %vm6083_vm1, %v6431_v51  ;;  %v561_v38 = vsel %vm15767_vm3, 0, %v560_v28  ;;  %v13872_v52 = vld.sshfl [vmem:[#allocation2 + $0xdc] sm:$0x33 pattern:$0x75316420]  ;;  %14702 = vmatprep.subr.bf16.mxu0 %v15152_v7 }
 0x13f   : > { %v6306_v40 = vsel %vm5824_vm10, %v6305_v60, %v6304_v59  ;;  %v16947_v12 = vsel %vm5839_vm15, %v6301_v9, %v6300_v17  ;;  %v995_v63 = vshrl.u32 %v460_v24, 16  ;;  %562 = vst [vmem:[#allocation2 + $0xf0] sm:$0x1] %v561_v38  ;;  %v998_v60 = vshll.u32 %v460_v24, 16  ;;  %v15154_v38 = vld [vmem:[#allocation7 + $0x58] sm:$0xff]  }
 0x140   : > { %22750 = vst [vmem:[#allocation35_spill] sm:$0xff] %v16947_v12  ;;  %v6308_v41 = vsel %vm5827_vm11, %v6307_v22, %v6306_v40  ;;  %v1003_v31 = vshrl.u32 %v461_v4, 16  ;;  %v1006_v45 = vshll.u32 %v461_v4, 16  ;;  %v2292_v9 = vcombine.high %v13871_v3, %v13871_v3 }
 0x141   : > { %v6310_v47 = vsel %vm5830_vm12, %v6309_v61, %v6308_v41  ;;  %v997_v35 = vrot.slane %v995_v63, 7  ;;  %v2299_v59 = vrot.slane %v13871_v3, %v15794_v27  ;;  %v2316_v28 = vcombine.high %v13872_v52, %v13872_v52  ;;  %14703 = vmatpush3.bf16.msra.mxu0 %v15152_v7 }
 0x142   : > { %v6312_v51 = vsel %vm5833_vm13, %v6311_v6, %v6310_v47  ;;  %v16956_v5 = vrot.slane %v1003_v31, 7  ;;  %v2323_v17 = vrot.slane %v13872_v52, %v15794_v27  ;;  %v2306_v40 = vrot.slane %v2292_v9, %v15794_v27  ;;  %14704 = vmatprep.subr.bf16.mxu0 %v15153_v43 }
 0x143   : > { %v6314_v22 = vsel %vm5836_vm14, %v6313_v18, %v6312_v51  ;;  %v1000_v24 = vor.u32 %v998_v60, %v997_v35  ;;  %v1001_v4 = vrot.slane %v997_v35, 4  ;;  %v2307_v41 = vcombine.high %v2299_v59, %v2299_v59 }
 0x144   : > { %22751 = vst [vmem:[#allocation61_spill] sm:$0xff] %v16956_v5  ;;  %v16960_v61 = vsel %vm5839_vm15, %v6315_v58, %v6314_v22  ;;  %v1008_v3 = vor.u32 %v1006_v45, %v16956_v5  ;;  %v2330_v18 = vrot.slane %v2316_v28, %v15794_v27  ;;  %v2308_v63 = vcombine.high %v2306_v40, %v2306_v40 }
 0x145   : > { %22752 = vst [vmem:[#allocation62_spill] sm:$0xff] %v16960_v61  ;;  %v6432_v6 = vpack.c.b16 %v16960_v61, %v16947_v12  ;;  %v2331_v52 = vcombine.high %v2323_v17, %v2323_v17  ;;  %v4802_v58 = vrot.slane %v2299_v59, %v15794_v27  ;;  %v4816_v7 = vrot.slane %v2306_v40, %v15794_v27 }
 0x146   : > { %v1009_v47 = vsel %vm15813_vm7, %v1001_v4, %v1008_v3  ;;  %v2332_v60 = vcombine.high %v2330_v18, %v2330_v18  ;;  %v4830_v31 = vrot.slane %v2307_v41, %v15794_v27  ;;  %v4858_v45 = vrot.slane %v2323_v17, %v15794_v27  ;;  %v1466_v51 = vld [vmem:[#allocation2 + $0xf0] sm:$0xf]  ;;  %14705 = vmatpush3.bf16.msra.mxu0 %v15153_v43 }
 0x147   : > { %14689 = vmatmul.mubr.msk.bf16.gmra.mrb[4].mxu0 %vm6083_vm1, %v6432_v6  ;;  %1469 = vst.msk [vmem:[#allocation2 + $0xf4] sm:$0xf] %vm490_vm0, %v1009_v47  ;;  %v16976_v35 = vrot.slane %v4802_v58, %v15794_v27  ;;  %v4823_v9 = vrot.slane %v4816_v7, %v15794_v27  ;;  %v4844_v59 = vrot.slane %v2308_v63, %v15794_v27  ;;  %v566_v6 = vld [vmem:[#allocation2 + $0x108] sm:$0x1] }
 0x148   : > { %v4872_v22 = vrot.slane %v2330_v18, %v15794_v27  ;;  %v1467_v28 = vsel %vm15828_vm8, %v1000_v24, %v1466_v51  ;;  %v4837_v4 = vrot.slane %v4830_v31, %v15794_v27  ;;  %v16985_v17 = vrot.slane %v4858_v45, %v15794_v27  ;;  %14706 = vmatprep.subr.bf16.mxu0 %v15154_v38  ;;  %v15155_v18 = vld [vmem:[#allocation7 + $0x60] sm:$0xff]   ;;  %v464_v47 = vld [vmem:[%s15744_s12 + $0x98] sm:$0xf]  ;;  %v572_v31 = vld [vmem:[#allocation2 + $0x120] sm:$0x1] }
 0x149   : > { %22753 = vst [vmem:[#allocation63_spill] sm:$0xff] %v16976_v35  ;;  %v4886_v40 = vrot.slane %v2331_v52, %v15794_v27  ;;  %1468 = vst [vmem:[#allocation2 + $0xf0] sm:$0xf] %v1467_v28  ;;  %v4851_v3 = vrot.slane %v4844_v59, %v15794_v27  ;;  %v4900_v43 = vrot.slane %v2332_v60, %v15794_v27  ;;  %v22114_v24 = vunpack.c.l.b16 %v16976_v35 }
 0x14a   : > { %22754 = vst [vmem:[#allocation64_spill] sm:$0xff] %v16985_v17  ;;  %v16990_v41 = vrot.slane %v4872_v22, %v15794_v27  ;;  %v16995_v58 = vunpack.c.l.b16 %v4823_v9  ;;  %v16997_v7 = vunpack.c.l.b16 %v4837_v4  ;;  %v22106_v52 = vunpack.c.l.b16 %v16985_v17  ;;  %14707 = vmatpush3.bf16.msra.mxu0 %v15154_v38  ;;  %v13846_v22 = vld.sshfl [vmem:[#allocation2 + $0x8] sm:$0x1 pattern:$0x75316420] }
 0x14b   : > { %v4893_v63 = vrot.slane %v4886_v40, %v15794_v27  ;;  %v4907_v45 = vrot.slane %v4900_v43, %v15794_v27  ;;  %v17002_v51 = vunpack.c.l.b16 %v4851_v3  ;;  %v567_v60 = vsel %vm15767_vm3, 0, %v566_v6  ;;  %14724 = vmatprep.subr.bf16.mxu0 %v15155_v18 }
 0x14c   : > { %22755 = vst [vmem:[#allocation65_spill] sm:$0xff] %v16990_v41  ;;  %22756 = vst [vmem:[#allocation66_spill] sm:$0xff] %v16995_v58  ;;  %v22108_v59 = vunpack.c.l.b16 %v16990_v41  ;;  %v6317_v9 = vrot.slane %v16995_v58, 7  ;;  %v6319_v4 = vrot.slane %v16997_v7, 6  ;;  %v6323_v40 = vrot.slane %v22106_v52, 4 }
 0x14d   : > { %22757 = vst [vmem:[#allocation67_spill] sm:$0xff] %v16997_v7  ;;  %22758 = vst [vmem:[#allocation68_spill] sm:$0xff] %v17002_v51  ;;  %v17007_v28 = vunpack.c.l.b16 %v4893_v63  ;;  %v17013_v3 = vunpack.c.l.b16 %v4907_v45  ;;  %v6321_v43 = vrot.slane %v17002_v51, 5  ;;  %v573_v38 = vsel %vm15767_vm3, 0, %v572_v31  ;;  %v578_v51 = vld [vmem:[#allocation2 + $0x138] sm:$0x1] }
 0x14e   : > { %568 = vst [vmem:[#allocation2 + $0x108] sm:$0x1] %v567_v60  ;;  %v6325_v6 = vrot.slane %v22108_v59, 3  ;;  %v6318_v61 = vsel %vm5821_vm9, %v6317_v9, %v22114_v24  ;;  %574 = vst [vmem:[#allocation2 + $0x120] sm:$0x1] %v573_v38  ;;  %v1029_v60 = vshrl.u32 %v464_v47, 16  ;;  %v1788_v18 = vrot.slane %v13846_v22, %v15794_v27 }
 0x14f   : > { %22759 = vst [vmem:[#allocation69_spill] sm:$0xff] %v17007_v28  ;;  %22760 = vst [vmem:[#allocation70_spill] sm:$0xff] %v17013_v3  ;;  %v13875_v63 = vld.sshfl [vmem:[#allocation2 + $0xf4] sm:$0x33 pattern:$0x75316420]  ;;  %v6320_v21 = vsel %vm5824_vm10, %v6319_v4, %v6318_v61 }
 0x150   : > { %v6327_v62 = vrot.slane %v17007_v28, 2  ;;  %v2378_v45 = vcombine.high %v13875_v63, %v13875_v63  ;;  %v2385_v52 = vrot.slane %v13875_v63, %v15794_v27  ;;  %v6329_v59 = vrot.slane %v17013_v3, 1  ;;  %v13874_v12 = vld.sshfl [vmem:[#allocation2 + $0xf0] sm:$0x33 pattern:$0x75316420] }
 0x151   : > { %v6322_v31 = vsel %vm5827_vm11, %v6321_v43, %v6320_v21  ;;  %v17029_v54 = vrot.slane %v1029_v60, 7  ;;  %v1032_v35 = vshll.u32 %v464_v47, 16  ;;  %v17032_v9 = vrot.slane %v1788_v18, %v15794_v27 }
 0x152   : > { %v2354_v38 = vcombine.high %v13874_v12, %v13874_v12  ;;  %v2361_v24 = vrot.slane %v13874_v12, %v15794_v27  ;;  %v2392_v22 = vrot.slane %v2378_v45, %v15794_v27  ;;  %v2393_v58 = vcombine.high %v2385_v52, %v2385_v52 }
 0x153   : > { %v4970_v63 = vrot.slane %v2385_v52, %v15794_v27  ;;  %v6324_v61 = vsel %vm5830_vm12, %v6323_v40, %v6322_v31  ;;  %v1034_v4 = vor.u32 %v1032_v35, %v17029_v54 }
 0x154   : > { %v2368_v43 = vrot.slane %v2354_v38, %v15794_v27  ;;  %v2369_v47 = vcombine.high %v2361_v24, %v2361_v24  ;;  %v2394_v60 = vcombine.high %v2392_v22, %v2392_v22  ;;  %v4914_v18 = vrot.slane %v2361_v24, %v15794_v27 }
 0x155   : > { %v17043_v3 = vrot.slane %v4970_v63, %v15794_v27  ;;  %v4984_v12 = vrot.slane %v2392_v22, %v15794_v27  ;;  %v4998_v45 = vrot.slane %v2393_v58, %v15794_v27  ;;  %v6326_v52 = vsel %vm5833_vm13, %v6325_v6, %v6324_v61 }
 0x156   : > { %v2370_v40 = vcombine.high %v2368_v43, %v2368_v43  ;;  %v17049_v35 = vrot.slane %v4914_v18, %v15794_v27  ;;  %v4928_v31 = vrot.slane %v2368_v43, %v15794_v27  ;;  %v4942_v38 = vrot.slane %v2369_v47, %v15794_v27 }
 0x157   : > { %22761 = vst [vmem:[#allocation71_spill] sm:$0xff] %v17043_v3  ;;  %v17054_v24 = vrot.slane %v4984_v12, %v15794_v27  ;;  %v5005_v63 = vrot.slane %v4998_v45, %v15794_v27  ;;  %v5012_v22 = vrot.slane %v2394_v60, %v15794_v27  ;;  %v6328_v45 = vsel %vm5836_vm14, %v6327_v62, %v6326_v52  ;;  %v465_v60 = vld [vmem:[%s15744_s12 + $0x9c] sm:$0xf]  ;;  %v469_v52 = vld [vmem:[%s15744_s12 + $0xac] sm:$0xf] }
 0x158   : > { %22762 = vst [vmem:[#allocation72_spill] sm:$0xff] %v17049_v35  ;;  %v4935_v6 = vrot.slane %v4928_v31, %v15794_v27  ;;  %v4949_v61 = vrot.slane %v4942_v38, %v15794_v27  ;;  %v4956_v18 = vrot.slane %v2370_v40, %v15794_v27  ;;  %v17075_v40 = vsel %vm5839_vm15, %v6329_v59, %v6328_v45  ;;  %v468_v38 = vld [vmem:[%s15744_s12 + $0xa8] sm:$0xf]  ;;  %v1480_v45 = vld [vmem:[#allocation2 + $0x108] sm:$0xf] }
 0x159   : > { %22763 = vst [vmem:[#allocation73_spill] sm:$0xff] %v17054_v24  ;;  %v5019_v47 = vrot.slane %v5012_v22, %v15794_v27  ;;  %v17065_v21 = vunpack.c.l.b16 %v5005_v63  ;;  %v22768_v22 = vunpack.c.l.b16 %v17043_v3  ;;  %v22769_v63 = vunpack.c.l.b16 %v17054_v24 }
 0x15a   : > { %v4963_v58 = vrot.slane %v4956_v18, %v15794_v27  ;;  %v17070_v28 = vunpack.c.l.b16 %v4935_v6  ;;  %v17072_v31 = vunpack.c.l.b16 %v4949_v61  ;;  %v1037_v59 = vshrl.u32 %v465_v60, 16 }
 0x15b   : > { %22764 = vst [vmem:[#allocation74_spill] sm:$0xff] %v17065_v21  ;;  %v17078_v43 = vunpack.c.l.b16 %v5019_v47  ;;  %v6337_v12 = vrot.slane %v22768_v22, 4  ;;  %v6339_v41 = vrot.slane %v22769_v63, 3  ;;  %v6341_v62 = vrot.slane %v17065_v21, 2 }
 0x15c   : > { %22765 = vst [vmem:[#allocation75_spill] sm:$0xff] %v17070_v28  ;;  %22766 = vst [vmem:[#allocation76_spill] sm:$0xff] %v17072_v31  ;;  %v17086_v18 = vunpack.c.l.b16 %v4963_v58  ;;  %v6331_v6 = vrot.slane %v17070_v28, 7  ;;  %v6333_v61 = vrot.slane %v17072_v31, 6  ;;  %v1040_v17 = vshll.u32 %v465_v60, 16 }
 0x15d   : > { %22767 = vst [vmem:[#allocation77_spill] sm:$0xff] %v17078_v43  ;;  %v6343_v47 = vrot.slane %v17078_v43, 1  ;;  %v1063_v3 = vshrl.u32 %v468_v38, 16  ;;  %v1066_v22 = vshll.u32 %v468_v38, 16  ;;  %v22771_v63 = vunpack.c.l.b16 %v17049_v35  ;;  %v584_v31 = vld [vmem:[#allocation2 + $0x150] sm:$0x1] }
 0x15e   : > { %22770 = vst [vmem:[#allocation78_spill] sm:$0xff] %v17086_v18  ;;  %v6335_v58 = vrot.slane %v17086_v18, 5  ;;  %v17095_v24 = vrot.slane %v1037_v59, 7  ;;  %v1071_v28 = vshrl.u32 %v469_v52, 16  ;;  %v1074_v5 = vshll.u32 %v469_v52, 16 }
 0x15f   : > { %v6332_v21 = vsel %vm5821_vm9, %v6331_v6, %v22771_v63  ;;  %v1065_v42 = vrot.slane %v1063_v3, 7  ;;  %v1481_v60 = vsel %vm15828_vm8, %v1034_v4, %v1480_v45  ;;  %v472_v38 = vld [vmem:[%s15744_s12 + $0xb8] sm:$0xf]  ;;  %v1494_v59 = vld [vmem:[#allocation2 + $0x120] sm:$0xf]  ;;  %v585_v4 = vsel %vm15767_vm3, 0, %v584_v31 }
 0x160   : > { %22772 = vst [vmem:[#allocation79_spill] sm:$0xff] %v17095_v24  ;;  %v6334_v7 = vsel %vm5824_vm10, %v6333_v61, %v6332_v21  ;;  %v1042_v43 = vor.u32 %v1040_v17, %v17095_v24  ;;  %v17103_v6 = vrot.slane %v1071_v28, 7  ;;  %1482 = vst [vmem:[#allocation2 + $0x108] sm:$0xf] %v1481_v60  ;;  %v473_v63 = vld [vmem:[%s15744_s12 + $0xbc] sm:$0xf] }
 0x161   : > { %v6336_v35 = vsel %vm5827_vm11, %v6335_v58, %v6334_v7  ;;  %v579_v21 = vsel %vm15767_vm3, 0, %v578_v51  ;;  %v1068_v52 = vor.u32 %v1066_v22, %v1065_v42  ;;  %v1069_v61 = vrot.slane %v1065_v42, 4  ;;  %v476_v58 = vld [vmem:[%s15744_s12 + $0xc8] sm:$0xf]  ;;  %586 = vst [vmem:[#allocation2 + $0x150] sm:$0x1] %v585_v4 }
 0x162   : > { %22773 = vst [vmem:[#allocation80_spill] sm:$0xff] %v17103_v6  ;;  %v6338_v3 = vsel %vm5830_vm12, %v6337_v12, %v6336_v35  ;;  %580 = vst [vmem:[#allocation2 + $0x138] sm:$0x1] %v579_v21  ;;  %v22774_v17 = vrot.slane %v17029_v54, 4  ;;  %v1076_v45 = vor.u32 %v1074_v5, %v17103_v6  ;;  %v1097_v51 = vshrl.u32 %v472_v38, 16 }
 0x163   : > { %v6340_v7 = vsel %vm5833_vm13, %v6339_v41, %v6338_v3  ;;  %v1495_v42 = vsel %vm15828_vm8, %v1068_v52, %v1494_v59  ;;  %v477_v12 = vld [vmem:[%s15744_s12 + $0xcc] sm:$0xf]  ;;  %v1100_v31 = vshll.u32 %v472_v38, 16  ;;  %v1105_v41 = vshrl.u32 %v473_v63, 16  ;;  %v590_v60 = vld [vmem:[#allocation2 + $0x168] sm:$0x1] }
 0x164   : > { %v1043_v28 = vsel %vm15813_vm7, %v22774_v17, %v1042_v43  ;;  %v6342_v35 = vsel %vm5836_vm14, %v6341_v62, %v6340_v7  ;;  %v1077_v43 = vsel %vm15813_vm7, %v1069_v61, %v1076_v45  ;;  %1496 = vst [vmem:[#allocation2 + $0x120] sm:$0xf] %v1495_v42  ;;  %v1099_v5 = vrot.slane %v1097_v51, 7  ;;  %v596_v3 = vld [vmem:[#allocation2 + $0x180] sm:$0x1] }
 0x165   : > { %1483 = vst.msk [vmem:[#allocation2 + $0x10c] sm:$0xf] %vm490_vm0, %v1043_v28  ;;  %v17124_v54 = vsel %vm5839_vm15, %v6343_v47, %v6342_v35  ;;  %v1108_v22 = vshll.u32 %v473_v63, 16  ;;  %1497 = vst.msk [vmem:[#allocation2 + $0x124] sm:$0xf] %vm490_vm0, %v1077_v43  ;;  %v17131_v21 = vrot.slane %v1105_v41, 7 }
 0x166   : > { %22775 = vst [vmem:[#allocation81_spill] sm:$0xff] %v17124_v54  ;;  %v6433_v62 = vpack.c.b16 %v17124_v54, %v17075_v40  ;;  %v1131_v59 = vshrl.u32 %v476_v58, 16  ;;  %v1134_v38 = vshll.u32 %v476_v58, 16  ;;  %v1102_v47 = vor.u32 %v1100_v31, %v1099_v5  ;;  %v17145_v42 = vld [vmem:[%s15744_s12 + $0xd8] sm:$0xf] }
 0x167   : > { %22776 = vst [vmem:[#allocation82_spill] sm:$0xff] %v17131_v21  ;;  %v1103_v52 = vrot.slane %v1099_v5, 4  ;;  %v1139_v4 = vshrl.u32 %v477_v12, 16  ;;  %v1142_v7 = vshll.u32 %v477_v12, 16  ;;  %v1110_v63 = vor.u32 %v1108_v22, %v17131_v21 }
 0x168   : > { %14692 = vmatprep.mubr.msk.bf16.mxu0 %vm6083_vm1, %v6433_v62  ;;  %v13877_v61 = vld.sshfl [vmem:[#allocation2 + $0x108] sm:$0x33 pattern:$0x75316420]  ;;  %v17135_v17 = vrot.slane %v1131_v59, 7  ;;  %v591_v40 = vsel %vm15767_vm3, 0, %v590_v60 }
 0x169   : > { %v2416_v45 = vcombine.high %v13877_v61, %v13877_v61  ;;  %v2423_v58 = vrot.slane %v13877_v61, %v15794_v27  ;;  %v17142_v51 = vrot.slane %v1139_v4, 7  ;;  %v1508_v35 = vld [vmem:[#allocation2 + $0x138] sm:$0xf]  ;;  %592 = vst [vmem:[#allocation2 + $0x168] sm:$0x1] %v591_v40  ;;  %v597_v12 = vsel %vm15767_vm3, 0, %v596_v3 }
 0x16a   : > { %v1111_v31 = vsel %vm15813_vm7, %v1103_v52, %v1110_v63  ;;  %v1136_v41 = vor.u32 %v1134_v38, %v17135_v17  ;;  %v1509_v5 = vsel %vm15828_vm8, %v1102_v47, %v1508_v35  ;;  %v1522_v22 = vld [vmem:[#allocation2 + $0x150] sm:$0xf]  ;;  %598 = vst [vmem:[#allocation2 + $0x180] sm:$0x1] %v597_v12 }
 0x16b   : > { %22777 = vst [vmem:[#allocation83_spill] sm:$0xff] %v17142_v51  ;;  %v2430_v62 = vrot.slane %v2416_v45, %v15794_v27  ;;  %v2431_v59 = vcombine.high %v2423_v58, %v2423_v58  ;;  %v5026_v4 = vrot.slane %v2423_v58, %v15794_v27  ;;  %v17158_v3 = vor.u32 %v1142_v7, %v17142_v51  ;;  %v13880_v38 = vld.sshfl [vmem:[#allocation2 + $0x120] sm:$0x33 pattern:$0x75316420] }
 0x16c   : > { %v13878_v60 = vld.sshfl [vmem:[#allocation2 + $0x10c] sm:$0x33 pattern:$0x75316420]  ;;  %1510 = vst [vmem:[#allocation2 + $0x138] sm:$0xf] %v1509_v5  ;;  %v1523_v47 = vsel %vm15828_vm8, %v1136_v41, %v1522_v22  ;;  %v2478_v35 = vcombine.high %v13880_v38, %v13880_v38  ;;  %v2485_v58 = vrot.slane %v13880_v38, %v15794_v27 }
 0x16d   : > { %1511 = vst.msk [vmem:[#allocation2 + $0x13c] sm:$0xf] %vm490_vm0, %v1111_v31  ;;  %v2440_v52 = vcombine.high %v13878_v60, %v13878_v60  ;;  %v2447_v61 = vrot.slane %v13878_v60, %v15794_v27  ;;  %v13881_v40 = vld.sshfl [vmem:[#allocation2 + $0x124] sm:$0x33 pattern:$0x75316420]  ;;  %v2432_v45 = vcombine.high %v2430_v62, %v2430_v62  ;;  %v17167_v7 = vrot.slane %v5026_v4, %v15794_v27 }
 0x16e   : > { %1524 = vst [vmem:[#allocation2 + $0x150] sm:$0xf] %v1523_v47  ;;  %v2502_v5 = vcombine.high %v13881_v40, %v13881_v40  ;;  %v2509_v60 = vrot.slane %v13881_v40, %v15794_v27  ;;  %v2492_v28 = vrot.slane %v2478_v35, %v15794_v27  ;;  %v2493_v41 = vcombine.high %v2485_v58, %v2485_v58 }
 0x16f   : > { %22778 = vst [vmem:[#allocation84_spill] sm:$0xff] %v17167_v7  ;;  %v2454_v12 = vrot.slane %v2440_v52, %v15794_v27  ;;  %v2455_v31 = vcombine.high %v2447_v61, %v2447_v61  ;;  %v5040_v22 = vrot.slane %v2430_v62, %v15794_v27  ;;  %v5054_v63 = vrot.slane %v2431_v59, %v15794_v27 }
 0x170   : > { %v2516_v38 = vrot.slane %v2502_v5, %v15794_v27  ;;  %v2517_v54 = vcombine.high %v2509_v60, %v2509_v60  ;;  %v5068_v4 = vrot.slane %v2432_v45, %v15794_v27  ;;  %v2494_v47 = vcombine.high %v2492_v28, %v2492_v28 }
 0x171   : > { %v2456_v43 = vcombine.high %v2454_v12, %v2454_v12  ;;  %v5047_v52 = vrot.slane %v5040_v22, %v15794_v27  ;;  %v5061_v51 = vrot.slane %v5054_v63, %v15794_v27  ;;  %v5082_v40 = vrot.slane %v2447_v61, %v15794_v27 }
 0x172   : > { %v2518_v21 = vcombine.high %v2516_v38, %v2516_v38  ;;  %v5075_v35 = vrot.slane %v5068_v4, %v15794_v27  ;;  %v5096_v62 = vrot.slane %v2454_v12, %v15794_v27  ;;  %v5110_v59 = vrot.slane %v2455_v31, %v15794_v27 }
 0x173   : > { %v17183_v6 = vrot.slane %v5082_v40, %v15794_v27  ;;  %v5124_v5 = vrot.slane %v2456_v43, %v15794_v27  ;;  %v5138_v45 = vrot.slane %v2485_v58, %v15794_v27  ;;  %v5152_v22 = vrot.slane %v2492_v28, %v15794_v27 }
 0x174   : > { %v17189_v63 = vrot.slane %v5096_v62, %v15794_v27  ;;  %v5117_v61 = vrot.slane %v5110_v59, %v15794_v27  ;;  %v5166_v4 = vrot.slane %v2493_v41, %v15794_v27  ;;  %v5180_v12 = vrot.slane %v2494_v47, %v15794_v27 }
 0x175   : > { %22779 = vst [vmem:[#allocation85_spill] sm:$0xff] %v17183_v6  ;;  %v5131_v31 = vrot.slane %v5124_v5, %v15794_v27  ;;  %v17196_v40 = vrot.slane %v5138_v45, %v15794_v27  ;;  %v5159_v43 = vrot.slane %v5152_v22, %v15794_v27  ;;  %v5194_v58 = vrot.slane %v2509_v60, %v15794_v27 }
 0x176   : > { %22780 = vst [vmem:[#allocation86_spill] sm:$0xff] %v17189_v63  ;;  %v5173_v28 = vrot.slane %v5166_v4, %v15794_v27  ;;  %v5187_v62 = vrot.slane %v5180_v12, %v15794_v27  ;;  %v5208_v24 = vrot.slane %v2516_v38, %v15794_v27  ;;  %v5222_v59 = vrot.slane %v2517_v54, %v15794_v27 }
 0x177   : > { %22781 = vst [vmem:[#allocation87_spill] sm:$0xff] %v17196_v40  ;;  %v17205_v41 = vrot.slane %v5194_v58, %v15794_v27  ;;  %v5236_v47 = vrot.slane %v2518_v21, %v15794_v27  ;;  %v17209_v45 = vunpack.c.l.b16 %v5047_v52  ;;  %v17215_v4 = vunpack.c.l.b16 %v5061_v51 }
 0x178   : > { %v17212_v22 = vrot.slane %v5208_v24, %v15794_v27  ;;  %v5229_v60 = vrot.slane %v5222_v59, %v15794_v27  ;;  %v17217_v12 = vunpack.c.l.b16 %v5075_v35  ;;  %v17222_v21 = vunpack.c.l.b16 %v5117_v61  ;;  %v13884_v59 = vld.sshfl [vmem:[#allocation2 + $0x13c] sm:$0x33 pattern:$0x75316420] }
 0x179   : > { %22782 = vst [vmem:[#allocation88_spill] sm:$0xff] %v17209_v45  ;;  %22783 = vst [vmem:[#allocation89_spill] sm:$0xff] %v17215_v4  ;;  %v5243_v54 = vrot.slane %v5236_v47, %v15794_v27  ;;  %v17224_v5 = vunpack.c.l.b16 %v5131_v31  ;;  %v17227_v24 = vunpack.c.l.b16 %v5159_v43  ;;  %v17229_v18 = vunpack.c.l.b16 %v5173_v28  ;;  %v13883_v43 = vld.sshfl [vmem:[#allocation2 + $0x138] sm:$0x33 pattern:$0x75316420] }
 0x17a   : > { %22784 = vst [vmem:[#allocation90_spill] sm:$0xff] %v17217_v12  ;;  %22785 = vst [vmem:[#allocation91_spill] sm:$0xff] %v17222_v21  ;;  %v17231_v51 = vunpack.c.l.b16 %v5187_v62  ;;  %v17235_v47 = vunpack.c.l.b16 %v5229_v60  ;;  %v6345_v61 = vrot.slane %v17209_v45, 7  ;;  %v6347_v31 = vrot.slane %v17215_v4, 6 }
 0x17b   : > { %22786 = vst [vmem:[#allocation92_spill] sm:$0xff] %v17224_v5  ;;  %22787 = vst [vmem:[#allocation93_spill] sm:$0xff] %v17227_v24  ;;  %v17237_v38 = vunpack.c.l.b16 %v5243_v54  ;;  %v6349_v52 = vrot.slane %v17217_v12, 5  ;;  %v22792_v28 = vunpack.c.l.b16 %v17183_v6  ;;  %v22793_v62 = vunpack.c.l.b16 %v17189_v63 }
 0x17c   : > { %22788 = vst [vmem:[#allocation94_spill] sm:$0xff] %v17229_v18  ;;  %22789 = vst [vmem:[#allocation95_spill] sm:$0xff] %v17231_v51  ;;  %v6355_v35 = vrot.slane %v17222_v21, 2  ;;  %v6357_v60 = vrot.slane %v17224_v5, 1  ;;  %v22794_v54 = vunpack.c.l.b16 %v17167_v7  ;;  %v6359_v4 = vrot.slane %v17227_v24, 7 }
 0x17d   : > { %22790 = vst [vmem:[#allocation96_spill] sm:$0xff] %v17235_v47  ;;  %22791 = vst [vmem:[#allocation97_spill] sm:$0xff] %v17237_v38  ;;  %v6351_v58 = vrot.slane %v22792_v28, 4  ;;  %v6353_v34 = vrot.slane %v22793_v62, 3  ;;  %v6361_v12 = vrot.slane %v17229_v18, 6  ;;  %v6363_v49 = vrot.slane %v17231_v51, 5 }
 0x17e   : > { %v6346_v45 = vsel %vm5821_vm9, %v6345_v61, %v22794_v54  ;;  %v22795_v63 = vunpack.c.l.b16 %v17205_v41  ;;  %v22796_v21 = vunpack.c.l.b16 %v17212_v22  ;;  %v6369_v5 = vrot.slane %v17235_v47, 2 }
 0x17f   : > { %v6348_v28 = vsel %vm5824_vm10, %v6347_v31, %v6346_v45  ;;  %v22797_v61 = vunpack.c.l.b16 %v17196_v40  ;;  %v6371_v24 = vrot.slane %v17237_v38, 1  ;;  %v22798_v51 = vrot.slane %v17135_v17, 4 }
 0x180   : > { %v6365_v62 = vrot.slane %v22795_v63, 4  ;;  %v6367_v6 = vrot.slane %v22796_v21, 3  ;;  %v6350_v7 = vsel %vm5827_vm11, %v6349_v52, %v6348_v28  ;;  %v2540_v31 = vcombine.high %v13883_v43, %v13883_v43 }
 0x181   : > { %v6360_v54 = vsel %vm5821_vm9, %v6359_v4, %v22797_v61  ;;  %v1145_v45 = vsel %vm15813_vm7, %v22798_v51, %v17158_v3  ;;  %v6352_v63 = vsel %vm5830_vm12, %v6351_v58, %v6350_v7  ;;  %v2547_v52 = vrot.slane %v13883_v43, %v15794_v27  ;;  %v13886_v61 = vld.sshfl [vmem:[#allocation2 + $0x150] sm:$0x33 pattern:$0x75316420] }
 0x182   : > { %v6362_v21 = vsel %vm5824_vm10, %v6361_v12, %v6360_v54  ;;  %1525 = vst.msk [vmem:[#allocation2 + $0x154] sm:$0xf] %vm490_vm0, %v1145_v45  ;;  %v6354_v28 = vsel %vm5833_vm13, %v6353_v34, %v6352_v63  ;;  %v2564_v40 = vcombine.high %v13884_v59, %v13884_v59  ;;  %v2571_v17 = vrot.slane %v13884_v59, %v15794_v27 }
 0x183   : > { %v6364_v4 = vsel %vm5827_vm11, %v6363_v49, %v6362_v21  ;;  %v6356_v38 = vsel %vm5836_vm14, %v6355_v35, %v6354_v28  ;;  %v2554_v7 = vrot.slane %v2540_v31, %v15794_v27  ;;  %v2555_v12 = vcombine.high %v2547_v52, %v2547_v52 }
 0x184   : > { %v6366_v3 = vsel %vm5830_vm12, %v6365_v62, %v6364_v4  ;;  %v17281_v58 = vsel %vm5839_vm15, %v6357_v60, %v6356_v38  ;;  %v2578_v34 = vrot.slane %v2564_v40, %v15794_v27  ;;  %v2579_v43 = vcombine.high %v2571_v17, %v2571_v17 }
 0x185   : > { %22799 = vst [vmem:[#allocation98_spill] sm:$0xff] %v17281_v58  ;;  %v6368_v51 = vsel %vm5833_vm13, %v6367_v6, %v6366_v3  ;;  %v2556_v54 = vcombine.high %v2554_v7, %v2554_v7  ;;  %v2602_v45 = vcombine.high %v13886_v61, %v13886_v61  ;;  %v2609_v59 = vrot.slane %v13886_v61, %v15794_v27 }
 0x186   : > { %v6370_v49 = vsel %vm5836_vm14, %v6369_v5, %v6368_v51  ;;  %v2580_v62 = vcombine.high %v2578_v34, %v2578_v34  ;;  %v5250_v63 = vrot.slane %v2547_v52, %v15794_v27  ;;  %v5264_v38 = vrot.slane %v2554_v7, %v15794_v27 }
 0x187   : > { %v17288_v35 = vsel %vm5839_vm15, %v6371_v24, %v6370_v49  ;;  %v2616_v40 = vrot.slane %v2602_v45, %v15794_v27  ;;  %v2617_v60 = vcombine.high %v2609_v59, %v2609_v59  ;;  %v5278_v5 = vrot.slane %v2555_v12, %v15794_v27 }
 0x188   : > { %22800 = vst [vmem:[#allocation99_spill] sm:$0xff] %v17288_v35  ;;  %v6434_v6 = vpack.c.b16 %v17288_v35, %v17281_v58  ;;  %v17297_v31 = vrot.slane %v5250_v63, %v15794_v27  ;;  %v5271_v24 = vrot.slane %v5264_v38, %v15794_v27  ;;  %v5292_v28 = vrot.slane %v2556_v54, %v15794_v27 }
 0x189   : > { %v13887_v21 = vld.sshfl [vmem:[#allocation2 + $0x154] sm:$0x33 pattern:$0x75316420]  ;;  %v5306_v52 = vrot.slane %v2571_v17, %v15794_v27  ;;  %v2618_v4 = vcombine.high %v2616_v40, %v2616_v40  ;;  %v5285_v7 = vrot.slane %v5278_v5, %v15794_v27  ;;  %v5320_v49 = vrot.slane %v2578_v34, %v15794_v27 }
 0x18a   : > { %22801 = vst [vmem:[#allocation100_spill] sm:$0xff] %v17297_v31  ;;  %14693 = vmatmul.mubr.msk.bf16.gmra.mrb[8].mxu0 %vm6083_vm1, %v6434_v6  ;;  %v2626_v61 = vcombine.high %v13887_v21, %v13887_v21  ;;  %v2633_v3 = vrot.slane %v13887_v21, %v15794_v27  ;;  %v5299_v12 = vrot.slane %v5292_v28, %v15794_v27 }
 0x18b   : > { %v17307_v51 = vrot.slane %v5306_v52, %v15794_v27  ;;  %v5334_v45 = vrot.slane %v2579_v43, %v15794_v27  ;;  %v5348_v63 = vrot.slane %v2580_v62, %v15794_v27  ;;  %v5362_v38 = vrot.slane %v2609_v59, %v15794_v27 }
 0x18c   : > { %v2640_v54 = vrot.slane %v2626_v61, %v15794_v27  ;;  %v2641_v17 = vcombine.high %v2633_v3, %v2633_v3  ;;  %v17315_v6 = vrot.slane %v5320_v49, %v15794_v27  ;;  %v5376_v21 = vrot.slane %v2616_v40, %v15794_v27 }
 0x18d   : > { %22802 = vst [vmem:[#allocation101_spill] sm:$0xff] %v17307_v51  ;;  %v5341_v5 = vrot.slane %v5334_v45, %v15794_v27  ;;  %v5390_v28 = vrot.slane %v2617_v60, %v15794_v27  ;;  %v5355_v34 = vrot.slane %v5348_v63, %v15794_v27  ;;  %v17322_v43 = vrot.slane %v5362_v38, %v15794_v27 }
 0x18e   : > { %22803 = vst [vmem:[#allocation102_spill] sm:$0xff] %v17315_v6  ;;  %v2642_v52 = vcombine.high %v2640_v54, %v2640_v54  ;;  %v5404_v61 = vrot.slane %v2618_v4, %v15794_v27  ;;  %v5383_v62 = vrot.slane %v5376_v21, %v15794_v27  ;;  %v5418_v49 = vrot.slane %v2633_v3, %v15794_v27 }
 0x18f   : > { %22804 = vst [vmem:[#allocation103_spill] sm:$0xff] %v17322_v43  ;;  %v5397_v59 = vrot.slane %v5390_v28, %v15794_v27  ;;  %v5432_v45 = vrot.slane %v2640_v54, %v15794_v27  ;;  %v5446_v60 = vrot.slane %v2641_v17, %v15794_v27  ;;  %v17339_v21 = vunpack.c.l.b16 %v5271_v24 }
 0x190   : > { %v5411_v40 = vrot.slane %v5404_v61, %v15794_v27  ;;  %v5460_v35 = vrot.slane %v2642_v52, %v15794_v27  ;;  %v17334_v38 = vrot.slane %v5418_v49, %v15794_v27  ;;  %v17341_v28 = vunpack.c.l.b16 %v5285_v7 }
 0x191   : > { %v17337_v4 = vrot.slane %v5432_v45, %v15794_v27  ;;  %22807 = vst [vmem:[#allocation106_spill] sm:$0xff] %v17339_v21  ;;  %v5453_v3 = vrot.slane %v5446_v60, %v15794_v27  ;;  %v17345_v61 = vunpack.c.l.b16 %v5299_v12  ;;  %v22178_v17 = vunpack.c.l.b16 %v17307_v51 }
 0x192   : > { %22805 = vst [vmem:[#allocation104_spill] sm:$0xff] %v17334_v38  ;;  %22808 = vst [vmem:[#allocation107_spill] sm:$0xff] %v17341_v28  ;;  %v5467_v54 = vrot.slane %v5460_v35, %v15794_v27  ;;  %v17349_v63 = vunpack.c.l.b16 %v5341_v5  ;;  %v17351_v49 = vunpack.c.l.b16 %v5355_v34  ;;  %v17354_v24 = vunpack.c.l.b16 %v5383_v62 }
 0x193   : > { %22806 = vst [vmem:[#allocation105_spill] sm:$0xff] %v17337_v4  ;;  %22809 = vst [vmem:[#allocation108_spill] sm:$0xff] %v17345_v61  ;;  %v17356_v7 = vunpack.c.l.b16 %v5397_v59  ;;  %v17358_v58 = vunpack.c.l.b16 %v5411_v40  ;;  %v17362_v60 = vunpack.c.l.b16 %v5453_v3  ;;  %v6373_v5 = vrot.slane %v17339_v21, 7 }
 0x194   : > { %22810 = vst [vmem:[#allocation109_spill] sm:$0xff] %v17349_v63  ;;  %22811 = vst [vmem:[#allocation110_spill] sm:$0xff] %v17351_v49  ;;  %v17364_v52 = vunpack.c.l.b16 %v5467_v54  ;;  %v6375_v34 = vrot.slane %v17341_v28, 6  ;;  %v6377_v62 = vrot.slane %v17345_v61, 5  ;;  %v6379_v59 = vrot.slane %v22178_v17, 4 }
 0x195   : > { %22812 = vst [vmem:[#allocation111_spill] sm:$0xff] %v17354_v24  ;;  %22813 = vst [vmem:[#allocation112_spill] sm:$0xff] %v17356_v7  ;;  %v22817_v40 = vunpack.c.l.b16 %v17315_v6  ;;  %v22818_v35 = vunpack.c.l.b16 %v17297_v31  ;;  %v6383_v3 = vrot.slane %v17349_v63, 2  ;;  %v6385_v54 = vrot.slane %v17351_v49, 1  ;;  %v481_v31 = vld [vmem:[%s15744_s12 + $0xdc] sm:$0xf] }
 0x196   : > { %22814 = vst [vmem:[#allocation113_spill] sm:$0xff] %v17358_v58  ;;  %22815 = vst [vmem:[#allocation114_spill] sm:$0xff] %v17362_v60  ;;  %v6387_v21 = vrot.slane %v17354_v24, 7  ;;  %v6389_v51 = vrot.slane %v17356_v7, 6  ;;  %v6391_v17 = vrot.slane %v17358_v58, 5  ;;  %v22821_v24 = vunpack.c.l.b16 %v17337_v4 }
 0x197   : > { %22816 = vst [vmem:[#allocation115_spill] sm:$0xff] %v17364_v52  ;;  %v6381_v45 = vrot.slane %v22817_v40, 3  ;;  %v6374_v12 = vsel %vm5821_vm9, %v6373_v5, %v22818_v35  ;;  %v22819_v40 = vunpack.c.l.b16 %v17334_v38  ;;  %v22820_v5 = vunpack.c.l.b16 %v17322_v43  ;;  %v484_v43 = vld [vmem:[%s15744_s12 + $0xe8] sm:$0xf] }
 0x198   : > { %v6376_v28 = vsel %vm5824_vm10, %v6375_v34, %v6374_v12  ;;  %v6395_v63 = vrot.slane %v22821_v24, 3  ;;  %v6397_v12 = vrot.slane %v17362_v60, 2  ;;  %v6399_v58 = vrot.slane %v17364_v52, 1 }
 0x199   : > { %v6393_v6 = vrot.slane %v22819_v40, 4  ;;  %v6378_v35 = vsel %vm5827_vm11, %v6377_v62, %v6376_v28  ;;  %v6388_v49 = vsel %vm5821_vm9, %v6387_v21, %v22820_v5  ;;  %v22822_v40 = vshrl.u32 %v17145_v42, 16  ;;  %v485_v21 = vld [vmem:[%s15744_s12 + $0xec] sm:$0xf] }
 0x19a   : > { %v6380_v34 = vsel %vm5830_vm12, %v6379_v59, %v6378_v35  ;;  %v6390_v7 = vsel %vm5824_vm10, %v6389_v51, %v6388_v49  ;;  %v1168_v5 = vshll.u32 %v17145_v42, 16  ;;  %v1173_v24 = vshrl.u32 %v481_v31, 16  ;;  %v1536_v49 = vld [vmem:[#allocation2 + $0x168] sm:$0xf] }
 0x19b   : > { %v1167_v38 = vrot.slane %v22822_v40, 7  ;;  %v6382_v28 = vsel %vm5833_vm13, %v6381_v45, %v6380_v34  ;;  %v6392_v62 = vsel %vm5827_vm11, %v6391_v17, %v6390_v7  ;;  %v1176_v51 = vshll.u32 %v481_v31, 16  ;;  %v610_v17 = vld [vmem:[#allocation2 + $0x20] sm:$0x1] }
 0x19c   : > { %v6384_v60 = vsel %vm5836_vm14, %v6383_v3, %v6382_v28  ;;  %v6394_v59 = vsel %vm5830_vm12, %v6393_v6, %v6392_v62  ;;  %v17408_v34 = vrot.slane %v1173_v24, 7  ;;  %v1199_v42 = vshrl.u32 %v484_v43, 16  ;;  %v628_v28 = vld [vmem:[#allocation2 + $0x68] sm:$0x1]  ;;  %v1550_v62 = vld [vmem:[#allocation2 + $0x180] sm:$0xf] }
 0x19d   : > { %v1171_v35 = vrot.slane %v1167_v38, 4  ;;  %v17405_v52 = vsel %vm5839_vm15, %v6385_v54, %v6384_v60  ;;  %v6396_v40 = vsel %vm5833_vm13, %v6395_v63, %v6394_v59  ;;  %v1170_v45 = vor.u32 %v1168_v5, %v1167_v38 }
 0x19e   : > { %22823 = vst [vmem:[#allocation116_spill] sm:$0xff] %v17405_v52  ;;  %v6398_v7 = vsel %vm5836_vm14, %v6397_v12, %v6396_v40  ;;  %v1202_v4 = vshll.u32 %v484_v43, 16  ;;  %v1207_v61 = vshrl.u32 %v485_v21, 16  ;;  %v1178_v31 = vor.u32 %v1176_v51, %v17408_v34 }
 0x19f   : > { %v17412_v3 = vsel %vm5839_vm15, %v6399_v58, %v6398_v7  ;;  %v1210_v6 = vshll.u32 %v485_v21, 16  ;;  %v1537_v60 = vsel %vm15828_vm8, %v1170_v45, %v1536_v49  ;;  %v1201_v38 = vrot.slane %v1199_v42, 7 }
 0x1a0   : > { %22824 = vst [vmem:[#allocation117_spill] sm:$0xff] %v17412_v3  ;;  %v6435_v63 = vpack.c.b16 %v17412_v3, %v17405_v52  ;;  %v17419_v54 = vrot.slane %v1207_v61, 7  ;;  %1538 = vst [vmem:[#allocation2 + $0x168] sm:$0xf] %v1537_v60  ;;  %v611_v43 = vsel %vm15774_vm5, 0, %v610_v17  ;;  %v1179_v58 = vsel %vm15813_vm7, %v1171_v35, %v1178_v31 }
 0x1a1   : > { %612 = vst [vmem:[#allocation2 + $0x20] sm:$0x1] %v611_v43  ;;  %v22826_v21 = vrot.slane %v17032_v9, %v15794_v27  ;;  %v22827_v24 = vrot.slane %v16144_v57, 7  ;;  %v22828_v59 = vrot.slane %v16171_v36, 7  ;;  %v1204_v49 = vor.u32 %v1202_v4, %v1201_v38  ;;  %1539 = vst.msk [vmem:[#allocation2 + $0x16c] sm:$0xf] %vm490_vm0, %v1179_v58 }
 0x1a2   : > { %14696 = vmatprep.mubr.msk.bf16.mxu0 %vm6083_vm1, %v6435_v63  ;;  %v1205_v35 = vrot.slane %v1201_v38, 4  ;;  %v1212_v40 = vor.u32 %v1210_v6, %v17419_v54  ;;  %v22829_v9 = vrot.slane %v16150_v14, 6  ;;  %v634_v57 = vld [vmem:[#allocation2 + $0x80] sm:$0x1]  ;;  %v22833_v4 = vrot.slane %v16176_v37, 6  ;;  %v22835_v6 = vld [vmem:[#allocation38_spill] sm:$0xff] }
 0x1a3   : > { %v6815_v5 = vunpack.c.l.b16 %v22826_v21  ;;  %v6831_v61 = vsel %vm5821_vm9, %v22827_v24, %v16132_v33  ;;  %v6839_v51 = vsel %vm5821_vm9, %v22828_v59, %v16166_v1  ;;  %v22830_v33 = vrot.slane %v16504_v55, 1  ;;  %v22832_v1 = vld [vmem:[#allocation36_spill] sm:$0xff]  ;;  %v22834_v55 = vld [vmem:[#allocation37_spill] sm:$0xff]  ;;  %v22837_v43 = vld [vmem:[#allocation39_spill] sm:$0xff] }
 0x1a4   : > { %v6832_v45 = vsel %vm5824_vm10, %v22829_v9, %v6831_v61  ;;  %v6840_v7 = vsel %vm5824_vm10, %v22833_v4, %v6839_v51  ;;  %v629_v42 = vsel %vm15774_vm5, 0, %v628_v28  ;;  %v1213_v14 = vsel %vm15813_vm7, %v1205_v35, %v1212_v40  ;;  %v22839_v61 = vld [vmem:[#allocation25_spill] sm:$0xff]  ;;  %v640_v51 = vld [vmem:[#allocation2 + $0x98] sm:$0x1]  ;;  %v22841_v35 = vld [vmem:[#allocation31_spill] sm:$0xff] }
 0x1a5   : > { %v17446_v36 = vsel %vm5839_vm15, %v22830_v33, %v16535_v20  ;;  %v6833_v17 = vsel %vm5827_vm11, %v22832_v1, %v6832_v45  ;;  %v1551_v31 = vsel %vm15828_vm8, %v1204_v49, %v1550_v62  ;;  %v6841_v60 = vsel %vm5827_vm11, %v22835_v6, %v6840_v7  ;;  %630 = vst [vmem:[#allocation2 + $0x68] sm:$0x1] %v629_v42  ;;  %v22843_v45 = vld [vmem:[#allocation47_spill] sm:$0xff]  ;;  %v22844_v33 = vld [vmem:[#allocation33_spill] sm:$0xff]  ;;  %v22847_v42 = vld [vmem:[#allocation42_spill] sm:$0xff] }
 0x1a6   : > { %22831 = vst [vmem:[#allocation118_spill] sm:$0xff] %v17446_v36  ;;  %v6834_v20 = vsel %vm5830_vm12, %v22834_v55, %v6833_v17  ;;  %1552 = vst [vmem:[#allocation2 + $0x180] sm:$0xf] %v1551_v31  ;;  %v22836_v37 = vrot.slane %v16157_v23, 3  ;;  %v6837_v38 = vrot.slane %v6815_v5, 1  ;;  %v6842_v28 = vsel %vm5830_vm12, %v22837_v43, %v6841_v60  ;;  %v22849_v60 = vld [vmem:[#allocation22_spill] sm:$0xff] }
 0x1a7   : > { %1553 = vst.msk [vmem:[#allocation2 + $0x184] sm:$0xf] %vm490_vm0, %v1213_v14  ;;  %v635_v58 = vsel %vm15774_vm5, 0, %v634_v57  ;;  %v22838_v21 = vrot.slane %v16162_v0, 2  ;;  %v22840_v23 = vrot.slane %v16223_v25, 7  ;;  %v22842_v40 = vrot.slane %v22841_v35, 3 }
 0x1a8   : > { %v6835_v63 = vsel %vm5833_vm13, %v22836_v37, %v6834_v20  ;;  %636 = vst [vmem:[#allocation2 + $0x80] sm:$0x1] %v635_v58  ;;  %v13889_v49 = vld.sshfl [vmem:[#allocation2 + $0x168] sm:$0x33 pattern:$0x75316420] }
 0x1a9   : > { %v6836_v24 = vsel %vm5836_vm14, %v22838_v21, %v6835_v63  ;;  %v6863_v5 = vsel %vm5821_vm9, %v22840_v23, %v16221_v39  ;;  %v6843_v9 = vsel %vm5833_vm13, %v22842_v40, %v6842_v28  ;;  %v22845_v0 = vrot.slane %v22844_v33, 6  ;;  %v1358_v7 = vld [vmem:[#allocation2 + $0x20] sm:$0x1]  ;;  %v646_v20 = vld [vmem:[#allocation2 + $0xb0] sm:$0x1]  ;;  %v22851_v63 = vld [vmem:[#allocation50_spill] sm:$0xff] }
 0x1aa   : > { %v22846_v17 = vrot.slane %v16648_v26, 7  ;;  %v2664_v25 = vcombine.high %v13889_v49, %v13889_v49  ;;  %v2671_v39 = vrot.slane %v13889_v49, %v15794_v27  ;;  %v22848_v31 = vrot.slane %v16658_v46, 6  ;;  %v13890_v6 = vld.sshfl [vmem:[#allocation2 + $0x16c] sm:$0x33 pattern:$0x75316420] }
 0x1ab   : > { %v6864_v1 = vsel %vm5824_vm10, %v22845_v0, %v6863_v5  ;;  %v22850_v37 = vrot.slane %v22849_v60, 4  ;;  %v641_v28 = vsel %vm15774_vm5, 0, %v640_v51  ;;  %v2688_v21 = vcombine.high %v13890_v6, %v13890_v6  ;;  %v22852_v49 = vld [vmem:[#allocation32_spill] sm:$0xff] }
 0x1ac   : > { %v6871_v4 = vsel %vm5821_vm9, %v22846_v17, %v16646_v48  ;;  %v6865_v14 = vsel %vm5827_vm11, %v22847_v42, %v6864_v1  ;;  %v17503_v48 = vsel %vm5839_vm15, %v6837_v38, %v6836_v24  ;;  %v2678_v46 = vrot.slane %v2664_v25, %v15794_v27  ;;  %642 = vst [vmem:[#allocation2 + $0x98] sm:$0x1] %v641_v28  ;;  %v22854_v24 = vld [vmem:[#allocation43_spill] sm:$0xff]  ;;  %v1400_v59 = vld [vmem:[#allocation2 + $0x68] sm:$0x1] }
 0x1ad   : > { %v6872_v55 = vsel %vm5824_vm10, %v22848_v31, %v6871_v4  ;;  %v1359_v26 = vsel %vm15767_vm3, %v22850_v37, %v1358_v7  ;;  %v2679_v58 = vcombine.high %v2671_v39, %v2671_v39  ;;  %v2695_v23 = vrot.slane %v13890_v6, %v15794_v27  ;;  %v13892_v33 = vld.sshfl [vmem:[#allocation2 + $0x180] sm:$0x33 pattern:$0x75316420]  ;;  %v22855_v4 = vld [vmem:[#allocation51_spill] sm:$0xff] }
 0x1ae   : > { %v6873_v43 = vsel %vm5827_vm11, %v22851_v63, %v6872_v55  ;;  %1360 = vst [vmem:[#allocation2 + $0x20] sm:$0x1] %v1359_v26  ;;  %v5474_v5 = vrot.slane %v2671_v39, %v15794_v27  ;;  %v22853_v35 = vrot.slane %v22852_v49, 2  ;;  %v17519_v40 = vsel %vm5830_vm12, %v22854_v24, %v6865_v14 }
 0x1af   : > { %v647_v51 = vsel %vm15774_vm5, 0, %v646_v20  ;;  %v2680_v0 = vcombine.high %v2678_v46, %v2678_v46  ;;  %v2702_v1 = vrot.slane %v2688_v21, %v15794_v27  ;;  %v5488_v17 = vrot.slane %v2678_v46, %v15794_v27 }
 0x1b0   : > { %v17515_v38 = vsel %vm5836_vm14, %v22853_v35, %v6843_v9  ;;  %v17527_v25 = vsel %vm5830_vm12, %v22855_v4, %v6873_v43  ;;  %648 = vst [vmem:[#allocation2 + $0xb0] sm:$0x1] %v647_v51  ;;  %v13893_v9 = vld.sshfl [vmem:[#allocation2 + $0x184] sm:$0x33 pattern:$0x75316420]  ;;  %v2703_v39 = vcombine.high %v2695_v23, %v2695_v23  ;;  %v2726_v7 = vcombine.high %v13892_v33, %v13892_v33 }
 0x1b1   : > { %v2733_v42 = vrot.slane %v13892_v33, %v15794_v27  ;;  %v5502_v14 = vrot.slane %v2679_v58, %v15794_v27  ;;  %v2704_v31 = vcombine.high %v2702_v1, %v2702_v1  ;;  %v2750_v55 = vcombine.high %v13893_v9, %v13893_v9 }
 0x1b2   : > { %v2757_v20 = vrot.slane %v13893_v9, %v15794_v27  ;;  %v17533_v6 = vrot.slane %v5474_v5, %v15794_v27  ;;  %v2740_v60 = vrot.slane %v2726_v7, %v15794_v27  ;;  %v5495_v26 = vrot.slane %v5488_v17, %v15794_v27 }
 0x1b3   : > { %v2741_v37 = vcombine.high %v2733_v42, %v2733_v42  ;;  %v5516_v63 = vrot.slane %v2680_v0, %v15794_v27  ;;  %v2764_v43 = vrot.slane %v2750_v55, %v15794_v27  ;;  %v5509_v28 = vrot.slane %v5502_v14, %v15794_v27 }
 0x1b4   : > { %22856 = vst [vmem:[#allocation36_spill] sm:$0xff] %v17533_v6  ;;  %v5530_v46 = vrot.slane %v2695_v23, %v15794_v27  ;;  %v5544_v58 = vrot.slane %v2702_v1, %v15794_v27  ;;  %v2742_v21 = vcombine.high %v2740_v60, %v2740_v60  ;;  %v2765_v49 = vcombine.high %v2757_v20, %v2757_v20 }
 0x1b5   : > { %v5558_v5 = vrot.slane %v2703_v39, %v15794_v27  ;;  %v5572_v35 = vrot.slane %v2704_v31, %v15794_v27  ;;  %v2766_v24 = vcombine.high %v2764_v43, %v2764_v43  ;;  %v5523_v51 = vrot.slane %v5516_v63, %v15794_v27 }
 0x1b6   : > { %v17546_v33 = vrot.slane %v5530_v46, %v15794_v27  ;;  %v5586_v0 = vrot.slane %v2733_v42, %v15794_v27  ;;  %v17550_v17 = vrot.slane %v5544_v58, %v15794_v27  ;;  %v5600_v1 = vrot.slane %v2740_v60, %v15794_v27 }
 0x1b7   : > { %v5565_v23 = vrot.slane %v5558_v5, %v15794_v27  ;;  %v5614_v4 = vrot.slane %v2741_v37, %v15794_v27  ;;  %v5579_v9 = vrot.slane %v5572_v35, %v15794_v27  ;;  %v5628_v39 = vrot.slane %v2742_v21, %v15794_v27 }
 0x1b8   : > { %v5642_v7 = vrot.slane %v2757_v20, %v15794_v27  ;;  %v5656_v14 = vrot.slane %v2764_v43, %v15794_v27  ;;  %v5607_v31 = vrot.slane %v5600_v1, %v15794_v27  ;;  %v5670_v55 = vrot.slane %v2765_v49, %v15794_v27 }
 0x1b9   : > { %v5621_v42 = vrot.slane %v5614_v4, %v15794_v27  ;;  %v5684_v63 = vrot.slane %v2766_v24, %v15794_v27  ;;  %v17564_v60 = vrot.slane %v5586_v0, %v15794_v27  ;;  %v5635_v37 = vrot.slane %v5628_v39, %v15794_v27 }
 0x1ba   : > { %v17568_v46 = vrot.slane %v5642_v7, %v15794_v27  ;;  %v17571_v20 = vrot.slane %v5656_v14, %v15794_v27  ;;  %v5677_v43 = vrot.slane %v5670_v55, %v15794_v27  ;;  %v17575_v21 = vunpack.c.l.b16 %v5495_v26  ;;  %v13849_v55 = vld.sshfl [vmem:[#allocation2 + $0x20] sm:$0x1 pattern:$0x75316420] }
 0x1bb   : > { %22857 = vst [vmem:[#allocation37_spill] sm:$0xff] %v17564_v60  ;;  %v5691_v58 = vrot.slane %v5684_v63, %v15794_v27  ;;  %v17577_v49 = vunpack.c.l.b16 %v5509_v28  ;;  %v17579_v5 = vunpack.c.l.b16 %v5523_v51  ;;  %v22201_v35 = vunpack.c.l.b16 %v17546_v33  ;;  %v1414_v51 = vld [vmem:[#allocation2 + $0x80] sm:$0x1] }
 0x1bc   : > { %22858 = vst [vmem:[#allocation38_spill] sm:$0xff] %v17568_v46  ;;  %22859 = vst [vmem:[#allocation39_spill] sm:$0xff] %v17575_v21  ;;  %v22202_v24 = vunpack.c.l.b16 %v17550_v17  ;;  %v17583_v0 = vunpack.c.l.b16 %v5565_v23  ;;  %v22208_v1 = vunpack.c.l.b16 %v17533_v6  ;;  %v17586_v4 = vunpack.c.l.b16 %v5579_v9 }
 0x1bd   : > { %22860 = vst [vmem:[#allocation25_spill] sm:$0xff] %v17577_v49  ;;  %22861 = vst [vmem:[#allocation31_spill] sm:$0xff] %v17579_v5  ;;  %v17588_v39 = vunpack.c.l.b16 %v5607_v31  ;;  %v17590_v7 = vunpack.c.l.b16 %v5621_v42  ;;  %v17593_v28 = vunpack.c.l.b16 %v5635_v37  ;;  %v17597_v63 = vunpack.c.l.b16 %v5677_v43 }
 0x1be   : > { %22862 = vst [vmem:[#allocation47_spill] sm:$0xff] %v17583_v0  ;;  %22863 = vst [vmem:[#allocation33_spill] sm:$0xff] %v17586_v4  ;;  %v6401_v23 = vrot.slane %v17575_v21, 7  ;;  %v6403_v9 = vrot.slane %v17577_v49, 6  ;;  %v6405_v31 = vrot.slane %v17579_v5, 5  ;;  %v17602_v62 = vunpack.c.l.b16 %v5691_v58 }
 0x1bf   : > { %22864 = vst [vmem:[#allocation42_spill] sm:$0xff] %v17588_v39  ;;  %22865 = vst [vmem:[#allocation22_spill] sm:$0xff] %v17590_v7  ;;  %v6407_v42 = vrot.slane %v22201_v35, 4  ;;  %v6409_v37 = vrot.slane %v22202_v24, 3  ;;  %v6411_v57 = vrot.slane %v17583_v0, 2  ;;  %v6415_v26 = vrot.slane %v17588_v39, 7 }
 0x1c0   : > { %22866 = vst [vmem:[#allocation50_spill] sm:$0xff] %v17593_v28  ;;  %22867 = vst [vmem:[#allocation32_spill] sm:$0xff] %v17597_v63  ;;  %v6402_v43 = vsel %vm5821_vm9, %v6401_v23, %v22208_v1  ;;  %v6417_v14 = vrot.slane %v17590_v7, 6  ;;  %v6419_v58 = vrot.slane %v17593_v28, 5  ;;  %v6413_v35 = vrot.slane %v17586_v4, 1 }
 0x1c1   : > { %22868 = vst [vmem:[#allocation43_spill] sm:$0xff] %v17602_v62  ;;  %v6404_v3 = vsel %vm5824_vm10, %v6403_v9, %v6402_v43  ;;  %v22869_v24 = vunpack.c.l.b16 %v17568_v46  ;;  %v22870_v2 = vunpack.c.l.b16 %v17571_v20  ;;  %v22871_v23 = vunpack.c.l.b16 %v17564_v60 }
 0x1c2   : > { %v6406_v6 = vsel %vm5827_vm11, %v6405_v31, %v6404_v3  ;;  %v6425_v39 = vrot.slane %v17597_v63, 2  ;;  %v1850_v21 = vrot.slane %v13849_v55, %v15794_v27  ;;  %v22872_v46 = vrot.slane %v22839_v61, 4 }
 0x1c3   : > { %v6421_v52 = vrot.slane %v22869_v24, 4  ;;  %v6423_v44 = vrot.slane %v22870_v2, 3  ;;  %v6416_v1 = vsel %vm5821_vm9, %v6415_v26, %v22871_v23  ;;  %v6408_v9 = vsel %vm5830_vm12, %v6407_v42, %v6406_v6 }
 0x1c4   : > { %v6418_v43 = vsel %vm5824_vm10, %v6417_v14, %v6416_v1  ;;  %v1401_v24 = vsel %vm15767_vm3, %v22872_v46, %v1400_v59  ;;  %v22873_v2 = vrot.slane %v22843_v45, 4  ;;  %v6410_v26 = vsel %vm5833_vm13, %v6409_v37, %v6408_v9  ;;  %v1428_v1 = vld [vmem:[#allocation2 + $0x98] sm:$0x1] }
 0x1c5   : > { %v6420_v31 = vsel %vm5827_vm11, %v6419_v58, %v6418_v43  ;;  %v6427_v55 = vrot.slane %v17602_v62, 1  ;;  %v6611_v6 = vrot.slane %v1850_v21, %v15794_v27  ;;  %1402 = vst [vmem:[#allocation2 + $0x68] sm:$0x1] %v1401_v24  ;;  %v6412_v61 = vsel %vm5836_vm14, %v6411_v57, %v6410_v26  ;;  %v658_v43 = vld [vmem:[#allocation2 + $0xf8] sm:$0x1] }
 0x1c6   : > { %v1415_v3 = vsel %vm15767_vm3, %v22873_v2, %v1414_v51  ;;  %v6422_v59 = vsel %vm5830_vm12, %v6421_v52, %v6420_v31  ;;  %v22874_v45 = vrot.slane %v22737_v56, 3  ;;  %v22875_v51 = vld [vmem:[#allocation49_spill] sm:$0xff]  ;;  %v17649_v42 = vsel %vm5839_vm15, %v6413_v35, %v6412_v61  ;;  %v1442_v52 = vld [vmem:[#allocation2 + $0xb0] sm:$0x1]  ;;  %v22878_v56 = vld [vmem:[#allocation26_spill] sm:$0xff] }
 0x1c7   : > { %1416 = vst [vmem:[#allocation2 + $0x80] sm:$0x1] %v1415_v3  ;;  %v908_v14 = vrot.slane %v22875_v51, 4  ;;  %22876 = vst [vmem:[#allocation51_spill] sm:$0xff] %v17649_v42  ;;  %v6424_v37 = vsel %vm5833_vm13, %v6423_v44, %v6422_v59  ;;  %v6618_v21 = vrot.slane %v6611_v6, %v15794_v27  ;;  %v22877_v58 = vrot.slane %v16665_v30, 3  ;;  %v22883_v31 = vld [vmem:[#allocation56_spill] sm:$0xff] }
 0x1c8   : > { %v6867_v46 = vsel %vm5833_vm13, %v22874_v45, %v17519_v40  ;;  %v6426_v23 = vsel %vm5836_vm14, %v6425_v39, %v6424_v37  ;;  %v942_v9 = vrot.slane %v22878_v56, 4  ;;  %v22879_v35 = vrot.slane %v16756_v50, 7  ;;  %v13873_v26 = vld.sshfl [vmem:[#allocation2 + $0xe0] sm:$0x1 pattern:$0x75316420] }
 0x1c9   : > { %v6875_v57 = vsel %vm5833_vm13, %v22877_v58, %v17527_v25  ;;  %v1429_v40 = vsel %vm15767_vm3, %v908_v14, %v1428_v1  ;;  %v17666_v24 = vsel %vm5839_vm15, %v6427_v55, %v6426_v23  ;;  %v6816_v30 = vunpack.c.l.b16 %v6618_v21  ;;  %v22885_v61 = vld [vmem:[#allocation57_spill] sm:$0xff]  ;;  %v22889_v58 = vld [vmem:[#allocation59_spill] sm:$0xff] }
 0x1ca   : > { %v6879_v44 = vsel %vm5821_vm9, %v22879_v35, %v16753_v19  ;;  %22880 = vst [vmem:[#allocation49_spill] sm:$0xff] %v17666_v24  ;;  %1430 = vst [vmem:[#allocation2 + $0x98] sm:$0x1] %v1429_v40  ;;  %v22881_v25 = vrot.slane %v16758_v29, 6  ;;  %v22882_v2 = vrot.slane %v16769_v10, 7  ;;  %v6436_v50 = vpack.c.b16 %v17666_v24, %v17649_v42 }
 0x1cb   : > { %v1443_v19 = vsel %vm15767_vm3, %v942_v9, %v1442_v52  ;;  %v22884_v6 = vrot.slane %v16771_v32, 6  ;;  %v6845_v1 = vrot.slane %v6816_v30, 1  ;;  %v659_v45 = vsel %vm15774_vm5, 0, %v658_v43 }
 0x1cc   : > { %v6880_v39 = vsel %vm5824_vm10, %v22881_v25, %v6879_v44  ;;  %v6887_v3 = vsel %vm5821_vm9, %v22882_v2, %v16767_v53  ;;  %1444 = vst [vmem:[#allocation2 + $0xb0] sm:$0x1] %v1443_v19  ;;  %v22886_v53 = vld [vmem:[#allocation58_spill] sm:$0xff]  ;;  %14697 = vmatmul.mubr.msk.bf16.gmra.mrb[12].mxu0 %vm6083_vm1, %v6436_v50  ;;  %v22887_v14 = vrot.slane %v22738_v11, 2  ;;  %v22888_v37 = vrot.slane %v16762_v16, 3  ;;  %v22894_v25 = vld [vmem:[#allocation53_spill] sm:$0xff] }
 0x1cd   : > { %v6881_v55 = vsel %vm5827_vm11, %v22883_v31, %v6880_v39  ;;  %v6888_v29 = vsel %vm5824_vm10, %v22884_v6, %v6887_v3  ;;  %v13858_v51 = vld.sshfl [vmem:[#allocation2 + $0x68] sm:$0x1 pattern:$0x75316420]  ;;  %660 = vst [vmem:[#allocation2 + $0xf8] sm:$0x1] %v659_v45  ;;  %v2346_v23 = vrot.slane %v13873_v26, %v15794_v27  ;;  %v17702_v56 = vsel %vm5839_vm15, %v6845_v1, %v17515_v38 }
 0x1ce   : > { %v6882_v10 = vsel %vm5830_vm12, %v22885_v61, %v6881_v55  ;;  %v6889_v59 = vsel %vm5827_vm11, %v22886_v53, %v6888_v29  ;;  %v6868_v32 = vsel %vm5836_vm14, %v22887_v14, %v6867_v46  ;;  %22890 = vst [vmem:[#allocation26_spill] sm:$0xff] %v17702_v56  ;;  %v13861_v9 = vld.sshfl [vmem:[#allocation2 + $0x80] sm:$0x1 pattern:$0x75316420]  ;;  %v2036_v40 = vrot.slane %v13858_v51, %v15794_v27  ;;  %v22892_v16 = vld [vmem:[#allocation54_spill] sm:$0xff] }
 0x1cf   : > { %v6883_v21 = vsel %vm5833_vm13, %v22888_v37, %v6882_v10  ;;  %v6890_v52 = vsel %vm5830_vm12, %v22889_v58, %v6889_v59  ;;  %v22891_v11 = vrot.slane %v16677_v15, 2  ;;  %v22893_v35 = vrot.slane %v22892_v16, 3  ;;  %v22896_v2 = vld [vmem:[#allocation61_spill] sm:$0xff]  ;;  %v22897_v26 = vld [vmem:[#allocation55_spill] sm:$0xff]  ;;  %v22900_v55 = vld [vmem:[#allocation68_spill] sm:$0xff] }
 0x1d0   : > { %v6959_v43 = vpack.c.b16 %v17702_v56, %v17503_v48  ;;  %v2098_v30 = vrot.slane %v13861_v9, %v15794_v27  ;;  %v22895_v39 = vrot.slane %v22894_v25, 2  ;;  %v1010_v3 = vrot.slane %v22896_v2, 4  ;;  %v22899_v19 = vld [vmem:[#allocation67_spill] sm:$0xff]  ;;  %v22901_v1 = vld [vmem:[#allocation64_spill] sm:$0xff]  ;;  %v22904_v53 = vld [vmem:[#allocation65_spill] sm:$0xff] }
 0x1d1   : > { %v6876_v46 = vsel %vm5836_vm14, %v22891_v11, %v6875_v57  ;;  %v6891_v44 = vsel %vm5833_vm13, %v22893_v35, %v6890_v52  ;;  %v6653_v15 = vrot.slane %v2036_v40, %v15794_v27  ;;  %v22898_v57 = vrot.slane %v22897_v26, 2  ;;  %v13864_v29 = vld.sshfl [vmem:[#allocation2 + $0x98] sm:$0x1 pattern:$0x75316420]  ;;  %v22907_v58 = vld [vmem:[#allocation69_spill] sm:$0xff] }
 0x1d2   : > { %v17717_v38 = vsel %vm5836_vm14, %v22895_v39, %v6883_v21  ;;  %v22214_v31 = vrot.slane %v22899_v19, 7  ;;  %v22215_v48 = vrot.slane %v22900_v55, 6  ;;  %14708 = vmatprep.mubr.msk.bf16.mxu0 %vm6083_vm1, %v6959_v43  ;;  %v6667_v6 = vrot.slane %v2098_v30, %v15794_v27  ;;  %v15156_v37 = vld [vmem:[#allocation7 + $0x68] sm:$0xff]   ;;  %v22908_v9 = vld [vmem:[#allocation70_spill] sm:$0xff]  ;;  %v22911_v26 = vld [vmem:[#allocation71_spill] sm:$0xff] }
 0x1d3   : > { %v17724_v50 = vsel %vm5836_vm14, %v22898_v57, %v6891_v44  ;;  %v22902_v61 = vunpack.c.l.b16 %v22901_v1  ;;  %v22905_v59 = vunpack.c.l.b16 %v22904_v53  ;;  %v6709_v51 = vrot.slane %v2346_v23, %v15794_v27  ;;  %v13867_v16 = vld.sshfl [vmem:[#allocation2 + $0xb0] sm:$0x1 pattern:$0x75316420]  ;;  %v22909_v35 = vld [vmem:[#allocation76_spill] sm:$0xff]  ;;  %v22910_v43 = vld [vmem:[#allocation78_spill] sm:$0xff] }
 0x1d4   : > { %v6660_v14 = vrot.slane %v6653_v15, %v15794_v27  ;;  %v2160_v21 = vrot.slane %v13864_v29, %v15794_v27  ;;  %v22216_v52 = vrot.slane %v22907_v58, 3  ;;  %v6674_v11 = vrot.slane %v6667_v6, %v15794_v27  ;;  %v1470_v15 = vld [vmem:[#allocation2 + $0xf8] sm:$0x1]  ;;  %v22915_v53 = vld [vmem:[#allocation73_spill] sm:$0xff]  ;;  %v22918_v40 = vld [vmem:[#allocation66_spill] sm:$0xff] }
 0x1d5   : > { %v17732_v10 = vrot.slane %v22902_v61, 5  ;;  %v17736_v45 = vrot.slane %v22905_v59, 4  ;;  %v22218_v44 = vrot.slane %v22909_v35, 7  ;;  %v22217_v30 = vrot.slane %v22910_v43, 6 }
 0x1d6   : > { %v6716_v25 = vrot.slane %v6709_v51, %v15794_v27  ;;  %v6819_v39 = vunpack.c.l.b16 %v6660_v14  ;;  %v2222_v23 = vrot.slane %v13867_v16, %v15794_v27  ;;  %v6681_v2 = vrot.slane %v2160_v21, %v15794_v27  ;;  %v15273_v21 = vld [vmem:[#allocation7 + $0x60] sm:$0xff]  }
 0x1d7   : > { %22903 = vst [vmem:[#allocation56_spill] sm:$0xff] %v17732_v10  ;;  %22906 = vst [vmem:[#allocation57_spill] sm:$0xff] %v17736_v45  ;;  %v22912_v57 = vunpack.c.l.b16 %v22911_v26  ;;  %v22914_v6 = vpack.c.b16 %v17446_v36, %v16545_v13  ;;  %v6820_v1 = vunpack.c.l.b16 %v6674_v11  ;;  %v1471_v61 = vsel %vm15767_vm3, %v1010_v3, %v1470_v15  ;;  %v22919_v3 = vld [vmem:[#allocation74_spill] sm:$0xff] }
 0x1d8   : > { %v22916_v59 = vunpack.c.l.b16 %v22915_v53  ;;  %v6823_v14 = vunpack.c.l.b16 %v6716_v25  ;;  %v6869_v16 = vrot.slane %v6819_v39, 1  ;;  %v6688_v26 = vrot.slane %v6681_v2, %v15794_v27  ;;  %1472 = vst [vmem:[#allocation2 + $0xf8] sm:$0x1] %v1471_v61  ;;  %v22920_v53 = vld [vmem:[#allocation75_spill] sm:$0xff] }
 0x1d9   : > { %v17751_v29 = vrot.slane %v22912_v57, 5  ;;  %14709 = vmatmul.mubr.msk.bf16.vlgmr.msra.gmra.mrb[0].mxu0 %vm6083_vm1, %v22914_v6  ;;  %v6695_v57 = vrot.slane %v2222_v23, %v15794_v27  ;;  %v6895_v11 = vsel %vm5821_vm9, %v22214_v31, %v22918_v40  ;;  %v6877_v6 = vrot.slane %v6820_v1, 1  ;;  %v15157_v23 = vld [vmem:[#allocation7 + $0x70] sm:$0xff]   ;;  %v670_v31 = vld [vmem:[#allocation2 + $0x128] sm:$0x1] }
 0x1da   : > { %v17761_v51 = vrot.slane %v22916_v59, 4  ;;  %14725 = vmatpush3.bf16.msra.mxu0 %v15273_v21  ;;  %v6896_v25 = vsel %vm5824_vm10, %v22215_v48, %v6895_v11  ;;  %v6903_v39 = vsel %vm5821_vm9, %v22218_v44, %v22920_v53  ;;  %v17778_v2 = vsel %vm5839_vm15, %v6869_v16, %v6868_v32  ;;  %v664_v21 = vld [vmem:[#allocation2 + $0x110] sm:$0x1]  ;;  %v694_v40 = vld [vmem:[#allocation2 + $0x188] sm:$0x1] }
 0x1db   : > { %22913 = vst [vmem:[#allocation58_spill] sm:$0xff] %v17751_v29  ;;  %14726 = vmatprep.subr.bf16.mxu0 %v15156_v37  ;;  %22921 = vst [vmem:[#allocation54_spill] sm:$0xff] %v17778_v2  ;;  %v6702_v61 = vrot.slane %v6695_v57, %v15794_v27  ;;  %v6821_v59 = vunpack.c.l.b16 %v6688_v26  ;;  %v6897_v1 = vsel %vm5827_vm11, %v17732_v10, %v6896_v25  ;;  %v6901_v48 = vrot.slane %v6823_v14, 1  ;;  %v22940_v44 = vld [vmem:[#allocation95_spill] sm:$0xff] }
 0x1dc   : > { %22917 = vst [vmem:[#allocation59_spill] sm:$0xff] %v17761_v51  ;;  %v17784_v15 = vsel %vm5839_vm15, %v6877_v6, %v6876_v46  ;;  %v6898_v11 = vsel %vm5830_vm12, %v17736_v45, %v6897_v1  ;;  %v6904_v32 = vsel %vm5824_vm10, %v22217_v30, %v6903_v39  ;;  %v22923_v46 = vrot.slane %v22908_v9, 2  ;;  %v22931_v30 = vld [vmem:[#allocation90_spill] sm:$0xff] }
 0x1dd   : > { %22922 = vst [vmem:[#allocation53_spill] sm:$0xff] %v17784_v15  ;;  %v6961_v16 = vpack.c.b16 %v17784_v15, %v17778_v2  ;;  %v6822_v26 = vunpack.c.l.b16 %v6702_v61  ;;  %v6885_v57 = vrot.slane %v6821_v59, 1  ;;  %v6899_v25 = vsel %vm5833_vm13, %v22216_v52, %v6898_v11  ;;  %v15158_v59 = vld [vmem:[#allocation7 + $0x78] sm:$0xff]   ;;  %v22938_v15 = vld [vmem:[#allocation91_spill] sm:$0xff] }
 0x1de   : > { %14727 = vmatpush3.bf16.msra.mxu0 %v15156_v37  ;;  %v6900_v6 = vsel %vm5836_vm14, %v22923_v46, %v6899_v25  ;;  %v6905_v14 = vsel %vm5827_vm11, %v17751_v29, %v6904_v32  ;;  %v665_v39 = vsel %vm15774_vm5, 0, %v664_v21  ;;  %v671_v61 = vsel %vm15774_vm5, 0, %v670_v31  ;;  %v22925_v25 = vld [vmem:[#allocation77_spill] sm:$0xff] }
 0x1df   : > { %14728 = vmatprep.subr.bf16.mxu0 %v15157_v23  ;;  %14712 = vmatprep.mubr.msk.bf16.mxu0 %vm6083_vm1, %v6961_v16  ;;  %v17808_v37 = vsel %vm5839_vm15, %v6885_v57, %v17717_v38  ;;  %v6893_v1 = vrot.slane %v6822_v26, 1  ;;  %v6906_v11 = vsel %vm5830_vm12, %v17761_v51, %v6905_v14  ;;  %666 = vst [vmem:[#allocation2 + $0x110] sm:$0x1] %v665_v39  ;;  %672 = vst [vmem:[#allocation2 + $0x128] sm:$0x1] %v671_v61  ;;  %v22928_v57 = vld [vmem:[#allocation79_spill] sm:$0xff] }
 0x1e0   : > { %22924 = vst [vmem:[#allocation61_spill] sm:$0xff] %v17808_v37  ;;  %v13876_v32 = vld.sshfl [vmem:[#allocation2 + $0xf8] sm:$0x1 pattern:$0x75316420]  ;;  %v17814_v21 = vsel %vm5839_vm15, %v6901_v48, %v6900_v6  ;;  %v22926_v31 = vrot.slane %v22919_v3, 3  ;;  %v22941_v36 = vunpack.c.l.b16 %v17205_v41 }
 0x1e1   : > { %v17821_v38 = vsel %vm5839_vm15, %v6893_v1, %v17724_v50  ;;  %v2408_v26 = vrot.slane %v13876_v32, %v15794_v27  ;;  %v1044_v14 = vrot.slane %v22928_v57, 4  ;;  %v22929_v39 = vld [vmem:[#allocation89_spill] sm:$0xff]  ;;  %v22930_v48 = vld [vmem:[#allocation80_spill] sm:$0xff]  ;;  %v17834_v1 = vld [vmem:[#allocation7 + $0x80] sm:$0xff]   ;;  %v22948_v2 = vrot.slane %v17229_v18, 7 }
 0x1e2   : > { %v6907_v16 = vsel %vm5833_vm13, %v22926_v31, %v6906_v11  ;;  %22927 = vst [vmem:[#allocation55_spill] sm:$0xff] %v17821_v38  ;;  %14729 = vmatpush3.bf16.msra.mxu0 %v15157_v23  ;;  %v6962_v52 = vpack.c.b16 %v17821_v38, %v17808_v37  ;;  %v1078_v6 = vrot.slane %v22930_v48, 4  ;;  %v22932_v46 = vld [vmem:[#allocation85_spill] sm:$0xff]  ;;  %v22935_v57 = vld [vmem:[#allocation86_spill] sm:$0xff]  ;;  %v682_v37 = vld [vmem:[#allocation2 + $0x158] sm:$0x1] }
 0x1e3   : > { %v22933_v11 = vunpack.c.l.b16 %v22932_v46  ;;  %v676_v50 = vld [vmem:[#allocation2 + $0x140] sm:$0x1]  ;;  %14730 = vmatprep.subr.bf16.mxu0 %v15158_v59  ;;  %v6723_v32 = vrot.slane %v2408_v26, %v15794_v27  ;;  %v22936_v61 = vunpack.c.l.b16 %v22935_v57  ;;  %v22939_v46 = vld [vmem:[#allocation92_spill] sm:$0xff]  ;;  %v17848_v13 = vrot.slane %v22941_v36, 5 }
 0x1e4   : > { %14713 = vmatmul.mubr.msk.bf16.gmra.mrb[4].mxu0 %vm6083_vm1, %v6962_v52  ;;  %v22943_v26 = vunpack.c.l.b16 %v17212_v22  ;;  %v22945_v48 = vld [vmem:[#allocation88_spill] sm:$0xff]  ;;  %v22946_v56 = vrot.slane %v22929_v39, 7  ;;  %v22949_v22 = vrot.slane %v22931_v30, 6  ;;  %v677_v58 = vsel %vm15774_vm5, 0, %v676_v50 }
 0x1e5   : > { %v17832_v31 = vrot.slane %v22933_v11, 5  ;;  %v17839_v23 = vrot.slane %v22936_v61, 4  ;;  %22942 = vst [vmem:[#allocation71_spill] sm:$0xff] %v17848_v13  ;;  %v6730_v61 = vrot.slane %v6723_v32, %v15794_v27  ;;  %v22947_v11 = vld [vmem:[#allocation93_spill] sm:$0xff]  ;;  %v22950_v32 = vrot.slane %v22940_v44, 6 }
 0x1e6   : > { %v17852_v57 = vrot.slane %v22943_v26, 4  ;;  %v6911_v52 = vsel %vm5821_vm9, %v22946_v56, %v22945_v48  ;;  %v6919_v41 = vsel %vm5821_vm9, %v22948_v2, %v22947_v11  ;;  %14731 = vmatpush3.bf16.msra.mxu0 %v15158_v59  ;;  %v1484_v36 = vld [vmem:[#allocation2 + $0x110] sm:$0x1]  ;;  %v1498_v9 = vld [vmem:[#allocation2 + $0x128] sm:$0x1]  ;;  %v683_v56 = vsel %vm15774_vm5, 0, %v682_v37 }
 0x1e7   : > { %22934 = vst [vmem:[#allocation64_spill] sm:$0xff] %v17832_v31  ;;  %22937 = vst [vmem:[#allocation65_spill] sm:$0xff] %v17839_v23  ;;  %v6912_v26 = vsel %vm5824_vm10, %v22949_v22, %v6911_v52  ;;  %v6920_v38 = vsel %vm5824_vm10, %v22950_v32, %v6919_v41  ;;  %14748 = vmatprep.subr.bf16.mxu0 %v17834_v1  ;;  %v6824_v2 = vunpack.c.l.b16 %v6730_v61  ;;  %v22951_v41 = vrot.slane %v22925_v25, 2  ;;  %v22952_v37 = vld [vmem:[#allocation97_spill] sm:$0xff]  ;;  %v688_v22 = vld [vmem:[#allocation2 + $0x170] sm:$0x1] }
 0x1e8   : > { %22944 = vst [vmem:[#allocation73_spill] sm:$0xff] %v17852_v57  ;;  %v1485_v59 = vsel %vm15767_vm3, %v1044_v14, %v1484_v36  ;;  %v1499_v45 = vsel %vm15767_vm3, %v1078_v6, %v1498_v9  ;;  %v6913_v52 = vsel %vm5827_vm11, %v17832_v31, %v6912_v26  ;;  %678 = vst [vmem:[#allocation2 + $0x140] sm:$0x1] %v677_v58  ;;  %v22953_v6 = vrot.slane %v22938_v15, 3  ;;  %v22954_v26 = vld [vmem:[#allocation82_spill] sm:$0xff]  ;;  %v22974_v15 = vld [vmem:[#allocation105_spill] sm:$0xff] }
 0x1e9   : > { %684 = vst [vmem:[#allocation2 + $0x158] sm:$0x1] %v683_v56  ;;  %v6908_v50 = vsel %vm5836_vm14, %v22951_v41, %v6907_v16  ;;  %1486 = vst [vmem:[#allocation2 + $0x110] sm:$0x1] %v1485_v59  ;;  %v6914_v61 = vsel %vm5830_vm12, %v17839_v23, %v6913_v52  ;;  %v6921_v14 = vsel %vm5827_vm11, %v17848_v13, %v6920_v38  ;;  %v6909_v9 = vrot.slane %v6824_v2, 1  ;;  %v22957_v38 = vld [vmem:[#allocation83_spill] sm:$0xff] }
 0x1ea   : > { %1500 = vst [vmem:[#allocation2 + $0x128] sm:$0x1] %v1499_v45  ;;  %v6915_v58 = vsel %vm5833_vm13, %v22953_v6, %v6914_v61  ;;  %v6922_v36 = vsel %vm5830_vm12, %v17852_v57, %v6921_v14  ;;  %v1112_v16 = vrot.slane %v22954_v26, 4  ;;  %v22955_v45 = vrot.slane %v22939_v46, 2  ;;  %v22958_v52 = vld [vmem:[#allocation107_spill] sm:$0xff]  ;;  %v22960_v14 = vld [vmem:[#allocation108_spill] sm:$0xff] }
 0x1eb   : > { %v22956_v56 = vrot.slane %v17235_v47, 3  ;;  %v1146_v2 = vrot.slane %v22957_v38, 4  ;;  %v17906_v61 = vsel %vm5839_vm15, %v6909_v9, %v6908_v50  ;;  %v22961_v26 = vld [vmem:[#allocation101_spill] sm:$0xff]  ;;  %v22968_v41 = vld [vmem:[#allocation112_spill] sm:$0xff]  ;;  %v22970_v46 = vld [vmem:[#allocation110_spill] sm:$0xff]  ;;  %v22979_v47 = vrot.slane %v22958_v52, 7 }
 0x1ec   : > { %v17898_v32 = vsel %vm5836_vm14, %v22955_v45, %v6915_v58  ;;  %22959 = vst [vmem:[#allocation79_spill] sm:$0xff] %v17906_v61  ;;  %v22962_v10 = vunpack.c.l.b16 %v22961_v26  ;;  %v22964_v58 = vld [vmem:[#allocation102_spill] sm:$0xff]  ;;  %v22969_v50 = vld [vmem:[#allocation113_spill] sm:$0xff]  ;;  %v22971_v57 = vld [vmem:[#allocation104_spill] sm:$0xff]  ;;  %v22984_v44 = vrot.slane %v22952_v37, 2 }
 0x1ed   : > { %v6923_v59 = vsel %vm5833_vm13, %v22956_v56, %v6922_v36  ;;  %v22965_v45 = vunpack.c.l.b16 %v22964_v58  ;;  %v6963_v36 = vpack.c.b16 %v17906_v61, %v17814_v21  ;;  %v22967_v56 = vld [vmem:[#allocation109_spill] sm:$0xff]  ;;  %v22972_v26 = vunpack.c.l.b16 %v22971_v57  ;;  %v22977_v25 = vld [vmem:[#allocation114_spill] sm:$0xff]  ;;  %v22980_v6 = vld [vmem:[#allocation111_spill] sm:$0xff] }
 0x1ee   : > { %v17911_v55 = vrot.slane %v22962_v10, 5  ;;  %v22975_v58 = vunpack.c.l.b16 %v22974_v15  ;;  %v22978_v61 = vld [vmem:[#allocation106_spill] sm:$0xff]  ;;  %v22981_v57 = vrot.slane %v22968_v41, 7  ;;  %v689_v15 = vsel %vm15774_vm5, 0, %v688_v22 }
 0x1ef   : > { %v17915_v19 = vrot.slane %v22965_v45, 4  ;;  %v17925_v10 = vrot.slane %v22972_v26, 5  ;;  %14716 = vmatprep.mubr.msk.bf16.mxu0 %vm6083_vm1, %v6963_v36  ;;  %v1512_v21 = vld [vmem:[#allocation2 + $0x140] sm:$0x1]  ;;  %v6927_v9 = vsel %vm5821_vm9, %v22979_v47, %v22978_v61  ;;  %v22982_v47 = vrot.slane %v22960_v14, 6 }
 0x1f0   : > { %22963 = vst [vmem:[#allocation80_spill] sm:$0xff] %v17911_v55  ;;  %v17929_v45 = vrot.slane %v22975_v58, 4  ;;  %v1526_v38 = vld [vmem:[#allocation2 + $0x158] sm:$0x1]  ;;  %v6935_v26 = vsel %vm5821_vm9, %v22981_v57, %v22980_v6  ;;  %v695_v58 = vsel %vm15774_vm5, 0, %v694_v40  ;;  %v1513_v36 = vsel %vm15767_vm3, %v1112_v16, %v1512_v21 }
 0x1f1   : > { %22966 = vst [vmem:[#allocation85_spill] sm:$0xff] %v17915_v19  ;;  %22973 = vst [vmem:[#allocation86_spill] sm:$0xff] %v17925_v10  ;;  %v13879_v13 = vld.sshfl [vmem:[#allocation2 + $0x110] sm:$0x1 pattern:$0x75316420]  ;;  %v1527_v23 = vsel %vm15767_vm3, %v1146_v2, %v1526_v38  ;;  %v6928_v3 = vsel %vm5824_vm10, %v22982_v47, %v6927_v9  ;;  %v6924_v16 = vsel %vm5836_vm14, %v22984_v44, %v6923_v59 }
 0x1f2   : > { %22976 = vst [vmem:[#allocation82_spill] sm:$0xff] %v17929_v45  ;;  %v22983_v60 = vrot.slane %v22969_v50, 6  ;;  %690 = vst [vmem:[#allocation2 + $0x170] sm:$0x1] %v689_v15  ;;  %v2470_v40 = vrot.slane %v13879_v13, %v15794_v27  ;;  %v6929_v2 = vsel %vm5827_vm11, %v17911_v55, %v6928_v3  ;;  %v1180_v3 = vrot.slane %v17408_v34, 4 }
 0x1f3   : > { %696 = vst [vmem:[#allocation2 + $0x188] sm:$0x1] %v695_v58  ;;  %v13882_v22 = vld.sshfl [vmem:[#allocation2 + $0x128] sm:$0x1 pattern:$0x75316420]  ;;  %v22989_v34 = vunpack.c.l.b16 %v17546_v33 }
 0x1f4   : > { %v6936_v57 = vsel %vm5824_vm10, %v22983_v60, %v6935_v26  ;;  %1514 = vst [vmem:[#allocation2 + $0x140] sm:$0x1] %v1513_v36  ;;  %1528 = vst [vmem:[#allocation2 + $0x158] sm:$0x1] %v1527_v23  ;;  %v2532_v9 = vrot.slane %v13882_v22, %v15794_v27  ;;  %v22985_v60 = vld [vmem:[#allocation115_spill] sm:$0xff]  ;;  %v6930_v26 = vsel %vm5830_vm12, %v17915_v19, %v6929_v2  ;;  %v22986_v23 = vrot.slane %v22967_v56, 3 }
 0x1f5   : > { %v6937_v38 = vsel %vm5827_vm11, %v17925_v10, %v6936_v57  ;;  %v6737_v44 = vrot.slane %v2470_v40, %v15794_v27  ;;  %v22987_v36 = vrot.slane %v22970_v46, 2  ;;  %v22988_v57 = vrot.slane %v22977_v25, 3  ;;  %v22993_v33 = vld [vmem:[#allocation38_spill] sm:$0xff] }
 0x1f6   : > { %v6938_v13 = vsel %vm5830_vm12, %v17929_v45, %v6937_v38  ;;  %v6931_v59 = vsel %vm5833_vm13, %v22986_v23, %v6930_v26  ;;  %v6751_v58 = vrot.slane %v2532_v9, %v15794_v27  ;;  %v1214_v40 = vrot.slane %v17419_v54, 4 }
 0x1f7   : > { %v17979_v47 = vsel %vm5836_vm14, %v22987_v36, %v6931_v59  ;;  %v6939_v22 = vsel %vm5833_vm13, %v22988_v57, %v6938_v13  ;;  %v6744_v2 = vrot.slane %v6737_v44, %v15794_v27  ;;  %v17989_v26 = vrot.slane %v22989_v34, 5 }
 0x1f8   : > { %v22991_v9 = vunpack.c.l.b16 %v17550_v17  ;;  %v6758_v59 = vrot.slane %v6751_v58, %v15794_v27  ;;  %v22994_v34 = vunpack.c.l.b16 %v22993_v33  ;;  %v22996_v17 = vld [vmem:[#allocation39_spill] sm:$0xff]  ;;  %v22998_v54 = vunpack.c.l.b16 %v17571_v20 }
 0x1f9   : > { %22990 = vst [vmem:[#allocation83_spill] sm:$0xff] %v17989_v26  ;;  %v6825_v57 = vunpack.c.l.b16 %v6744_v2  ;;  %v1540_v44 = vld [vmem:[#allocation2 + $0x170] sm:$0x1] }
 0x1fa   : > { %v17993_v23 = vrot.slane %v22991_v9, 4  ;;  %v1554_v21 = vld [vmem:[#allocation2 + $0x188] sm:$0x1]  ;;  %v18002_v15 = vrot.slane %v22994_v34, 5  ;;  %v22997_v9 = vrot.slane %v17577_v49, 7  ;;  %v6826_v46 = vunpack.c.l.b16 %v6758_v59 }
 0x1fb   : > { %v13885_v36 = vld.sshfl [vmem:[#allocation2 + $0x140] sm:$0x1 pattern:$0x75316420]  ;;  %v1541_v13 = vsel %vm15767_vm3, %v1180_v3, %v1540_v44  ;;  %v1555_v2 = vsel %vm15767_vm3, %v1214_v40, %v1554_v21  ;;  %v18014_v38 = vrot.slane %v22998_v54, 4  ;;  %v6917_v33 = vrot.slane %v6825_v57, 1 }
 0x1fc   : > { %22992 = vst [vmem:[#allocation101_spill] sm:$0xff] %v17993_v23  ;;  %22995 = vst [vmem:[#allocation102_spill] sm:$0xff] %v18002_v15  ;;  %v6943_v58 = vsel %vm5821_vm9, %v22997_v9, %v22996_v17  ;;  %v13888_v34 = vld.sshfl [vmem:[#allocation2 + $0x158] sm:$0x1 pattern:$0x75316420]  ;;  %v2594_v37 = vrot.slane %v13885_v36, %v15794_v27 }
 0x1fd   : > { %22999 = vst [vmem:[#allocation104_spill] sm:$0xff] %v18014_v38  ;;  %1542 = vst [vmem:[#allocation2 + $0x170] sm:$0x1] %v1541_v13  ;;  %v23000_v59 = vrot.slane %v17579_v5, 6  ;;  %v6925_v44 = vrot.slane %v6826_v46, 1  ;;  %v2656_v21 = vrot.slane %v13888_v34, %v15794_v27  ;;  %v23001_v40 = vld [vmem:[#allocation42_spill] sm:$0xff]  ;;  %v18030_v13 = vsel %vm5839_vm15, %v6917_v33, %v17898_v32 }
 0x1fe   : > { %1556 = vst [vmem:[#allocation2 + $0x188] sm:$0x1] %v1555_v2  ;;  %v23002_v54 = vrot.slane %v17590_v7, 7  ;;  %23003 = vst [vmem:[#allocation105_spill] sm:$0xff] %v18030_v13  ;;  %v6765_v57 = vrot.slane %v2594_v37, %v15794_v27  ;;  %v509_v34 = vld [vmem:[#allocation2 + $0xc] sm:$0x1] }
 0x1ff   : > { %v6944_v3 = vsel %vm5824_vm10, %v23000_v59, %v6943_v58  ;;  %v23004_v58 = vrot.slane %v17593_v28, 6  ;;  %v515_v59 = vld [vmem:[#allocation2 + $0x24] sm:$0x1]  ;;  %v426_v33 = vld [vmem:[%s15744_s12] sm:$0xf]  ;;  %v23007_v32 = vrot.slane %v17597_v63, 3 }
 0x200   : > { %v6945_v20 = vsel %vm5827_vm11, %v17989_v26, %v6944_v3  ;;  %v6951_v36 = vsel %vm5821_vm9, %v23002_v54, %v23001_v40  ;;  %v18039_v3 = vsel %vm5839_vm15, %v6925_v44, %v6924_v16  ;;  %v6779_v54 = vrot.slane %v2656_v21, %v15794_v27  ;;  %v427_v44 = vld [vmem:[%s15744_s12 + $0x4] sm:$0xf] }
 0x201   : > { %v6946_v46 = vsel %vm5830_vm12, %v17993_v23, %v6945_v20  ;;  %v6952_v2 = vsel %vm5824_vm10, %v23004_v58, %v6951_v36  ;;  %23005 = vst [vmem:[#allocation38_spill] sm:$0xff] %v18039_v3  ;;  %v6964_v20 = vpack.c.b16 %v18039_v3, %v18030_v13  ;;  %v6772_v9 = vrot.slane %v6765_v57, %v15794_v27  ;;  %v533_v23 = vld [vmem:[#allocation2 + $0x6c] sm:$0x1] }
 0x202   : > { %v6953_v37 = vsel %vm5827_vm11, %v18002_v15, %v6952_v2  ;;  %v23006_v36 = vrot.slane %v17583_v0, 3  ;;  %v6786_v21 = vrot.slane %v6779_v54, %v15794_v27  ;;  %v510_v15 = vsel %vm15767_vm3, 0, %v509_v34 }
 0x203   : > { %v6954_v16 = vsel %vm5830_vm12, %v18014_v38, %v6953_v37  ;;  %v516_v57 = vsel %vm15767_vm3, 0, %v515_v59  ;;  %14717 = vmatmul.mubr.msk.bf16.gmra.mrb[8].mxu0 %vm6083_vm1, %v6964_v20  ;;  %v6827_v3 = vunpack.c.l.b16 %v6772_v9  ;;  %511 = vst [vmem:[#allocation2 + $0xc] sm:$0x1] %v510_v15  ;;  %v706_v54 = vshrl.u32 %v426_v33, 16 }
 0x204   : > { %v6947_v58 = vsel %vm5833_vm13, %v23006_v36, %v6946_v46  ;;  %v6955_v2 = vsel %vm5833_vm13, %v23007_v32, %v6954_v16  ;;  %v23008_v46 = vrot.slane %v22985_v60, 2  ;;  %v430_v36 = vld [vmem:[%s15744_s12 + $0x10] sm:$0xf]  ;;  %517 = vst [vmem:[#allocation2 + $0x24] sm:$0x1] %v516_v57  ;;  %v709_v13 = vshll.u32 %v426_v33, 16 }
 0x205   : > { %v6828_v32 = vunpack.c.l.b16 %v6786_v21  ;;  %v13891_v16 = vld.sshfl [vmem:[#allocation2 + $0x170] sm:$0x1 pattern:$0x75316420]  ;;  %v23009_v34 = vrot.slane %v17586_v4, 2  ;;  %v714_v59 = vshrl.u32 %v427_v44, 16 }
 0x206   : > { %v6940_v37 = vsel %vm5836_vm14, %v23008_v46, %v6939_v22  ;;  %v717_v38 = vshll.u32 %v427_v44, 16  ;;  %v6933_v20 = vrot.slane %v6827_v3, 1  ;;  %v13894_v9 = vld.sshfl [vmem:[#allocation2 + $0x188] sm:$0x1 pattern:$0x75316420]  ;;  %v2718_v0 = vrot.slane %v13891_v16, %v15794_v27 }
 0x207   : > { %v6948_v63 = vsel %vm5836_vm14, %v23009_v34, %v6947_v58  ;;  %v23010_v22 = vrot.slane %v17602_v62, 2  ;;  %v708_v46 = vrot.slane %v706_v54, 7  ;;  %v6941_v57 = vrot.slane %v6828_v32, 1  ;;  %v431_v21 = vld [vmem:[%s15744_s12 + $0x14] sm:$0xf] }
 0x208   : > { %v2780_v33 = vrot.slane %v13894_v9, %v15794_v27  ;;  %v18077_v60 = vrot.slane %v714_v59, 7  ;;  %v740_v4 = vshrl.u32 %v430_v36, 16  ;;  %v18081_v58 = vsel %vm5839_vm15, %v6933_v20, %v17979_v47  ;;  %v521_v9 = vld [vmem:[#allocation2 + $0x3c] sm:$0x1] }
 0x209   : > { %v6956_v15 = vsel %vm5836_vm14, %v23010_v22, %v6955_v2  ;;  %23012 = vst [vmem:[#allocation120_spill] sm:$0xff] %v18081_v58  ;;  %v6793_v3 = vrot.slane %v2718_v0, %v15794_v27  ;;  %v711_v44 = vor.u32 %v709_v13, %v708_v46  ;;  %v712_v16 = vrot.slane %v708_v46, 4  ;;  %v434_v0 = vld [vmem:[%s15744_s12 + $0x20] sm:$0xf]  ;;  %v527_v13 = vld [vmem:[#allocation2 + $0x54] sm:$0x1] }
 0x20a   : > { %23011 = vst [vmem:[#allocation119_spill] sm:$0xff] %v18077_v60  ;;  %v18085_v34 = vsel %vm5839_vm15, %v6941_v57, %v6940_v37  ;;  %v6807_v2 = vrot.slane %v2780_v33, %v15794_v27  ;;  %v719_v54 = vor.u32 %v717_v38, %v18077_v60  ;;  %v742_v32 = vrot.slane %v740_v4, 7  ;;  %v1347_v4 = vld [vmem:[#allocation2 + $0xc] sm:$0xf] }
 0x20b   : > { %23013 = vst [vmem:[#allocation121_spill] sm:$0xff] %v18085_v34  ;;  %v6965_v59 = vpack.c.b16 %v18085_v34, %v18081_v58  ;;  %v6800_v22 = vrot.slane %v6793_v3, %v15794_v27  ;;  %v743_v47 = vshll.u32 %v430_v36, 16  ;;  %v748_v20 = vshrl.u32 %v431_v21, 16  ;;  %v1361_v62 = vld [vmem:[#allocation2 + $0x24] sm:$0xf] }
 0x20c   : > { %v6814_v37 = vrot.slane %v6807_v2, %v15794_v27  ;;  %v720_v57 = vsel %vm15813_vm7, %v712_v16, %v719_v54  ;;  %v746_v33 = vrot.slane %v742_v32, 4  ;;  %v751_v38 = vshll.u32 %v431_v21, 16  ;;  %v435_v2 = vld [vmem:[%s15744_s12 + $0x24] sm:$0xf]  ;;  %v438_v16 = vld [vmem:[%s15744_s12 + $0x30] sm:$0xf] }
 0x20d   : > { %14720 = vmatprep.mubr.msk.bf16.mxu0 %vm6083_vm1, %v6965_v59  ;;  %v6829_v34 = vunpack.c.l.b16 %v6800_v22  ;;  %v745_v58 = vor.u32 %v743_v47, %v742_v32  ;;  %v18097_v3 = vrot.slane %v748_v20, 7  ;;  %v1348_v25 = vsel %vm15828_vm8, %v711_v44, %v1347_v4  ;;  %1350 = vst.msk [vmem:[#allocation2 + $0x10] sm:$0xf] %vm490_vm0, %v720_v57 }
 0x20e   : > { %v6830_v28 = vunpack.c.l.b16 %v6814_v37  ;;  %1349 = vst [vmem:[#allocation2 + $0xc] sm:$0xf] %v1348_v25  ;;  %v522_v21 = vsel %vm15767_vm3, 0, %v521_v9  ;;  %v528_v54 = vsel %vm15767_vm3, 0, %v527_v13  ;;  %v774_v59 = vshrl.u32 %v434_v0, 16 }
 0x20f   : > { %23015 = vst [vmem:[#allocation122_spill] sm:$0xff] %v18097_v3  ;;  %v6949_v32 = vrot.slane %v6829_v34, 1  ;;  %v753_v22 = vor.u32 %v751_v38, %v18097_v3  ;;  %v1362_v44 = vsel %vm15828_vm8, %v745_v58, %v1361_v62  ;;  %523 = vst [vmem:[#allocation2 + $0x3c] sm:$0x1] %v522_v21  ;;  %v777_v47 = vshll.u32 %v434_v0, 16 }
 0x210   : > { %529 = vst [vmem:[#allocation2 + $0x54] sm:$0x1] %v528_v54  ;;  %v6957_v20 = vrot.slane %v6830_v28, 1  ;;  %1363 = vst [vmem:[#allocation2 + $0x24] sm:$0xf] %v1362_v44  ;;  %v776_v37 = vrot.slane %v774_v59, 7 }
 0x211   : > { %v18112_v25 = vld [vmem:[%s15744_s12 + $0x34] sm:$0xf]  ;;  %v782_v57 = vshrl.u32 %v435_v2, 16  ;;  %v785_v9 = vshll.u32 %v435_v2, 16  ;;  %v18115_v4 = vsel %vm5839_vm15, %v6949_v32, %v6948_v63  ;;  %v754_v34 = vsel %vm15813_vm7, %v746_v33, %v753_v22 }
 0x212   : > { %23017 = vst [vmem:[#allocation123_spill] sm:$0xff] %v18115_v4  ;;  %v808_v13 = vshrl.u32 %v438_v16, 16  ;;  %v811_v38 = vshll.u32 %v438_v16, 16  ;;  %v539_v62 = vld [vmem:[#allocation2 + $0x84] sm:$0x1]  ;;  %v18120_v58 = vsel %vm5839_vm15, %v6957_v20, %v6956_v15  ;;  %v779_v28 = vor.u32 %v777_v47, %v776_v37 }
 0x213   : > { %23018 = vst [vmem:[#allocation124_spill] sm:$0xff] %v18120_v58  ;;  %1364 = vst.msk [vmem:[#allocation2 + $0x28] sm:$0xf] %vm490_vm0, %v754_v34  ;;  %v780_v0 = vrot.slane %v776_v37, 4  ;;  %v18123_v21 = vrot.slane %v782_v57, 7  ;;  %v6966_v63 = vpack.c.b16 %v18120_v58, %v18115_v4  ;;  %v816_v33 = vshrl.u32 %v18112_v25, 16 }
 0x214   : > { %v18127_v2 = vrot.slane %v808_v13, 7  ;;  %v13899_v54 = vld.sshfl [vmem:[#allocation2 + $0x10] sm:$0x33 pattern:$0x75316420]  ;;  %v534_v15 = vsel %vm15767_vm3, 0, %v533_v23 }
 0x215   : > { %23019 = vst [vmem:[#allocation125_spill] sm:$0xff] %v18123_v21  ;;  %v787_v59 = vor.u32 %v785_v9, %v18123_v21  ;;  %v540_v32 = vsel %vm15767_vm3, 0, %v539_v62  ;;  %14721 = vmatmul.mubr.msk.bf16.gmra.mrb[12].mxu0 %vm6083_vm1, %v6966_v63  ;;  %v13898_v22 = vld.sshfl [vmem:[#allocation2 + $0xc] sm:$0x33 pattern:$0x75316420]  ;;  %v2922_v44 = vcombine.high %v13899_v54, %v13899_v54  ;;  %v2929_v47 = vrot.slane %v13899_v54, %v15794_v27 }
 0x216   : > { %v18139_v20 = vor.u32 %v811_v38, %v18127_v2  ;;  %535 = vst [vmem:[#allocation2 + $0x6c] sm:$0x1] %v534_v15  ;;  %541 = vst [vmem:[#allocation2 + $0x84] sm:$0x1] %v540_v32  ;;  %v2898_v57 = vcombine.high %v13898_v22, %v13898_v22  ;;  %v2905_v9 = vrot.slane %v13898_v22, %v15794_v27  ;;  %v18145_v34 = vrot.slane %v816_v33, 7 }
 0x217   : > { %v788_v23 = vsel %vm15813_vm7, %v780_v0, %v787_v59  ;;  %v1375_v13 = vld [vmem:[#allocation2 + $0x3c] sm:$0xf]  ;;  %v13901_v62 = vld.sshfl [vmem:[#allocation2 + $0x24] sm:$0x33 pattern:$0x75316420]  ;;  %v2936_v63 = vrot.slane %v2922_v44, %v15794_v27  ;;  %v2937_v54 = vcombine.high %v2929_v47, %v2929_v47  ;;  %v7199_v38 = vrot.slane %v2929_v47, %v15794_v27 }
 0x218   : > { %23020 = vst [vmem:[#allocation126_spill] sm:$0xff] %v18145_v34  ;;  %v1376_v37 = vsel %vm15828_vm8, %v779_v28, %v1375_v13  ;;  %1378 = vst.msk [vmem:[#allocation2 + $0x40] sm:$0xf] %vm490_vm0, %v788_v23  ;;  %v2912_v15 = vrot.slane %v2898_v57, %v15794_v27  ;;  %v2913_v32 = vcombine.high %v2905_v9, %v2905_v9  ;;  %v1389_v49 = vld [vmem:[#allocation2 + $0x54] sm:$0xf]  ;;  %v23027_v18 = vshll.u32 %v18112_v25, 16 }
 0x219   : > { %v2960_v22 = vcombine.high %v13901_v62, %v13901_v62  ;;  %v2967_v0 = vrot.slane %v13901_v62, %v15794_v27  ;;  %1377 = vst [vmem:[#allocation2 + $0x3c] sm:$0xf] %v1376_v37  ;;  %v2938_v59 = vcombine.high %v2936_v63, %v2936_v63  ;;  %v7143_v16 = vrot.slane %v2905_v9, %v15794_v27 }
 0x21a   : > { %v13902_v33 = vld.sshfl [vmem:[#allocation2 + $0x28] sm:$0x33 pattern:$0x75316420]  ;;  %v18156_v44 = vrot.slane %v7199_v38, %v15794_v27  ;;  %v7213_v47 = vrot.slane %v2936_v63, %v15794_v27  ;;  %v2914_v58 = vcombine.high %v2912_v15, %v2912_v15  ;;  %v7157_v37 = vrot.slane %v2912_v15, %v15794_v27 }
 0x21b   : > { %v2974_v28 = vrot.slane %v2960_v22, %v15794_v27  ;;  %v2975_v23 = vcombine.high %v2967_v0, %v2967_v0  ;;  %v2984_v13 = vcombine.high %v13902_v33, %v13902_v33  ;;  %v2991_v57 = vrot.slane %v13902_v33, %v15794_v27 }
 0x21c   : > { %v18162_v4 = vrot.slane %v7143_v16, %v15794_v27  ;;  %v7171_v62 = vrot.slane %v2913_v32, %v15794_v27  ;;  %v7185_v56 = vrot.slane %v2914_v58, %v15794_v27  ;;  %v18169_v63 = vrot.slane %v7213_v47, %v15794_v27 }
 0x21d   : > { %v2976_v9 = vcombine.high %v2974_v28, %v2974_v28  ;;  %v2998_v38 = vrot.slane %v2984_v13, %v15794_v27  ;;  %v2999_v22 = vcombine.high %v2991_v57, %v2991_v57  ;;  %v7164_v45 = vrot.slane %v7157_v37, %v15794_v27 }
 0x21e   : > { %v7178_v33 = vrot.slane %v7171_v62, %v15794_v27  ;;  %v7227_v16 = vrot.slane %v2937_v54, %v15794_v27  ;;  %v7192_v15 = vrot.slane %v7185_v56, %v15794_v27  ;;  %v7241_v32 = vrot.slane %v2938_v59, %v15794_v27 }
 0x21f   : > { %v3000_v7 = vcombine.high %v2998_v38, %v2998_v38  ;;  %v7255_v26 = vrot.slane %v2967_v0, %v15794_v27  ;;  %v7269_v58 = vrot.slane %v2974_v28, %v15794_v27  ;;  %v7283_v47 = vrot.slane %v2975_v23, %v15794_v27 }
 0x220   : > { %v7234_v13 = vrot.slane %v7227_v16, %v15794_v27  ;;  %v7297_v19 = vrot.slane %v2976_v9, %v15794_v27  ;;  %v7248_v37 = vrot.slane %v7241_v32, %v15794_v27  ;;  %v7311_v54 = vrot.slane %v2991_v57, %v15794_v27 }
 0x221   : > { %v18183_v62 = vrot.slane %v7255_v26, %v15794_v27  ;;  %v7325_v56 = vrot.slane %v2998_v38, %v15794_v27  ;;  %v7276_v59 = vrot.slane %v7269_v58, %v15794_v27  ;;  %v7290_v0 = vrot.slane %v7283_v47, %v15794_v27 }
 0x222   : > { %v7304_v16 = vrot.slane %v7297_v19, %v15794_v27  ;;  %v7339_v28 = vrot.slane %v2999_v22, %v15794_v27  ;;  %v18192_v23 = vrot.slane %v7311_v54, %v15794_v27  ;;  %v7353_v26 = vrot.slane %v3000_v7, %v15794_v27 }
 0x223   : > { %v18195_v9 = vrot.slane %v7325_v56, %v15794_v27  ;;  %v18200_v32 = vunpack.c.l.b16 %v7164_v45  ;;  %v18202_v58 = vunpack.c.l.b16 %v7178_v33  ;;  %v18204_v47 = vunpack.c.l.b16 %v7192_v15 }
 0x224   : > { %v7346_v38 = vrot.slane %v7339_v28, %v15794_v27  ;;  %v7360_v19 = vrot.slane %v7353_v26, %v15794_v27  ;;  %v18209_v56 = vunpack.c.l.b16 %v7234_v13  ;;  %v18211_v10 = vunpack.c.l.b16 %v7248_v37 }
 0x225   : > { %v18214_v57 = vunpack.c.l.b16 %v7276_v59  ;;  %v18216_v45 = vunpack.c.l.b16 %v7290_v0  ;;  %v18218_v33 = vunpack.c.l.b16 %v7304_v16  ;;  %v9057_v13 = vrot.slane %v18200_v32, 7  ;;  %v13904_v59 = vld.sshfl [vmem:[#allocation2 + $0x3c] sm:$0x33 pattern:$0x75316420] }
 0x226   : > { %v18222_v26 = vunpack.c.l.b16 %v7346_v38  ;;  %v18224_v22 = vunpack.c.l.b16 %v7360_v19  ;;  %v9059_v37 = vrot.slane %v18202_v58, 6  ;;  %v9061_v7 = vrot.slane %v18204_v47, 5 }
 0x227   : > { %v23021_v0 = vunpack.c.l.b16 %v18156_v44  ;;  %v23022_v16 = vunpack.c.l.b16 %v18169_v63  ;;  %v9067_v15 = vrot.slane %v18209_v56, 2  ;;  %v9069_v38 = vrot.slane %v18211_v10, 1 }
 0x228   : > { %v23023_v19 = vunpack.c.l.b16 %v18162_v4  ;;  %v9071_v5 = vrot.slane %v18214_v57, 7  ;;  %v9073_v55 = vrot.slane %v18216_v45, 6  ;;  %v9075_v50 = vrot.slane %v18218_v33, 5 }
 0x229   : > { %v9063_v54 = vrot.slane %v23021_v0, 4  ;;  %v9065_v40 = vrot.slane %v23022_v16, 3  ;;  %v23024_v14 = vunpack.c.l.b16 %v18192_v23  ;;  %v23025_v31 = vunpack.c.l.b16 %v18195_v9 }
 0x22a   : > { %v9058_v28 = vsel %vm5821_vm9, %v9057_v13, %v23023_v19  ;;  %v9081_v51 = vrot.slane %v18222_v26, 2  ;;  %v23026_v13 = vunpack.c.l.b16 %v18183_v62  ;;  %v9083_v52 = vrot.slane %v18224_v22, 1 }
 0x22b   : > { %v9060_v0 = vsel %vm5824_vm10, %v9059_v37, %v9058_v28  ;;  %v9077_v16 = vrot.slane %v23024_v14, 4  ;;  %v9079_v41 = vrot.slane %v23025_v31, 3  ;;  %v821_v28 = vor.u32 %v23027_v18, %v18145_v34  ;;  %v13905_v37 = vld.sshfl [vmem:[#allocation2 + $0x40] sm:$0x33 pattern:$0x75316420] }
 0x22c   : > { %v9062_v17 = vsel %vm5827_vm11, %v9061_v7, %v9060_v0  ;;  %v9072_v19 = vsel %vm5821_vm9, %v9071_v5, %v23026_v13  ;;  %v1390_v31 = vsel %vm15828_vm8, %v18139_v20, %v1389_v49  ;;  %v3022_v7 = vcombine.high %v13904_v59, %v13904_v59  ;;  %v446_v34 = vld [vmem:[%s15744_s12 + $0x50] sm:$0xf] }
 0x22d   : > { %v9064_v14 = vsel %vm5830_vm12, %v9063_v54, %v9062_v17  ;;  %v9074_v30 = vsel %vm5824_vm10, %v9073_v55, %v9072_v19  ;;  %v23028_v13 = vrot.slane %v18127_v2, 4  ;;  %1391 = vst [vmem:[#allocation2 + $0x54] sm:$0xf] %v1390_v31  ;;  %v3029_v18 = vrot.slane %v13904_v59, %v15794_v27 }
 0x22e   : > { %v9066_v0 = vsel %vm5833_vm13, %v9065_v40, %v9064_v14  ;;  %v9076_v5 = vsel %vm5827_vm11, %v9075_v50, %v9074_v30  ;;  %v3036_v49 = vrot.slane %v3022_v7, %v15794_v27  ;;  %v3046_v20 = vcombine.high %v13905_v37, %v13905_v37 }
 0x22f   : > { %v822_v25 = vsel %vm15813_vm7, %v23028_v13, %v821_v28  ;;  %v9068_v17 = vsel %vm5836_vm14, %v9067_v15, %v9066_v0  ;;  %v9078_v55 = vsel %vm5830_vm12, %v9077_v16, %v9076_v5  ;;  %v3037_v50 = vcombine.high %v3029_v18, %v3029_v18 }
 0x230   : > { %1392 = vst.msk [vmem:[#allocation2 + $0x58] sm:$0xf] %vm490_vm0, %v822_v25  ;;  %v9070_v40 = vsel %vm5839_vm15, %v9069_v38, %v9068_v17  ;;  %v9080_v30 = vsel %vm5833_vm13, %v9079_v41, %v9078_v55  ;;  %v3053_v2 = vrot.slane %v13905_v37, %v15794_v27  ;;  %v3038_v19 = vcombine.high %v3036_v49, %v3036_v49 }
 0x231   : > { %v9082_v54 = vsel %vm5836_vm14, %v9081_v51, %v9080_v30  ;;  %v3060_v59 = vrot.slane %v3046_v20, %v15794_v27  ;;  %v7367_v15 = vrot.slane %v3029_v18, %v15794_v27  ;;  %v7381_v14 = vrot.slane %v3036_v49, %v15794_v27 }
 0x232   : > { %v9084_v16 = vsel %vm5839_vm15, %v9083_v52, %v9082_v54  ;;  %v3061_v28 = vcombine.high %v3053_v2, %v3053_v2  ;;  %v7395_v31 = vrot.slane %v3037_v50, %v15794_v27  ;;  %v7409_v37 = vrot.slane %v3038_v19, %v15794_v27 }
 0x233   : > { %v9281_v38 = vpack.c.b16 %v9084_v16, %v9070_v40  ;;  %v3062_v7 = vcombine.high %v3060_v59, %v3060_v59  ;;  %v18281_v41 = vrot.slane %v7367_v15, %v15794_v27  ;;  %v7388_v51 = vrot.slane %v7381_v14, %v15794_v27 }
 0x234   : > { %v7402_v0 = vrot.slane %v7395_v31, %v15794_v27  ;;  %v7423_v5 = vrot.slane %v3053_v2, %v15794_v27  ;;  %v7437_v52 = vrot.slane %v3060_v59, %v15794_v27  ;;  %v13907_v13 = vld.sshfl [vmem:[#allocation2 + $0x54] sm:$0x33 pattern:$0x75316420]  ;;  %v7416_v25 = vrot.slane %v7409_v37, %v15794_v27 }
 0x235   : > { %14732 = vmatprep.mubr.msk.bf16.mxu0 %vm6083_vm1, %v9281_v38  ;;  %v7451_v18 = vrot.slane %v3061_v28, %v15794_v27  ;;  %v7465_v17 = vrot.slane %v3062_v7, %v15794_v27  ;;  %v3084_v20 = vcombine.high %v13907_v13, %v13907_v13  ;;  %v3091_v40 = vrot.slane %v13907_v13, %v15794_v27 }
 0x236   : > { %v18295_v30 = vrot.slane %v7423_v5, %v15794_v27  ;;  %v18298_v50 = vrot.slane %v7437_v52, %v15794_v27  ;;  %v18305_v14 = vunpack.c.l.b16 %v7388_v51  ;;  %v18309_v37 = vunpack.c.l.b16 %v7402_v0 }
 0x237   : > { %v13908_v49 = vld.sshfl [vmem:[#allocation2 + $0x58] sm:$0x33 pattern:$0x75316420]  ;;  %v7458_v19 = vrot.slane %v7451_v18, %v15794_v27  ;;  %v7472_v59 = vrot.slane %v7465_v17, %v15794_v27  ;;  %v3098_v15 = vrot.slane %v3084_v20, %v15794_v27  ;;  %v3099_v16 = vcombine.high %v3091_v40, %v3091_v40 }
 0x238   : > { %v3108_v2 = vcombine.high %v13908_v49, %v13908_v49  ;;  %v3115_v54 = vrot.slane %v13908_v49, %v15794_v27  ;;  %v7479_v28 = vrot.slane %v3091_v40, %v15794_v27 }
 0x239   : > { %v3100_v5 = vcombine.high %v3098_v15, %v3098_v15  ;;  %v7493_v13 = vrot.slane %v3098_v15, %v15794_v27  ;;  %v7507_v18 = vrot.slane %v3099_v16, %v15794_v27 }
 0x23a   : > { %v3122_v31 = vrot.slane %v3108_v2, %v15794_v27  ;;  %v3123_v38 = vcombine.high %v3115_v54, %v3115_v54  ;;  %v7535_v7 = vrot.slane %v3115_v54, %v15794_v27  ;;  %v18312_v52 = vrot.slane %v7479_v28, %v15794_v27 }
 0x23b   : > { %v7500_v40 = vrot.slane %v7493_v13, %v15794_v27  ;;  %v7514_v0 = vrot.slane %v7507_v18, %v15794_v27  ;;  %v7521_v2 = vrot.slane %v3100_v5, %v15794_v27  ;;  %v18324_v54 = vunpack.c.l.b16 %v7416_v25 }
 0x23c   : > { %23029 = vst [vmem:[#allocation127_spill] sm:$0xff] %v18312_v52  ;;  %v3124_v17 = vcombine.high %v3122_v31, %v3122_v31  ;;  %v18317_v49 = vrot.slane %v7535_v7, %v15794_v27  ;;  %v7549_v51 = vrot.slane %v3122_v31, %v15794_v27  ;;  %v7563_v20 = vrot.slane %v3123_v38, %v15794_v27 }
 0x23d   : > { %v22280_v7 = vunpack.c.l.b16 %v18295_v30  ;;  %v7528_v31 = vrot.slane %v7521_v2, %v15794_v27  ;;  %v18334_v13 = vunpack.c.l.b16 %v7458_v19  ;;  %v18336_v18 = vunpack.c.l.b16 %v7472_v59  ;;  %v442_v2 = vld [vmem:[%s15744_s12 + $0x40] sm:$0xf] }
 0x23e   : > { %23030 = vst [vmem:[#allocation128_spill] sm:$0xff] %v18317_v49  ;;  %v18327_v15 = vrot.slane %v7549_v51, %v15794_v27  ;;  %v7570_v16 = vrot.slane %v7563_v20, %v15794_v27  ;;  %v7577_v28 = vrot.slane %v3124_v17, %v15794_v27  ;;  %v18340_v51 = vunpack.c.l.b16 %v7500_v40 }
 0x23f   : > { %23032 = vst [vmem:[#allocation130_spill] sm:$0xff] %v18334_v13  ;;  %23033 = vst [vmem:[#allocation131_spill] sm:$0xff] %v18336_v18  ;;  %v18342_v20 = vunpack.c.l.b16 %v7514_v0  ;;  %v18344_v17 = vunpack.c.l.b16 %v7528_v31  ;;  %v9087_v38 = vrot.slane %v18309_v37, 6  ;;  %v9089_v40 = vrot.slane %v18324_v54, 5 }
 0x240   : > { %23031 = vst [vmem:[#allocation129_spill] sm:$0xff] %v18327_v15  ;;  %v7584_v25 = vrot.slane %v7577_v28, %v15794_v27  ;;  %23034 = vst [vmem:[#allocation132_spill] sm:$0xff] %v18340_v51  ;;  %v18348_v19 = vunpack.c.l.b16 %v7570_v16  ;;  %v9085_v28 = vrot.slane %v18305_v14, 7  ;;  %v9091_v0 = vrot.slane %v22280_v7, 4  ;;  %v443_v7 = vld [vmem:[%s15744_s12 + $0x44] sm:$0xf] }
 0x241   : > { %23035 = vst [vmem:[#allocation133_spill] sm:$0xff] %v18342_v20  ;;  %23036 = vst [vmem:[#allocation134_spill] sm:$0xff] %v18344_v17  ;;  %v23039_v31 = vunpack.c.l.b16 %v18298_v50  ;;  %v9095_v55 = vrot.slane %v18334_v13, 2  ;;  %v9097_v16 = vrot.slane %v18336_v18, 1  ;;  %v9099_v29 = vrot.slane %v18340_v51, 7 }
 0x242   : > { %23037 = vst [vmem:[#allocation135_spill] sm:$0xff] %v18348_v19  ;;  %v18350_v59 = vunpack.c.l.b16 %v7584_v25  ;;  %v23040_v25 = vunpack.c.l.b16 %v18281_v41  ;;  %v9101_v61 = vrot.slane %v18342_v20, 6  ;;  %v9103_v24 = vrot.slane %v18344_v17, 5 }
 0x243   : > { %v9093_v5 = vrot.slane %v23039_v31, 3  ;;  %v23041_v31 = vunpack.c.l.b16 %v18317_v49  ;;  %v23042_v43 = vunpack.c.l.b16 %v18327_v15  ;;  %v9109_v35 = vrot.slane %v18348_v19, 2 }
 0x244   : > { %23038 = vst [vmem:[#allocation136_spill] sm:$0xff] %v18350_v59  ;;  %v9086_v6 = vsel %vm5821_vm9, %v9085_v28, %v23040_v25  ;;  %v23043_v25 = vunpack.c.l.b16 %v18312_v52  ;;  %v9111_v53 = vrot.slane %v18350_v59, 1  ;;  %v842_v21 = vshrl.u32 %v442_v2, 16 }
 0x245   : > { %v9088_v11 = vsel %vm5824_vm10, %v9087_v38, %v9086_v6  ;;  %v9105_v39 = vrot.slane %v23041_v31, 4  ;;  %v9107_v48 = vrot.slane %v23042_v43, 3  ;;  %v845_v31 = vshll.u32 %v442_v2, 16 }
 0x246   : > { %v9090_v28 = vsel %vm5827_vm11, %v9089_v40, %v9088_v11  ;;  %v9100_v42 = vsel %vm5821_vm9, %v9099_v29, %v23043_v25  ;;  %v850_v3 = vshrl.u32 %v443_v7, 16  ;;  %v844_v12 = vrot.slane %v842_v21, 7  ;;  %v447_v25 = vld [vmem:[%s15744_s12 + $0x54] sm:$0xf] }
 0x247   : > { %v9092_v6 = vsel %vm5830_vm12, %v9091_v0, %v9090_v28  ;;  %v9102_v38 = vsel %vm5824_vm10, %v9101_v61, %v9100_v42  ;;  %v853_v11 = vshll.u32 %v443_v7, 16  ;;  %v876_v19 = vshrl.u32 %v446_v34, 16  ;;  %v1403_v0 = vld [vmem:[#allocation2 + $0x6c] sm:$0xf] }
 0x248   : > { %v9094_v43 = vsel %vm5833_vm13, %v9093_v5, %v9092_v6  ;;  %v9104_v60 = vsel %vm5827_vm11, %v9103_v24, %v9102_v38  ;;  %v18388_v59 = vrot.slane %v850_v3, 7  ;;  %v847_v5 = vor.u32 %v845_v31, %v844_v12  ;;  %v545_v24 = vld [vmem:[#allocation2 + $0x9c] sm:$0x1]  ;;  %v551_v3 = vld [vmem:[#allocation2 + $0xb4] sm:$0x1] }
 0x249   : > { %v9096_v40 = vsel %vm5836_vm14, %v9095_v55, %v9094_v43  ;;  %v9106_v29 = vsel %vm5830_vm12, %v9105_v39, %v9104_v60  ;;  %v848_v2 = vrot.slane %v844_v12, 4  ;;  %v878_v55 = vrot.slane %v876_v19, 7  ;;  %v450_v60 = vld [vmem:[%s15744_s12 + $0x60] sm:$0xf]  ;;  %v1417_v38 = vld [vmem:[#allocation2 + $0x84] sm:$0xf] }
 0x24a   : > { %23044 = vst [vmem:[#allocation137_spill] sm:$0xff] %v18388_v59  ;;  %v9098_v42 = vsel %vm5839_vm15, %v9097_v16, %v9096_v40  ;;  %v9108_v61 = vsel %vm5833_vm13, %v9107_v48, %v9106_v29  ;;  %v855_v7 = vor.u32 %v853_v11, %v18388_v59  ;;  %v879_v39 = vshll.u32 %v446_v34, 16  ;;  %v451_v12 = vld [vmem:[%s15744_s12 + $0x64] sm:$0xf]  ;;  %v15160_v34 = vld [vmem:[#allocation7 + $0x88] sm:$0xff]  }
 0x24b   : > { %v9110_v21 = vsel %vm5836_vm14, %v9109_v35, %v9108_v61  ;;  %v884_v6 = vshrl.u32 %v447_v25, 16  ;;  %v887_v16 = vshll.u32 %v447_v25, 16  ;;  %v1404_v48 = vsel %vm15828_vm8, %v847_v5, %v1403_v0  ;;  %v454_v11 = vld [vmem:[%s15744_s12 + $0x70] sm:$0xf]  ;;  %v455_v40 = vld [vmem:[%s15744_s12 + $0x74] sm:$0xf] }
 0x24c   : > { %v9112_v28 = vsel %vm5839_vm15, %v9111_v53, %v9110_v21  ;;  %v856_v35 = vsel %vm15813_vm7, %v848_v2, %v855_v7  ;;  %v881_v43 = vor.u32 %v879_v39, %v878_v55  ;;  %v882_v19 = vrot.slane %v878_v55, 4  ;;  %1405 = vst [vmem:[#allocation2 + $0x6c] sm:$0xf] %v1404_v48  ;;  %v563_v7 = vld [vmem:[#allocation2 + $0xfc] sm:$0x1] }
 0x24d   : > { %v9282_v31 = vpack.c.b16 %v9112_v28, %v9098_v42  ;;  %v18403_v29 = vrot.slane %v884_v6, 7  ;;  %1406 = vst.msk [vmem:[#allocation2 + $0x70] sm:$0xf] %vm490_vm0, %v856_v35  ;;  %v546_v53 = vsel %vm15767_vm3, 0, %v545_v24  ;;  %v552_v25 = vsel %vm15767_vm3, 0, %v551_v3 }
 0x24e   : > { %v910_v0 = vshrl.u32 %v450_v60, 16  ;;  %v557_v42 = vld [vmem:[#allocation2 + $0xe4] sm:$0x1]  ;;  %v1418_v61 = vsel %vm15828_vm8, %v881_v43, %v1417_v38  ;;  %547 = vst [vmem:[#allocation2 + $0x9c] sm:$0x1] %v546_v53  ;;  %v913_v5 = vshll.u32 %v450_v60, 16 }
 0x24f   : > { %23045 = vst [vmem:[#allocation138_spill] sm:$0xff] %v18403_v29  ;;  %14733 = vmatmul.mubr.msk.bf16.vlgmr.msra.gmra.mrb[0].mxu0 %vm6083_vm1, %v9282_v31  ;;  %553 = vst [vmem:[#allocation2 + $0xb4] sm:$0x1] %v552_v25  ;;  %v918_v2 = vshrl.u32 %v451_v12, 16  ;;  %v921_v21 = vshll.u32 %v451_v12, 16  ;;  %v889_v24 = vor.u32 %v887_v16, %v18403_v29  ;;  %v944_v39 = vshrl.u32 %v454_v11, 16 }
 0x250   : > { %14749 = vmatpush3.bf16.msra.mxu0 %v17834_v1  ;;  %1419 = vst [vmem:[#allocation2 + $0x84] sm:$0xf] %v1418_v61  ;;  %v912_v55 = vrot.slane %v910_v0, 7  ;;  %v947_v3 = vshll.u32 %v454_v11, 16  ;;  %v18416_v28 = vld [vmem:[%s15744_s12 + $0x80] sm:$0xf] }
 0x251   : > { %14750 = vmatprep.subr.bf16.mxu0 %v15160_v34  ;;  %v18418_v6 = vrot.slane %v918_v2, 7  ;;  %v952_v48 = vshrl.u32 %v455_v40, 16  ;;  %v955_v38 = vshll.u32 %v455_v40, 16  ;;  %v558_v60 = vsel %vm15767_vm3, 0, %v557_v42  ;;  %v15161_v12 = vld [vmem:[#allocation7 + $0x90] sm:$0xff]  }
 0x252   : > { %v890_v1 = vsel %vm15813_vm7, %v882_v19, %v889_v24  ;;  %v916_v16 = vrot.slane %v912_v55, 4  ;;  %v946_v31 = vrot.slane %v944_v39, 7  ;;  %559 = vst [vmem:[#allocation2 + $0xe4] sm:$0x1] %v558_v60  ;;  %v18429_v11 = vld [vmem:[%s15744_s12 + $0x84] sm:$0xf]  ;;  %v18434_v0 = vor.u32 %v913_v5, %v912_v55 }
 0x253   : > { %23046 = vst [vmem:[#allocation139_spill] sm:$0xff] %v18418_v6  ;;  %1420 = vst.msk [vmem:[#allocation2 + $0x88] sm:$0xf] %vm490_vm0, %v890_v1  ;;  %v923_v35 = vor.u32 %v921_v21, %v18418_v6  ;;  %v18426_v43 = vrot.slane %v952_v48, 7  ;;  %v564_v40 = vsel %vm15767_vm3, 0, %v563_v7  ;;  %v978_v53 = vshrl.u32 %v18416_v28, 16 }
 0x254   : > { %v13910_v25 = vld.sshfl [vmem:[#allocation2 + $0x6c] sm:$0x33 pattern:$0x75316420]  ;;  %v18436_v19 = vor.u32 %v947_v3, %v946_v31  ;;  %v950_v42 = vrot.slane %v946_v31, 4  ;;  %14751 = vmatpush3.bf16.msra.mxu0 %v15160_v34 }
 0x255   : > { %23047 = vst [vmem:[#allocation140_spill] sm:$0xff] %v18426_v43  ;;  %565 = vst [vmem:[#allocation2 + $0xfc] sm:$0x1] %v564_v40  ;;  %v3146_v21 = vcombine.high %v13910_v25, %v13910_v25  ;;  %v3153_v24 = vrot.slane %v13910_v25, %v15794_v27  ;;  %v924_v39 = vsel %vm15813_vm7, %v916_v16, %v923_v35  ;;  %14752 = vmatprep.subr.bf16.mxu0 %v15161_v12 }
 0x256   : > { %v13911_v2 = vld.sshfl [vmem:[#allocation2 + $0x70] sm:$0x33 pattern:$0x75316420]  ;;  %v957_v7 = vor.u32 %v955_v38, %v18426_v43  ;;  %1434 = vst.msk [vmem:[#allocation2 + $0xa0] sm:$0xf] %vm490_vm0, %v924_v39 }
 0x257   : > { %v3170_v48 = vcombine.high %v13911_v2, %v13911_v2  ;;  %v3177_v5 = vrot.slane %v13911_v2, %v15794_v27  ;;  %v18445_v55 = vrot.slane %v978_v53, 7  ;;  %v13913_v3 = vld.sshfl [vmem:[#allocation2 + $0x84] sm:$0x33 pattern:$0x75316420]  ;;  %v3160_v60 = vrot.slane %v3146_v21, %v15794_v27 }
 0x258   : > { %v3161_v1 = vcombine.high %v3153_v24, %v3153_v24  ;;  %v7591_v31 = vrot.slane %v3153_v24, %v15794_v27  ;;  %v958_v16 = vsel %vm15813_vm7, %v950_v42, %v957_v7  ;;  %v3208_v40 = vcombine.high %v13913_v3, %v13913_v3  ;;  %14753 = vmatpush3.bf16.msra.mxu0 %v15161_v12 }
 0x259   : > { %v3184_v38 = vrot.slane %v3170_v48, %v15794_v27  ;;  %v3185_v35 = vcombine.high %v3177_v5, %v3177_v5  ;;  %v3215_v25 = vrot.slane %v13913_v3, %v15794_v27  ;;  %1448 = vst.msk [vmem:[#allocation2 + $0xb8] sm:$0xf] %vm490_vm0, %v958_v16  ;;  %v3162_v53 = vcombine.high %v3160_v60, %v3160_v60 }
 0x25a   : > { %v18456_v2 = vrot.slane %v7591_v31, %v15794_v27  ;;  %v7605_v21 = vrot.slane %v3160_v60, %v15794_v27  ;;  %v7619_v24 = vrot.slane %v3161_v1, %v15794_v27  ;;  %v13914_v39 = vld.sshfl [vmem:[#allocation2 + $0x88] sm:$0x33 pattern:$0x75316420]  ;;  %v3222_v42 = vrot.slane %v3208_v40, %v15794_v27 }
 0x25b   : > { %v3186_v34 = vcombine.high %v3184_v38, %v3184_v38  ;;  %v3223_v7 = vcombine.high %v3215_v25, %v3215_v25  ;;  %v7647_v48 = vrot.slane %v3177_v5, %v15794_v27  ;;  %v3232_v61 = vcombine.high %v13914_v39, %v13914_v39 }
 0x25c   : > { %23048 = vst [vmem:[#allocation141_spill] sm:$0xff] %v18456_v2  ;;  %v3239_v3 = vrot.slane %v13914_v39, %v15794_v27  ;;  %v7612_v12 = vrot.slane %v7605_v21, %v15794_v27  ;;  %v7626_v16 = vrot.slane %v7619_v24, %v15794_v27  ;;  %v3224_v31 = vcombine.high %v3222_v42, %v3222_v42 }
 0x25d   : > { %v7633_v43 = vrot.slane %v3162_v53, %v15794_v27  ;;  %v18467_v60 = vrot.slane %v7647_v48, %v15794_v27  ;;  %v7661_v1 = vrot.slane %v3184_v38, %v15794_v27  ;;  %v3246_v40 = vrot.slane %v3232_v61, %v15794_v27 }
 0x25e   : > { %v3247_v6 = vcombine.high %v3239_v3, %v3239_v3  ;;  %v7675_v5 = vrot.slane %v3185_v35, %v15794_v27  ;;  %v7689_v29 = vrot.slane %v3186_v34, %v15794_v27  ;;  %v7703_v24 = vrot.slane %v3215_v25, %v15794_v27 }
 0x25f   : > { %23049 = vst [vmem:[#allocation142_spill] sm:$0xff] %v18467_v60  ;;  %v7640_v39 = vrot.slane %v7633_v43, %v15794_v27  ;;  %v18475_v21 = vrot.slane %v7661_v1, %v15794_v27  ;;  %v7717_v53 = vrot.slane %v3222_v42, %v15794_v27  ;;  %v3248_v48 = vcombine.high %v3246_v40, %v3246_v40 }
 0x260   : > { %v7682_v59 = vrot.slane %v7675_v5, %v15794_v27  ;;  %v7696_v38 = vrot.slane %v7689_v29, %v15794_v27  ;;  %v7731_v61 = vrot.slane %v3223_v7, %v15794_v27  ;;  %v18483_v35 = vrot.slane %v7703_v24, %v15794_v27 }
 0x261   : > { %23050 = vst [vmem:[#allocation143_spill] sm:$0xff] %v18475_v21  ;;  %v7724_v34 = vrot.slane %v7717_v53, %v15794_v27  ;;  %v7745_v43 = vrot.slane %v3224_v31, %v15794_v27  ;;  %v7759_v1 = vrot.slane %v3239_v3, %v15794_v27  ;;  %v7773_v42 = vrot.slane %v3246_v40, %v15794_v27 }
 0x262   : > { %23051 = vst [vmem:[#allocation144_spill] sm:$0xff] %v18483_v35  ;;  %v7738_v25 = vrot.slane %v7731_v61, %v15794_v27  ;;  %v7787_v15 = vrot.slane %v3247_v6, %v15794_v27  ;;  %v7801_v5 = vrot.slane %v3248_v48, %v15794_v27  ;;  %v18497_v53 = vunpack.c.l.b16 %v7612_v12 }
 0x263   : > { %v7752_v29 = vrot.slane %v7745_v43, %v15794_v27  ;;  %v18494_v7 = vrot.slane %v7759_v1, %v15794_v27  ;;  %v18500_v31 = vrot.slane %v7773_v42, %v15794_v27  ;;  %v18504_v61 = vunpack.c.l.b16 %v7626_v16 }
 0x264   : > { %23053 = vst [vmem:[#allocation146_spill] sm:$0xff] %v18497_v53  ;;  %v7794_v3 = vrot.slane %v7787_v15, %v15794_v27  ;;  %v7808_v40 = vrot.slane %v7801_v5, %v15794_v27  ;;  %v18506_v6 = vunpack.c.l.b16 %v7640_v39  ;;  %v18510_v1 = vunpack.c.l.b16 %v7682_v59  ;;  %v1431_v39 = vld [vmem:[#allocation2 + $0x9c] sm:$0xf] }
 0x265   : > { %23052 = vst [vmem:[#allocation145_spill] sm:$0xff] %v18494_v7  ;;  %23054 = vst [vmem:[#allocation147_spill] sm:$0xff] %v18500_v31  ;;  %v18512_v24 = vunpack.c.l.b16 %v7696_v38  ;;  %v18515_v42 = vunpack.c.l.b16 %v7724_v34  ;;  %v18517_v49 = vunpack.c.l.b16 %v7738_v25  ;;  %v18519_v15 = vunpack.c.l.b16 %v7752_v29  ;;  %v13917_v34 = vld.sshfl [vmem:[#allocation2 + $0xa0] sm:$0x33 pattern:$0x75316420] }
 0x266   : > { %23055 = vst [vmem:[#allocation148_spill] sm:$0xff] %v18504_v61  ;;  %23056 = vst [vmem:[#allocation149_spill] sm:$0xff] %v18506_v6  ;;  %v18523_v5 = vunpack.c.l.b16 %v7794_v3  ;;  %v18525_v48 = vunpack.c.l.b16 %v7808_v40  ;;  %v9113_v59 = vrot.slane %v18497_v53, 7  ;;  %v9115_v38 = vrot.slane %v18504_v61, 6 }
 0x267   : > { %23057 = vst [vmem:[#allocation150_spill] sm:$0xff] %v18510_v1  ;;  %23058 = vst [vmem:[#allocation151_spill] sm:$0xff] %v18512_v24  ;;  %v9117_v12 = vrot.slane %v18506_v6, 5  ;;  %v23064_v25 = vunpack.c.l.b16 %v18467_v60  ;;  %v23065_v29 = vunpack.c.l.b16 %v18475_v21  ;;  %v9123_v16 = vrot.slane %v18510_v1, 2 }
 0x268   : > { %23059 = vst [vmem:[#allocation152_spill] sm:$0xff] %v18515_v42  ;;  %23060 = vst [vmem:[#allocation153_spill] sm:$0xff] %v18517_v49  ;;  %v9125_v3 = vrot.slane %v18512_v24, 1  ;;  %v23066_v17 = vunpack.c.l.b16 %v18456_v2  ;;  %v9127_v61 = vrot.slane %v18515_v42, 7  ;;  %v9129_v6 = vrot.slane %v18517_v49, 6 }
 0x269   : > { %23061 = vst [vmem:[#allocation154_spill] sm:$0xff] %v18519_v15  ;;  %23062 = vst [vmem:[#allocation155_spill] sm:$0xff] %v18523_v5  ;;  %v9119_v43 = vrot.slane %v23064_v25, 4  ;;  %v9121_v51 = vrot.slane %v23065_v29, 3  ;;  %v9131_v60 = vrot.slane %v18519_v15, 5  ;;  %v23067_v29 = vunpack.c.l.b16 %v18494_v7 }
 0x26a   : > { %23063 = vst [vmem:[#allocation156_spill] sm:$0xff] %v18525_v48  ;;  %v13920_v40 = vld.sshfl [vmem:[#allocation2 + $0xb8] sm:$0x33 pattern:$0x75316420]  ;;  %v9114_v53 = vsel %vm5821_vm9, %v9113_v59, %v23066_v17  ;;  %v23068_v24 = vunpack.c.l.b16 %v18500_v31  ;;  %v9137_v52 = vrot.slane %v18523_v5, 2  ;;  %v23069_v17 = vunpack.c.l.b16 %v18483_v35 }
 0x26b   : > { %v1445_v25 = vld [vmem:[#allocation2 + $0xb4] sm:$0xf]  ;;  %v9116_v21 = vsel %vm5824_vm10, %v9115_v38, %v9114_v53  ;;  %v9133_v1 = vrot.slane %v23067_v29, 4  ;;  %v9139_v42 = vrot.slane %v18525_v48, 1  ;;  %v1432_v53 = vsel %vm15828_vm8, %v18434_v0, %v1431_v39  ;;  %v15162_v39 = vld [vmem:[#allocation7 + $0x98] sm:$0xff]  }
 0x26c   : > { %v9135_v20 = vrot.slane %v23068_v24, 3  ;;  %v9118_v2 = vsel %vm5827_vm11, %v9117_v12, %v9116_v21  ;;  %v9128_v59 = vsel %vm5821_vm9, %v9127_v61, %v23069_v17  ;;  %1433 = vst [vmem:[#allocation2 + $0x9c] sm:$0xf] %v1432_v53  ;;  %v1446_v24 = vsel %vm15828_vm8, %v18436_v19, %v1445_v25  ;;  %14754 = vmatprep.subr.bf16.mxu0 %v15162_v39  ;;  %v462_v5 = vld [vmem:[%s15744_s12 + $0x90] sm:$0xf] }
 0x26d   : > { %v9120_v38 = vsel %vm5830_vm12, %v9119_v43, %v9118_v2  ;;  %v9130_v29 = vsel %vm5824_vm10, %v9129_v6, %v9128_v59  ;;  %v3294_v21 = vcombine.high %v13917_v34, %v13917_v34  ;;  %1447 = vst [vmem:[#allocation2 + $0xb4] sm:$0xf] %v1446_v24  ;;  %v3301_v17 = vrot.slane %v13917_v34, %v15794_v27 }
 0x26e   : > { %v9122_v12 = vsel %vm5833_vm13, %v9121_v51, %v9120_v38  ;;  %v9132_v61 = vsel %vm5827_vm11, %v9131_v60, %v9130_v29  ;;  %v3356_v48 = vcombine.high %v13920_v40, %v13920_v40  ;;  %v3363_v43 = vrot.slane %v13920_v40, %v15794_v27  ;;  %14755 = vmatpush3.bf16.msra.mxu0 %v15162_v39 }
 0x26f   : > { %v9124_v0 = vsel %vm5836_vm14, %v9123_v16, %v9122_v12  ;;  %v9134_v2 = vsel %vm5830_vm12, %v9133_v1, %v9132_v61  ;;  %v3308_v6 = vrot.slane %v3294_v21, %v15794_v27  ;;  %v3309_v51 = vcombine.high %v3301_v17, %v3301_v17 }
 0x270   : > { %v9126_v19 = vsel %vm5839_vm15, %v9125_v3, %v9124_v0  ;;  %v9136_v25 = vsel %vm5833_vm13, %v9135_v20, %v9134_v2  ;;  %v3370_v60 = vrot.slane %v3356_v48, %v15794_v27  ;;  %v3371_v53 = vcombine.high %v3363_v43, %v3363_v43 }
 0x271   : > { %v9138_v59 = vsel %vm5836_vm14, %v9137_v52, %v9136_v25  ;;  %v3310_v34 = vcombine.high %v3308_v6, %v3308_v6  ;;  %v7871_v16 = vrot.slane %v3301_v17, %v15794_v27  ;;  %v7885_v40 = vrot.slane %v3308_v6, %v15794_v27 }
 0x272   : > { %v9140_v1 = vsel %vm5839_vm15, %v9139_v42, %v9138_v59  ;;  %v3372_v38 = vcombine.high %v3370_v60, %v3370_v60  ;;  %v7899_v29 = vrot.slane %v3309_v51, %v15794_v27  ;;  %v7983_v52 = vrot.slane %v3363_v43, %v15794_v27 }
 0x273   : > { %v9283_v3 = vpack.c.b16 %v9140_v1, %v9126_v19  ;;  %v18577_v20 = vrot.slane %v7871_v16, %v15794_v27  ;;  %v7913_v48 = vrot.slane %v3310_v34, %v15794_v27  ;;  %v13916_v24 = vld.sshfl [vmem:[#allocation2 + $0x9c] sm:$0x33 pattern:$0x75316420]  ;;  %v18582_v21 = vrot.slane %v7885_v40, %v15794_v27 }
 0x274   : > { %v7906_v42 = vrot.slane %v7899_v29, %v15794_v27  ;;  %v7997_v12 = vrot.slane %v3370_v60, %v15794_v27  ;;  %v8011_v61 = vrot.slane %v3371_v53, %v15794_v27  ;;  %v13919_v17 = vld.sshfl [vmem:[#allocation2 + $0xb4] sm:$0x33 pattern:$0x75316420]  ;;  %v3270_v0 = vcombine.high %v13916_v24, %v13916_v24 }
 0x275   : > { %23070 = vst [vmem:[#allocation157_spill] sm:$0xff] %v18577_v20  ;;  %23071 = vst [vmem:[#allocation158_spill] sm:$0xff] %v18582_v21  ;;  %14736 = vmatprep.mubr.msk.bf16.mxu0 %vm6083_vm1, %v9283_v3  ;;  %v3277_v2 = vrot.slane %v13916_v24, %v15794_v27  ;;  %v7920_v6 = vrot.slane %v7913_v48, %v15794_v27  ;;  %v18591_v43 = vrot.slane %v7983_v52, %v15794_v27 }
 0x276   : > { %v3332_v39 = vcombine.high %v13919_v17, %v13919_v17  ;;  %v3339_v19 = vrot.slane %v13919_v17, %v15794_v27  ;;  %v18595_v25 = vrot.slane %v7997_v12, %v15794_v27  ;;  %v8018_v51 = vrot.slane %v8011_v61, %v15794_v27 }
 0x277   : > { %23072 = vst [vmem:[#allocation159_spill] sm:$0xff] %v18591_v43  ;;  %v3284_v60 = vrot.slane %v3270_v0, %v15794_v27  ;;  %v3285_v59 = vcombine.high %v3277_v2, %v3277_v2  ;;  %v7815_v34 = vrot.slane %v3277_v2, %v15794_v27  ;;  %v8025_v53 = vrot.slane %v3372_v38, %v15794_v27 }
 0x278   : > { %23073 = vst [vmem:[#allocation160_spill] sm:$0xff] %v18595_v25  ;;  %v3346_v16 = vrot.slane %v3332_v39, %v15794_v27  ;;  %v3347_v1 = vcombine.high %v3339_v19, %v3339_v19  ;;  %v7927_v40 = vrot.slane %v3339_v19, %v15794_v27 }
 0x279   : > { %v3286_v3 = vcombine.high %v3284_v60, %v3284_v60  ;;  %v18605_v48 = vrot.slane %v7815_v34, %v15794_v27  ;;  %v7829_v52 = vrot.slane %v3284_v60, %v15794_v27  ;;  %v7843_v24 = vrot.slane %v3285_v59, %v15794_v27 }
 0x27a   : > { %v3348_v12 = vcombine.high %v3346_v16, %v3346_v16  ;;  %v18610_v61 = vrot.slane %v7927_v40, %v15794_v27  ;;  %v7941_v38 = vrot.slane %v3346_v16, %v15794_v27  ;;  %v7955_v17 = vrot.slane %v3347_v1, %v15794_v27 }
 0x27b   : > { %23074 = vst [vmem:[#allocation161_spill] sm:$0xff] %v18605_v48  ;;  %v7836_v0 = vrot.slane %v7829_v52, %v15794_v27  ;;  %v7850_v2 = vrot.slane %v7843_v24, %v15794_v27  ;;  %v7857_v39 = vrot.slane %v3286_v3, %v15794_v27  ;;  %v8032_v19 = vrot.slane %v8025_v53, %v15794_v27 }
 0x27c   : > { %23075 = vst [vmem:[#allocation162_spill] sm:$0xff] %v18610_v61  ;;  %v7948_v60 = vrot.slane %v7941_v38, %v15794_v27  ;;  %v7962_v59 = vrot.slane %v7955_v17, %v15794_v27  ;;  %v7969_v34 = vrot.slane %v3348_v12, %v15794_v27  ;;  %v18629_v24 = vunpack.c.l.b16 %v7906_v42 }
 0x27d   : > { %v7864_v16 = vrot.slane %v7857_v39, %v15794_v27  ;;  %v18623_v29 = vunpack.c.l.b16 %v7836_v0  ;;  %v18625_v1 = vunpack.c.l.b16 %v7850_v2  ;;  %v18631_v53 = vunpack.c.l.b16 %v7920_v6 }
 0x27e   : > { %v7976_v3 = vrot.slane %v7969_v34, %v15794_v27  ;;  %23078 = vst [vmem:[#allocation165_spill] sm:$0xff] %v18629_v24  ;;  %v18636_v12 = vunpack.c.l.b16 %v7948_v60  ;;  %v18638_v40 = vunpack.c.l.b16 %v7962_v59  ;;  %v18644_v52 = vunpack.c.l.b16 %v8018_v51 }
 0x27f   : > { %23076 = vst [vmem:[#allocation163_spill] sm:$0xff] %v18623_v29  ;;  %23077 = vst [vmem:[#allocation164_spill] sm:$0xff] %v18625_v1  ;;  %v18634_v17 = vunpack.c.l.b16 %v7864_v16  ;;  %v18646_v42 = vunpack.c.l.b16 %v8032_v19  ;;  %v9141_v6 = vrot.slane %v18623_v29, 7  ;;  %v9143_v34 = vrot.slane %v18625_v1, 6 }
 0x280   : > { %23079 = vst [vmem:[#allocation166_spill] sm:$0xff] %v18631_v53  ;;  %23081 = vst [vmem:[#allocation168_spill] sm:$0xff] %v18636_v12  ;;  %v18641_v2 = vunpack.c.l.b16 %v7976_v3  ;;  %v23086_v59 = vunpack.c.l.b16 %v18577_v20  ;;  %v23087_v38 = vunpack.c.l.b16 %v18582_v21  ;;  %v9151_v39 = vrot.slane %v18629_v24, 2 }
 0x281   : > { %23080 = vst [vmem:[#allocation167_spill] sm:$0xff] %v18634_v17  ;;  %23082 = vst [vmem:[#allocation169_spill] sm:$0xff] %v18638_v40  ;;  %v9145_v60 = vrot.slane %v18634_v17, 5  ;;  %v9153_v51 = vrot.slane %v18631_v53, 1  ;;  %v9155_v19 = vrot.slane %v18636_v12, 7  ;;  %v23088_v0 = vunpack.c.l.b16 %v18605_v48 }
 0x282   : > { %23083 = vst [vmem:[#allocation170_spill] sm:$0xff] %v18641_v2  ;;  %23084 = vst [vmem:[#allocation171_spill] sm:$0xff] %v18644_v52  ;;  %v9147_v16 = vrot.slane %v23086_v59, 4  ;;  %v9149_v3 = vrot.slane %v23087_v38, 3  ;;  %v9157_v1 = vrot.slane %v18638_v40, 6  ;;  %v9159_v17 = vrot.slane %v18641_v2, 5 }
 0x283   : > { %23085 = vst [vmem:[#allocation172_spill] sm:$0xff] %v18646_v42  ;;  %v9142_v29 = vsel %vm5821_vm9, %v9141_v6, %v23088_v0  ;;  %v23089_v59 = vunpack.c.l.b16 %v18591_v43  ;;  %v23090_v21 = vunpack.c.l.b16 %v18610_v61  ;;  %v23091_v53 = vunpack.c.l.b16 %v18595_v25  ;;  %v463_v43 = vld [vmem:[%s15744_s12 + $0x94] sm:$0xf] }
 0x284   : > { %v9144_v38 = vsel %vm5824_vm10, %v9143_v34, %v9142_v29  ;;  %v9165_v48 = vrot.slane %v18644_v52, 2  ;;  %v9167_v2 = vrot.slane %v18646_v42, 1  ;;  %v23092_v29 = vshll.u32 %v18416_v28, 16  ;;  %v1459_v28 = vld [vmem:[#allocation2 + $0xe4] sm:$0xf] }
 0x285   : > { %v9161_v20 = vrot.slane %v23089_v59, 4  ;;  %v9156_v24 = vsel %vm5821_vm9, %v9155_v19, %v23090_v21  ;;  %v9163_v12 = vrot.slane %v23091_v53, 3  ;;  %v9146_v0 = vsel %vm5827_vm11, %v9145_v60, %v9144_v38 }
 0x286   : > { %v9158_v6 = vsel %vm5824_vm10, %v9157_v1, %v9156_v24  ;;  %v983_v34 = vor.u32 %v23092_v29, %v18445_v55  ;;  %v9148_v59 = vsel %vm5830_vm12, %v9147_v16, %v9146_v0  ;;  %v984_v53 = vrot.slane %v18445_v55, 4  ;;  %v569_v0 = vld [vmem:[#allocation2 + $0x114] sm:$0x1] }
 0x287   : > { %v9160_v21 = vsel %vm5827_vm11, %v9159_v17, %v9158_v6  ;;  %v23093_v19 = vshrl.u32 %v18429_v11, 16  ;;  %v9150_v1 = vsel %vm5833_vm13, %v9149_v3, %v9148_v59  ;;  %v989_v60 = vshll.u32 %v18429_v11, 16  ;;  %v466_v11 = vld [vmem:[%s15744_s12 + $0xa0] sm:$0xf]  ;;  %v575_v59 = vld [vmem:[#allocation2 + $0x12c] sm:$0x1] }
 0x288   : > { %v9162_v24 = vsel %vm5830_vm12, %v9161_v20, %v9160_v21  ;;  %v1012_v38 = vshrl.u32 %v462_v5, 16  ;;  %v9152_v29 = vsel %vm5836_vm14, %v9151_v39, %v9150_v1  ;;  %v1015_v16 = vshll.u32 %v462_v5, 16 }
 0x289   : > { %v18685_v52 = vrot.slane %v23093_v19, 7  ;;  %v9164_v17 = vsel %vm5833_vm13, %v9163_v12, %v9162_v24  ;;  %v1020_v55 = vshrl.u32 %v463_v43, 16  ;;  %v9154_v6 = vsel %vm5839_vm15, %v9153_v51, %v9152_v29  ;;  %v1473_v12 = vld [vmem:[#allocation2 + $0xfc] sm:$0xf]  ;;  %v467_v24 = vld [vmem:[%s15744_s12 + $0xa4] sm:$0xf] }
 0x28a   : > { %v9166_v19 = vsel %vm5836_vm14, %v9165_v48, %v9164_v17  ;;  %v1014_v20 = vrot.slane %v1012_v38, 7  ;;  %v1023_v1 = vshll.u32 %v463_v43, 16  ;;  %v1460_v5 = vsel %vm15828_vm8, %v983_v34, %v1459_v28  ;;  %v470_v38 = vld [vmem:[%s15744_s12 + $0xb0] sm:$0xf]  ;;  %v471_v17 = vld [vmem:[%s15744_s12 + $0xb4] sm:$0xf] }
 0x28b   : > { %23094 = vst [vmem:[#allocation173_spill] sm:$0xff] %v18685_v52  ;;  %v991_v3 = vor.u32 %v989_v60, %v18685_v52  ;;  %v9168_v21 = vsel %vm5839_vm15, %v9167_v2, %v9166_v19  ;;  %v18697_v39 = vrot.slane %v1020_v55, 7  ;;  %1461 = vst [vmem:[#allocation2 + $0xe4] sm:$0xf] %v1460_v5  ;;  %v570_v43 = vsel %vm15767_vm3, 0, %v569_v0 }
 0x28c   : > { %v9284_v51 = vpack.c.b16 %v9168_v21, %v9154_v6  ;;  %v1017_v29 = vor.u32 %v1015_v16, %v1014_v20  ;;  %v1018_v60 = vrot.slane %v1014_v20, 4  ;;  %v576_v2 = vsel %vm15767_vm3, 0, %v575_v59  ;;  %v581_v28 = vld [vmem:[#allocation2 + $0x144] sm:$0x1]  ;;  %571 = vst [vmem:[#allocation2 + $0x114] sm:$0x1] %v570_v43 }
 0x28d   : > { %23095 = vst [vmem:[#allocation174_spill] sm:$0xff] %v18697_v39  ;;  %v992_v48 = vsel %vm15813_vm7, %v984_v53, %v991_v3  ;;  %v1025_v52 = vor.u32 %v1023_v1, %v18697_v39  ;;  %v1046_v34 = vshrl.u32 %v466_v11, 16  ;;  %577 = vst [vmem:[#allocation2 + $0x12c] sm:$0x1] %v576_v2  ;;  %v1049_v16 = vshll.u32 %v466_v11, 16  ;;  %v15163_v3 = vld [vmem:[#allocation7 + $0xa0] sm:$0xff]  }
 0x28e   : > { %1462 = vst.msk [vmem:[#allocation2 + $0xe8] sm:$0xf] %vm490_vm0, %v992_v48  ;;  %14737 = vmatmul.mubr.msk.bf16.gmra.mrb[4].mxu0 %vm6083_vm1, %v9284_v51  ;;  %v1474_v53 = vsel %vm15828_vm8, %v1017_v29, %v1473_v12  ;;  %v1054_v55 = vshrl.u32 %v467_v24, 16  ;;  %v1057_v6 = vshll.u32 %v467_v24, 16  ;;  %v587_v19 = vld [vmem:[#allocation2 + $0x15c] sm:$0x1]  ;;  %14772 = vmatprep.subr.bf16.mxu0 %v15163_v3 }
 0x28f   : > { %v1026_v0 = vsel %vm15813_vm7, %v1018_v60, %v1025_v52  ;;  %1475 = vst [vmem:[#allocation2 + $0xfc] sm:$0xf] %v1474_v53  ;;  %v1048_v20 = vrot.slane %v1046_v34, 7  ;;  %v1080_v59 = vshrl.u32 %v470_v38, 16  ;;  %v1083_v21 = vshll.u32 %v470_v38, 16 }
 0x290   : > { %v18718_v1 = vld [vmem:[%s15744_s12 + $0xc0] sm:$0xf]  ;;  %1476 = vst.msk [vmem:[#allocation2 + $0x100] sm:$0xf] %vm490_vm0, %v1026_v0  ;;  %v18721_v5 = vrot.slane %v1054_v55, 7  ;;  %v1088_v12 = vshrl.u32 %v471_v17, 16 }
 0x291   : > { %v1091_v51 = vshll.u32 %v471_v17, 16  ;;  %v18724_v11 = vld [vmem:[%s15744_s12 + $0xc4] sm:$0xf]  ;;  %v582_v24 = vsel %vm15767_vm3, 0, %v581_v28  ;;  %v1052_v48 = vrot.slane %v1048_v20, 4  ;;  %v1082_v52 = vrot.slane %v1080_v59, 7 }
 0x292   : > { %23096 = vst [vmem:[#allocation175_spill] sm:$0xff] %v18721_v5  ;;  %583 = vst [vmem:[#allocation2 + $0x144] sm:$0x1] %v582_v24  ;;  %v588_v29 = vsel %vm15767_vm3, 0, %v587_v19  ;;  %v1059_v60 = vor.u32 %v1057_v6, %v18721_v5  ;;  %v18731_v38 = vrot.slane %v1088_v12, 7  ;;  %v1114_v43 = vshrl.u32 %v18718_v1, 16 }
 0x293   : > { %589 = vst [vmem:[#allocation2 + $0x15c] sm:$0x1] %v588_v29  ;;  %v13922_v2 = vld.sshfl [vmem:[#allocation2 + $0xe4] sm:$0x33 pattern:$0x75316420]  ;;  %v18735_v34 = vor.u32 %v1049_v16, %v1048_v20  ;;  %v18737_v28 = vor.u32 %v1083_v21, %v1082_v52 }
 0x294   : > { %23097 = vst [vmem:[#allocation176_spill] sm:$0xff] %v18731_v38  ;;  %v1086_v53 = vrot.slane %v1082_v52, 4  ;;  %v1122_v55 = vshrl.u32 %v18724_v11, 16  ;;  %v3394_v0 = vcombine.high %v13922_v2, %v13922_v2  ;;  %v3401_v19 = vrot.slane %v13922_v2, %v15794_v27 }
 0x295   : > { %v13923_v3 = vld.sshfl [vmem:[#allocation2 + $0xe8] sm:$0x33 pattern:$0x75316420]  ;;  %v1060_v6 = vsel %vm15813_vm7, %v1052_v48, %v1059_v60  ;;  %v1093_v59 = vor.u32 %v1091_v51, %v18731_v38  ;;  %v18746_v16 = vrot.slane %v1114_v43, 7 }
 0x296   : > { %v3418_v12 = vcombine.high %v13923_v3, %v13923_v3  ;;  %v3425_v24 = vrot.slane %v13923_v3, %v15794_v27  ;;  %1490 = vst.msk [vmem:[#allocation2 + $0x118] sm:$0xf] %vm490_vm0, %v1060_v6  ;;  %v18748_v20 = vrot.slane %v1122_v55, 7  ;;  %v3408_v52 = vrot.slane %v3394_v0, %v15794_v27 }
 0x297   : > { %v13925_v21 = vld.sshfl [vmem:[#allocation2 + $0xfc] sm:$0x33 pattern:$0x75316420]  ;;  %v3409_v29 = vcombine.high %v3401_v19, %v3401_v19  ;;  %v8039_v2 = vrot.slane %v3401_v19, %v15794_v27  ;;  %v1094_v48 = vsel %vm15813_vm7, %v1086_v53, %v1093_v59 }
 0x298   : > { %23098 = vst [vmem:[#allocation177_spill] sm:$0xff] %v18748_v20  ;;  %v13926_v60 = vld.sshfl [vmem:[#allocation2 + $0x100] sm:$0x33 pattern:$0x75316420]  ;;  %v3432_v51 = vrot.slane %v3418_v12, %v15794_v27  ;;  %v3433_v17 = vcombine.high %v3425_v24, %v3425_v24  ;;  %v3456_v3 = vcombine.high %v13925_v21, %v13925_v21  ;;  %v3463_v6 = vrot.slane %v13925_v21, %v15794_v27 }
 0x299   : > { %1504 = vst.msk [vmem:[#allocation2 + $0x130] sm:$0xf] %vm490_vm0, %v1094_v48  ;;  %v3410_v43 = vcombine.high %v3408_v52, %v3408_v52  ;;  %v3480_v55 = vcombine.high %v13926_v60, %v13926_v60  ;;  %v3487_v38 = vrot.slane %v13926_v60, %v15794_v27  ;;  %v18759_v0 = vrot.slane %v8039_v2, %v15794_v27 }
 0x29a   : > { %v3434_v19 = vcombine.high %v3432_v51, %v3432_v51  ;;  %v3470_v5 = vrot.slane %v3456_v3, %v15794_v27  ;;  %v3471_v53 = vcombine.high %v3463_v6, %v3463_v6  ;;  %v8053_v59 = vrot.slane %v3408_v52, %v15794_v27 }
 0x29b   : > { %23099 = vst [vmem:[#allocation178_spill] sm:$0xff] %v18759_v0  ;;  %v3494_v12 = vrot.slane %v3480_v55, %v15794_v27  ;;  %v3495_v39 = vcombine.high %v3487_v38, %v3487_v38  ;;  %v8067_v21 = vrot.slane %v3409_v29, %v15794_v27  ;;  %v8081_v48 = vrot.slane %v3410_v43, %v15794_v27 }
 0x29c   : > { %v3472_v42 = vcombine.high %v3470_v5, %v3470_v5  ;;  %v8060_v25 = vrot.slane %v8053_v59, %v15794_v27  ;;  %v8095_v60 = vrot.slane %v3425_v24, %v15794_v27  ;;  %v8109_v2 = vrot.slane %v3432_v51, %v15794_v27 }
 0x29d   : > { %v3496_v40 = vcombine.high %v3494_v12, %v3494_v12  ;;  %v8074_v3 = vrot.slane %v8067_v21, %v15794_v27  ;;  %v8088_v61 = vrot.slane %v8081_v48, %v15794_v27  ;;  %v8123_v52 = vrot.slane %v3433_v17, %v15794_v27 }
 0x29e   : > { %v18773_v55 = vrot.slane %v8095_v60, %v15794_v27  ;;  %v18776_v29 = vrot.slane %v8109_v2, %v15794_v27  ;;  %v8137_v43 = vrot.slane %v3434_v19, %v15794_v27  ;;  %v8151_v59 = vrot.slane %v3463_v6, %v15794_v27 }
 0x29f   : > { %v8130_v24 = vrot.slane %v8123_v52, %v15794_v27  ;;  %v8165_v51 = vrot.slane %v3470_v5, %v15794_v27  ;;  %v8179_v21 = vrot.slane %v3471_v53, %v15794_v27  ;;  %v8193_v48 = vrot.slane %v3472_v42, %v15794_v27 }
 0x2a0   : > { %23100 = vst [vmem:[#allocation179_spill] sm:$0xff] %v18773_v55  ;;  %23101 = vst [vmem:[#allocation180_spill] sm:$0xff] %v18776_v29  ;;  %v8144_v17 = vrot.slane %v8137_v43, %v15794_v27  ;;  %v18786_v60 = vrot.slane %v8151_v59, %v15794_v27  ;;  %v8207_v2 = vrot.slane %v3487_v38, %v15794_v27  ;;  %v18803_v59 = vunpack.c.l.b16 %v8060_v25 }
 0x2a1   : > { %v8221_v31 = vrot.slane %v3494_v12, %v15794_v27  ;;  %v8172_v19 = vrot.slane %v8165_v51, %v15794_v27  ;;  %v8186_v6 = vrot.slane %v8179_v21, %v15794_v27  ;;  %v8200_v52 = vrot.slane %v8193_v48, %v15794_v27 }
 0x2a2   : > { %v8235_v5 = vrot.slane %v3495_v39, %v15794_v27  ;;  %v18795_v53 = vrot.slane %v8207_v2, %v15794_v27  ;;  %v8249_v43 = vrot.slane %v3496_v40, %v15794_v27  ;;  %23102 = vst [vmem:[#allocation181_spill] sm:$0xff] %v18803_v59  ;;  %v18805_v51 = vunpack.c.l.b16 %v8074_v3 }
 0x2a3   : > { %v18798_v42 = vrot.slane %v8221_v31, %v15794_v27  ;;  %v18807_v21 = vunpack.c.l.b16 %v8088_v61  ;;  %v18812_v31 = vunpack.c.l.b16 %v8130_v24  ;;  %v18814_v7 = vunpack.c.l.b16 %v8144_v17 }
 0x2a4   : > { %v8242_v12 = vrot.slane %v8235_v5, %v15794_v27  ;;  %23103 = vst [vmem:[#allocation182_spill] sm:$0xff] %v18805_v51  ;;  %v8256_v39 = vrot.slane %v8249_v43, %v15794_v27  ;;  %v18817_v38 = vunpack.c.l.b16 %v8172_v19  ;;  %v18819_v25 = vunpack.c.l.b16 %v8186_v6  ;;  %v13929_v19 = vld.sshfl [vmem:[#allocation2 + $0x118] sm:$0x33 pattern:$0x75316420] }
 0x2a5   : > { %23104 = vst [vmem:[#allocation183_spill] sm:$0xff] %v18807_v21  ;;  %23105 = vst [vmem:[#allocation184_spill] sm:$0xff] %v18812_v31  ;;  %v18821_v3 = vunpack.c.l.b16 %v8200_v52  ;;  %v9169_v24 = vrot.slane %v18803_v59, 7  ;;  %v9171_v17 = vrot.slane %v18805_v51, 6  ;;  %v9173_v40 = vrot.slane %v18807_v21, 5 }
 0x2a6   : > { %23106 = vst [vmem:[#allocation185_spill] sm:$0xff] %v18814_v7  ;;  %23107 = vst [vmem:[#allocation186_spill] sm:$0xff] %v18817_v38  ;;  %v18825_v43 = vunpack.c.l.b16 %v8242_v12  ;;  %v18827_v48 = vunpack.c.l.b16 %v8256_v39  ;;  %v23112_v6 = vunpack.c.l.b16 %v18773_v55  ;;  %v23113_v52 = vunpack.c.l.b16 %v18776_v29  ;;  %v1487_v5 = vld [vmem:[#allocation2 + $0x114] sm:$0xf] }
 0x2a7   : > { %23108 = vst [vmem:[#allocation187_spill] sm:$0xff] %v18819_v25  ;;  %23109 = vst [vmem:[#allocation188_spill] sm:$0xff] %v18821_v3  ;;  %v9179_v61 = vrot.slane %v18812_v31, 2  ;;  %v9181_v12 = vrot.slane %v18814_v7, 1  ;;  %v23114_v49 = vunpack.c.l.b16 %v18759_v0  ;;  %v9183_v51 = vrot.slane %v18817_v38, 7 }
 0x2a8   : > { %23110 = vst [vmem:[#allocation189_spill] sm:$0xff] %v18825_v43  ;;  %23111 = vst [vmem:[#allocation190_spill] sm:$0xff] %v18827_v48  ;;  %v9175_v2 = vrot.slane %v23112_v6, 4  ;;  %v9177_v15 = vrot.slane %v23113_v52, 3  ;;  %v9185_v21 = vrot.slane %v18819_v25, 6  ;;  %v9187_v55 = vrot.slane %v18821_v3, 5 }
 0x2a9   : > { %v13932_v39 = vld.sshfl [vmem:[#allocation2 + $0x130] sm:$0x33 pattern:$0x75316420]  ;;  %v9170_v59 = vsel %vm5821_vm9, %v9169_v24, %v23114_v49  ;;  %v1501_v6 = vld [vmem:[#allocation2 + $0x12c] sm:$0xf]  ;;  %v23115_v52 = vunpack.c.l.b16 %v18795_v53  ;;  %v23116_v7 = vunpack.c.l.b16 %v18798_v42  ;;  %v23117_v49 = vunpack.c.l.b16 %v18786_v60 }
 0x2aa   : > { %v9172_v29 = vsel %vm5824_vm10, %v9171_v17, %v9170_v59  ;;  %v9193_v18 = vrot.slane %v18825_v43, 2  ;;  %v9195_v38 = vrot.slane %v18827_v48, 1  ;;  %v1488_v59 = vsel %vm15828_vm8, %v18735_v34, %v1487_v5  ;;  %v478_v43 = vld [vmem:[%s15744_s12 + $0xd0] sm:$0xf] }
 0x2ab   : > { %v9189_v31 = vrot.slane %v23115_v52, 4  ;;  %v9191_v35 = vrot.slane %v23116_v7, 3  ;;  %v9174_v0 = vsel %vm5827_vm11, %v9173_v40, %v9172_v29  ;;  %v9184_v24 = vsel %vm5821_vm9, %v9183_v51, %v23117_v49  ;;  %1489 = vst [vmem:[#allocation2 + $0x114] sm:$0xf] %v1488_v59 }
 0x2ac   : > { %v9176_v17 = vsel %vm5830_vm12, %v9175_v2, %v9174_v0  ;;  %v9186_v52 = vsel %vm5824_vm10, %v9185_v21, %v9184_v24  ;;  %v1502_v7 = vsel %vm15828_vm8, %v18737_v28, %v1501_v6  ;;  %v3542_v29 = vcombine.high %v13929_v19, %v13929_v19 }
 0x2ad   : > { %v9178_v40 = vsel %vm5833_vm13, %v9177_v15, %v9176_v17  ;;  %v9188_v51 = vsel %vm5827_vm11, %v9187_v55, %v9186_v52  ;;  %1503 = vst [vmem:[#allocation2 + $0x12c] sm:$0xf] %v1502_v7  ;;  %v3549_v49 = vrot.slane %v13929_v19, %v15794_v27  ;;  %v3604_v48 = vcombine.high %v13932_v39, %v13932_v39 }
 0x2ae   : > { %v9180_v34 = vsel %vm5836_vm14, %v9179_v61, %v9178_v40  ;;  %v9190_v0 = vsel %vm5830_vm12, %v9189_v31, %v9188_v51  ;;  %v3556_v21 = vrot.slane %v3542_v29, %v15794_v27  ;;  %v3611_v2 = vrot.slane %v13932_v39, %v15794_v27 }
 0x2af   : > { %v9182_v5 = vsel %vm5839_vm15, %v9181_v12, %v9180_v34  ;;  %v9192_v28 = vsel %vm5833_vm13, %v9191_v35, %v9190_v0  ;;  %v3557_v6 = vcombine.high %v3549_v49, %v3549_v49  ;;  %v3618_v15 = vrot.slane %v3604_v48, %v15794_v27 }
 0x2b0   : > { %v9194_v55 = vsel %vm5836_vm14, %v9193_v18, %v9192_v28  ;;  %v3558_v24 = vcombine.high %v3556_v21, %v3556_v21  ;;  %v3619_v19 = vcombine.high %v3611_v2, %v3611_v2  ;;  %v8319_v59 = vrot.slane %v3549_v49, %v15794_v27 }
 0x2b1   : > { %v9196_v61 = vsel %vm5839_vm15, %v9195_v38, %v9194_v55  ;;  %v3620_v31 = vcombine.high %v3618_v15, %v3618_v15  ;;  %v8333_v17 = vrot.slane %v3556_v21, %v15794_v27  ;;  %v8347_v39 = vrot.slane %v3557_v6, %v15794_v27 }
 0x2b2   : > { %v9285_v52 = vpack.c.b16 %v9196_v61, %v9182_v5  ;;  %v18879_v12 = vrot.slane %v8319_v59, %v15794_v27  ;;  %v8361_v35 = vrot.slane %v3558_v24, %v15794_v27  ;;  %v8431_v48 = vrot.slane %v3611_v2, %v15794_v27  ;;  %v13928_v18 = vld.sshfl [vmem:[#allocation2 + $0x114] sm:$0x33 pattern:$0x75316420] }
 0x2b3   : > { %v18884_v7 = vrot.slane %v8333_v17, %v15794_v27  ;;  %v8354_v29 = vrot.slane %v8347_v39, %v15794_v27  ;;  %v8445_v38 = vrot.slane %v3618_v15, %v15794_v27  ;;  %v8459_v40 = vrot.slane %v3619_v19, %v15794_v27 }
 0x2b4   : > { %23118 = vst [vmem:[#allocation191_spill] sm:$0xff] %v18879_v12  ;;  %14740 = vmatprep.mubr.msk.bf16.mxu0 %vm6083_vm1, %v9285_v52  ;;  %v13931_v51 = vld.sshfl [vmem:[#allocation2 + $0x12c] sm:$0x33 pattern:$0x75316420]  ;;  %v3518_v49 = vcombine.high %v13928_v18, %v13928_v18  ;;  %v3525_v34 = vrot.slane %v13928_v18, %v15794_v27  ;;  %v8368_v0 = vrot.slane %v8361_v35, %v15794_v27 }
 0x2b5   : > { %23119 = vst [vmem:[#allocation192_spill] sm:$0xff] %v18884_v7  ;;  %v18893_v21 = vrot.slane %v8431_v48, %v15794_v27  ;;  %v3580_v2 = vcombine.high %v13931_v51, %v13931_v51  ;;  %v3587_v5 = vrot.slane %v13931_v51, %v15794_v27  ;;  %v18897_v28 = vrot.slane %v8445_v38, %v15794_v27 }
 0x2b6   : > { %v8466_v6 = vrot.slane %v8459_v40, %v15794_v27  ;;  %v3532_v15 = vrot.slane %v3518_v49, %v15794_v27  ;;  %v3533_v55 = vcombine.high %v3525_v34, %v3525_v34  ;;  %v8263_v24 = vrot.slane %v3525_v34, %v15794_v27 }
 0x2b7   : > { %23120 = vst [vmem:[#allocation193_spill] sm:$0xff] %v18893_v21  ;;  %v8473_v19 = vrot.slane %v3620_v31, %v15794_v27  ;;  %v3594_v59 = vrot.slane %v3580_v2, %v15794_v27  ;;  %v3595_v61 = vcombine.high %v3587_v5, %v3587_v5  ;;  %v8375_v17 = vrot.slane %v3587_v5, %v15794_v27 }
 0x2b8   : > { %v3534_v52 = vcombine.high %v3532_v15, %v3532_v15  ;;  %v18907_v35 = vrot.slane %v8263_v24, %v15794_v27  ;;  %v8277_v48 = vrot.slane %v3532_v15, %v15794_v27  ;;  %v8291_v18 = vrot.slane %v3533_v55, %v15794_v27 }
 0x2b9   : > { %v3596_v38 = vcombine.high %v3594_v59, %v3594_v59  ;;  %v18912_v40 = vrot.slane %v8375_v17, %v15794_v27  ;;  %v8389_v31 = vrot.slane %v3594_v59, %v15794_v27  ;;  %v8403_v51 = vrot.slane %v3595_v61, %v15794_v27 }
 0x2ba   : > { %23121 = vst [vmem:[#allocation194_spill] sm:$0xff] %v18907_v35  ;;  %v8284_v49 = vrot.slane %v8277_v48, %v15794_v27  ;;  %v8298_v34 = vrot.slane %v8291_v18, %v15794_v27  ;;  %v8305_v2 = vrot.slane %v3534_v52, %v15794_v27  ;;  %v8480_v5 = vrot.slane %v8473_v19, %v15794_v27 }
 0x2bb   : > { %v8396_v15 = vrot.slane %v8389_v31, %v15794_v27  ;;  %v8410_v55 = vrot.slane %v8403_v51, %v15794_v27  ;;  %v8417_v24 = vrot.slane %v3596_v38, %v15794_v27  ;;  %v18931_v18 = vunpack.c.l.b16 %v8354_v29 }
 0x2bc   : > { %v8312_v59 = vrot.slane %v8305_v2, %v15794_v27  ;;  %v18925_v39 = vunpack.c.l.b16 %v8284_v49  ;;  %v18927_v61 = vunpack.c.l.b16 %v8298_v34  ;;  %v18933_v19 = vunpack.c.l.b16 %v8368_v0 }
 0x2bd   : > { %v8424_v52 = vrot.slane %v8417_v24, %v15794_v27  ;;  %23124 = vst [vmem:[#allocation197_spill] sm:$0xff] %v18931_v18  ;;  %v18938_v38 = vunpack.c.l.b16 %v8396_v15  ;;  %v18940_v17 = vunpack.c.l.b16 %v8410_v55  ;;  %v18946_v48 = vunpack.c.l.b16 %v8466_v6 }
 0x2be   : > { %23122 = vst [vmem:[#allocation195_spill] sm:$0xff] %v18925_v39  ;;  %23123 = vst [vmem:[#allocation196_spill] sm:$0xff] %v18927_v61  ;;  %v18936_v51 = vunpack.c.l.b16 %v8312_v59  ;;  %v18948_v29 = vunpack.c.l.b16 %v8480_v5  ;;  %v9197_v0 = vrot.slane %v18925_v39, 7  ;;  %v9199_v24 = vrot.slane %v18927_v61, 6 }
 0x2bf   : > { %23125 = vst [vmem:[#allocation198_spill] sm:$0xff] %v18933_v19  ;;  %23127 = vst [vmem:[#allocation200_spill] sm:$0xff] %v18938_v38  ;;  %v18943_v34 = vunpack.c.l.b16 %v8424_v52  ;;  %v23131_v55 = vunpack.c.l.b16 %v18879_v12  ;;  %v23132_v31 = vunpack.c.l.b16 %v18884_v7  ;;  %v9207_v2 = vrot.slane %v18931_v18, 2 }
 0x2c0   : > { %23126 = vst [vmem:[#allocation199_spill] sm:$0xff] %v18936_v51  ;;  %23129 = vst [vmem:[#allocation202_spill] sm:$0xff] %v18946_v48  ;;  %v9201_v15 = vrot.slane %v18936_v51, 5  ;;  %v9209_v6 = vrot.slane %v18933_v19, 1  ;;  %v9211_v5 = vrot.slane %v18938_v38, 7  ;;  %v23133_v49 = vunpack.c.l.b16 %v18907_v35 }
 0x2c1   : > { %23128 = vst [vmem:[#allocation201_spill] sm:$0xff] %v18943_v34  ;;  %23130 = vst [vmem:[#allocation203_spill] sm:$0xff] %v18948_v29  ;;  %v9203_v59 = vrot.slane %v23131_v55, 4  ;;  %v9205_v52 = vrot.slane %v23132_v31, 3  ;;  %v9213_v61 = vrot.slane %v18940_v17, 6  ;;  %v9215_v51 = vrot.slane %v18943_v34, 5 }
 0x2c2   : > { %v9198_v39 = vsel %vm5821_vm9, %v9197_v0, %v23133_v49  ;;  %v23134_v55 = vunpack.c.l.b16 %v18893_v21  ;;  %v23135_v7 = vunpack.c.l.b16 %v18912_v40  ;;  %v23136_v19 = vunpack.c.l.b16 %v18897_v28  ;;  %v479_v21 = vld [vmem:[%s15744_s12 + $0xd4] sm:$0xf] }
 0x2c3   : > { %v9200_v31 = vsel %vm5824_vm10, %v9199_v24, %v9198_v39  ;;  %v9221_v35 = vrot.slane %v18946_v48, 2  ;;  %v9223_v34 = vrot.slane %v18948_v29, 1  ;;  %v23137_v39 = vshll.u32 %v18718_v1, 16  ;;  %v1515_v29 = vld [vmem:[#allocation2 + $0x144] sm:$0xf] }
 0x2c4   : > { %v9217_v12 = vrot.slane %v23134_v55, 4  ;;  %v9212_v18 = vsel %vm5821_vm9, %v9211_v5, %v23135_v7  ;;  %v9219_v38 = vrot.slane %v23136_v19, 3  ;;  %v9202_v49 = vsel %vm5827_vm11, %v9201_v15, %v9200_v31 }
 0x2c5   : > { %v9214_v0 = vsel %vm5824_vm10, %v9213_v61, %v9212_v18  ;;  %v1119_v24 = vor.u32 %v23137_v39, %v18746_v16  ;;  %v9204_v55 = vsel %vm5830_vm12, %v9203_v59, %v9202_v49  ;;  %v1120_v19 = vrot.slane %v18746_v16, 4  ;;  %v593_v16 = vld [vmem:[#allocation2 + $0x174] sm:$0x1]  ;;  %v599_v49 = vld [vmem:[#allocation2 + $0x18c] sm:$0x1] }
 0x2c6   : > { %v9216_v7 = vsel %vm5827_vm11, %v9215_v51, %v9214_v0  ;;  %v1125_v5 = vshll.u32 %v18724_v11, 16  ;;  %v9206_v15 = vsel %vm5833_vm13, %v9205_v52, %v9204_v55  ;;  %v1148_v18 = vshrl.u32 %v478_v43, 16  ;;  %v482_v55 = vld [vmem:[%s15744_s12 + $0xe0] sm:$0xf] }
 0x2c7   : > { %v9218_v61 = vsel %vm5830_vm12, %v9217_v12, %v9216_v7  ;;  %v1151_v31 = vshll.u32 %v478_v43, 16  ;;  %v9208_v1 = vsel %vm5836_vm14, %v9207_v2, %v9206_v15  ;;  %v1156_v59 = vshrl.u32 %v479_v21, 16  ;;  %v486_v43 = vld [vmem:[%s15744_s12 + $0xf0] sm:$0xf]  ;;  %v1529_v15 = vld [vmem:[#allocation2 + $0x15c] sm:$0xf] }
 0x2c8   : > { %v9220_v39 = vsel %vm5833_vm13, %v9219_v38, %v9218_v61  ;;  %v1127_v51 = vor.u32 %v1125_v5, %v18748_v20  ;;  %v9210_v11 = vsel %vm5839_vm15, %v9209_v6, %v9208_v1  ;;  %v1150_v0 = vrot.slane %v1148_v18, 7  ;;  %v483_v61 = vld [vmem:[%s15744_s12 + $0xe4] sm:$0xf] }
 0x2c9   : > { %v9222_v52 = vsel %vm5836_vm14, %v9221_v35, %v9220_v39  ;;  %v1159_v12 = vshll.u32 %v479_v21, 16  ;;  %v18998_v2 = vrot.slane %v1156_v59, 7  ;;  %v1516_v5 = vsel %vm15828_vm8, %v1119_v24, %v1515_v29  ;;  %v487_v21 = vld [vmem:[%s15744_s12 + $0xf4] sm:$0xf] }
 0x2ca   : > { %v9224_v7 = vsel %vm5839_vm15, %v9223_v34, %v9222_v52  ;;  %v1128_v38 = vsel %vm15813_vm7, %v1120_v19, %v1127_v51  ;;  %v1153_v1 = vor.u32 %v1151_v31, %v1150_v0  ;;  %v1154_v35 = vrot.slane %v1150_v0, 4  ;;  %1517 = vst [vmem:[#allocation2 + $0x144] sm:$0xf] %v1516_v5 }
 0x2cb   : > { %23138 = vst [vmem:[#allocation204_spill] sm:$0xff] %v18998_v2  ;;  %v9286_v6 = vpack.c.b16 %v9224_v7, %v9210_v11  ;;  %1518 = vst.msk [vmem:[#allocation2 + $0x148] sm:$0xf] %vm490_vm0, %v1128_v38  ;;  %v594_v34 = vsel %vm15767_vm3, 0, %v593_v16  ;;  %v1161_v18 = vor.u32 %v1159_v12, %v18998_v2  ;;  %v600_v19 = vsel %vm15767_vm3, 0, %v599_v49 }
 0x2cc   : > { %595 = vst [vmem:[#allocation2 + $0x174] sm:$0x1] %v594_v34  ;;  %v1182_v39 = vshrl.u32 %v482_v55, 16  ;;  %v1185_v29 = vshll.u32 %v482_v55, 16  ;;  %v1530_v24 = vsel %vm15828_vm8, %v1153_v1, %v1529_v15  ;;  %601 = vst [vmem:[#allocation2 + $0x18c] sm:$0x1] %v600_v19  ;;  %v23140_v7 = vunpack.c.l.b16 %v18162_v4 }
 0x2cd   : > { %14741 = vmatmul.mubr.msk.bf16.gmra.mrb[8].mxu0 %vm6083_vm1, %v9286_v6  ;;  %v1190_v31 = vshrl.u32 %v483_v61, 16  ;;  %v1193_v51 = vshll.u32 %v483_v61, 16  ;;  %v1216_v59 = vshrl.u32 %v486_v43, 16  ;;  %v1162_v16 = vsel %vm15813_vm7, %v1154_v35, %v1161_v18  ;;  %1531 = vst [vmem:[#allocation2 + $0x15c] sm:$0xf] %v1530_v24 }
 0x2ce   : > { %v1184_v11 = vrot.slane %v1182_v39, 7  ;;  %v1219_v52 = vshll.u32 %v486_v43, 16  ;;  %v1224_v0 = vshrl.u32 %v487_v21, 16  ;;  %1532 = vst.msk [vmem:[#allocation2 + $0x160] sm:$0xf] %vm490_vm0, %v1162_v16  ;;  %v1227_v55 = vshll.u32 %v487_v21, 16 }
 0x2cf   : > { %v19016_v49 = vrot.slane %v1190_v31, 7  ;;  %v1218_v12 = vrot.slane %v1216_v59, 7  ;;  %v9459_v38 = vrot.slane %v23140_v7, 1  ;;  %v9461_v6 = vrot.slane %v18202_v58, 7 }
 0x2d0   : > { %v1187_v5 = vor.u32 %v1185_v29, %v1184_v11  ;;  %v1188_v15 = vrot.slane %v1184_v11, 4  ;;  %v19020_v61 = vrot.slane %v1224_v0, 7  ;;  %v23142_v39 = vunpack.c.l.b16 %v18156_v44 }
 0x2d1   : > { %23139 = vst [vmem:[#allocation205_spill] sm:$0xff] %v19016_v49  ;;  %v1195_v1 = vor.u32 %v1193_v51, %v19016_v49  ;;  %v1221_v35 = vor.u32 %v1219_v52, %v1218_v12  ;;  %v1222_v43 = vrot.slane %v1218_v12, 4  ;;  %v9460_v34 = vsel %vm5821_vm9, %v18200_v32, %v9459_v38  ;;  %v13934_v18 = vld.sshfl [vmem:[#allocation2 + $0x144] sm:$0x33 pattern:$0x75316420] }
 0x2d2   : > { %23141 = vst [vmem:[#allocation206_spill] sm:$0xff] %v19020_v61  ;;  %v1229_v19 = vor.u32 %v1227_v55, %v19020_v61  ;;  %v19028_v21 = vsel %vm5824_vm10, %v9461_v6, %v9460_v34  ;;  %v19033_v29 = vrot.slane %v23142_v39, 5  ;;  %v13935_v58 = vld.sshfl [vmem:[#allocation2 + $0x148] sm:$0x33 pattern:$0x75316420]  ;;  %v3642_v24 = vcombine.high %v13934_v18, %v13934_v18 }
 0x2d3   : > { %v3649_v31 = vrot.slane %v13934_v18, %v15794_v27  ;;  %v1196_v51 = vsel %vm15813_vm7, %v1188_v15, %v1195_v1  ;;  %v1543_v59 = vld [vmem:[#allocation2 + $0x174] sm:$0xf]  ;;  %v19040_v16 = vsel %vm5821_vm9, %v9461_v6, %v18200_v32  ;;  %v3666_v11 = vcombine.high %v13935_v58, %v13935_v58  ;;  %v1557_v12 = vld [vmem:[#allocation2 + $0x18c] sm:$0xf] }
 0x2d4   : > { %23143 = vst [vmem:[#allocation207_spill] sm:$0xff] %v19040_v16  ;;  %v3673_v52 = vrot.slane %v13935_v58, %v15794_v27  ;;  %v1230_v44 = vsel %vm15813_vm7, %v1222_v43, %v1229_v19  ;;  %v1544_v0 = vsel %vm15828_vm8, %v1187_v5, %v1543_v59  ;;  %1546 = vst.msk [vmem:[#allocation2 + $0x178] sm:$0xf] %vm490_vm0, %v1196_v51 }
 0x2d5   : > { %v13937_v55 = vld.sshfl [vmem:[#allocation2 + $0x15c] sm:$0x33 pattern:$0x75316420]  ;;  %v3656_v7 = vrot.slane %v3642_v24, %v15794_v27  ;;  %v3657_v38 = vcombine.high %v3649_v31, %v3649_v31  ;;  %v8487_v15 = vrot.slane %v3649_v31, %v15794_v27  ;;  %1545 = vst [vmem:[#allocation2 + $0x174] sm:$0xf] %v1544_v0  ;;  %v1558_v32 = vsel %vm15828_vm8, %v1221_v35, %v1557_v12 }
 0x2d6   : > { %1560 = vst.msk [vmem:[#allocation2 + $0x190] sm:$0xf] %vm490_vm0, %v1230_v44  ;;  %v13938_v6 = vld.sshfl [vmem:[#allocation2 + $0x160] sm:$0x33 pattern:$0x75316420]  ;;  %v3680_v1 = vrot.slane %v3666_v11, %v15794_v27  ;;  %v3681_v43 = vcombine.high %v3673_v52, %v3673_v52  ;;  %v3704_v5 = vcombine.high %v13937_v55, %v13937_v55  ;;  %v3711_v34 = vrot.slane %v13937_v55, %v15794_v27 }
 0x2d7   : > { %1559 = vst [vmem:[#allocation2 + $0x18c] sm:$0xf] %v1558_v32  ;;  %v3658_v18 = vcombine.high %v3656_v7, %v3656_v7  ;;  %v3728_v19 = vcombine.high %v13938_v6, %v13938_v6  ;;  %v3735_v39 = vrot.slane %v13938_v6, %v15794_v27  ;;  %v19057_v58 = vrot.slane %v8487_v15, %v15794_v27 }
 0x2d8   : > { %v3682_v24 = vcombine.high %v3680_v1, %v3680_v1  ;;  %v3718_v35 = vrot.slane %v3704_v5, %v15794_v27  ;;  %v3719_v31 = vcombine.high %v3711_v34, %v3711_v34  ;;  %v8501_v51 = vrot.slane %v3656_v7, %v15794_v27 }
 0x2d9   : > { %v3742_v59 = vrot.slane %v3728_v19, %v15794_v27  ;;  %v3743_v11 = vcombine.high %v3735_v39, %v3735_v39  ;;  %v8515_v44 = vrot.slane %v3657_v38, %v15794_v27  ;;  %v8529_v0 = vrot.slane %v3658_v18, %v15794_v27 }
 0x2da   : > { %v3720_v12 = vcombine.high %v3718_v35, %v3718_v35  ;;  %v8508_v55 = vrot.slane %v8501_v51, %v15794_v27  ;;  %v8543_v32 = vrot.slane %v3673_v52, %v15794_v27  ;;  %v8557_v15 = vrot.slane %v3680_v1, %v15794_v27 }
 0x2db   : > { %v3744_v6 = vcombine.high %v3742_v59, %v3742_v59  ;;  %v8522_v5 = vrot.slane %v8515_v44, %v15794_v27  ;;  %v8536_v4 = vrot.slane %v8529_v0, %v15794_v27  ;;  %v8571_v7 = vrot.slane %v3681_v43, %v15794_v27 }
 0x2dc   : > { %v19071_v19 = vrot.slane %v8543_v32, %v15794_v27  ;;  %v19074_v38 = vrot.slane %v8557_v15, %v15794_v27  ;;  %v8585_v18 = vrot.slane %v3682_v24, %v15794_v27  ;;  %v8599_v51 = vrot.slane %v3711_v34, %v15794_v27 }
 0x2dd   : > { %v8578_v52 = vrot.slane %v8571_v7, %v15794_v27  ;;  %v8613_v1 = vrot.slane %v3718_v35, %v15794_v27  ;;  %v8627_v44 = vrot.slane %v3719_v31, %v15794_v27  ;;  %v8641_v0 = vrot.slane %v3720_v12, %v15794_v27 }
 0x2de   : > { %23144 = vst [vmem:[#allocation208_spill] sm:$0xff] %v19074_v38  ;;  %v8592_v43 = vrot.slane %v8585_v18, %v15794_v27  ;;  %v19084_v32 = vrot.slane %v8599_v51, %v15794_v27  ;;  %v8655_v15 = vrot.slane %v3735_v39, %v15794_v27  ;;  %v8669_v36 = vrot.slane %v3742_v59, %v15794_v27 }
 0x2df   : > { %v8620_v24 = vrot.slane %v8613_v1, %v15794_v27  ;;  %v8634_v34 = vrot.slane %v8627_v44, %v15794_v27  ;;  %v8648_v7 = vrot.slane %v8641_v0, %v15794_v27  ;;  %v8683_v35 = vrot.slane %v3743_v11, %v15794_v27  ;;  %v13940_v0 = vld.sshfl [vmem:[#allocation2 + $0x174] sm:$0x33 pattern:$0x75316420] }
 0x2e0   : > { %v19093_v31 = vrot.slane %v8655_v15, %v15794_v27  ;;  %v19096_v12 = vrot.slane %v8669_v36, %v15794_v27  ;;  %v8697_v18 = vrot.slane %v3744_v6, %v15794_v27  ;;  %v19101_v51 = vunpack.c.l.b16 %v8508_v55  ;;  %v13941_v6 = vld.sshfl [vmem:[#allocation2 + $0x178] sm:$0x33 pattern:$0x75316420] }
 0x2e1   : > { %v8690_v59 = vrot.slane %v8683_v35, %v15794_v27  ;;  %v19103_v1 = vunpack.c.l.b16 %v8522_v5  ;;  %v19105_v44 = vunpack.c.l.b16 %v8536_v4  ;;  %v19110_v36 = vunpack.c.l.b16 %v8578_v52 }
 0x2e2   : > { %23145 = vst [vmem:[#allocation209_spill] sm:$0xff] %v19096_v12  ;;  %23146 = vst [vmem:[#allocation210_spill] sm:$0xff] %v19101_v51  ;;  %v8704_v11 = vrot.slane %v8697_v18, %v15794_v27  ;;  %v19112_v46 = vunpack.c.l.b16 %v8592_v43  ;;  %v19115_v39 = vunpack.c.l.b16 %v8620_v24  ;;  %v19117_v55 = vunpack.c.l.b16 %v8634_v34 }
 0x2e3   : > { %23147 = vst [vmem:[#allocation211_spill] sm:$0xff] %v19110_v36  ;;  %v19119_v5 = vunpack.c.l.b16 %v8648_v7  ;;  %v19123_v18 = vunpack.c.l.b16 %v8690_v59  ;;  %v9225_v52 = vrot.slane %v19101_v51, 7  ;;  %v9227_v43 = vrot.slane %v19103_v1, 6 }
 0x2e4   : > { %23148 = vst [vmem:[#allocation212_spill] sm:$0xff] %v19112_v46  ;;  %23149 = vst [vmem:[#allocation213_spill] sm:$0xff] %v19115_v39  ;;  %v19125_v15 = vunpack.c.l.b16 %v8704_v11  ;;  %v9229_v24 = vrot.slane %v19105_v44, 5  ;;  %v23154_v34 = vunpack.c.l.b16 %v19071_v19  ;;  %v23155_v61 = vunpack.c.l.b16 %v19074_v38 }
 0x2e5   : > { %23150 = vst [vmem:[#allocation214_spill] sm:$0xff] %v19117_v55  ;;  %23151 = vst [vmem:[#allocation215_spill] sm:$0xff] %v19119_v5  ;;  %v9235_v35 = vrot.slane %v19110_v36, 2  ;;  %v9237_v59 = vrot.slane %v19112_v46, 1  ;;  %v23156_v11 = vunpack.c.l.b16 %v19057_v58  ;;  %v9239_v2 = vrot.slane %v19115_v39, 7 }
 0x2e6   : > { %23152 = vst [vmem:[#allocation216_spill] sm:$0xff] %v19123_v18  ;;  %23153 = vst [vmem:[#allocation217_spill] sm:$0xff] %v19125_v15  ;;  %v9231_v7 = vrot.slane %v23154_v34, 4  ;;  %v9233_v4 = vrot.slane %v23155_v61, 3  ;;  %v9241_v20 = vrot.slane %v19117_v55, 6  ;;  %v9243_v8 = vrot.slane %v19119_v5, 5 }
 0x2e7   : > { %v9226_v49 = vsel %vm5821_vm9, %v9225_v52, %v23156_v11  ;;  %v23157_v34 = vunpack.c.l.b16 %v19093_v31  ;;  %v23158_v61 = vunpack.c.l.b16 %v19096_v12  ;;  %v9249_v46 = vrot.slane %v19123_v18, 2  ;;  %v13943_v12 = vld.sshfl [vmem:[#allocation2 + $0x18c] sm:$0x33 pattern:$0x75316420] }
 0x2e8   : > { %v9228_v16 = vsel %vm5824_vm10, %v9227_v43, %v9226_v49  ;;  %v23159_v52 = vunpack.c.l.b16 %v19084_v32  ;;  %v9251_v39 = vrot.slane %v19125_v15, 1  ;;  %v3766_v55 = vcombine.high %v13940_v0, %v13940_v0  ;;  %v13944_v15 = vld.sshfl [vmem:[#allocation2 + $0x190] sm:$0x33 pattern:$0x75316420] }
 0x2e9   : > { %v9245_v51 = vrot.slane %v23157_v34, 4  ;;  %v9247_v36 = vrot.slane %v23158_v61, 3  ;;  %v9230_v38 = vsel %vm5827_vm11, %v9229_v24, %v9228_v16  ;;  %v3773_v43 = vrot.slane %v13940_v0, %v15794_v27 }
 0x2ea   : > { %v9240_v11 = vsel %vm5821_vm9, %v9239_v2, %v23159_v52  ;;  %v9232_v5 = vsel %vm5830_vm12, %v9231_v7, %v9230_v38  ;;  %v3790_v34 = vcombine.high %v13941_v6, %v13941_v6  ;;  %v3780_v16 = vrot.slane %v3766_v55, %v15794_v27 }
 0x2eb   : > { %v9242_v49 = vsel %vm5824_vm10, %v9241_v20, %v9240_v11  ;;  %v9234_v61 = vsel %vm5833_vm13, %v9233_v4, %v9232_v5  ;;  %v3797_v24 = vrot.slane %v13941_v6, %v15794_v27  ;;  %v3781_v38 = vcombine.high %v3773_v43, %v3773_v43 }
 0x2ec   : > { %v9244_v18 = vsel %vm5827_vm11, %v9243_v8, %v9242_v49  ;;  %v9236_v2 = vsel %vm5836_vm14, %v9235_v35, %v9234_v61  ;;  %v3804_v20 = vrot.slane %v3790_v34, %v15794_v27  ;;  %v3782_v5 = vcombine.high %v3780_v16, %v3780_v16 }
 0x2ed   : > { %v9246_v52 = vsel %vm5830_vm12, %v9245_v51, %v9244_v18  ;;  %v9238_v0 = vsel %vm5839_vm15, %v9237_v59, %v9236_v2  ;;  %v3805_v4 = vcombine.high %v3797_v24, %v3797_v24  ;;  %v3828_v55 = vcombine.high %v13943_v12, %v13943_v12 }
 0x2ee   : > { %v9248_v7 = vsel %vm5833_vm13, %v9247_v36, %v9246_v52  ;;  %v3806_v11 = vcombine.high %v3804_v20, %v3804_v20  ;;  %v3835_v6 = vrot.slane %v13943_v12, %v15794_v27  ;;  %v3852_v49 = vcombine.high %v13944_v15, %v13944_v15 }
 0x2ef   : > { %v9250_v8 = vsel %vm5836_vm14, %v9249_v46, %v9248_v7  ;;  %v3859_v51 = vrot.slane %v13944_v15, %v15794_v27  ;;  %v8711_v18 = vrot.slane %v3773_v43, %v15794_v27  ;;  %v3842_v59 = vrot.slane %v3828_v55, %v15794_v27 }
 0x2f0   : > { %v9252_v35 = vsel %vm5839_vm15, %v9251_v39, %v9250_v8  ;;  %v3843_v61 = vcombine.high %v3835_v6, %v3835_v6  ;;  %v8725_v36 = vrot.slane %v3780_v16, %v15794_v27  ;;  %v3866_v2 = vrot.slane %v3852_v49, %v15794_v27 }
 0x2f1   : > { %v9287_v34 = vpack.c.b16 %v9252_v35, %v9238_v0  ;;  %v3867_v46 = vcombine.high %v3859_v51, %v3859_v51  ;;  %v19174_v52 = vrot.slane %v8711_v18, %v15794_v27  ;;  %v8739_v12 = vrot.slane %v3781_v38, %v15794_v27 }
 0x2f2   : > { %v3844_v39 = vcombine.high %v3842_v59, %v3842_v59  ;;  %v8732_v15 = vrot.slane %v8725_v36, %v15794_v27  ;;  %v8753_v43 = vrot.slane %v3782_v5, %v15794_v27  ;;  %v8767_v0 = vrot.slane %v3797_v24, %v15794_v27 }
 0x2f3   : > { %14744 = vmatprep.mubr.msk.bf16.mxu0 %vm6083_vm1, %v9287_v34  ;;  %v3868_v7 = vcombine.high %v3866_v2, %v3866_v2  ;;  %v8746_v16 = vrot.slane %v8739_v12, %v15794_v27  ;;  %v8781_v8 = vrot.slane %v3804_v20, %v15794_v27  ;;  %v8795_v55 = vrot.slane %v3805_v4, %v15794_v27 }
 0x2f4   : > { %v8760_v35 = vrot.slane %v8753_v43, %v15794_v27  ;;  %v19186_v38 = vrot.slane %v8767_v0, %v15794_v27  ;;  %v8809_v49 = vrot.slane %v3806_v11, %v15794_v27  ;;  %v8823_v18 = vrot.slane %v3835_v6, %v15794_v27 }
 0x2f5   : > { %v19191_v5 = vrot.slane %v8781_v8, %v15794_v27  ;;  %v8802_v24 = vrot.slane %v8795_v55, %v15794_v27  ;;  %v8837_v34 = vrot.slane %v3842_v59, %v15794_v27  ;;  %v8851_v20 = vrot.slane %v3843_v61, %v15794_v27 }
 0x2f6   : > { %23160 = vst [vmem:[#allocation218_spill] sm:$0xff] %v19186_v38  ;;  %v8816_v4 = vrot.slane %v8809_v49, %v15794_v27  ;;  %v19198_v36 = vrot.slane %v8823_v18, %v15794_v27  ;;  %v8865_v12 = vrot.slane %v3844_v39, %v15794_v27  ;;  %v8879_v11 = vrot.slane %v3859_v51, %v15794_v27 }
 0x2f7   : > { %23161 = vst [vmem:[#allocation219_spill] sm:$0xff] %v19191_v5  ;;  %v8844_v6 = vrot.slane %v8837_v34, %v15794_v27  ;;  %v8858_v43 = vrot.slane %v8851_v20, %v15794_v27  ;;  %v8893_v0 = vrot.slane %v3866_v2, %v15794_v27  ;;  %v8907_v8 = vrot.slane %v3867_v46, %v15794_v27 }
 0x2f8   : > { %v8872_v59 = vrot.slane %v8865_v12, %v15794_v27  ;;  %v19208_v61 = vrot.slane %v8879_v11, %v15794_v27  ;;  %v8921_v55 = vrot.slane %v3868_v7, %v15794_v27  ;;  %v19216_v18 = vunpack.c.l.b16 %v8732_v15 }
 0x2f9   : > { %v19213_v39 = vrot.slane %v8893_v0, %v15794_v27  ;;  %v8914_v51 = vrot.slane %v8907_v8, %v15794_v27  ;;  %v19218_v34 = vunpack.c.l.b16 %v8746_v16  ;;  %v19221_v46 = vunpack.c.l.b16 %v8760_v35 }
 0x2fa   : > { %23163 = vst [vmem:[#allocation221_spill] sm:$0xff] %v19216_v18  ;;  %v8928_v2 = vrot.slane %v8921_v55, %v15794_v27  ;;  %v22438_v12 = vunpack.c.l.b16 %v19191_v5  ;;  %v19225_v7 = vunpack.c.l.b16 %v8802_v24  ;;  %v19227_v11 = vunpack.c.l.b16 %v8816_v4 }
 0x2fb   : > { %23162 = vst [vmem:[#allocation220_spill] sm:$0xff] %v19213_v39  ;;  %23164 = vst [vmem:[#allocation222_spill] sm:$0xff] %v19218_v34  ;;  %v19230_v49 = vunpack.c.l.b16 %v8844_v6  ;;  %v19232_v15 = vunpack.c.l.b16 %v8858_v43  ;;  %v19234_v16 = vunpack.c.l.b16 %v8872_v59  ;;  %v19238_v55 = vunpack.c.l.b16 %v8914_v51 }
 0x2fc   : > { %23165 = vst [vmem:[#allocation223_spill] sm:$0xff] %v19221_v46  ;;  %23166 = vst [vmem:[#allocation224_spill] sm:$0xff] %v19225_v7  ;;  %v19240_v20 = vunpack.c.l.b16 %v8928_v2  ;;  %v9253_v24 = vrot.slane %v19216_v18, 7  ;;  %v9255_v4 = vrot.slane %v19218_v34, 6  ;;  %v9257_v0 = vrot.slane %v19221_v46, 5 }
 0x2fd   : > { %23167 = vst [vmem:[#allocation225_spill] sm:$0xff] %v19227_v11  ;;  %23168 = vst [vmem:[#allocation226_spill] sm:$0xff] %v19230_v49  ;;  %v23170_v6 = vunpack.c.l.b16 %v19186_v38  ;;  %v9261_v59 = vrot.slane %v22438_v12, 3  ;;  %v9263_v8 = vrot.slane %v19225_v7, 2  ;;  %v23171_v35 = vunpack.c.l.b16 %v19174_v52 }
 0x2fe   : > { %23169 = vst [vmem:[#allocation227_spill] sm:$0xff] %v19232_v15  ;;  %v9265_v2 = vrot.slane %v19227_v11, 1  ;;  %v9267_v27 = vrot.slane %v19230_v49, 7  ;;  %v9269_v18 = vrot.slane %v19232_v15, 6  ;;  %v9271_v38 = vrot.slane %v19234_v16, 5 }
 0x2ff   : > { %v9259_v43 = vrot.slane %v23170_v6, 4  ;;  %v9254_v51 = vsel %vm5821_vm9, %v9253_v24, %v23171_v35  ;;  %v23172_v6 = vunpack.c.l.b16 %v19208_v61  ;;  %v23173_v12 = vunpack.c.l.b16 %v19213_v39 }
 0x300   : > { %v9256_v46 = vsel %vm5824_vm10, %v9255_v4, %v9254_v51  ;;  %v23174_v35 = vunpack.c.l.b16 %v19198_v36  ;;  %v9277_v49 = vrot.slane %v19238_v55, 2  ;;  %v9279_v15 = vrot.slane %v19240_v20, 1 }
 0x301   : > { %v9273_v5 = vrot.slane %v23172_v6, 4  ;;  %v9275_v7 = vrot.slane %v23173_v12, 3  ;;  %v9258_v34 = vsel %vm5827_vm11, %v9257_v0, %v9256_v46  ;;  %v23175_v6 = vrot.slane %v18204_v47, 6 }
 0x302   : > { %v9268_v24 = vsel %vm5821_vm9, %v9267_v27, %v23174_v35  ;;  %v9260_v4 = vsel %vm5830_vm12, %v9259_v43, %v9258_v34  ;;  %v23176_v12 = vunpack.c.l.b16 %v18169_v63  ;;  %v22450_v34 = vrot.slane %v18209_v56, 3 }
 0x303   : > { %v9270_v51 = vsel %vm5824_vm10, %v9269_v18, %v9268_v24  ;;  %v9464_v39 = vsel %vm5827_vm11, %v23175_v6, %v19028_v21  ;;  %v9262_v0 = vsel %vm5833_vm13, %v9261_v59, %v9260_v4  ;;  %v22448_v63 = vrot.slane %v18211_v10, 2 }
 0x304   : > { %v19276_v46 = vrot.slane %v23176_v12, 4  ;;  %v9272_v27 = vsel %vm5827_vm11, %v9271_v38, %v9270_v51  ;;  %v9466_v35 = vsel %vm5830_vm12, %v19033_v29, %v9464_v39  ;;  %v9264_v18 = vsel %vm5836_vm14, %v9263_v8, %v9262_v0 }
 0x305   : > { %v9274_v43 = vsel %vm5830_vm12, %v9273_v5, %v9272_v27  ;;  %v9266_v24 = vsel %vm5839_vm15, %v9265_v2, %v9264_v18  ;;  %v23177_v39 = vunpack.c.l.b16 %v18183_v62  ;;  %v22454_v51 = vrot.slane %v18216_v45, 7 }
 0x306   : > { %v9468_v21 = vsel %vm5833_vm13, %v19276_v46, %v9466_v35  ;;  %v9276_v59 = vsel %vm5833_vm13, %v9275_v7, %v9274_v43  ;;  %v22453_v6 = vrot.slane %v18218_v33, 6  ;;  %v23178_v12 = vunpack.c.l.b16 %v18192_v23 }
 0x307   : > { %v9470_v38 = vsel %vm5836_vm14, %v22450_v34, %v9468_v21  ;;  %v9473_v4 = vrot.slane %v23177_v39, 1  ;;  %v9278_v8 = vsel %vm5836_vm14, %v9277_v49, %v9276_v59  ;;  %v23179_v62 = vunpack.c.l.b16 %v18195_v9 }
 0x308   : > { %v9472_v5 = vsel %vm5839_vm15, %v22448_v63, %v9470_v38  ;;  %v9280_v2 = vsel %vm5839_vm15, %v9279_v15, %v9278_v8  ;;  %v19306_v0 = vrot.slane %v23178_v12, 5  ;;  %v22449_v18 = vrot.slane %v18222_v26, 3  ;;  %v23185_v12 = vld [vmem:[#allocation131_spill] sm:$0xff] }
 0x309   : > { %v9474_v7 = vsel %vm5821_vm9, %v18214_v57, %v9473_v4  ;;  %v19310_v49 = vrot.slane %v23179_v62, 4  ;;  %v9288_v27 = vpack.c.b16 %v9280_v2, %v9266_v24  ;;  %v22452_v15 = vrot.slane %v18224_v22, 2 }
 0x30a   : > { %v9476_v35 = vsel %vm5824_vm10, %v22454_v51, %v9474_v7  ;;  %v23180_v23 = vunpack.c.l.b16 %v18281_v41  ;;  %v22451_v9 = vrot.slane %v18309_v37, 7  ;;  %v22456_v59 = vrot.slane %v18324_v54, 6 }
 0x30b   : > { %v9478_v43 = vsel %vm5827_vm11, %v22453_v6, %v9476_v35  ;;  %14745 = vmatmul.mubr.msk.bf16.gmra.mrb[12].mxu0 %vm6083_vm1, %v9288_v27  ;;  %v23181_v38 = vunpack.c.l.b16 %v18295_v30  ;;  %v23183_v4 = vunpack.c.l.b16 %v18298_v50  ;;  %v22460_v41 = vrot.slane %v18334_v13, 3  ;;  %v23186_v27 = vld [vmem:[#allocation127_spill] sm:$0xff] }
 0x30c   : > { %v9487_v21 = vrot.slane %v23180_v23, 1  ;;  %v9480_v24 = vsel %vm5830_vm12, %v19306_v0, %v9478_v43  ;;  %v22463_v62 = vrot.slane %v23185_v12, 2  ;;  %v23187_v35 = vunpack.c.l.b16 %v23186_v27  ;;  %v23188_v23 = vld [vmem:[#allocation133_spill] sm:$0xff] }
 0x30d   : > { %v19329_v39 = vrot.slane %v23181_v38, 5  ;;  %v19333_v8 = vrot.slane %v23183_v4, 4  ;;  %v9482_v2 = vsel %vm5833_vm13, %v19310_v49, %v9480_v24  ;;  %v22455_v38 = vrot.slane %v23188_v23, 7  ;;  %v23189_v4 = vld [vmem:[#allocation134_spill] sm:$0xff] }
 0x30e   : > { %v9488_v7 = vsel %vm5821_vm9, %v18305_v14, %v9487_v21  ;;  %v9501_v43 = vrot.slane %v23187_v35, 1  ;;  %v9484_v30 = vsel %vm5836_vm14, %v22449_v18, %v9482_v2  ;;  %v22457_v24 = vrot.slane %v23189_v4, 6  ;;  %v23190_v35 = vld [vmem:[#allocation132_spill] sm:$0xff] }
 0x30f   : > { %23182 = vst [vmem:[#allocation228_spill] sm:$0xff] %v19329_v39  ;;  %23184 = vst [vmem:[#allocation229_spill] sm:$0xff] %v19333_v8  ;;  %v9490_v50 = vsel %vm5824_vm10, %v22451_v9, %v9488_v7  ;;  %v9486_v21 = vsel %vm5839_vm15, %v22452_v15, %v9484_v30  ;;  %v23191_v2 = vld [vmem:[#allocation128_spill] sm:$0xff]  ;;  %v23195_v15 = vld [vmem:[#allocation129_spill] sm:$0xff] }
 0x310   : > { %v9492_v27 = vsel %vm5827_vm11, %v22456_v59, %v9490_v50  ;;  %v9502_v63 = vsel %vm5821_vm9, %v23190_v35, %v9501_v43  ;;  %v23192_v18 = vunpack.c.l.b16 %v23191_v2  ;;  %v19363_v7 = vpack.c.b16 %v9486_v21, %v9472_v5  ;;  %v23198_v5 = vld [vmem:[#allocation135_spill] sm:$0xff]  ;;  %v23199_v21 = vld [vmem:[#allocation136_spill] sm:$0xff]  ;;  %v23203_v2 = vld [vmem:[#allocation149_spill] sm:$0xff] }
 0x311   : > { %v9494_v9 = vsel %vm5830_vm12, %v19329_v39, %v9492_v27  ;;  %v9504_v30 = vsel %vm5824_vm10, %v22455_v38, %v9502_v63  ;;  %v23196_v6 = vunpack.c.l.b16 %v23195_v15  ;;  %v23200_v15 = vld [vmem:[#allocation141_spill] sm:$0xff]  ;;  %v23202_v38 = vld [vmem:[#allocation148_spill] sm:$0xff]  ;;  %v23209_v59 = vld [vmem:[#allocation143_spill] sm:$0xff] }
 0x312   : > { %v19361_v34 = vrot.slane %v23192_v18, 5  ;;  %23194 = vst [vmem:[#allocation132_spill] sm:$0xff] %v19363_v7  ;;  %v9496_v43 = vsel %vm5833_vm13, %v19333_v8, %v9494_v9  ;;  %v9506_v18 = vsel %vm5827_vm11, %v22457_v24, %v9504_v30  ;;  %14756 = vmatprep.mubr.msk.bf16.mxu0 %vm6083_vm1, %v19363_v7  ;;  %v23201_v9 = vunpack.c.l.b16 %v23200_v15  ;;  %v23204_v7 = vld [vmem:[#allocation142_spill] sm:$0xff]  ;;  %v23230_v4 = vld [vmem:[#allocation156_spill] sm:$0xff] }
 0x313   : > { %v19372_v51 = vrot.slane %v23196_v6, 4  ;;  %v9498_v63 = vsel %vm5836_vm14, %v22460_v41, %v9496_v43  ;;  %v23205_v13 = vunpack.c.l.b16 %v23204_v7  ;;  %v23210_v12 = vunpack.c.l.b16 %v23209_v59 }
 0x314   : > { %23193 = vst [vmem:[#allocation127_spill] sm:$0xff] %v19361_v34  ;;  %v9508_v6 = vsel %vm5830_vm12, %v19361_v34, %v9506_v18  ;;  %v9515_v27 = vrot.slane %v23201_v9, 1  ;;  %v9500_v30 = vsel %vm5839_vm15, %v22463_v62, %v9498_v63  ;;  %v23207_v18 = vrot.slane %v23198_v5, 3  ;;  %v23208_v9 = vld [vmem:[#allocation146_spill] sm:$0xff]  ;;  %v23215_v5 = vld [vmem:[#allocation151_spill] sm:$0xff]  ;;  %v23220_v62 = vld [vmem:[#allocation153_spill] sm:$0xff] }
 0x315   : > { %23197 = vst [vmem:[#allocation128_spill] sm:$0xff] %v19372_v51  ;;  %v9510_v24 = vsel %vm5833_vm13, %v19372_v51, %v9508_v6  ;;  %v19399_v43 = vrot.slane %v23205_v13, 5  ;;  %v19408_v34 = vrot.slane %v23210_v12, 4  ;;  %v23212_v63 = vld [vmem:[#allocation150_spill] sm:$0xff]  ;;  %v23213_v6 = vrot.slane %v23199_v21, 2  ;;  %v23223_v51 = vld [vmem:[#allocation145_spill] sm:$0xff] }
 0x316   : > { %v9512_v15 = vsel %vm5836_vm14, %v23207_v18, %v9510_v24  ;;  %v9516_v41 = vsel %vm5821_vm9, %v23208_v9, %v9515_v27  ;;  %v23214_v13 = vrot.slane %v23202_v38, 7  ;;  %v23216_v24 = vld [vmem:[#allocation144_spill] sm:$0xff]  ;;  %v23219_v59 = vrot.slane %v23203_v2, 6  ;;  %v23221_v21 = vld [vmem:[#allocation154_spill] sm:$0xff] }
 0x317   : > { %23206 = vst [vmem:[#allocation129_spill] sm:$0xff] %v19399_v43  ;;  %23211 = vst [vmem:[#allocation141_spill] sm:$0xff] %v19408_v34  ;;  %v9514_v50 = vsel %vm5839_vm15, %v23213_v6, %v9512_v15  ;;  %v23217_v18 = vunpack.c.l.b16 %v23216_v24  ;;  %v22475_v9 = vrot.slane %v23220_v62, 7  ;;  %v15164_v15 = vld [vmem:[#allocation7 + $0xa8] sm:$0xff]   ;;  %v23224_v24 = vunpack.c.l.b16 %v23223_v51  ;;  %v23237_v51 = vld [vmem:[#allocation167_spill] sm:$0xff] }
 0x318   : > { %v9518_v7 = vsel %vm5824_vm10, %v23214_v13, %v9516_v41  ;;  %v19420_v27 = vpack.c.b16 %v9514_v50, %v9500_v30  ;;  %v23222_v41 = vld [vmem:[#allocation152_spill] sm:$0xff]  ;;  %v23226_v50 = vld [vmem:[#allocation147_spill] sm:$0xff]  ;;  %v23242_v38 = vld [vmem:[#allocation158_spill] sm:$0xff] }
 0x319   : > { %v9529_v8 = vrot.slane %v23217_v18, 1  ;;  %v9520_v12 = vsel %vm5827_vm11, %v23219_v59, %v9518_v7  ;;  %v19433_v18 = vrot.slane %v23224_v24, 5  ;;  %v23227_v30 = vunpack.c.l.b16 %v23226_v50  ;;  %v15274_v24 = vld [vmem:[#allocation7 + $0xa0] sm:$0xff]   ;;  %v23235_v62 = vld [vmem:[#allocation164_spill] sm:$0xff] }
 0x31a   : > { %23218 = vst [vmem:[#allocation142_spill] sm:$0xff] %v19420_v27  ;;  %v9522_v6 = vsel %vm5830_vm12, %v19399_v43, %v9520_v12  ;;  %14757 = vmatmul.mubr.msk.bf16.vlgmr.msra.gmra.mrb[0].mxu0 %vm6083_vm1, %v19420_v27  ;;  %v23229_v12 = vld [vmem:[#allocation155_spill] sm:$0xff]  ;;  %v23231_v50 = vrot.slane %v23212_v63, 3  ;;  %v23232_v43 = vrot.slane %v23221_v21, 6  ;;  %v23248_v21 = vld [vmem:[#allocation166_spill] sm:$0xff] }
 0x31b   : > { %v9530_v13 = vsel %vm5821_vm9, %v23222_v41, %v9529_v8  ;;  %23225 = vst [vmem:[#allocation143_spill] sm:$0xff] %v19433_v18  ;;  %v19437_v2 = vrot.slane %v23227_v30, 4  ;;  %v9524_v7 = vsel %vm5833_vm13, %v19408_v34, %v9522_v6  ;;  %14773 = vmatpush3.bf16.msra.mxu0 %v15274_v24  ;;  %v23233_v41 = vld [vmem:[#allocation161_spill] sm:$0xff] }
 0x31c   : > { %v9532_v59 = vsel %vm5824_vm10, %v22475_v9, %v9530_v13  ;;  %v9526_v30 = vsel %vm5836_vm14, %v23231_v50, %v9524_v7  ;;  %v23234_v6 = vunpack.c.l.b16 %v23233_v41  ;;  %v23236_v13 = vrot.slane %v23215_v5, 2  ;;  %14774 = vmatprep.subr.bf16.mxu0 %v15164_v15  ;;  %v23238_v7 = vld [vmem:[#allocation157_spill] sm:$0xff] }
 0x31d   : > { %23228 = vst [vmem:[#allocation144_spill] sm:$0xff] %v19437_v2  ;;  %v9534_v27 = vsel %vm5827_vm11, %v23232_v43, %v9532_v59  ;;  %v23239_v50 = vunpack.c.l.b16 %v23238_v7  ;;  %v15165_v43 = vld [vmem:[#allocation7 + $0xb0] sm:$0xff]   ;;  %v23241_v59 = vld [vmem:[#allocation163_spill] sm:$0xff]  ;;  %v23243_v5 = vunpack.c.l.b16 %v23242_v38  ;;  %v23247_v7 = vrot.slane %v23235_v62, 7 }
 0x31e   : > { %v9543_v34 = vrot.slane %v23234_v6, 1  ;;  %v9528_v9 = vsel %vm5839_vm15, %v23236_v13, %v9526_v30  ;;  %v9536_v24 = vsel %vm5830_vm12, %v19433_v18, %v9534_v27  ;;  %v23245_v13 = vld [vmem:[#allocation165_spill] sm:$0xff]  ;;  %v23246_v18 = vrot.slane %v23229_v12, 3 }
 0x31f   : > { %v19465_v63 = vrot.slane %v23239_v50, 5  ;;  %v9538_v41 = vsel %vm5833_vm13, %v19437_v2, %v9536_v24  ;;  %v19473_v30 = vrot.slane %v23243_v5, 4  ;;  %v23249_v24 = vld [vmem:[#allocation162_spill] sm:$0xff]  ;;  %v23252_v5 = vrot.slane %v23237_v51, 6  ;;  %14775 = vmatpush3.bf16.msra.mxu0 %v15164_v15  ;;  %v23260_v15 = vld [vmem:[#allocation160_spill] sm:$0xff] }
 0x320   : > { %v9544_v6 = vsel %vm5821_vm9, %v23241_v59, %v9543_v34  ;;  %v9540_v8 = vsel %vm5836_vm14, %v23246_v18, %v9538_v41  ;;  %v23250_v2 = vunpack.c.l.b16 %v23249_v24  ;;  %v23251_v34 = vrot.slane %v23230_v4, 2  ;;  %v23253_v59 = vld [vmem:[#allocation169_spill] sm:$0xff]  ;;  %v23254_v18 = vld [vmem:[#allocation170_spill] sm:$0xff]  ;;  %v23257_v24 = vld [vmem:[#allocation159_spill] sm:$0xff]  ;;  %14776 = vmatprep.subr.bf16.mxu0 %v15165_v43 }
 0x321   : > { %23240 = vst [vmem:[#allocation145_spill] sm:$0xff] %v19465_v63  ;;  %23244 = vst [vmem:[#allocation147_spill] sm:$0xff] %v19473_v30  ;;  %v9546_v50 = vsel %vm5824_vm10, %v23247_v7, %v9544_v6  ;;  %v22487_v12 = vrot.slane %v23253_v59, 7  ;;  %v23256_v7 = vld [vmem:[#allocation168_spill] sm:$0xff]  ;;  %v23258_v39 = vunpack.c.l.b16 %v23257_v24  ;;  %v23265_v24 = vrot.slane %v23254_v18, 6  ;;  %v23270_v59 = vld [vmem:[#allocation182_spill] sm:$0xff] }
 0x322   : > { %v9557_v23 = vrot.slane %v23250_v2, 1  ;;  %v9542_v38 = vsel %vm5839_vm15, %v23251_v34, %v9540_v8  ;;  %v9548_v27 = vsel %vm5827_vm11, %v23252_v5, %v9546_v50  ;;  %v15166_v34 = vld [vmem:[#allocation7 + $0xb8] sm:$0xff]  }
 0x323   : > { %v19493_v62 = vpack.c.b16 %v9542_v38, %v9528_v9  ;;  %v9550_v6 = vsel %vm5830_vm12, %v19465_v63, %v9548_v27  ;;  %v19501_v8 = vrot.slane %v23258_v39, 5  ;;  %v23261_v38 = vunpack.c.l.b16 %v23260_v15  ;;  %v23263_v27 = vld [vmem:[#allocation171_spill] sm:$0xff]  ;;  %14777 = vmatpush3.bf16.msra.mxu0 %v15165_v43 }
 0x324   : > { %v9558_v2 = vsel %vm5821_vm9, %v23256_v7, %v9557_v23  ;;  %v9552_v50 = vsel %vm5833_vm13, %v19473_v30, %v9550_v6  ;;  %v23264_v39 = vrot.slane %v23245_v13, 3  ;;  %v23266_v30 = vld [vmem:[#allocation172_spill] sm:$0xff]  ;;  %v22496_v13 = vrot.slane %v23270_v59, 7  ;;  %v23271_v7 = vld [vmem:[#allocation183_spill] sm:$0xff]  ;;  %14778 = vmatprep.subr.bf16.mxu0 %v15166_v34 }
 0x325   : > { %23255 = vst [vmem:[#allocation156_spill] sm:$0xff] %v19493_v62  ;;  %23259 = vst [vmem:[#allocation161_spill] sm:$0xff] %v19501_v8  ;;  %v9560_v9 = vsel %vm5824_vm10, %v22487_v12, %v9558_v2  ;;  %v19510_v5 = vrot.slane %v23261_v38, 4  ;;  %14760 = vmatprep.mubr.msk.bf16.mxu0 %vm6083_vm1, %v19493_v62  ;;  %v23267_v2 = vld [vmem:[#allocation178_spill] sm:$0xff]  ;;  %v23269_v38 = vrot.slane %v23248_v21, 2  ;;  %v23275_v21 = vld [vmem:[#allocation180_spill] sm:$0xff] }
 0x326   : > { %v9554_v23 = vsel %vm5836_vm14, %v23264_v39, %v9552_v50  ;;  %v9562_v6 = vsel %vm5827_vm11, %v23265_v24, %v9560_v9  ;;  %v23268_v12 = vunpack.c.l.b16 %v23267_v2  ;;  %v23272_v39 = vld [vmem:[#allocation181_spill] sm:$0xff]  ;;  %v23273_v2 = vld [vmem:[#allocation179_spill] sm:$0xff]  ;;  %v23278_v50 = vrot.slane %v23263_v27, 3 }
 0x327   : > { %23262 = vst [vmem:[#allocation167_spill] sm:$0xff] %v19510_v5  ;;  %v9556_v41 = vsel %vm5839_vm15, %v23269_v38, %v9554_v23  ;;  %v9564_v62 = vsel %vm5830_vm12, %v19501_v8, %v9562_v6  ;;  %v23276_v23 = vunpack.c.l.b16 %v23275_v21  ;;  %v19543_v6 = vld [vmem:[#allocation7 + $0xc0] sm:$0xff]   ;;  %v23283_v27 = vunpack.c.l.b16 %v18786_v60  ;;  %14779 = vmatpush3.bf16.msra.mxu0 %v15166_v34 }
 0x328   : > { %v9571_v15 = vrot.slane %v23268_v12, 1  ;;  %v9566_v9 = vsel %vm5833_vm13, %v19510_v5, %v9564_v62  ;;  %v23274_v12 = vunpack.c.l.b16 %v23273_v2  ;;  %23277 = vst [vmem:[#allocation157_spill] sm:$0xff] %v19543_v6  ;;  %v23280_v2 = vld [vmem:[#allocation185_spill] sm:$0xff]  ;;  %v23281_v5 = vrot.slane %v23266_v30, 2  ;;  %14796 = vmatprep.subr.bf16.mxu0 %v19543_v6  ;;  %v23295_v6 = vld [vmem:[#allocation196_spill] sm:$0xff] }
 0x329   : > { %v19541_v38 = vrot.slane %v23276_v23, 4  ;;  %v9568_v43 = vsel %vm5836_vm14, %v23278_v50, %v9566_v9  ;;  %v23282_v23 = vrot.slane %v23271_v7, 6  ;;  %v9585_v18 = vrot.slane %v23283_v27, 1 }
 0x32a   : > { %v9572_v24 = vsel %vm5821_vm9, %v23272_v39, %v9571_v15  ;;  %v19537_v63 = vrot.slane %v23274_v12, 5  ;;  %v23279_v15 = vld [vmem:[#allocation184_spill] sm:$0xff]  ;;  %v9570_v21 = vsel %vm5839_vm15, %v23281_v5, %v9568_v43  ;;  %v22500_v50 = vrot.slane %v18819_v25, 7  ;;  %v23287_v43 = vld [vmem:[#allocation186_spill] sm:$0xff] }
 0x32b   : > { %v9574_v62 = vsel %vm5824_vm10, %v22496_v13, %v9572_v24  ;;  %v19562_v9 = vpack.c.b16 %v9570_v21, %v9556_v41  ;;  %v22503_v13 = vrot.slane %v18821_v3, 6  ;;  %v23285_v12 = vunpack.c.l.b16 %v18795_v53  ;;  %v23308_v3 = vld [vmem:[#allocation201_spill] sm:$0xff] }
 0x32c   : > { %v9576_v8 = vsel %vm5827_vm11, %v23282_v23, %v9574_v62  ;;  %v9586_v60 = vsel %vm5821_vm9, %v23287_v43, %v9585_v18  ;;  %v23288_v27 = vunpack.c.l.b16 %v18798_v42  ;;  %v23289_v62 = vld [vmem:[#allocation189_spill] sm:$0xff]  ;;  %v23290_v53 = vrot.slane %v23279_v15, 3  ;;  %v23291_v18 = vld [vmem:[#allocation190_spill] sm:$0xff] }
 0x32d   : > { %23284 = vst [vmem:[#allocation158_spill] sm:$0xff] %v19562_v9  ;;  %v9578_v24 = vsel %vm5830_vm12, %v19537_v63, %v9576_v8  ;;  %v19569_v39 = vrot.slane %v23285_v12, 5  ;;  %14761 = vmatmul.mubr.msk.bf16.gmra.mrb[4].mxu0 %vm6083_vm1, %v19562_v9  ;;  %v9588_v34 = vsel %vm5824_vm10, %v22500_v50, %v9586_v60  ;;  %v23292_v42 = vld [vmem:[#allocation194_spill] sm:$0xff]  ;;  %v22507_v15 = vrot.slane %v23295_v6, 7  ;;  %v23297_v50 = vld [vmem:[#allocation195_spill] sm:$0xff] }
 0x32e   : > { %v9580_v5 = vsel %vm5833_vm13, %v19541_v38, %v9578_v24  ;;  %v19577_v41 = vrot.slane %v23288_v27, 4  ;;  %v23293_v23 = vunpack.c.l.b16 %v23292_v42  ;;  %v23294_v27 = vrot.slane %v23280_v2, 2  ;;  %v23298_v42 = vld [vmem:[#allocation191_spill] sm:$0xff]  ;;  %v23300_v2 = vld [vmem:[#allocation192_spill] sm:$0xff] }
 0x32f   : > { %23286 = vst [vmem:[#allocation162_spill] sm:$0xff] %v19569_v39  ;;  %v9582_v8 = vsel %vm5836_vm14, %v23290_v53, %v9580_v5  ;;  %v9590_v9 = vsel %vm5827_vm11, %v22503_v13, %v9588_v34  ;;  %v23296_v5 = vld [vmem:[#allocation199_spill] sm:$0xff]  ;;  %v23302_v53 = vld [vmem:[#allocation197_spill] sm:$0xff]  ;;  %v23307_v6 = vrot.slane %v23291_v18, 2 }
 0x330   : > { %v9599_v24 = vrot.slane %v23293_v23, 1  ;;  %v9584_v21 = vsel %vm5839_vm15, %v23294_v27, %v9582_v8  ;;  %v9592_v60 = vsel %vm5830_vm12, %v19569_v39, %v9590_v9  ;;  %v23299_v23 = vunpack.c.l.b16 %v23298_v42  ;;  %v23303_v39 = vld [vmem:[#allocation198_spill] sm:$0xff] }
 0x331   : > { %v23301_v8 = vunpack.c.l.b16 %v23300_v2  ;;  %v9594_v34 = vsel %vm5833_vm13, %v19577_v41, %v9592_v60  ;;  %v22510_v60 = vrot.slane %v18940_v17, 7  ;;  %v22512_v9 = vrot.slane %v23308_v3, 6 }
 0x332   : > { %v9600_v12 = vsel %vm5821_vm9, %v23297_v50, %v9599_v24  ;;  %v19606_v25 = vrot.slane %v23299_v23, 5  ;;  %v23304_v24 = vrot.slane %v23289_v62, 3  ;;  %v23305_v23 = vrot.slane %v23296_v5, 6  ;;  %v23309_v62 = vld [vmem:[#allocation193_spill] sm:$0xff] }
 0x333   : > { %v19610_v27 = vrot.slane %v23301_v8, 4  ;;  %v9602_v13 = vsel %vm5824_vm10, %v22507_v15, %v9600_v12  ;;  %v23306_v8 = vunpack.c.l.b16 %v18912_v40 }
 0x334   : > { %v9596_v42 = vsel %vm5836_vm14, %v23304_v24, %v9594_v34  ;;  %v9604_v2 = vsel %vm5827_vm11, %v23305_v23, %v9602_v13  ;;  %v23310_v34 = vunpack.c.l.b16 %v23309_v62  ;;  %v23313_v13 = vld [vmem:[#allocation200_spill] sm:$0xff] }
 0x335   : > { %v9613_v50 = vrot.slane %v23306_v8, 1  ;;  %v9598_v12 = vsel %vm5839_vm15, %v23307_v6, %v9596_v42  ;;  %v9606_v15 = vsel %vm5830_vm12, %v19606_v25, %v9604_v2  ;;  %v23314_v8 = vunpack.c.l.b16 %v18897_v28 }
 0x336   : > { %v19636_v24 = vrot.slane %v23310_v34, 5  ;;  %v19638_v5 = vpack.c.b16 %v9598_v12, %v9584_v21  ;;  %v9608_v40 = vsel %vm5833_vm13, %v19610_v27, %v9606_v15  ;;  %v23316_v42 = vrot.slane %v23302_v53, 3  ;;  %v23317_v12 = vld [vmem:[#allocation203_spill] sm:$0xff] }
 0x337   : > { %v9614_v23 = vsel %vm5821_vm9, %v23313_v13, %v9613_v50  ;;  %v19646_v6 = vrot.slane %v23314_v8, 4  ;;  %v23318_v15 = vrot.slane %v23303_v39, 2  ;;  %v23320_v34 = vunpack.c.l.b16 %v19071_v19  ;;  %v23327_v39 = vld [vmem:[#allocation212_spill] sm:$0xff] }
 0x338   : > { %23311 = vst [vmem:[#allocation159_spill] sm:$0xff] %v19636_v24  ;;  %23312 = vst [vmem:[#allocation160_spill] sm:$0xff] %v19638_v5  ;;  %v9610_v2 = vsel %vm5836_vm14, %v23316_v42, %v9608_v40  ;;  %v9616_v62 = vsel %vm5824_vm10, %v22510_v60, %v9614_v23  ;;  %14764 = vmatprep.mubr.msk.bf16.mxu0 %vm6083_vm1, %v19638_v5  ;;  %v23319_v40 = vunpack.c.l.b16 %v19057_v58  ;;  %v23322_v5 = vld [vmem:[#allocation208_spill] sm:$0xff]  ;;  %v23325_v58 = vld [vmem:[#allocation210_spill] sm:$0xff]  ;;  %v23328_v60 = vrot.slane %v18946_v48, 3 }
 0x339   : > { %23315 = vst [vmem:[#allocation172_spill] sm:$0xff] %v19646_v6  ;;  %v9612_v28 = vsel %vm5839_vm15, %v23318_v15, %v9610_v2  ;;  %v9618_v50 = vsel %vm5827_vm11, %v22512_v9, %v9616_v62  ;;  %v19672_v21 = vrot.slane %v23320_v34, 5  ;;  %v23323_v2 = vunpack.c.l.b16 %v23322_v5  ;;  %v23326_v9 = vld [vmem:[#allocation211_spill] sm:$0xff] }
 0x33a   : > { %v9627_v8 = vrot.slane %v23319_v40, 1  ;;  %v9620_v42 = vsel %vm5830_vm12, %v19636_v24, %v9618_v50  ;;  %v23329_v34 = vrot.slane %v19103_v1, 7  ;;  %v23331_v24 = vld [vmem:[#allocation214_spill] sm:$0xff]  ;;  %v23333_v23 = vrot.slane %v19105_v44, 6 }
 0x33b   : > { %23321 = vst [vmem:[#allocation178_spill] sm:$0xff] %v19672_v21  ;;  %v19676_v15 = vrot.slane %v23323_v2, 4  ;;  %v9622_v62 = vsel %vm5833_vm13, %v19646_v6, %v9620_v42  ;;  %v23330_v2 = vunpack.c.l.b16 %v19084_v32  ;;  %v23332_v6 = vrot.slane %v23317_v12, 2  ;;  %v23339_v42 = vld [vmem:[#allocation209_spill] sm:$0xff] }
 0x33c   : > { %v9628_v40 = vsel %vm5821_vm9, %v23325_v58, %v9627_v8  ;;  %v9624_v19 = vsel %vm5836_vm14, %v23328_v60, %v9622_v62  ;;  %v23334_v58 = vld [vmem:[#allocation215_spill] sm:$0xff]  ;;  %v23335_v60 = vunpack.c.l.b16 %v19093_v31 }
 0x33d   : > { %23324 = vst [vmem:[#allocation182_spill] sm:$0xff] %v19676_v15  ;;  %v9630_v5 = vsel %vm5824_vm10, %v23329_v34, %v9628_v40  ;;  %v9641_v53 = vrot.slane %v23330_v2, 1  ;;  %v9626_v8 = vsel %vm5839_vm15, %v23332_v6, %v9624_v19  ;;  %v23338_v34 = vld [vmem:[#allocation213_spill] sm:$0xff]  ;;  %v23340_v6 = vunpack.c.l.b16 %v23339_v42 }
 0x33e   : > { %v9632_v50 = vsel %vm5827_vm11, %v23333_v23, %v9630_v5  ;;  %v19702_v62 = vrot.slane %v23335_v60, 5  ;;  %v19704_v40 = vpack.c.b16 %v9626_v8, %v9612_v28  ;;  %v23342_v5 = vrot.slane %v23331_v24, 7  ;;  %v23343_v60 = vld [vmem:[#allocation216_spill] sm:$0xff]  ;;  %v23344_v8 = vld [vmem:[#allocation217_spill] sm:$0xff]  ;;  %v23351_v24 = vld [vmem:[#allocation218_spill] sm:$0xff] }
 0x33f   : > { %v9634_v32 = vsel %vm5830_vm12, %v19672_v21, %v9632_v50  ;;  %v9642_v2 = vsel %vm5821_vm9, %v23338_v34, %v9641_v53  ;;  %v19712_v19 = vrot.slane %v23340_v6, 4  ;;  %v23345_v53 = vrot.slane %v23326_v9, 3  ;;  %v23348_v21 = vld [vmem:[#allocation222_spill] sm:$0xff] }
 0x340   : > { %23336 = vst [vmem:[#allocation183_spill] sm:$0xff] %v19702_v62  ;;  %23337 = vst [vmem:[#allocation179_spill] sm:$0xff] %v19704_v40  ;;  %v9636_v23 = vsel %vm5833_vm13, %v19676_v15, %v9634_v32  ;;  %v9644_v31 = vsel %vm5824_vm10, %v23342_v5, %v9642_v2  ;;  %14765 = vmatmul.mubr.msk.bf16.gmra.mrb[8].mxu0 %vm6083_vm1, %v19704_v40  ;;  %v23346_v42 = vrot.slane %v23334_v58, 6  ;;  %v23347_v32 = vunpack.c.l.b16 %v19174_v52  ;;  %v23350_v40 = vld [vmem:[#allocation223_spill] sm:$0xff]  ;;  %v23353_v52 = vld [vmem:[#allocation221_spill] sm:$0xff] }
 0x341   : > { %23341 = vst [vmem:[#allocation180_spill] sm:$0xff] %v19712_v19  ;;  %v9638_v50 = vsel %vm5836_vm14, %v23345_v53, %v9636_v23  ;;  %v23349_v5 = vrot.slane %v23327_v39, 2  ;;  %v23352_v23 = vunpack.c.l.b16 %v23351_v24  ;;  %v23359_v24 = vrot.slane %v23348_v21, 7 }
 0x342   : > { %v9646_v6 = vsel %vm5827_vm11, %v23346_v42, %v9644_v31  ;;  %v9655_v15 = vrot.slane %v23347_v32, 1  ;;  %v23354_v32 = vld [vmem:[#allocation219_spill] sm:$0xff] }
 0x343   : > { %v9640_v48 = vsel %vm5839_vm15, %v23349_v5, %v9638_v50  ;;  %v9648_v28 = vsel %vm5830_vm12, %v19702_v62, %v9646_v6  ;;  %v19740_v53 = vrot.slane %v23352_v23, 5  ;;  %v23355_v2 = vunpack.c.l.b16 %v23354_v32  ;;  %v23357_v50 = vld [vmem:[#allocation224_spill] sm:$0xff] }
 0x344   : > { %v9650_v31 = vsel %vm5833_vm13, %v19712_v19, %v9648_v28  ;;  %v9656_v42 = vsel %vm5821_vm9, %v23353_v52, %v9655_v15  ;;  %v23358_v6 = vrot.slane %v23343_v60, 3  ;;  %v23360_v28 = vunpack.c.l.b16 %v19198_v36  ;;  %v23363_v60 = vld [vmem:[#allocation227_spill] sm:$0xff]  ;;  %v23365_v36 = vld [vmem:[#allocation226_spill] sm:$0xff] }
 0x345   : > { %v19748_v39 = vrot.slane %v23355_v2, 4  ;;  %v9658_v23 = vsel %vm5824_vm10, %v23359_v24, %v9656_v42  ;;  %v23361_v15 = vrot.slane %v23344_v8, 2  ;;  %v23362_v32 = vrot.slane %v23350_v40, 6 }
 0x346   : > { %v9652_v9 = vsel %vm5836_vm14, %v23358_v6, %v9650_v31  ;;  %v9669_v19 = vrot.slane %v23360_v28, 1  ;;  %v22528_v52 = vrot.slane %v23363_v60, 7  ;;  %v22531_v31 = vrot.slane %v19234_v16, 6  ;;  %v607_v6 = vld [vmem:[#allocation2 + $0x14] sm:$0x1] }
 0x347   : > { %23356 = vst [vmem:[#allocation186_spill] sm:$0xff] %v19748_v39  ;;  %v9654_v2 = vsel %vm5839_vm15, %v23361_v15, %v9652_v9  ;;  %v9660_v5 = vsel %vm5827_vm11, %v23362_v32, %v9658_v23  ;;  %v23366_v28 = vunpack.c.l.b16 %v19208_v61  ;;  %v613_v15 = vld [vmem:[#allocation2 + $0x2c] sm:$0x1]  ;;  %v23369_v61 = vrot.slane %v23357_v50, 3 }
 0x348   : > { %v19768_v21 = vpack.c.b16 %v9654_v2, %v9640_v48  ;;  %v9662_v42 = vsel %vm5830_vm12, %v19740_v53, %v9660_v5  ;;  %v9670_v24 = vsel %vm5821_vm9, %v23365_v36, %v9669_v19  ;;  %v23367_v48 = vld [vmem:[#allocation220_spill] sm:$0xff] }
 0x349   : > { %v19776_v9 = vrot.slane %v23366_v28, 5  ;;  %v9664_v23 = vsel %vm5833_vm13, %v19748_v39, %v9662_v42  ;;  %v9672_v32 = vsel %vm5824_vm10, %v22528_v52, %v9670_v24  ;;  %v23368_v2 = vunpack.c.l.b16 %v23367_v48  ;;  %v23374_v39 = vld [vmem:[#allocation207_spill] sm:$0xff]  ;;  %v23618_v24 = vld [vmem:[#allocation109_spill] sm:$0xff] }
 0x34a   : > { %23364 = vst [vmem:[#allocation190_spill] sm:$0xff] %v19768_v21  ;;  %14768 = vmatprep.mubr.msk.bf16.mxu0 %vm6083_vm1, %v19768_v21  ;;  %v9666_v19 = vsel %vm5836_vm14, %v23369_v61, %v9664_v23  ;;  %v9674_v42 = vsel %vm5827_vm11, %v22531_v31, %v9672_v32  ;;  %v608_v48 = vsel %vm15774_vm5, 0, %v607_v6  ;;  %v23371_v52 = vrot.slane %v19227_v11, 2  ;;  %v23372_v61 = vld [vmem:[#allocation119_spill] sm:$0xff]  ;;  %v625_v32 = vld [vmem:[#allocation2 + $0x5c] sm:$0x1] }
 0x34b   : > { %v19785_v62 = vrot.slane %v23368_v2, 4  ;;  %v619_v2 = vld [vmem:[#allocation2 + $0x44] sm:$0x1]  ;;  %v9676_v21 = vsel %vm5830_vm12, %v19776_v9, %v9674_v42  ;;  %609 = vst [vmem:[#allocation2 + $0x14] sm:$0x1] %v608_v48  ;;  %v614_v23 = vsel %vm15774_vm5, 0, %v613_v15 }
 0x34c   : > { %v9668_v5 = vsel %vm5839_vm15, %v23371_v52, %v9666_v19  ;;  %v721_v50 = vrot.slane %v23372_v61, 4  ;;  %615 = vst [vmem:[#allocation2 + $0x2c] sm:$0x1] %v614_v23  ;;  %v23373_v6 = vld [vmem:[#allocation122_spill] sm:$0xff]  ;;  %v23375_v11 = vrot.slane %v18204_v47, 6  ;;  %v23376_v19 = vrot.slane %v18216_v45, 7 }
 0x34d   : > { %v9678_v31 = vsel %vm5833_vm13, %v19785_v62, %v9676_v21  ;;  %v755_v28 = vrot.slane %v23373_v6, 4  ;;  %v23377_v15 = vrot.slane %v19238_v55, 3  ;;  %v23378_v23 = vrot.slane %v18218_v33, 6  ;;  %v631_v33 = vld [vmem:[#allocation2 + $0x74] sm:$0x1] }
 0x34e   : > { %v10102_v52 = vsel %vm5824_vm10, %v23375_v11, %v23374_v39  ;;  %v10109_v42 = vsel %vm5821_vm9, %v23376_v19, %v18214_v57  ;;  %v620_v47 = vsel %vm15774_vm5, 0, %v619_v2  ;;  %v23379_v11 = vrot.slane %v19240_v20, 2  ;;  %v23381_v19 = vld [vmem:[#allocation125_spill] sm:$0xff] }
 0x34f   : > { %v9680_v48 = vsel %vm5836_vm14, %v23377_v15, %v9678_v31  ;;  %v10103_v21 = vsel %vm5827_vm11, %v19033_v29, %v10102_v52  ;;  %v10110_v61 = vsel %vm5824_vm10, %v23378_v23, %v10109_v42  ;;  %621 = vst [vmem:[#allocation2 + $0x44] sm:$0x1] %v620_v47  ;;  %v626_v29 = vsel %vm15774_vm5, 0, %v625_v32  ;;  %v637_v42 = vld [vmem:[#allocation2 + $0x8c] sm:$0x1]  ;;  %v23388_v47 = vld [vmem:[#allocation133_spill] sm:$0xff] }
 0x350   : > { %v9682_v45 = vsel %vm5839_vm15, %v23379_v11, %v9680_v48  ;;  %v10104_v57 = vsel %vm5830_vm12, %v19276_v46, %v10103_v21  ;;  %v10111_v39 = vsel %vm5827_vm11, %v19306_v0, %v10110_v61  ;;  %v23380_v6 = vrot.slane %v18209_v56, 3  ;;  %627 = vst [vmem:[#allocation2 + $0x5c] sm:$0x1] %v626_v29  ;;  %v23384_v48 = vld [vmem:[#allocation126_spill] sm:$0xff] }
 0x351   : > { %v19837_v31 = vpack.c.b16 %v9682_v45, %v9668_v5  ;;  %v10112_v52 = vsel %vm5830_vm12, %v19310_v49, %v10111_v39  ;;  %v789_v46 = vrot.slane %v23381_v19, 4  ;;  %v23382_v0 = vrot.slane %v18211_v10, 2 }
 0x352   : > { %v10105_v2 = vsel %vm5833_vm13, %v23380_v6, %v10104_v57  ;;  %v23383_v32 = vrot.slane %v18222_v26, 3  ;;  %v823_v56 = vrot.slane %v23384_v48, 4  ;;  %v23385_v21 = vrot.slane %v18309_v37, 7  ;;  %v1351_v37 = vld [vmem:[#allocation2 + $0x14] sm:$0x1]  ;;  %v23390_v57 = vld [vmem:[#allocation228_spill] sm:$0xff] }
 0x353   : > { %v19848_v15 = vsel %vm5836_vm14, %v23382_v0, %v10105_v2  ;;  %14769 = vmatmul.mubr.msk.bf16.gmra.mrb[12].mxu0 %vm6083_vm1, %v19837_v31  ;;  %v23386_v23 = vrot.slane %v18224_v22, 2  ;;  %v23387_v61 = vrot.slane %v18324_v54, 6  ;;  %v23389_v11 = vrot.slane %v23388_v47, 7  ;;  %v23391_v22 = vld [vmem:[#allocation134_spill] sm:$0xff]  ;;  %v23393_v2 = vld [vmem:[#allocation137_spill] sm:$0xff]  ;;  %v23400_v47 = vld [vmem:[#allocation128_spill] sm:$0xff] }
 0x354   : > { %v10113_v5 = vsel %vm5833_vm13, %v23383_v32, %v10112_v52  ;;  %v10117_v49 = vsel %vm5821_vm9, %v23385_v21, %v18305_v14  ;;  %v632_v14 = vsel %vm15774_vm5, 0, %v631_v33  ;;  %v23392_v29 = vrot.slane %v23391_v22, 6  ;;  %v1365_v0 = vld [vmem:[#allocation2 + $0x2c] sm:$0x1]  ;;  %v23395_v32 = vld [vmem:[#allocation229_spill] sm:$0xff]  ;;  %v23404_v22 = vld [vmem:[#allocation131_spill] sm:$0xff] }
 0x355   : > { %v19863_v10 = vsel %vm5836_vm14, %v23386_v23, %v10113_v5  ;;  %v10118_v26 = vsel %vm5824_vm10, %v23387_v61, %v10117_v49  ;;  %v10125_v45 = vsel %vm5821_vm9, %v23389_v11, %v23190_v35  ;;  %633 = vst [vmem:[#allocation2 + $0x74] sm:$0x1] %v632_v14  ;;  %v638_v54 = vsel %vm15774_vm5, 0, %v637_v42  ;;  %v23396_v5 = vld [vmem:[#allocation127_spill] sm:$0xff]  ;;  %v23397_v21 = vld [vmem:[#allocation138_spill] sm:$0xff] }
 0x356   : > { %v10119_v39 = vsel %vm5827_vm11, %v23390_v57, %v10118_v26  ;;  %v10126_v6 = vsel %vm5824_vm10, %v23392_v29, %v10125_v45  ;;  %v857_v52 = vrot.slane %v23393_v2, 4  ;;  %v1352_v35 = vsel %vm15767_vm3, %v721_v50, %v1351_v37  ;;  %639 = vst [vmem:[#allocation2 + $0x8c] sm:$0x1] %v638_v54  ;;  %v23398_v42 = vld [vmem:[#allocation130_spill] sm:$0xff]  ;;  %v23402_v45 = vld [vmem:[#allocation148_spill] sm:$0xff] }
 0x357   : > { %v10120_v33 = vsel %vm5830_vm12, %v23395_v32, %v10119_v39  ;;  %v10127_v48 = vsel %vm5827_vm11, %v23396_v5, %v10126_v6  ;;  %v891_v49 = vrot.slane %v23397_v21, 4  ;;  %1353 = vst [vmem:[#allocation2 + $0x14] sm:$0x1] %v1352_v35  ;;  %v1366_v23 = vsel %vm15767_vm3, %v755_v28, %v1365_v0  ;;  %v23401_v11 = vld [vmem:[#allocation146_spill] sm:$0xff]  ;;  %v643_v57 = vld [vmem:[#allocation2 + $0xa4] sm:$0x1] }
 0x358   : > { %v23399_v61 = vrot.slane %v23398_v42, 3  ;;  %v10128_v50 = vsel %vm5830_vm12, %v23400_v47, %v10127_v48  ;;  %v23403_v14 = vrot.slane %v23402_v45, 7  ;;  %1367 = vst [vmem:[#allocation2 + $0x2c] sm:$0x1] %v1366_v23  ;;  %v1379_v39 = vld [vmem:[#allocation2 + $0x44] sm:$0x1] }
 0x359   : > { %v23405_v29 = vrot.slane %v23404_v22, 2  ;;  %v23406_v28 = vld [vmem:[#allocation135_spill] sm:$0xff]  ;;  %v23408_v35 = vld [vmem:[#allocation149_spill] sm:$0xff]  ;;  %v649_v23 = vld [vmem:[#allocation2 + $0xbc] sm:$0x1]  ;;  %v1380_v42 = vsel %vm15767_vm3, %v789_v46, %v1379_v39 }
 0x35a   : > { %v10121_v26 = vsel %vm5833_vm13, %v23399_v61, %v10120_v33  ;;  %v10133_v37 = vsel %vm5821_vm9, %v23403_v14, %v23401_v11  ;;  %v23407_v54 = vrot.slane %v23406_v28, 3  ;;  %v23409_v0 = vrot.slane %v23408_v35, 6  ;;  %v23410_v33 = vld [vmem:[#allocation152_spill] sm:$0xff]  ;;  %v23411_v5 = vld [vmem:[#allocation153_spill] sm:$0xff]  ;;  %v23416_v14 = vld [vmem:[#allocation154_spill] sm:$0xff] }
 0x35b   : > { %v19903_v6 = vsel %vm5836_vm14, %v23405_v29, %v10121_v26  ;;  %v23412_v48 = vrot.slane %v23411_v5, 7  ;;  %v1393_v61 = vld [vmem:[#allocation2 + $0x5c] sm:$0x1]  ;;  %1381 = vst [vmem:[#allocation2 + $0x44] sm:$0x1] %v1380_v42  ;;  %v23418_v28 = vld [vmem:[#allocation141_spill] sm:$0xff] }
 0x35c   : > { %v10129_v2 = vsel %vm5833_vm13, %v23407_v54, %v10128_v50  ;;  %v10134_v32 = vsel %vm5824_vm10, %v23409_v0, %v10133_v37  ;;  %v23413_v26 = vld [vmem:[#allocation136_spill] sm:$0xff]  ;;  %v23415_v50 = vld [vmem:[#allocation129_spill] sm:$0xff]  ;;  %v23417_v37 = vrot.slane %v23416_v14, 6  ;;  %v1394_v29 = vsel %vm15767_vm3, %v823_v56, %v1393_v61  ;;  %v23419_v39 = vld [vmem:[#allocation143_spill] sm:$0xff] }
 0x35d   : > { %v10141_v21 = vsel %vm5821_vm9, %v23412_v48, %v23410_v33  ;;  %v23414_v47 = vrot.slane %v23413_v26, 2  ;;  %v10135_v45 = vsel %vm5827_vm11, %v23415_v50, %v10134_v32  ;;  %1395 = vst [vmem:[#allocation2 + $0x5c] sm:$0x1] %v1394_v29  ;;  %v23420_v35 = vld [vmem:[#allocation150_spill] sm:$0xff]  ;;  %v23422_v33 = vld [vmem:[#allocation144_spill] sm:$0xff]  ;;  %v650_v56 = vsel %vm15774_vm5, 0, %v649_v23 }
 0x35e   : > { %v10142_v22 = vsel %vm5824_vm10, %v23417_v37, %v10141_v21  ;;  %v10136_v46 = vsel %vm5830_vm12, %v23418_v28, %v10135_v45  ;;  %v23421_v0 = vrot.slane %v23420_v35, 3  ;;  %v23423_v48 = vld [vmem:[#allocation139_spill] sm:$0xff]  ;;  %v655_v42 = vld [vmem:[#allocation2 + $0xec] sm:$0x1]  ;;  %651 = vst [vmem:[#allocation2 + $0xbc] sm:$0x1] %v650_v56 }
 0x35f   : > { %v19920_v11 = vsel %vm5836_vm14, %v23414_v47, %v10129_v2  ;;  %v10143_v54 = vsel %vm5827_vm11, %v23419_v39, %v10142_v22  ;;  %v644_v2 = vsel %vm15774_vm5, 0, %v643_v57  ;;  %v925_v21 = vrot.slane %v23423_v48, 4  ;;  %v1407_v61 = vld [vmem:[#allocation2 + $0x74] sm:$0x1]  ;;  %v23428_v37 = vld [vmem:[#allocation140_spill] sm:$0xff]  ;;  %v23435_v56 = vld [vmem:[#allocation169_spill] sm:$0xff] }
 0x360   : > { %v10137_v32 = vsel %vm5833_vm13, %v23421_v0, %v10136_v46  ;;  %v10144_v5 = vsel %vm5830_vm12, %v23422_v33, %v10143_v54  ;;  %645 = vst [vmem:[#allocation2 + $0xa4] sm:$0x1] %v644_v2  ;;  %v23424_v26 = vld [vmem:[#allocation151_spill] sm:$0xff]  ;;  %v959_v22 = vrot.slane %v23428_v37, 4  ;;  %v23430_v28 = vld [vmem:[#allocation164_spill] sm:$0xff]  ;;  %v1408_v54 = vsel %vm15767_vm3, %v857_v52, %v1407_v61  ;;  %v23437_v61 = vld [vmem:[#allocation145_spill] sm:$0xff] }
 0x361   : > { %v23425_v47 = vrot.slane %v23424_v26, 2  ;;  %v23426_v50 = vld [vmem:[#allocation155_spill] sm:$0xff]  ;;  %v23431_v46 = vrot.slane %v23430_v28, 7  ;;  %v661_v39 = vld [vmem:[#allocation2 + $0x104] sm:$0x1]  ;;  %v23432_v35 = vrot.slane %v23230_v4, 2 }
 0x362   : > { %v23427_v45 = vrot.slane %v23426_v50, 3  ;;  %v23429_v29 = vld [vmem:[#allocation163_spill] sm:$0xff]  ;;  %v1421_v2 = vld [vmem:[#allocation2 + $0x8c] sm:$0x1]  ;;  %v23436_v48 = vrot.slane %v23435_v56, 7 }
 0x363   : > { %v19946_v57 = vsel %vm5836_vm14, %v23425_v47, %v10137_v32  ;;  %v10149_v23 = vsel %vm5821_vm9, %v23431_v46, %v23429_v29  ;;  %v23433_v32 = vrot.slane %v23237_v51, 6  ;;  %v13900_v47 = vld.sshfl [vmem:[#allocation2 + $0x14] sm:$0x1 pattern:$0x75316420]  ;;  %v1422_v52 = vsel %vm15767_vm3, %v891_v49, %v1421_v2  ;;  %v23438_v50 = vld [vmem:[#allocation170_spill] sm:$0xff] }
 0x364   : > { %v10145_v14 = vsel %vm5833_vm13, %v23427_v45, %v10144_v5  ;;  %v23434_v5 = vld [vmem:[#allocation168_spill] sm:$0xff]  ;;  %1409 = vst [vmem:[#allocation2 + $0x74] sm:$0x1] %v1408_v54  ;;  %v23439_v45 = vrot.slane %v23438_v50, 6  ;;  %v656_v51 = vsel %vm15774_vm5, 0, %v655_v42  ;;  %v23440_v29 = vld [vmem:[#allocation21_spill] sm:$0xff] }
 0x365   : > { %v19961_v0 = vsel %vm5836_vm14, %v23432_v35, %v10145_v14  ;;  %v10150_v33 = vsel %vm5824_vm10, %v23433_v32, %v10149_v23  ;;  %v10157_v26 = vsel %vm5821_vm9, %v23436_v48, %v23434_v5  ;;  %v13903_v37 = vld.sshfl [vmem:[#allocation2 + $0x2c] sm:$0x1 pattern:$0x75316420]  ;;  %v2952_v28 = vrot.slane %v13900_v47, %v23440_v29  ;;  %1423 = vst [vmem:[#allocation2 + $0x8c] sm:$0x1] %v1422_v52 }
 0x366   : > { %v10151_v4 = vsel %vm5827_vm11, %v23437_v61, %v10150_v33  ;;  %v10158_v14 = vsel %vm5824_vm10, %v23439_v45, %v10157_v26  ;;  %v23441_v46 = vld [vmem:[#allocation147_spill] sm:$0xff]  ;;  %v23442_v54 = vld [vmem:[#allocation161_spill] sm:$0xff]  ;;  %657 = vst [vmem:[#allocation2 + $0xec] sm:$0x1] %v656_v51  ;;  %v662_v2 = vsel %vm15774_vm5, 0, %v661_v39  ;;  %v3014_v35 = vrot.slane %v13903_v37, %v23440_v29  ;;  %v23447_v61 = vld [vmem:[#allocation166_spill] sm:$0xff] }
 0x367   : > { %v10152_v23 = vsel %vm5830_vm12, %v23441_v46, %v10151_v4  ;;  %v10159_v49 = vsel %vm5827_vm11, %v23442_v54, %v10158_v14  ;;  %v23443_v32 = vld [vmem:[#allocation165_spill] sm:$0xff]  ;;  %v23445_v5 = vld [vmem:[#allocation167_spill] sm:$0xff]  ;;  %663 = vst [vmem:[#allocation2 + $0x104] sm:$0x1] %v662_v2  ;;  %v9867_v47 = vrot.slane %v2952_v28, %v23440_v29  ;;  %v23448_v4 = vrot.slane %v23447_v61, 2  ;;  %v23451_v51 = vld [vmem:[#allocation174_spill] sm:$0xff] }
 0x368   : > { %v23444_v33 = vrot.slane %v23443_v32, 3  ;;  %v10160_v56 = vsel %vm5830_vm12, %v23445_v5, %v10159_v49  ;;  %v23446_v48 = vld [vmem:[#allocation173_spill] sm:$0xff]  ;;  %v23449_v39 = vld [vmem:[#allocation171_spill] sm:$0xff]  ;;  %v1027_v37 = vrot.slane %v23451_v51, 4  ;;  %v9881_v46 = vrot.slane %v3014_v35, %v23440_v29 }
 0x369   : > { %v993_v26 = vrot.slane %v23446_v48, 4  ;;  %v13906_v52 = vld.sshfl [vmem:[#allocation2 + $0x44] sm:$0x1 pattern:$0x75316420]  ;;  %v23450_v45 = vrot.slane %v23449_v39, 3  ;;  %v9874_v5 = vrot.slane %v9867_v47, %v23440_v29 }
 0x36a   : > { %v10153_v42 = vsel %vm5833_vm13, %v23444_v33, %v10152_v23  ;;  %v13909_v23 = vld.sshfl [vmem:[#allocation2 + $0x5c] sm:$0x1 pattern:$0x75316420]  ;;  %v3076_v54 = vrot.slane %v13906_v52, %v23440_v29  ;;  %v1435_v49 = vld [vmem:[#allocation2 + $0xa4] sm:$0x1]  ;;  %v9888_v61 = vrot.slane %v9881_v46, %v23440_v29 }
 0x36b   : > { %v19997_v50 = vsel %vm5836_vm14, %v23448_v4, %v10153_v42  ;;  %v10161_v14 = vsel %vm5833_vm13, %v23450_v45, %v10160_v56  ;;  %v23452_v28 = vrot.slane %v23266_v30, 2  ;;  %v23453_v32 = vld [vmem:[#allocation181_spill] sm:$0xff]  ;;  %v23454_v33 = vrot.slane %v23270_v59, 7  ;;  %v1449_v48 = vld [vmem:[#allocation2 + $0xbc] sm:$0x1] }
 0x36c   : > { %v3138_v56 = vrot.slane %v13909_v23, %v23440_v29  ;;  %v1436_v35 = vsel %vm15767_vm3, %v925_v21, %v1435_v49  ;;  %v23455_v52 = vrot.slane %v23271_v7, 6  ;;  %v9895_v4 = vrot.slane %v3076_v54, %v23440_v29  ;;  %v13912_v21 = vld.sshfl [vmem:[#allocation2 + $0x74] sm:$0x1 pattern:$0x75316420] }
 0x36d   : > { %v20008_v2 = vsel %vm5836_vm14, %v23452_v28, %v10161_v14  ;;  %v10165_v42 = vsel %vm5821_vm9, %v23454_v33, %v23453_v32  ;;  %1437 = vst [vmem:[#allocation2 + $0xa4] sm:$0x1] %v1436_v35  ;;  %v1450_v59 = vsel %vm15767_vm3, %v959_v22, %v1449_v48  ;;  %v10085_v39 = vunpack.c.l.b16 %v9874_v5  ;;  %v23456_v14 = vld [vmem:[#allocation187_spill] sm:$0xff]  ;;  %v23458_v28 = vld [vmem:[#allocation184_spill] sm:$0xff] }
 0x36e   : > { %v10166_v30 = vsel %vm5824_vm10, %v23455_v52, %v10165_v42  ;;  %v9909_v45 = vrot.slane %v3138_v56, %v23440_v29  ;;  %1451 = vst [vmem:[#allocation2 + $0xbc] sm:$0x1] %v1450_v59  ;;  %v23457_v51 = vrot.slane %v23456_v14, 7  ;;  %v10086_v23 = vunpack.c.l.b16 %v9888_v61  ;;  %v23462_v14 = vld [vmem:[#allocation188_spill] sm:$0xff] }
 0x36f   : > { %v10167_v47 = vsel %vm5827_vm11, %v19537_v63, %v10166_v30  ;;  %v9902_v54 = vrot.slane %v9895_v4, %v23440_v29  ;;  %v13915_v22 = vld.sshfl [vmem:[#allocation2 + $0x8c] sm:$0x1 pattern:$0x75316420]  ;;  %v3200_v49 = vrot.slane %v13912_v21, %v23440_v29  ;;  %v23459_v32 = vrot.slane %v23458_v28, 3 }
 0x370   : > { %v10168_v7 = vsel %vm5830_vm12, %v19541_v38, %v10167_v47  ;;  %v10173_v46 = vsel %vm5821_vm9, %v23457_v51, %v23287_v43  ;;  %v1463_v63 = vld [vmem:[#allocation2 + $0xec] sm:$0x1]  ;;  %v10107_v42 = vrot.slane %v10085_v39, 1  ;;  %v9916_v5 = vrot.slane %v9909_v45, %v23440_v29  ;;  %v1477_v43 = vld [vmem:[#allocation2 + $0x104] sm:$0x1] }
 0x371   : > { %v10169_v33 = vsel %vm5833_vm13, %v23459_v32, %v10168_v7  ;;  %v3262_v38 = vrot.slane %v13915_v22, %v23440_v29  ;;  %v1464_v56 = vsel %vm15767_vm3, %v993_v26, %v1463_v63  ;;  %v10115_v35 = vrot.slane %v10086_v23, 1  ;;  %v23460_v47 = vld [vmem:[#allocation185_spill] sm:$0xff] }
 0x372   : > { %v10087_v48 = vunpack.c.l.b16 %v9902_v54  ;;  %v9923_v52 = vrot.slane %v3200_v49, %v23440_v29  ;;  %1465 = vst [vmem:[#allocation2 + $0xec] sm:$0x1] %v1464_v56  ;;  %v1478_v30 = vsel %vm15767_vm3, %v1027_v37, %v1477_v43  ;;  %v10108_v61 = vsel %vm5839_vm15, %v10107_v42, %v19848_v15  ;;  %v23464_v49 = vld [vmem:[#allocation162_spill] sm:$0xff]  ;;  %v23465_v43 = vld [vmem:[#allocation189_spill] sm:$0xff] }
 0x373   : > { %v10088_v4 = vunpack.c.l.b16 %v9916_v5  ;;  %v9937_v59 = vrot.slane %v3262_v38, %v23440_v29  ;;  %1479 = vst [vmem:[#allocation2 + $0x104] sm:$0x1] %v1478_v30  ;;  %v23461_v39 = vrot.slane %v23460_v47, 2  ;;  %v10116_v45 = vsel %vm5839_vm15, %v10115_v35, %v19863_v10  ;;  %v667_v5 = vld [vmem:[#allocation2 + $0x11c] sm:$0x1] }
 0x374   : > { %v10123_v21 = vrot.slane %v10087_v48, 1  ;;  %v9930_v7 = vrot.slane %v9923_v52, %v23440_v29  ;;  %v23463_v37 = vrot.slane %v23462_v14, 6  ;;  %v10229_v15 = vpack.c.b16 %v10116_v45, %v10108_v61  ;;  %v13918_v22 = vld.sshfl [vmem:[#allocation2 + $0xa4] sm:$0x1 pattern:$0x75316420] }
 0x375   : > { %v20052_v26 = vsel %vm5836_vm14, %v23461_v39, %v10169_v33  ;;  %v10131_v23 = vrot.slane %v10088_v4, 1  ;;  %v9944_v54 = vrot.slane %v9937_v59, %v23440_v29  ;;  %v13921_v10 = vld.sshfl [vmem:[#allocation2 + $0xbc] sm:$0x1 pattern:$0x75316420]  ;;  %v3324_v33 = vrot.slane %v13918_v22, %v23440_v29  ;;  %v23471_v22 = vld [vmem:[#allocation157_spill] sm:$0xff] }
 0x376   : > { %v10174_v51 = vsel %vm5824_vm10, %v23463_v37, %v10173_v46  ;;  %v10124_v28 = vsel %vm5839_vm15, %v10123_v21, %v19903_v6  ;;  %v10089_v32 = vunpack.c.l.b16 %v9930_v7  ;;  %14780 = vmatprep.mubr.msk.bf16.mxu0 %vm6083_vm1, %v10229_v15  ;;  %v3386_v56 = vrot.slane %v13921_v10, %v23440_v29  ;;  %v673_v48 = vld [vmem:[#allocation2 + $0x134] sm:$0x1]  ;;  %v15168_v61 = vld [vmem:[#allocation7 + $0xc8] sm:$0xff]  }
 0x377   : > { %v10175_v63 = vsel %vm5827_vm11, %v23464_v49, %v10174_v51  ;;  %v10132_v46 = vsel %vm5839_vm15, %v10131_v23, %v19920_v11  ;;  %v10090_v38 = vunpack.c.l.b16 %v9944_v54  ;;  %v23466_v35 = vrot.slane %v23465_v43, 3  ;;  %v23468_v21 = vld [vmem:[#allocation195_spill] sm:$0xff]  ;;  %v23469_v7 = vld [vmem:[#allocation196_spill] sm:$0xff] }
 0x378   : > { %v10176_v42 = vsel %vm5830_vm12, %v19577_v41, %v10175_v63  ;;  %v10230_v52 = vpack.c.b16 %v10132_v46, %v10124_v28  ;;  %v10139_v30 = vrot.slane %v10089_v32, 1  ;;  %v9951_v4 = vrot.slane %v3324_v33, %v23440_v29  ;;  %v23473_v46 = vld [vmem:[#allocation176_spill] sm:$0xff] }
 0x379   : > { %v10177_v6 = vsel %vm5833_vm13, %v23466_v35, %v10176_v42  ;;  %v23467_v41 = vrot.slane %v23291_v18, 2  ;;  %v10147_v47 = vrot.slane %v10090_v38, 1  ;;  %v9965_v11 = vrot.slane %v3386_v56, %v23440_v29  ;;  %v13924_v39 = vld.sshfl [vmem:[#allocation2 + $0xec] sm:$0x1 pattern:$0x75316420] }
 0x37a   : > { %v668_v45 = vsel %vm15774_vm5, 0, %v667_v5  ;;  %v23470_v14 = vrot.slane %v23469_v7, 7  ;;  %14781 = vmatmul.mubr.msk.bf16.vlgmr.msra.gmra.mrb[0].mxu0 %vm6083_vm1, %v10230_v52  ;;  %v10140_v18 = vsel %vm5839_vm15, %v10139_v30, %v19946_v57  ;;  %v9958_v51 = vrot.slane %v9951_v4, %v23440_v29  ;;  %v13927_v15 = vld.sshfl [vmem:[#allocation2 + $0x104] sm:$0x1 pattern:$0x75316420] }
 0x37b   : > { %v20079_v59 = vsel %vm5836_vm14, %v23467_v41, %v10177_v6  ;;  %v3448_v23 = vrot.slane %v13924_v39, %v23440_v29  ;;  %669 = vst [vmem:[#allocation2 + $0x11c] sm:$0x1] %v668_v45  ;;  %v674_v54 = vsel %vm15774_vm5, 0, %v673_v48  ;;  %14797 = vmatpush3.bf16.msra.mxu0 %v23471_v22  ;;  %v10148_v49 = vsel %vm5839_vm15, %v10147_v47, %v19961_v0  ;;  %v23472_v57 = vld [vmem:[#allocation175_spill] sm:$0xff]  ;;  %v15169_v5 = vld [vmem:[#allocation7 + $0xd0] sm:$0xff]  }
 0x37c   : > { %v10181_v37 = vsel %vm5821_vm9, %v23470_v14, %v23468_v21  ;;  %v9972_v63 = vrot.slane %v9965_v11, %v23440_v29  ;;  %v3510_v28 = vrot.slane %v13927_v15, %v23440_v29  ;;  %675 = vst [vmem:[#allocation2 + $0x134] sm:$0x1] %v674_v54  ;;  %v1061_v32 = vrot.slane %v23472_v57, 4  ;;  %14798 = vmatprep.subr.bf16.mxu0 %v15168_v61  ;;  %v23474_v35 = vld [vmem:[#allocation199_spill] sm:$0xff]  ;;  %v685_v15 = vld [vmem:[#allocation2 + $0x164] sm:$0x1] }
 0x37d   : > { %v10231_v10 = vpack.c.b16 %v10148_v49, %v10140_v18  ;;  %v10091_v33 = vunpack.c.l.b16 %v9958_v51  ;;  %v9979_v42 = vrot.slane %v3448_v23, %v23440_v29  ;;  %v1095_v38 = vrot.slane %v23473_v46, 4  ;;  %v23481_v18 = vld [vmem:[#allocation172_spill] sm:$0xff]  ;;  %v679_v51 = vld [vmem:[#allocation2 + $0x14c] sm:$0x1] }
 0x37e   : > { %v10092_v56 = vunpack.c.l.b16 %v9972_v63  ;;  %v9993_v43 = vrot.slane %v3510_v28, %v23440_v29  ;;  %v23475_v0 = vrot.slane %v23474_v35, 6  ;;  %v23476_v48 = vrot.slane %v18940_v17, 7  ;;  %v15170_v23 = vld [vmem:[#allocation7 + $0xd8] sm:$0xff]   ;;  %v691_v35 = vld [vmem:[#allocation2 + $0x17c] sm:$0x1] }
 0x37f   : > { %14784 = vmatprep.mubr.msk.bf16.mxu0 %vm6083_vm1, %v10231_v10  ;;  %v10155_v30 = vrot.slane %v10091_v33, 1  ;;  %v9986_v4 = vrot.slane %v9979_v42, %v23440_v29  ;;  %v23477_v47 = vrot.slane %v23308_v3, 6  ;;  %14799 = vmatpush3.bf16.msra.mxu0 %v15168_v61  ;;  %v23482_v49 = vld [vmem:[#allocation198_spill] sm:$0xff] }
 0x380   : > { %v10182_v6 = vsel %vm5824_vm10, %v23475_v0, %v10181_v37  ;;  %v10189_v52 = vsel %vm5821_vm9, %v23476_v48, %v23313_v13  ;;  %v10163_v39 = vrot.slane %v10092_v56, 1  ;;  %v10000_v45 = vrot.slane %v9993_v43, %v23440_v29  ;;  %v23478_v13 = vld [vmem:[#allocation159_spill] sm:$0xff]  ;;  %14800 = vmatprep.subr.bf16.mxu0 %v15169_v5  ;;  %v23484_v28 = vld [vmem:[#allocation202_spill] sm:$0xff] }
 0x381   : > { %v10183_v41 = vsel %vm5827_vm11, %v19606_v25, %v10182_v6  ;;  %v10190_v11 = vsel %vm5824_vm10, %v23477_v47, %v10189_v52  ;;  %v10156_v7 = vsel %vm5839_vm15, %v10155_v30, %v19997_v50  ;;  %v10093_v14 = vunpack.c.l.b16 %v9986_v4  ;;  %v23479_v25 = vld [vmem:[#allocation197_spill] sm:$0xff] }
 0x382   : > { %v10184_v17 = vsel %vm5830_vm12, %v19610_v27, %v10183_v41  ;;  %v10191_v21 = vsel %vm5827_vm11, %v23478_v13, %v10190_v11  ;;  %v23480_v37 = vrot.slane %v23479_v25, 3  ;;  %v10164_v27 = vsel %vm5839_vm15, %v10163_v39, %v20008_v2  ;;  %v1491_v22 = vld [vmem:[#allocation2 + $0x11c] sm:$0x1]  ;;  %v23487_v30 = vld [vmem:[#allocation177_spill] sm:$0xff]  ;;  %v23488_v41 = vld [vmem:[#allocation210_spill] sm:$0xff] }
 0x383   : > { %v10192_v61 = vsel %vm5830_vm12, %v23481_v18, %v10191_v21  ;;  %v10094_v54 = vunpack.c.l.b16 %v10000_v45  ;;  %v23483_v63 = vrot.slane %v23482_v49, 2  ;;  %v23485_v57 = vrot.slane %v23484_v28, 3  ;;  %v1505_v56 = vld [vmem:[#allocation2 + $0x134] sm:$0x1]  ;;  %14801 = vmatpush3.bf16.msra.mxu0 %v15169_v5  ;;  %v23496_v18 = vld [vmem:[#allocation182_spill] sm:$0xff] }
 0x384   : > { %v10185_v3 = vsel %vm5833_vm13, %v23480_v37, %v10184_v17  ;;  %v10232_v33 = vpack.c.b16 %v10164_v27, %v10156_v7  ;;  %v10171_v42 = vrot.slane %v10093_v14, 1  ;;  %v1492_v46 = vsel %vm15767_vm3, %v1061_v32, %v1491_v22  ;;  %v697_v32 = vld [vmem:[#allocation2 + $0x194] sm:$0x1]  ;;  %14802 = vmatprep.subr.bf16.mxu0 %v15170_v23  ;;  %v23493_v14 = vld [vmem:[#allocation178_spill] sm:$0xff]  ;;  %v23498_v27 = vld [vmem:[#allocation205_spill] sm:$0xff] }
 0x385   : > { %v20135_v50 = vsel %vm5836_vm14, %v23483_v63, %v10185_v3  ;;  %v10193_v10 = vsel %vm5833_vm13, %v23485_v57, %v10192_v61  ;;  %v23486_v43 = vrot.slane %v23317_v12, 2  ;;  %v10179_v0 = vrot.slane %v10094_v54, 1  ;;  %1493 = vst [vmem:[#allocation2 + $0x11c] sm:$0x1] %v1492_v46  ;;  %v20172_v21 = vld [vmem:[#allocation7 + $0xe0] sm:$0xff]   ;;  %v23501_v63 = vld [vmem:[#allocation180_spill] sm:$0xff] }
 0x386   : > { %v1506_v6 = vsel %vm15767_vm3, %v1095_v38, %v1505_v56  ;;  %v680_v48 = vsel %vm15774_vm5, 0, %v679_v51  ;;  %v686_v52 = vsel %vm15774_vm5, 0, %v685_v15  ;;  %14785 = vmatmul.mubr.msk.bf16.gmra.mrb[4].mxu0 %vm6083_vm1, %v10232_v33  ;;  %v10172_v12 = vsel %vm5839_vm15, %v10171_v42, %v20052_v26  ;;  %v23491_v26 = vld [vmem:[#allocation214_spill] sm:$0xff]  ;;  %v23497_v51 = vld [vmem:[#allocation183_spill] sm:$0xff]  ;;  %v23502_v57 = vld [vmem:[#allocation221_spill] sm:$0xff] }
 0x387   : > { %v20145_v2 = vsel %vm5836_vm14, %v23486_v43, %v10193_v10  ;;  %1507 = vst [vmem:[#allocation2 + $0x134] sm:$0x1] %v1506_v6  ;;  %681 = vst [vmem:[#allocation2 + $0x14c] sm:$0x1] %v680_v48  ;;  %v1129_v4 = vrot.slane %v23487_v30, 4  ;;  %v23489_v5 = vrot.slane %v19103_v1, 7  ;;  %v10180_v47 = vsel %vm5839_vm15, %v10179_v0, %v20079_v59  ;;  %14803 = vmatpush3.bf16.msra.mxu0 %v15170_v23 }
 0x388   : > { %687 = vst [vmem:[#allocation2 + $0x164] sm:$0x1] %v686_v52  ;;  %v23490_v11 = vrot.slane %v19105_v44, 6  ;;  %v23492_v45 = vrot.slane %v23491_v26, 7  ;;  %v692_v13 = vsel %vm15774_vm5, 0, %v691_v35  ;;  %v20174_v1 = vld [vmem:[#allocation10] sm:$0xff]   ;;  %v10233_v7 = vpack.c.b16 %v10180_v47, %v10172_v12  ;;  %14820 = vmatprep.subr.bf16.mxu0 %v20172_v21 }
 0x389   : > { %v10197_v38 = vsel %vm5821_vm9, %v23489_v5, %v23488_v41  ;;  %v23494_v44 = vrot.slane %v23334_v58, 6  ;;  %693 = vst [vmem:[#allocation2 + $0x17c] sm:$0x1] %v692_v13  ;;  %v698_v37 = vsel %vm15774_vm5, 0, %v697_v32  ;;  %v1197_v54 = vrot.slane %v23498_v27, 4  ;;  %14868 = vmatprep.subr.bf16.mxu1 %v20174_v1  ;;  %v23499_v58 = vld [vmem:[#allocation211_spill] sm:$0xff] }
 0x38a   : > { %v10198_v39 = vsel %vm5824_vm10, %v23490_v11, %v10197_v38  ;;  %v10205_v17 = vsel %vm5821_vm9, %v23492_v45, %v23338_v34  ;;  %v23495_v34 = vld [vmem:[#allocation204_spill] sm:$0xff]  ;;  %699 = vst [vmem:[#allocation2 + $0x194] sm:$0x1] %v698_v37  ;;  %14788 = vmatprep.mubr.msk.bf16.mxu0 %vm6083_vm1, %v10233_v7  ;;  %v23500_v22 = vrot.slane %v23499_v58, 3  ;;  %v23503_v10 = vld [vmem:[#allocation222_spill] sm:$0xff]  ;;  %v23505_v46 = vrot.slane %v23363_v60, 7 }
 0x38b   : > { %v10199_v59 = vsel %vm5827_vm11, %v23493_v14, %v10198_v39  ;;  %v10206_v25 = vsel %vm5824_vm10, %v23494_v44, %v10205_v17  ;;  %v1163_v3 = vrot.slane %v23495_v34, 4  ;;  %v23504_v33 = vrot.slane %v23503_v10, 7  ;;  %v23506_v56 = vld [vmem:[#allocation212_spill] sm:$0xff]  ;;  %v456_v60 = vld [vmem:[%s15744_s12 + $0x78] sm:$0xf] }
 0x38c   : > { %v10200_v61 = vsel %vm5830_vm12, %v23496_v18, %v10199_v59  ;;  %v10207_v15 = vsel %vm5827_vm11, %v23497_v51, %v10206_v25  ;;  %v10221_v23 = vsel %vm5821_vm9, %v23505_v46, %v23365_v36  ;;  %v23507_v43 = vrot.slane %v23506_v56, 2  ;;  %v23508_v0 = vld [vmem:[#allocation216_spill] sm:$0xff]  ;;  %v554_v36 = vld [vmem:[#allocation2 + $0xc0] sm:$0x1]  ;;  %v23513_v47 = vld [vmem:[#allocation206_spill] sm:$0xff] }
 0x38d   : > { %v10201_v49 = vsel %vm5833_vm13, %v23500_v22, %v10200_v61  ;;  %v10208_v28 = vsel %vm5830_vm12, %v23501_v63, %v10207_v15  ;;  %v10213_v42 = vsel %vm5821_vm9, %v23504_v33, %v23502_v57  ;;  %v23509_v6 = vrot.slane %v23508_v0, 3  ;;  %v13930_v41 = vld.sshfl [vmem:[#allocation2 + $0x11c] sm:$0x1 pattern:$0x75316420]  ;;  %v23514_v17 = vld [vmem:[#allocation186_spill] sm:$0xff] }
 0x38e   : > { %v20207_v35 = vsel %vm5836_vm14, %v23507_v43, %v10201_v49  ;;  %v23510_v52 = vrot.slane %v23350_v40, 6  ;;  %v23511_v12 = vrot.slane %v19234_v16, 6  ;;  %v23512_v5 = vrot.slane %v23344_v8, 2  ;;  %v1519_v45 = vld [vmem:[#allocation2 + $0x14c] sm:$0x1]  ;;  %v23518_v51 = vld [vmem:[#allocation225_spill] sm:$0xff] }
 0x38f   : > { %v10209_v48 = vsel %vm5833_vm13, %v23509_v6, %v10208_v28  ;;  %v1231_v11 = vrot.slane %v23513_v47, 4  ;;  %v13933_v39 = vld.sshfl [vmem:[#allocation2 + $0x134] sm:$0x1 pattern:$0x75316420]  ;;  %v3572_v26 = vrot.slane %v13930_v41, %v23440_v29  ;;  %v1520_v14 = vsel %vm15767_vm3, %v1129_v4, %v1519_v45 }
 0x390   : > { %v10214_v32 = vsel %vm5824_vm10, %v23510_v52, %v10213_v42  ;;  %v10222_v30 = vsel %vm5824_vm10, %v23511_v12, %v10221_v23  ;;  %v20223_v38 = vsel %vm5836_vm14, %v23512_v5, %v10209_v48  ;;  %v3634_v7 = vrot.slane %v13933_v39, %v23440_v29  ;;  %v1533_v59 = vld [vmem:[#allocation2 + $0x164] sm:$0x1]  ;;  %v457_v34 = vld [vmem:[%s15744_s12 + $0x7c] sm:$0xf]  ;;  %1521 = vst [vmem:[#allocation2 + $0x14c] sm:$0x1] %v1520_v14 }
 0x391   : > { %v10215_v40 = vsel %vm5827_vm11, %v19740_v53, %v10214_v32  ;;  %v10223_v16 = vsel %vm5827_vm11, %v19776_v9, %v10222_v30  ;;  %v23515_v53 = vld [vmem:[#allocation224_spill] sm:$0xff]  ;;  %v23517_v25 = vrot.slane %v19238_v55, 3  ;;  %v10007_v18 = vrot.slane %v3572_v26, %v23440_v29  ;;  %v1561_v49 = vld [vmem:[#allocation2 + $0x194] sm:$0x1]  ;;  %v488_v23 = vld [vmem:[%s15744_s12 + $0xf8] sm:$0xf] }
 0x392   : > { %v10216_v13 = vsel %vm5830_vm12, %v23514_v17, %v10215_v40  ;;  %v10224_v8 = vsel %vm5830_vm12, %v19785_v62, %v10223_v16  ;;  %v23516_v44 = vrot.slane %v23515_v53, 3  ;;  %v1534_v62 = vsel %vm15767_vm3, %v1163_v3, %v1533_v59  ;;  %v1547_v61 = vld [vmem:[#allocation2 + $0x17c] sm:$0x1]  ;;  %v602_v33 = vld [vmem:[#allocation2 + $0x198] sm:$0x1] }
 0x393   : > { %v10225_v37 = vsel %vm5833_vm13, %v23517_v25, %v10224_v8  ;;  %v23519_v15 = vrot.slane %v23518_v51, 2  ;;  %v23520_v27 = vrot.slane %v19240_v20, 2  ;;  %v10021_v55 = vrot.slane %v3634_v7, %v23440_v29  ;;  %1535 = vst [vmem:[#allocation2 + $0x164] sm:$0x1] %v1534_v62  ;;  %v489_v0 = vld [vmem:[%s15744_s12 + $0xfc] sm:$0xf] }
 0x394   : > { %v10217_v9 = vsel %vm5833_vm13, %v23516_v44, %v10216_v13  ;;  %v1548_v22 = vsel %vm15767_vm3, %v1197_v54, %v1547_v61  ;;  %v555_v3 = vsel %vm15767_vm3, 0, %v554_v36  ;;  %v961_v63 = vshrl.u32 %v456_v60, 16  ;;  %s13843_s12 = sshll.u32 %s15740_s10, 7 }
 0x395   : > { %v20251_v4 = vsel %vm5836_vm14, %v23519_v15, %v10217_v9  ;;  %v20256_v58 = vsel %vm5836_vm14, %v23520_v27, %v10225_v37  ;;  %v10014_v28 = vrot.slane %v10007_v18, %v23440_v29  ;;  %1549 = vst [vmem:[#allocation2 + $0x17c] sm:$0x1] %v1548_v22  ;;  %v1562_v20 = vsel %vm15767_vm3, %v1231_v11, %v1561_v49  ;;  %s21868_s19 = scalar_lea.vmem [#allocation12], %s13843_s12 }
 0x396   : > { %556 = vst [vmem:[#allocation2 + $0xc0] sm:$0x1] %v555_v3  ;;  %v964_v57 = vshll.u32 %v456_v60, 16  ;;  %v969_v10 = vshrl.u32 %v457_v34, 16  ;;  %v10028_v42 = vrot.slane %v10021_v55, %v23440_v29  ;;  %1563 = vst [vmem:[#allocation2 + $0x194] sm:$0x1] %v1562_v20 }
 0x397   : > { %v963_v54 = vrot.slane %v961_v63, 7  ;;  %v972_v46 = vshll.u32 %v457_v34, 16  ;;  %v10095_v56 = vunpack.c.l.b16 %v10014_v28  ;;  %v603_v32 = vsel %vm15767_vm3, 0, %v602_v33  ;;  %v23523_v33 = vld [vmem:[#allocation27_spill] sm:$0xff]  ;;  %s13726_s30 = sshll.u32 %s21868_s19, 4  ;;  %s21982_s30 = int_to_ptr.vmem [resolvable:$true] %s13726_s30 }
 0x398   : > { %v20268_v43 = vrot.slane %v969_v10, 7  ;;  %v10096_v6 = vunpack.c.l.b16 %v10028_v42  ;;  %604 = vst [vmem:[#allocation2 + $0x198] sm:$0x1] %v603_v32  ;;  %v1233_v60 = vshrl.u32 %v488_v23, 16  ;;  %v1236_v36 = vshll.u32 %v488_v23, 16  ;;  %v23524_v42 = vld [vmem:[#allocation46_spill] sm:$0xff]  ;;  %p15400_p12 = scmp.lt.s32.totalorder %s21982_s30, %s15398_s28 }
 0x399   : > { %v966_v48 = vor.u32 %v964_v57, %v963_v54  ;;  %v967_v52 = vrot.slane %v963_v54, 4  ;;  %v10187_v12 = vrot.slane %v10095_v56, 1  ;;  %v13936_v5 = vld.sshfl [vmem:[#allocation2 + $0x14c] sm:$0x1 pattern:$0x75316420]  ;;  %v10675_v54 = vpack.c.b16 %v23524_v42, %v23523_v33 }
 0x39a   : > { %v974_v30 = vor.u32 %v972_v46, %v20268_v43  ;;  %v10195_v41 = vrot.slane %v10096_v6, 1  ;;  %v1241_v47 = vshrl.u32 %v489_v0, 16  ;;  %v13939_v40 = vld.sshfl [vmem:[#allocation2 + $0x164] sm:$0x1 pattern:$0x75316420]  ;;  %v3696_v16 = vrot.slane %v13936_v5, %v23440_v29 }
 0x39b   : > { %v10188_v11 = vsel %vm5839_vm15, %v10187_v12, %v20135_v50  ;;  %v1235_v45 = vrot.slane %v1233_v60, 7  ;;  %v3758_v13 = vrot.slane %v13939_v40, %v23440_v29  ;;  %v1244_v51 = vshll.u32 %v489_v0, 16  ;;  %v23525_v12 = vld [vmem:[#allocation34_spill] sm:$0xff]  ;;  %s15393_s18 = scalar_lea.vmem %s21982_s30, 2048 }
 0x39c   : > { %v975_v26 = vsel %vm15813_vm7, %v967_v52, %v974_v30  ;;  %v10196_v17 = vsel %vm5839_vm15, %v10195_v41, %v20145_v2  ;;  %v13942_v8 = vld.sshfl [vmem:[#allocation2 + $0x17c] sm:$0x1 pattern:$0x75316420]  ;;  %v10035_v59 = vrot.slane %v3696_v16, %v23440_v29  ;;  %v20292_v61 = vrot.slane %v1241_v47, 7  ;;  %v23526_v30 = vld [vmem:[#allocation35_spill] sm:$0xff]  ;;  %p15394_p10 = scmp.ne.s32.totalorder %s21982_s30, %s15393_s18  ;;  %p15401_p1 = scmp.lt.s32.totalorder %s15399_s27, %s15393_s18 }
 0x39d   : > { %v1452_v7 = vld [vmem:[#allocation2 + $0xc0] sm:$0xf]  ;;  %1455 = vst.msk [vmem:[#allocation2 + $0xc4] sm:$0xf] %vm490_vm0, %v975_v26  ;;  %v10234_v14 = vpack.c.b16 %v10196_v17, %v10188_v11  ;;  %v3820_v53 = vrot.slane %v13942_v8, %v23440_v29  ;;  %v10049_v25 = vrot.slane %v3758_v13, %v23440_v29  ;;  %v1238_v2 = vor.u32 %v1236_v36, %v1235_v45  ;;  %v23528_v5 = vld [vmem:[#allocation98_spill] sm:$0xff] }
 0x39e   : > { %v13945_v50 = vld.sshfl [vmem:[#allocation2 + $0x194] sm:$0x1 pattern:$0x75316420]  ;;  %v1453_v9 = vsel %vm15828_vm8, %v966_v48, %v1452_v7  ;;  %v1239_v34 = vrot.slane %v1235_v45, 4  ;;  %v10042_v18 = vrot.slane %v10035_v59, %v23440_v29  ;;  %v1246_v3 = vor.u32 %v1244_v51, %v20292_v61  ;;  %v23527_v41 = vld [vmem:[#allocation81_spill] sm:$0xff]  ;;  %p15395_p3 = pnand %p15394_p10, %p15689_p5  ;;  %p15402_p2 = por %p15401_p1, %p15400_p12 }
 0x39f   : > { %v3882_v37 = vrot.slane %v13945_v50, %v23440_v29  ;;  %1454 = vst [vmem:[#allocation2 + $0xc0] sm:$0xf] %v1453_v9  ;;  %14789 = vmatmul.mubr.msk.bf16.gmra.mrb[8].mxu0 %vm6083_vm1, %v10234_v14  ;;  %v10063_v62 = vrot.slane %v3820_v53, %v23440_v29  ;;  %v10056_v15 = vrot.slane %v10049_v25, %v23440_v29  ;;  %v1564_v55 = vld [vmem:[#allocation2 + $0x198] sm:$0xf] }
 0x3a0   : > { %v10097_v22 = vunpack.c.l.b16 %v10042_v18  ;;  %v1565_v63 = vsel %vm15828_vm8, %v1238_v2, %v1564_v55  ;;  %v1247_v23 = vsel %vm15813_vm7, %v1239_v34, %v1246_v3  ;;  %v10677_v60 = vpack.c.b16 %v23526_v30, %v23525_v12  ;;  %p15396_p7 = pneg %p15395_p3 }
 0x3a1   : > { %v10077_v27 = vrot.slane %v3882_v37, %v23440_v29  ;;  %v10070_v49 = vrot.slane %v10063_v62, %v23440_v29  ;;  %v10098_v28 = vunpack.c.l.b16 %v10056_v15  ;;  %1566 = vst [vmem:[#allocation2 + $0x198] sm:$0xf] %v1565_v63  ;;  %1567 = vst.msk [vmem:[#allocation2 + $0x19c] sm:$0xf] %vm490_vm0, %v1247_v23  ;;  %v10679_v47 = vpack.c.b16 %v23528_v5, %v23527_v41 }
 0x3a2   : > { %v10203_v57 = vrot.slane %v10097_v22, 1  ;;  %vm11537_vm0 = vcmask 1040384   ;;  %vm12241_vm7 = vcmask 1042432   ;;  %vm12242_vm8 = vcmask 1046532   ;;  %p15403_p4 = pnand %p15402_p2, %p15396_p7 }
 0x3a3   : > { %v10084_v20 = vrot.slane %v10077_v27, %v23440_v29  ;;  %v10099_v10 = vunpack.c.l.b16 %v10070_v49  ;;  %v10211_v56 = vrot.slane %v10098_v28, 1 }
 0x3a4   : > { %v13869_v46 = vld.sshfl [vmem:[#allocation2 + $0xc4] sm:$0x33 pattern:$0x75316420]  ;;  %v10204_v52 = vsel %vm5839_vm15, %v10203_v57, %v20207_v35 }
 0x3a5   : > { %v10100_v0 = vunpack.c.l.b16 %v10084_v20  ;;  %v2254_v6 = vcombine.high %v13869_v46, %v13869_v46  ;;  %v2261_v48 = vrot.slane %v13869_v46, %v23440_v29  ;;  %v10219_v32 = vrot.slane %v10099_v10, 1  ;;  %v23529_v46 = vld [vmem:[#allocation72_spill] sm:$0xff] }
 0x3a6   : > { %v13868_v36 = vld.sshfl [vmem:[#allocation2 + $0xc0] sm:$0x33 pattern:$0x75316420]  ;;  %v10212_v11 = vsel %vm5839_vm15, %v10211_v56, %v20223_v38  ;;  %v23530_v23 = vunpack.c.l.b16 %v23529_v46  ;;  %v23534_v46 = vld [vmem:[#allocation62_spill] sm:$0xff] }
 0x3a7   : > { %v10227_v40 = vrot.slane %v10100_v0, 1  ;;  %v2230_v16 = vcombine.high %v13868_v36, %v13868_v36  ;;  %v2237_v39 = vrot.slane %v13868_v36, %v23440_v29  ;;  %v10235_v26 = vpack.c.b16 %v10212_v11, %v10204_v52 }
 0x3a8   : > { %v10220_v45 = vsel %vm5839_vm15, %v10219_v32, %v20251_v4  ;;  %v2268_v35 = vrot.slane %v2254_v6, %v23440_v29  ;;  %v2269_v17 = vcombine.high %v2261_v48, %v2261_v48  ;;  %v10469_v50 = vrot.slane %v2261_v48, %v23440_v29  ;;  %v13895_v18 = vld.sshfl [vmem:[#allocation2 + $0x198] sm:$0x33 pattern:$0x75316420] }
 0x3a9   : > { %v10228_v13 = vsel %vm5839_vm15, %v10227_v40, %v20256_v58  ;;  %v2244_v8 = vrot.slane %v2230_v16, %v23440_v29  ;;  %v2245_v7 = vcombine.high %v2237_v39, %v2237_v39  ;;  %v10413_v14 = vrot.slane %v2237_v39, %v23440_v29  ;;  %14792 = vmatprep.mubr.msk.bf16.mxu0 %vm6083_vm1, %v10235_v26  ;;  %v13896_v57 = vld.sshfl [vmem:[#allocation2 + $0x19c] sm:$0x33 pattern:$0x75316420] }
 0x3aa   : > { %v10236_v38 = vpack.c.b16 %v10228_v13, %v10220_v45  ;;  %v2270_v59 = vcombine.high %v2268_v35, %v2268_v35  ;;  %v10483_v53 = vrot.slane %v2268_v35, %v23440_v29  ;;  %v20333_v25 = vrot.slane %v10469_v50, %v23440_v29  ;;  %v15172_v32 = vld [vmem:[#allocation7 + $0xe8] sm:$0xff]  }
 0x3ab   : > { %v2246_v4 = vcombine.high %v2244_v8, %v2244_v8  ;;  %v20327_v44 = vrot.slane %v10413_v14, %v23440_v29  ;;  %v10427_v9 = vrot.slane %v2244_v8, %v23440_v29  ;;  %v10441_v58 = vrot.slane %v2245_v7, %v23440_v29  ;;  %v23532_v13 = vld [vmem:[#allocation60_spill] sm:$0xff] }
 0x3ac   : > { %14793 = vmatmul.mubr.msk.bf16.gmra.mrb[12].mxu0 %vm6083_vm1, %v10236_v38  ;;  %v20336_v37 = vrot.slane %v10483_v53, %v23440_v29  ;;  %v10497_v2 = vrot.slane %v2269_v17, %v23440_v29  ;;  %v10511_v34 = vrot.slane %v2270_v59, %v23440_v29  ;;  %v10635_v49 = vunpack.c.l.b16 %v20333_v25  ;;  %v23531_v17 = vld [vmem:[#allocation30_spill] sm:$0xff] }
 0x3ad   : > { %14804 = vmatprep.mubr.msk.bf16.mxu0 %vm6083_vm1, %v10675_v54  ;;  %v10434_v62 = vrot.slane %v10427_v9, %v23440_v29  ;;  %v10448_v51 = vrot.slane %v10441_v58, %v23440_v29  ;;  %v10455_v15 = vrot.slane %v2246_v4, %v23440_v29  ;;  %v10631_v27 = vunpack.c.l.b16 %v20327_v44 }
 0x3ae   : > { %v10504_v55 = vrot.slane %v10497_v2, %v23440_v29  ;;  %v10518_v22 = vrot.slane %v10511_v34, %v23440_v29  ;;  %v10636_v3 = vunpack.c.l.b16 %v20336_v37  ;;  %v2788_v10 = vcombine.high %v13895_v18, %v13895_v18  ;;  %v15173_v2 = vld [vmem:[#allocation7 + $0xf0] sm:$0xff]  }
 0x3af   : > { %v10462_v63 = vrot.slane %v10455_v15, %v23440_v29  ;;  %v20350_v28 = vunpack.c.l.b16 %v10434_v62  ;;  %v20352_v20 = vunpack.c.l.b16 %v10448_v51  ;;  %v10653_v54 = vrot.slane %v10635_v49, 4 }
 0x3b0   : > { %v20354_v33 = vunpack.c.l.b16 %v10504_v55  ;;  %v20356_v42 = vunpack.c.l.b16 %v10518_v22  ;;  %v20362_v56 = vrot.slane %v23530_v23, 1  ;;  %v2795_v52 = vrot.slane %v13895_v18, %v23440_v29 }
 0x3b1   : > { %v20364_v0 = vunpack.c.l.b16 %v10462_v63  ;;  %v10647_v6 = vrot.slane %v20350_v28, 7  ;;  %v10649_v48 = vrot.slane %v20352_v20, 6  ;;  %v10655_v36 = vrot.slane %v10636_v3, 3 }
 0x3b2   : > { %v10657_v11 = vrot.slane %v20354_v33, 2  ;;  %v2802_v40 = vrot.slane %v2788_v10, %v23440_v29  ;;  %v2812_v16 = vcombine.high %v13896_v57, %v13896_v57  ;;  %v2803_v45 = vcombine.high %v2795_v52, %v2795_v52 }
 0x3b3   : > { %v10648_v39 = vsel %vm5821_vm9, %v10647_v6, %v10631_v27  ;;  %v10651_v26 = vrot.slane %v20364_v0, 5  ;;  %v2819_v35 = vrot.slane %v13896_v57, %v23440_v29  ;;  %v23533_v8 = vpack.c.b16 %v23531_v17, %v23532_v13  ;;  %v15174_v6 = vld [vmem:[#allocation7 + $0xf8] sm:$0xff]  }
 0x3b4   : > { %v10650_v7 = vsel %vm5824_vm10, %v10649_v48, %v10648_v39  ;;  %v2804_v14 = vcombine.high %v2802_v40, %v2802_v40  ;;  %v2826_v38 = vrot.slane %v2812_v16, %v23440_v29  ;;  %v10525_v59 = vrot.slane %v2795_v52, %v23440_v29 }
 0x3b5   : > { %14805 = vmatmul.mubr.msk.bf16.vlgmr.msra.gmra.mrb[0].mxu0 %vm6083_vm1, %v23533_v8  ;;  %v10652_v50 = vsel %vm5827_vm11, %v10651_v26, %v10650_v7  ;;  %v10659_v53 = vrot.slane %v20356_v42, 1  ;;  %v2827_v4 = vcombine.high %v2819_v35, %v2819_v35  ;;  %v10539_v9 = vrot.slane %v2802_v40, %v23440_v29 }
 0x3b6   : > { %14821 = vmatpush3.bf16.msra.mxu0 %v20172_v21  ;;  %14808 = vmatprep.mubr.msk.bf16.mxu0 %vm6083_vm1, %v10677_v60  ;;  %v10654_v58 = vsel %vm5830_vm12, %v10653_v54, %v10652_v50  ;;  %v2828_v34 = vcombine.high %v2826_v38, %v2826_v38  ;;  %v20395_v18 = vrot.slane %v10525_v59, %v23440_v29  ;;  %v23537_v50 = vld [vmem:[#allocation84_spill] sm:$0xff] }
 0x3b7   : > { %14822 = vmatprep.subr.bf16.mxu0 %v15172_v32  ;;  %v10553_v21 = vrot.slane %v2803_v45, %v23440_v29  ;;  %v10656_v12 = vsel %vm5833_vm13, %v10655_v36, %v10654_v58  ;;  %v10546_v30 = vrot.slane %v10539_v9, %v23440_v29  ;;  %v10567_v60 = vrot.slane %v2804_v14, %v23440_v29  ;;  %v23535_v14 = vld [vmem:[#allocation99_spill] sm:$0xff] }
 0x3b8   : > { %v10581_v62 = vrot.slane %v2819_v35, %v23440_v29  ;;  %v10658_v51 = vsel %vm5836_vm14, %v10657_v11, %v10656_v12  ;;  %v10595_v55 = vrot.slane %v2826_v38, %v23440_v29  ;;  %v10609_v22 = vrot.slane %v2827_v4, %v23440_v29  ;;  %v23536_v38 = vld [vmem:[#allocation116_spill] sm:$0xff]  ;;  %v23540_v12 = vld [vmem:[#allocation117_spill] sm:$0xff] }
 0x3b9   : > { %v10560_v15 = vrot.slane %v10553_v21, %v23440_v29  ;;  %v10660_v63 = vsel %vm5839_vm15, %v10659_v53, %v10658_v51  ;;  %v10574_v57 = vrot.slane %v10567_v60, %v23440_v29  ;;  %v10623_v54 = vrot.slane %v2828_v34, %v23440_v29  ;;  %v23539_v34 = vld [vmem:[#allocation75_spill] sm:$0xff] }
 0x3ba   : > { %14823 = vmatpush3.bf16.msra.mxu0 %v15172_v32  ;;  %v20409_v10 = vrot.slane %v10581_v62, %v23440_v29  ;;  %v10678_v23 = vpack.c.b16 %v10660_v63, %v23534_v46  ;;  %v20414_v48 = vrot.slane %v10595_v55, %v23440_v29  ;;  %v10616_v52 = vrot.slane %v10609_v22, %v23440_v29  ;;  %v23542_v63 = vld [vmem:[#allocation76_spill] sm:$0xff] }
 0x3bb   : > { %14824 = vmatprep.subr.bf16.mxu0 %v15173_v2  ;;  %v10639_v36 = vunpack.c.l.b16 %v20395_v18  ;;  %v10630_v32 = vrot.slane %v10623_v54, %v23440_v29  ;;  %v20419_v11 = vunpack.c.l.b16 %v10546_v30  ;;  %v20421_v40 = vunpack.c.l.b16 %v10560_v15  ;;  %v23541_v30 = vld [vmem:[#allocation51_spill] sm:$0xff] }
 0x3bc   : > { %v20423_v16 = vunpack.c.l.b16 %v10574_v57  ;;  %v10643_v39 = vunpack.c.l.b16 %v20409_v10  ;;  %v10644_v26 = vunpack.c.l.b16 %v20414_v48  ;;  %v20428_v45 = vunpack.c.l.b16 %v10616_v52  ;;  %v23631_v10 = vld [vmem:[#allocation56_spill] sm:$0xff] }
 0x3bd   : > { %14809 = vmatmul.mubr.msk.bf16.gmra.mrb[4].mxu0 %vm6083_vm1, %v10678_v23  ;;  %v10853_v35 = vrot.slane %v10631_v27, 1  ;;  %v20436_v17 = vunpack.c.l.b16 %v10630_v32  ;;  %v10661_v13 = vrot.slane %v20419_v11, 7  ;;  %v10663_v8 = vrot.slane %v20421_v40, 6  ;;  %v20445_v27 = vld [vmem:[#allocation7 + $0x100] sm:$0xff]   ;;  %v23544_v23 = vld [vmem:[#allocation88_spill] sm:$0xff] }
 0x3be   : > { %14812 = vmatprep.mubr.msk.bf16.mxu0 %vm6083_vm1, %v10679_v47  ;;  %14825 = vmatpush3.bf16.msra.mxu0 %v15173_v2  ;;  %v10665_v7 = vrot.slane %v20423_v16, 5  ;;  %v10680_v59 = vpack.c.b16 %v23536_v38, %v23535_v14  ;;  %v10667_v44 = vrot.slane %v10643_v39, 4  ;;  %v10669_v5 = vrot.slane %v10644_v26, 3  ;;  %v23547_v14 = vld [vmem:[#allocation78_spill] sm:$0xff] }
 0x3bf   : > { %14826 = vmatprep.subr.bf16.mxu0 %v15174_v6  ;;  %v10662_v41 = vsel %vm5821_vm9, %v10661_v13, %v10639_v36  ;;  %v10855_v47 = vrot.slane %v20352_v20, 7  ;;  %v23538_v53 = vunpack.c.l.b16 %v23537_v50  ;;  %v10671_v58 = vrot.slane %v20428_v45, 2  ;;  %v23551_v50 = vld [vmem:[#allocation89_spill] sm:$0xff] }
 0x3c0   : > { %v10664_v9 = vsel %vm5824_vm10, %v10663_v8, %v10662_v41  ;;  %v10854_v2 = vsel %vm5821_vm9, %v20350_v28, %v10853_v35  ;;  %v5954_v21 = vsel %vm5821_vm9, %v23539_v34, %v20362_v56  ;;  %v10681_v60 = vpack.c.b16 %v23541_v30, %v23540_v12  ;;  %v23545_v35 = vld [vmem:[#allocation87_spill] sm:$0xff]  ;;  %v23556_v34 = vld [vmem:[#allocation36_spill] sm:$0xff]  ;;  %v23558_v30 = vld [vmem:[#allocation49_spill] sm:$0xff] }
 0x3c1   : > { %v5967_v4 = vrot.slane %v23538_v53, 1  ;;  %v10666_v62 = vsel %vm5827_vm11, %v10665_v7, %v10664_v9  ;;  %v10673_v51 = vrot.slane %v20436_v17, 1  ;;  %v10857_v55 = vrot.slane %v20364_v0, 6  ;;  %v23554_v9 = vld [vmem:[#allocation103_spill] sm:$0xff] }
 0x3c2   : > { %14827 = vmatpush3.bf16.msra.mxu0 %v15174_v6  ;;  %v10668_v15 = vsel %vm5830_vm12, %v10667_v44, %v10666_v62  ;;  %v10856_v56 = vsel %vm5824_vm10, %v10855_v47, %v10854_v2  ;;  %v23543_v57 = vrot.slane %v23542_v63, 7  ;;  %v20484_v32 = vrot.slane %v10635_v49, 5  ;;  %v23549_v44 = vld [vmem:[#allocation100_spill] sm:$0xff]  ;;  %v23553_v49 = vld [vmem:[#allocation93_spill] sm:$0xff] }
 0x3c3   : > { %14844 = vmatprep.subr.bf16.mxu0 %v20445_v27  ;;  %v10670_v22 = vsel %vm5833_vm13, %v10669_v5, %v10668_v15  ;;  %v5968_v6 = vsel %vm5821_vm9, %v23544_v23, %v5967_v4  ;;  %v23546_v13 = vunpack.c.l.b16 %v23545_v35  ;;  %v10858_v7 = vsel %vm5827_vm11, %v10857_v55, %v10856_v56  ;;  %v23560_v56 = vld [vmem:[#allocation58_spill] sm:$0xff] }
 0x3c4   : > { %v5956_v54 = vsel %vm5824_vm10, %v23543_v57, %v5954_v21  ;;  %v10672_v46 = vsel %vm5836_vm14, %v10671_v58, %v10670_v22  ;;  %v23548_v38 = vrot.slane %v23547_v14, 6  ;;  %v23550_v41 = vunpack.c.l.b16 %v23549_v44  ;;  %v23561_v57 = vld [vmem:[#allocation111_spill] sm:$0xff] }
 0x3c5   : > { %14813 = vmatmul.mubr.msk.bf16.gmra.mrb[8].mxu0 %vm6083_vm1, %v10680_v59  ;;  %v10674_v52 = vsel %vm5839_vm15, %v10673_v51, %v10672_v46  ;;  %v5981_v8 = vrot.slane %v23546_v13, 1  ;;  %v23552_v53 = vrot.slane %v23551_v50, 7  ;;  %v23555_v58 = vunpack.c.l.b16 %v23554_v9  ;;  %v23559_v51 = vld [vmem:[#allocation106_spill] sm:$0xff]  ;;  %v23566_v13 = vld [vmem:[#allocation107_spill] sm:$0xff]  ;;  %v23575_v9 = vld [vmem:[#allocation64_spill] sm:$0xff] }
 0x3c6   : > { %14816 = vmatprep.mubr.msk.bf16.mxu0 %vm6083_vm1, %v10681_v60  ;;  %v5958_v59 = vsel %vm5827_vm11, %v23548_v38, %v5956_v54  ;;  %v5995_v5 = vrot.slane %v23550_v41, 1  ;;  %v23557_v21 = vunpack.c.l.b16 %v23556_v34  ;;  %v10682_v60 = vpack.c.b16 %v10674_v52, %v23558_v30  ;;  %v23562_v46 = vld [vmem:[#allocation90_spill] sm:$0xff]  ;;  %v23568_v14 = vld [vmem:[#allocation39_spill] sm:$0xff] }
 0x3c7   : > { %v5970_v25 = vsel %vm5824_vm10, %v23552_v53, %v5968_v6  ;;  %v5982_v4 = vsel %vm5821_vm9, %v23553_v49, %v5981_v8  ;;  %v6009_v2 = vrot.slane %v23555_v58, 1  ;;  %v20508_v62 = vrot.slane %v10636_v3, 4  ;;  %v23564_v52 = vld [vmem:[#allocation94_spill] sm:$0xff]  ;;  %v23569_v44 = vld [vmem:[#allocation59_spill] sm:$0xff]  ;;  %v23573_v49 = vld [vmem:[#allocation40_spill] sm:$0xff] }
 0x3c8   : > { %v6023_v12 = vrot.slane %v23557_v21, 1  ;;  %v5996_v15 = vsel %vm5821_vm9, %v23559_v51, %v5995_v5  ;;  %v10860_v22 = vsel %vm5830_vm12, %v20484_v32, %v10858_v7  ;;  %v5960_v63 = vsel %vm5830_vm12, %v23560_v56, %v5958_v59  ;;  %v23570_v5 = vld [vmem:[#allocation112_spill] sm:$0xff] }
 0x3c9   : > { %v6010_v54 = vsel %vm5821_vm9, %v23561_v57, %v6009_v2  ;;  %v23563_v23 = vrot.slane %v23562_v46, 6  ;;  %v23565_v37 = vrot.slane %v23564_v52, 7  ;;  %v10863_v35 = vrot.slane %v20354_v33, 3  ;;  %v23576_v2 = vld [vmem:[#allocation95_spill] sm:$0xff] }
 0x3ca   : > { %v23567_v8 = vrot.slane %v23566_v13, 7  ;;  %v6024_v38 = vsel %vm5821_vm9, %v23568_v14, %v6023_v12  ;;  %v10862_v59 = vsel %vm5833_vm13, %v20508_v62, %v10860_v22  ;;  %v5962_v41 = vsel %vm5833_vm13, %v23569_v44, %v5960_v63  ;;  %v23578_v12 = vld [vmem:[#allocation37_spill] sm:$0xff]  ;;  %v23589_v44 = vld [vmem:[#allocation71_spill] sm:$0xff] }
 0x3cb   : > { %v5972_v6 = vsel %vm5827_vm11, %v23563_v23, %v5970_v25  ;;  %v5984_v3 = vsel %vm5824_vm10, %v23565_v37, %v5982_v4  ;;  %v23571_v50 = vrot.slane %v23570_v5, 7  ;;  %v23572_v25 = vld [vmem:[#allocation41_spill] sm:$0xff]  ;;  %v23577_v34 = vrot.slane %v23576_v2, 6  ;;  %v23584_v23 = vld [vmem:[#allocation74_spill] sm:$0xff] }
 0x3cc   : > { %v5998_v7 = vsel %vm5824_vm10, %v23567_v8, %v5996_v15  ;;  %v23574_v4 = vpack.c.b16 %v23572_v25, %v23573_v49  ;;  %v5974_v58 = vsel %vm5830_vm12, %v23575_v9, %v5972_v6  ;;  %v23579_v30 = vunpack.c.l.b16 %v23578_v12  ;;  %v23580_v15 = vld [vmem:[#allocation108_spill] sm:$0xff]  ;;  %v23582_v63 = vld [vmem:[#allocation25_spill] sm:$0xff]  ;;  %v652_v5 = vld [vmem:[#allocation2 + $0xc8] sm:$0x1] }
 0x3cd   : > { %14817 = vmatmul.mubr.msk.bf16.gmra.mrb[12].mxu0 %vm6083_vm1, %v10682_v60  ;;  %v6012_v53 = vsel %vm5824_vm10, %v23571_v50, %v6010_v54  ;;  %v5986_v21 = vsel %vm5827_vm11, %v23577_v34, %v5984_v3  ;;  %v10865_v51 = vrot.slane %v20356_v42, 2  ;;  %v23581_v22 = vrot.slane %v23580_v15, 6  ;;  %v23586_v37 = vld [vmem:[#allocation113_spill] sm:$0xff]  ;;  %v23590_v50 = vld [vmem:[#allocation52_spill] sm:$0xff]  ;;  %v23595_v2 = vld [vmem:[#allocation42_spill] sm:$0xff] }
 0x3ce   : > { %14828 = vmatprep.mubr.msk.bf16.mxu0 %vm6083_vm1, %v23574_v4  ;;  %v6037_v60 = vrot.slane %v23579_v30, 1  ;;  %v23583_v57 = vrot.slane %v23582_v63, 7  ;;  %v10864_v46 = vsel %vm5836_vm14, %v10863_v35, %v10862_v59  ;;  %v23585_v6 = vrot.slane %v23584_v23, 3  ;;  %v23591_v59 = vld [vmem:[#allocation28_spill] sm:$0xff]  ;;  %v23593_v4 = vld [vmem:[#allocation31_spill] sm:$0xff]  ;;  %v23596_v34 = vld [vmem:[#allocation77_spill] sm:$0xff] }
 0x3cf   : > { %v6000_v56 = vsel %vm5827_vm11, %v23581_v22, %v5998_v7  ;;  %v23587_v3 = vrot.slane %v23586_v37, 6  ;;  %v10867_v8 = vrot.slane %v10639_v36, 1  ;;  %v23588_v7 = vld [vmem:[#allocation65_spill] sm:$0xff]  ;;  %v10883_v25 = vpack.c.b16 %v23591_v59, %v23590_v50  ;;  %v23592_v49 = vld [vmem:[#allocation80_spill] sm:$0xff]  ;;  %v23598_v30 = vld [vmem:[#allocation86_spill] sm:$0xff] }
 0x3d0   : > { %v6026_v54 = vsel %vm5824_vm10, %v23583_v57, %v6024_v38  ;;  %v5964_v52 = vsel %vm5836_vm14, %v23585_v6, %v5962_v41  ;;  %v5976_v14 = vsel %vm5833_vm13, %v23588_v7, %v5974_v58  ;;  %v5988_v38 = vsel %vm5830_vm12, %v23589_v44, %v5986_v21  ;;  %v15176_v36 = vld [vmem:[#allocation7 + $0x108] sm:$0xff]   ;;  %v23599_v63 = vld [vmem:[#allocation91_spill] sm:$0xff]  ;;  %v23607_v50 = vld [vmem:[#allocation22_spill] sm:$0xff] }
 0x3d1   : > { %v6014_v13 = vsel %vm5827_vm11, %v23587_v3, %v6012_v53  ;;  %v6002_v41 = vsel %vm5830_vm12, %v23592_v49, %v6000_v56  ;;  %v23594_v9 = vrot.slane %v23593_v4, 6  ;;  %v6038_v18 = vsel %vm5821_vm9, %v23595_v2, %v6037_v60  ;;  %v700_v56 = vld [vmem:[#allocation2 + $0x1a0] sm:$0x1]  ;;  %v23603_v37 = vld [vmem:[#allocation44_spill] sm:$0xff]  ;;  %v23606_v44 = vld [vmem:[#allocation83_spill] sm:$0xff] }
 0x3d2   : > { %v10866_v58 = vsel %vm5839_vm15, %v10865_v51, %v10864_v46  ;;  %v23597_v21 = vrot.slane %v23596_v34, 2  ;;  %v6016_v15 = vsel %vm5830_vm12, %v23598_v30, %v6014_v13  ;;  %v10869_v22 = vrot.slane %v20421_v40, 7  ;;  %v23605_v13 = vld [vmem:[#allocation85_spill] sm:$0xff]  ;;  %v23612_v2 = vld [vmem:[#allocation82_spill] sm:$0xff] }
 0x3d3   : > { %v6028_v53 = vsel %vm5827_vm11, %v23594_v9, %v6026_v54  ;;  %v23600_v57 = vrot.slane %v23599_v63, 3  ;;  %v23601_v54 = vld [vmem:[#allocation73_spill] sm:$0xff]  ;;  %v10868_v46 = vsel %vm5821_vm9, %v20419_v11, %v10867_v8  ;;  %v653_v6 = vsel %vm15774_vm5, 0, %v652_v5  ;;  %v23609_v8 = vld [vmem:[#allocation63_spill] sm:$0xff] }
 0x3d4   : > { %v20586_v12 = vsel %vm5839_vm15, %v23597_v21, %v5964_v52  ;;  %v5990_v23 = vsel %vm5833_vm13, %v23601_v54, %v5988_v38  ;;  %v23602_v52 = vld [vmem:[#allocation45_spill] sm:$0xff]  ;;  %v6004_v7 = vsel %vm5833_vm13, %v23605_v13, %v6002_v41  ;;  %v23608_v59 = vrot.slane %v23607_v50, 7  ;;  %654 = vst [vmem:[#allocation2 + $0xc8] sm:$0x1] %v653_v6 }
 0x3d5   : > { %v5978_v60 = vsel %vm5836_vm14, %v23600_v57, %v5976_v14  ;;  %v23604_v3 = vpack.c.b16 %v23602_v52, %v23603_v37  ;;  %v6030_v14 = vsel %vm5830_vm12, %v23606_v44, %v6028_v53  ;;  %v23610_v49 = vunpack.c.l.b16 %v23609_v8  ;;  %v23611_v5 = vld [vmem:[#allocation29_spill] sm:$0xff]  ;;  %v23615_v57 = vld [vmem:[#allocation96_spill] sm:$0xff]  ;;  %v23621_v37 = vld [vmem:[#allocation50_spill] sm:$0xff] }
 0x3d6   : > { %v6040_v38 = vsel %vm5824_vm10, %v23608_v59, %v6038_v18  ;;  %v10884_v9 = vpack.c.b16 %v10866_v58, %v23611_v5  ;;  %v6018_v41 = vsel %vm5833_vm13, %v23612_v2, %v6016_v15  ;;  %v10871_v34 = vrot.slane %v20423_v16, 6  ;;  %v23613_v18 = vld [vmem:[#allocation92_spill] sm:$0xff]  ;;  %v15177_v63 = vld [vmem:[#allocation7 + $0x110] sm:$0xff]   ;;  %v23617_v15 = vld [vmem:[#allocation66_spill] sm:$0xff] }
 0x3d7   : > { %14829 = vmatmul.mubr.msk.bf16.vlgmr.msra.gmra.mrb[0].mxu0 %vm6083_vm1, %v23604_v3  ;;  %v5939_v4 = vrot.slane %v23610_v49, 1  ;;  %v701_v53 = vsel %vm15774_vm5, 0, %v700_v56  ;;  %v23614_v21 = vrot.slane %v23613_v18, 2  ;;  %v10870_v58 = vsel %vm5824_vm10, %v10869_v22, %v10868_v46  ;;  %v23620_v52 = vld [vmem:[#allocation101_spill] sm:$0xff]  ;;  %v23625_v46 = vld [vmem:[#allocation114_spill] sm:$0xff]  ;;  %vm20813_vm5 = vmand %vm11537_vm0, %vm605_vm4 }
 0x3d8   : > { %14845 = vmatpush3.bf16.msra.mxu0 %v20445_v27  ;;  %14832 = vmatprep.mubr.msk.bf16.mxu0 %vm6083_vm1, %v10883_v25  ;;  %v23616_v27 = vrot.slane %v23615_v57, 3  ;;  %702 = vst [vmem:[#allocation2 + $0x1a0] sm:$0x1] %v701_v53  ;;  %v23619_v56 = vrot.slane %v23618_v24, 3  ;;  %v23622_v3 = vrot.slane %v23621_v37, 6  ;;  %v23626_v59 = vrot.slane %v23625_v46, 3 }
 0x3d9   : > { %14846 = vmatprep.subr.bf16.mxu0 %v15176_v36  ;;  %v5980_v30 = vsel %vm5839_vm15, %v23614_v21, %v5978_v60  ;;  %v5940_v54 = vsel %vm5821_vm9, %v23617_v15, %v5939_v4  ;;  %v6032_v60 = vsel %vm5833_vm13, %v23620_v52, %v6030_v14  ;;  %v20648_v49 = vrot.slane %v10643_v39, 5  ;;  %v23627_v4 = vld [vmem:[#allocation68_spill] sm:$0xff]  ;;  %v23629_v2 = vld [vmem:[#allocation97_spill] sm:$0xff]  ;;  %v23638_v37 = vld [vmem:[#allocation47_spill] sm:$0xff] }
 0x3da   : > { %v5992_v25 = vsel %vm5836_vm14, %v23616_v27, %v5990_v23  ;;  %v6006_v6 = vsel %vm5836_vm14, %v23619_v56, %v6004_v7  ;;  %v6042_v13 = vsel %vm5827_vm11, %v23622_v3, %v6040_v38  ;;  %v23623_v23 = vld [vmem:[#allocation67_spill] sm:$0xff]  ;;  %v6020_v8 = vsel %vm5836_vm14, %v23626_v59, %v6018_v41  ;;  %v15178_v27 = vld [vmem:[#allocation7 + $0x118] sm:$0xff]  }
 0x3db   : > { %v23624_v44 = vrot.slane %v23623_v23, 7  ;;  %v976_v7 = vrot.slane %v20268_v43, 4  ;;  %v23628_v14 = vrot.slane %v23627_v4, 6  ;;  %v10885_v38 = vpack.c.b16 %v5980_v30, %v20586_v12  ;;  %v23632_v43 = vld [vmem:[#allocation110_spill] sm:$0xff]  ;;  %v23636_v56 = vld [vmem:[#allocation115_spill] sm:$0xff] }
 0x3dc   : > { %14847 = vmatpush3.bf16.msra.mxu0 %v15176_v36  ;;  %v23630_v53 = vrot.slane %v23629_v2, 2  ;;  %v10872_v41 = vsel %vm5827_vm11, %v10871_v34, %v10870_v58  ;;  %v23633_v21 = vrot.slane %v23632_v43, 2  ;;  %v23634_v36 = vld [vmem:[#allocation102_spill] sm:$0xff]  ;;  %v23637_v52 = vrot.slane %v23636_v56, 2 }
 0x3dd   : > { %v5942_v50 = vsel %vm5824_vm10, %v23624_v44, %v5940_v54  ;;  %14848 = vmatprep.subr.bf16.mxu0 %v15177_v63  ;;  %v6044_v15 = vsel %vm5830_vm12, %v23634_v36, %v6042_v13  ;;  %v23635_v54 = vld [vmem:[#allocation57_spill] sm:$0xff]  ;;  %v23639_v3 = vrot.slane %v23638_v37, 3  ;;  %v1456_v44 = vld [vmem:[#allocation2 + $0xc8] sm:$0x1]  ;;  %v11097_v33 = vsel %vm5821_vm9, %v10869_v22, %v20419_v11 }
 0x3de   : > { %v5944_v5 = vsel %vm5827_vm11, %v23628_v14, %v5942_v50  ;;  %v5994_v18 = vsel %vm5839_vm15, %v23630_v53, %v5992_v25  ;;  %v6008_v57 = vsel %vm5839_vm15, %v23633_v21, %v6006_v6  ;;  %v1248_v25 = vrot.slane %v20292_v61, 4  ;;  %v23640_v50 = vld [vmem:[#allocation69_spill] sm:$0xff]  ;;  %v23651_v37 = vld [vmem:[#allocation26_spill] sm:$0xff] }
 0x3df   : > { %v5946_v39 = vsel %vm5830_vm12, %v23631_v10, %v5944_v5  ;;  %v6022_v58 = vsel %vm5839_vm15, %v23637_v52, %v6020_v8  ;;  %v6034_v23 = vsel %vm5836_vm14, %v23639_v3, %v6032_v60  ;;  %v20679_v6 = vrot.slane %v10644_v26, 4  ;;  %14833 = vmatmul.mubr.msk.bf16.gmra.mrb[4].mxu0 %vm6083_vm1, %v10884_v9  ;;  %v23642_v8 = vld [vmem:[#allocation70_spill] sm:$0xff]  ;;  %v23644_v26 = vld [vmem:[#allocation104_spill] sm:$0xff]  ;;  %v1568_v2 = vld [vmem:[#allocation2 + $0x1a0] sm:$0x1] }
 0x3e0   : > { %v5948_v24 = vsel %vm5833_vm13, %v23635_v54, %v5946_v39  ;;  %v23641_v13 = vrot.slane %v23640_v50, 3  ;;  %v10874_v61 = vsel %vm5830_vm12, %v20648_v49, %v10872_v41  ;;  %v1457_v59 = vsel %vm15767_vm3, %v976_v7, %v1456_v44  ;;  %14836 = vmatprep.mubr.msk.bf16.mxu0 %vm6083_vm1, %v10885_v38  ;;  %14849 = vmatpush3.bf16.msra.mxu0 %v15177_v63  ;;  %v23645_v53 = vld [vmem:[#allocation33_spill] sm:$0xff]  ;;  %v15180_v38 = vld [vmem:[#allocation10 + $0x8] sm:$0xff]   ;;  %v23649_v54 = vld [vmem:[#allocation43_spill] sm:$0xff] }
 0x3e1   : > { %v23643_v4 = vrot.slane %v23642_v8, 2  ;;  %v6056_v48 = vpack.c.b16 %v5994_v18, %v5980_v30  ;;  %v6046_v14 = vsel %vm5833_vm13, %v23644_v26, %v6044_v15  ;;  %1458 = vst [vmem:[#allocation2 + $0xc8] sm:$0x1] %v1457_v59  ;;  %v6057_v5 = vpack.c.b16 %v6022_v58, %v6008_v57  ;;  %14850 = vmatprep.subr.bf16.mxu0 %v15178_v27  ;;  %v23647_v39 = vld [vmem:[#allocation32_spill] sm:$0xff]  ;;  %v23655_v59 = vld [vmem:[#allocation54_spill] sm:$0xff] }
 0x3e2   : > { %v5950_v46 = vsel %vm5836_vm14, %v23641_v13, %v5948_v24  ;;  %v23646_v41 = vrot.slane %v23645_v53, 2  ;;  %v10877_v10 = vrot.slane %v20428_v45, 3  ;;  %v1569_v30 = vsel %vm15767_vm3, %v1248_v25, %v1568_v2  ;;  %v15181_v25 = vld [vmem:[#allocation10 + $0x10] sm:$0xff]   ;;  %v23652_v3 = vld [vmem:[#allocation48_spill] sm:$0xff]  ;;  %v23663_v22 = vld [vmem:[#allocation158_spill] sm:$0xff] }
 0x3e3   : > { %v5952_v60 = vsel %vm5839_vm15, %v23643_v4, %v5950_v46  ;;  %v10876_v63 = vsel %vm5833_vm13, %v20679_v6, %v10874_v61  ;;  %1570 = vst [vmem:[#allocation2 + $0x1a0] sm:$0x1] %v1569_v30  ;;  %v23648_v43 = vrot.slane %v23647_v39, 3  ;;  %v10879_v15 = vrot.slane %v20436_v17, 2  ;;  %v23653_v13 = vld [vmem:[#allocation132_spill] sm:$0xff]  ;;  %v23656_v4 = vld [vmem:[#allocation53_spill] sm:$0xff]  ;;  %vm20806_vm3 = vmand %vm11537_vm0, %vm507_vm2 }
 0x3e4   : > { %v6055_v9 = vpack.c.b16 %v20586_v12, %v5952_v60  ;;  %v6036_v7 = vsel %vm5839_vm15, %v23646_v41, %v6034_v23  ;;  %v10886_v12 = vpack.c.b16 %v6008_v57, %v5994_v18  ;;  %14851 = vmatpush3.bf16.msra.mxu0 %v15178_v27  ;;  %v10878_v19 = vsel %vm5836_vm14, %v10877_v10, %v10876_v63  ;;  %v23657_v60 = vld [vmem:[#allocation61_spill] sm:$0xff]  ;;  %v23661_v41 = vld [vmem:[#allocation79_spill] sm:$0xff]  ;;  %v23664_v63 = vld [vmem:[#allocation160_spill] sm:$0xff] }
 0x3e5   : > { %v6048_v21 = vsel %vm5836_vm14, %v23648_v43, %v6046_v14  ;;  %v10887_v36 = vpack.c.b16 %v6036_v7, %v6022_v58  ;;  %v23650_v18 = vrot.slane %v23649_v54, 2  ;;  %v11089_v24 = vsel %vm5821_vm9, %v10855_v47, %v20350_v28  ;;  %v15182_v47 = vld [vmem:[#allocation10 + $0x18] sm:$0xff]   ;;  %v23667_v39 = vld [vmem:[#allocation121_spill] sm:$0xff]  ;;  %v23668_v43 = vld [vmem:[#allocation123_spill] sm:$0xff] }
 0x3e6   : > { %14668 = vmatprep.mubr.msk.bf16.mxu1 %vm6083_vm1, %v6055_v9  ;;  %v11090_v20 = vsel %vm5824_vm10, %v10857_v55, %v11089_v24  ;;  %v11105_v23 = vpack.c.b16 %v23652_v3, %v23651_v37  ;;  %v23658_v9 = vld [vmem:[#allocation142_spill] sm:$0xff]  ;;  %v11098_v42 = vsel %vm5824_vm10, %v10871_v34, %v11097_v33  ;;  %v15184_v17 = vld [vmem:[#allocation9] sm:$0xff]   ;;  %vm11982_vm2 = vsmask.f32 3328  ;;  %vm20938_vm10 = vmor %vm12241_vm7, %vm12242_vm8 }
 0x3e7   : > { %14669 = vmatmul.mubr.msk.bf16.vlgmr.msra.gmra.mrb[0].mxu1 %vm6083_vm1, %v6056_v48  ;;  %v6050_v57 = vsel %vm5839_vm15, %v23650_v18, %v6048_v21  ;;  %14837 = vmatmul.mubr.msk.bf16.gmra.mrb[8].mxu0 %vm6083_vm1, %v10886_v12  ;;  %v11091_v50 = vsel %vm5827_vm11, %v20484_v32, %v11090_v20  ;;  %v23654_v32 = vld [vmem:[#allocation118_spill] sm:$0xff]  ;;  %v11107_v48 = vpack.c.b16 %v23657_v60, %v23656_v4  ;;  %v11597_v3 = vld [vmem:[#allocation3 + $0x24] sm:$0x1]  ;;  %v11551_v4 = vld [vmem:[#allocation3 + $0x28] sm:$0x1] }
 0x3e8   : > { %14672 = vmatprep.mubr.msk.bf16.mxu1 %vm6083_vm1, %v6057_v5  ;;  %14869 = vmatpush3.bf16.msra.mxu1 %v20174_v1  ;;  %v13870_v27 = vld.sshfl [vmem:[#allocation2 + $0xc8] sm:$0x1 pattern:$0x75316420]  ;;  %v6058_v56 = vpack.c.b16 %v6050_v57, %v6036_v7  ;;  %v10880_v1 = vsel %vm5839_vm15, %v10879_v15, %v10878_v19  ;;  %v11092_v0 = vsel %vm5830_vm12, %v20508_v62, %v11091_v50  ;;  %v23659_v5 = vld [vmem:[#allocation156_spill] sm:$0xff]  ;;  %v23662_v7 = vld [vmem:[#allocation105_spill] sm:$0xff] }
 0x3e9   : > { %14870 = vmatprep.subr.bf16.mxu1 %v15180_v38  ;;  %14840 = vmatprep.mubr.msk.bf16.mxu0 %vm6083_vm1, %v10887_v36  ;;  %v2284_v52 = vrot.slane %v13870_v27, %v23440_v29  ;;  %v10888_v58 = vpack.c.b16 %v10880_v1, %v6050_v57  ;;  %v11093_v61 = vsel %vm5833_vm13, %v10863_v35, %v11092_v0  ;;  %v23669_v19 = vld [vmem:[#allocation179_spill] sm:$0xff]  ;;  %v23670_v54 = vld [vmem:[#allocation190_spill] sm:$0xff]  ;;  %v11539_v1 = vld [vmem:[#allocation3 + $0x8] sm:$0x1] }
 0x3ea   : > { %v13897_v46 = vld.sshfl [vmem:[#allocation2 + $0x1a0] sm:$0x1 pattern:$0x75316420]  ;;  %v11106_v8 = vpack.c.b16 %v23655_v59, %v23654_v32  ;;  %v11094_v62 = vsel %vm5836_vm14, %v10865_v51, %v11093_v61  ;;  %v23660_v51 = vld [vmem:[#allocation55_spill] sm:$0xff]  ;;  %v11109_v30 = vpack.c.b16 %v23662_v7, %v23661_v41  ;;  %v11099_v11 = vsel %vm5827_vm11, %v20648_v49, %v11098_v42  ;;  %v23666_v49 = vld [vmem:[#allocation120_spill] sm:$0xff] }
 0x3eb   : > { %v11065_v28 = vrot.slane %v2284_v52, %v23440_v29  ;;  %v2842_v14 = vrot.slane %v13897_v46, %v23440_v29  ;;  %v11100_v16 = vsel %vm5830_vm12, %v20679_v6, %v11099_v11  ;;  %v11111_v21 = vpack.c.b16 %v23668_v43, %v23667_v39  ;;  %v15183_v57 = vld [vmem:[#allocation9 + $0x40] sm:$0xff]   ;;  %v11594_v27 = vld [vmem:[#allocation3 + $0x1c] sm:$0x1]  ;;  %v11588_v52 = vld [vmem:[#allocation3 + $0xc] sm:$0x1] }
 0x3ec   : > { %14871 = vmatpush3.bf16.msra.mxu1 %v15180_v38  ;;  %v23665_v38 = vld [vmem:[#allocation38_spill] sm:$0xff]  ;;  %v11595_v20 = vsel %vm20813_vm5, 0, %v11594_v27  ;;  %v15186_v0 = vld [vmem:[#allocation9 + $0x48] sm:$0xff]   ;;  %v11560_v33 = vld [vmem:[#allocation3 + $0x40] sm:$0x1]  ;;  %vm11844_vm11 = vcmask 1043456  }
 0x3ed   : > { %14872 = vmatprep.subr.bf16.mxu1 %v15181_v25  ;;  %v11072_v44 = vrot.slane %v11065_v28, %v23440_v29  ;;  %v11079_v2 = vrot.slane %v2842_v14, %v23440_v29  ;;  %v11110_v12 = vpack.c.b16 %v23666_v49, %v23665_v38  ;;  %v11540_v28 = vsel %vm20806_vm3, 0, %v11539_v1  ;;  %11596 = vst [vmem:[#allocation3 + $0x1c] sm:$0x1] %v11595_v20  ;;  %v15187_v46 = vld [vmem:[#allocation9 + $0x8] sm:$0xff]   ;;  %v11557_v61 = vld [vmem:[#allocation3 + $0x38] sm:$0x1]  ;;  %vm20924_vm9 = vmor %vm11982_vm2, %vm11983_vm6 }
 0x3ee   : > { %11541 = vst [vmem:[#allocation3 + $0x8] sm:$0x1] %v11540_v28  ;;  %v11606_v32 = vld [vmem:[#allocation3 + $0x3c] sm:$0x1]  ;;  %v11558_v59 = vsel %vm20806_vm3, 0, %v11557_v61  ;;  %v15188_v14 = vld [vmem:[#allocation9 + $0x208] sm:$0xff]   ;;  %vm20981_vm12 = vmand %vm11844_vm11, %vm605_vm4 }
 0x3ef   : > { %14673 = vmatmul.mubr.msk.bf16.gmra.mrb[4].mxu1 %vm6083_vm1, %v6058_v56  ;;  %14841 = vmatmul.mubr.msk.bf16.gmra.mrb[12].mxu0 %vm6083_vm1, %v10888_v58  ;;  %v11087_v55 = vunpack.c.l.b16 %v11072_v44  ;;  %v11086_v40 = vrot.slane %v11079_v2, %v23440_v29  ;;  %v11101_v29 = vsel %vm5833_vm13, %v10877_v10, %v11100_v16  ;;  %v23671_v10 = vld [vmem:[#allocation124_spill] sm:$0xff]  ;;  %v11548_v58 = vld [vmem:[#allocation3 + $0x20] sm:$0x1]  ;;  %v11598_v44 = vsel %vm20813_vm5, 0, %v11597_v3  ;;  %11559 = vst [vmem:[#allocation3 + $0x38] sm:$0x1] %v11558_v59 }
 0x3f0   : > { %14876 = vmatprep.mubr.msk.bf16.mxu1 %vm6083_vm1, %v23653_v13  ;;  %14873 = vmatpush3.bf16.msra.mxu1 %v15181_v25  ;;  %v11102_v6 = vsel %vm5836_vm14, %v10879_v15, %v11101_v29  ;;  %v15185_v15 = vld [vmem:[#allocation9 + $0x200] sm:$0xff]   ;;  %v11545_v25 = vld [vmem:[#allocation3 + $0x18] sm:$0x1]  ;;  %v11549_v37 = vsel %vm20806_vm3, 0, %v11548_v58  ;;  %v11591_v13 = vld [vmem:[#allocation3 + $0x14] sm:$0x1] }
 0x3f1   : > { %14874 = vmatprep.subr.bf16.mxu1 %v15182_v47  ;;  %14852 = vmatprep.mubr.msk.bf16.mxu0 %vm6083_vm1, %v11105_v23  ;;  %v11095_v26 = vrot.slane %v11087_v55, 1  ;;  %v11088_v34 = vunpack.c.l.b16 %v11086_v40  ;;  %v11546_v56 = vsel %vm20806_vm3, 0, %v11545_v25  ;;  %v11542_v23 = vld [vmem:[#allocation3 + $0x10] sm:$0x1]  ;;  %11550 = vst [vmem:[#allocation3 + $0x20] sm:$0x1] %v11549_v37 }
 0x3f2   : > { %14892 = vmatprep.subr.bf16.mxu0 %v15185_v15  ;;  %11547 = vst [vmem:[#allocation3 + $0x18] sm:$0x1] %v11546_v56  ;;  %v11543_v50 = vsel %vm20806_vm3, 0, %v11542_v23  ;;  %11599 = vst [vmem:[#allocation3 + $0x24] sm:$0x1] %v11598_v44  ;;  %v11592_v55 = vsel %vm20813_vm5, 0, %v11591_v13 }
 0x3f3   : > { %v11096_v35 = vsel %vm5839_vm15, %v11095_v26, %v11094_v62  ;;  %v11103_v36 = vrot.slane %v11088_v34, 1  ;;  %11544 = vst [vmem:[#allocation3 + $0x10] sm:$0x1] %v11543_v50  ;;  %11593 = vst [vmem:[#allocation3 + $0x14] sm:$0x1] %v11592_v55  ;;  %v15190_v62 = vld [vmem:[#allocation9 + $0x10] sm:$0xff]  }
 0x3f4   : > { %14875 = vmatpush3.bf16.msra.mxu1 %v15182_v47  ;;  %v11108_v53 = vpack.c.b16 %v11096_v35, %v23660_v51  ;;  %v11589_v47 = vsel %vm20813_vm5, 0, %v11588_v52  ;;  %v11600_v60 = vld [vmem:[#allocation3 + $0x2c] sm:$0x1]  ;;  %v11609_v35 = vld [vmem:[#allocation3 + $0x44] sm:$0x1]  ;;  %v15192_v2 = vld [vmem:[#allocation9 + $0x58] sm:$0xff]  }
 0x3f5   : > { %v11104_v45 = vsel %vm5839_vm15, %v11103_v36, %v11102_v6  ;;  %14380 = vmatprep.subr.bf16.mxu1 %v15183_v57  ;;  %11590 = vst [vmem:[#allocation3 + $0xc] sm:$0x1] %v11589_v47  ;;  %v11601_v26 = vsel %vm20813_vm5, 0, %v11600_v60  ;;  %v11561_v42 = vsel %vm20806_vm3, 0, %v11560_v33  ;;  %v11610_v51 = vsel %vm20813_vm5, 0, %v11609_v35  ;;  %v15194_v11 = vld [vmem:[#allocation9 + $0x218] sm:$0xff]  }
 0x3f6   : > { %v11112_v18 = vpack.c.b16 %v11104_v45, %v23671_v10  ;;  %11602 = vst [vmem:[#allocation3 + $0x2c] sm:$0x1] %v11601_v26  ;;  %11562 = vst [vmem:[#allocation3 + $0x40] sm:$0x1] %v11561_v42  ;;  %v11603_v7 = vld [vmem:[#allocation3 + $0x34] sm:$0x1] }
 0x3f7   : > { %14877 = vmatmul.mubr.msk.bf16.vlgmr.msra.gmra.mrb[8].mxu1 %vm6083_vm1, %v23658_v9  ;;  %14853 = vmatmul.mubr.msk.bf16.vlgmr.msra.gmra.mrb[0].mxu0 %vm6083_vm1, %v11106_v8  ;;  %v11607_v8 = vsel %vm20813_vm5, 0, %v11606_v32  ;;  %v15189_v9 = vld [vmem:[#allocation9 + $0x50] sm:$0xff]   ;;  %11611 = vst [vmem:[#allocation3 + $0x44] sm:$0x1] %v11610_v51  ;;  %v11604_v40 = vsel %vm20813_vm5, 0, %v11603_v7  ;;  %v15197_v16 = vld [vmem:[#allocation9 + $0x220] sm:$0xff]  }
 0x3f8   : > { %14880 = vmatprep.mubr.msk.bf16.mxu1 %vm6083_vm1, %v23659_v5  ;;  %14856 = vmatprep.mubr.msk.bf16.mxu0 %vm6083_vm1, %v11107_v48  ;;  %11608 = vst [vmem:[#allocation3 + $0x3c] sm:$0x1] %v11607_v8  ;;  %v11552_v48 = vsel %vm20806_vm3, 0, %v11551_v4  ;;  %v15191_v5 = vld [vmem:[#allocation9 + $0x210] sm:$0xff]   ;;  %11605 = vst [vmem:[#allocation3 + $0x34] sm:$0x1] %v11604_v40 }
 0x3f9   : > { %14381 = vmatpush3.bf16.msra.mxu1 %v15184_v17  ;;  %14893 = vmatpush3.bf16.msra.mxu0 %v15185_v15  ;;  %11553 = vst [vmem:[#allocation3 + $0x28] sm:$0x1] %v11552_v48  ;;  %v11569_v34 = vld [vmem:[#allocation3 + $0x68] sm:$0x1]  ;;  %v11618_v29 = vld [vmem:[#allocation3 + $0x6c] sm:$0x1] }
 0x3fa   : > { %14382 = vmatprep.subr.bf16.mxu1 %v15186_v0  ;;  %14894 = vmatprep.subr.bf16.mxu0 %v15188_v14  ;;  %v11570_v38 = vsel %vm20806_vm3, 0, %v11569_v34  ;;  %v11619_v49 = vsel %vm20813_vm5, 0, %v11618_v29  ;;  %v11612_v39 = vld [vmem:[#allocation3 + $0x5c] sm:$0x1]  ;;  %v11572_v36 = vld [vmem:[#allocation3 + $0x70] sm:$0x1] }
 0x3fb   : > { %11571 = vst [vmem:[#allocation3 + $0x68] sm:$0x1] %v11570_v38  ;;  %11620 = vst [vmem:[#allocation3 + $0x6c] sm:$0x1] %v11619_v49  ;;  %v11621_v6 = vld [vmem:[#allocation3 + $0x74] sm:$0x1] }
 0x3fc   : > { %v15199_v45 = vld [vmem:[#allocation9 + $0x28] sm:$0xff]   ;;  %v11622_v10 = vsel %vm20813_vm5, 0, %v11621_v6  ;;  %v11615_v57 = vld [vmem:[#allocation3 + $0x64] sm:$0x1]  ;;  %v15201_v1 = vld [vmem:[#allocation9 + $0x70] sm:$0xff]  }
 0x3fd   : > { %14383 = vmatpush3.bf16.msra.mxu1 %v15187_v46  ;;  %14895 = vmatpush3.bf16.msra.mxu0 %v15188_v14  ;;  %11623 = vst [vmem:[#allocation3 + $0x74] sm:$0x1] %v11622_v10  ;;  %v11616_v15 = vsel %vm20813_vm5, 0, %v11615_v57  ;;  %v15200_v25 = vld [vmem:[#allocation9 + $0x228] sm:$0xff]   ;;  %v11575_v28 = vld [vmem:[#allocation3 + $0x78] sm:$0x1] }
 0x3fe   : > { %14384 = vmatprep.subr.bf16.mxu1 %v15189_v9  ;;  %14896 = vmatprep.subr.bf16.mxu0 %v15191_v5  ;;  %11617 = vst [vmem:[#allocation3 + $0x64] sm:$0x1] %v11616_v15  ;;  %v11581_v27 = vld [vmem:[#allocation3 + $0x88] sm:$0x1]  ;;  %v11630_v56 = vld [vmem:[#allocation3 + $0x8c] sm:$0x1] }
 0x3ff   : > { %14881 = vmatmul.mubr.msk.bf16.gmra.mrb[12].mxu1 %vm6083_vm1, %v23663_v22  ;;  %14857 = vmatmul.mubr.msk.bf16.gmra.mrb[4].mxu0 %vm6083_vm1, %v11108_v53  ;;  %v11554_v53 = vld [vmem:[#allocation3 + $0x30] sm:$0x1]  ;;  %v15195_v22 = vld [vmem:[#allocation9 + $0x60] sm:$0xff]   ;;  %v11582_v52 = vsel %vm20806_vm3, 0, %v11581_v27  ;;  %v11631_v20 = vsel %vm20813_vm5, 0, %v11630_v56  ;;  %v11576_v58 = vsel %vm20806_vm3, 0, %v11575_v28 }
 0x400   : > { %14884 = vmatprep.mubr.msk.bf16.mxu1 %vm6083_vm1, %v23664_v63  ;;  %14860 = vmatprep.mubr.msk.bf16.mxu0 %vm6083_vm1, %v11109_v30  ;;  %v11555_v41 = vsel %vm20806_vm3, 0, %v11554_v53  ;;  %v15193_v30 = vld [vmem:[#allocation9 + $0x18] sm:$0xff]   ;;  %v15196_v63 = vld [vmem:[#allocation9 + $0x20] sm:$0xff]   ;;  %11583 = vst [vmem:[#allocation3 + $0x88] sm:$0x1] %v11582_v52  ;;  %v15202_v3 = vld [vmem:[#allocation9 + $0x30] sm:$0xff]  }
 0x401   : > { %14385 = vmatpush3.bf16.msra.mxu1 %v15190_v62  ;;  %11556 = vst [vmem:[#allocation3 + $0x30] sm:$0x1] %v11555_v41  ;;  %14897 = vmatpush3.bf16.msra.mxu0 %v15191_v5  ;;  %11632 = vst [vmem:[#allocation3 + $0x8c] sm:$0x1] %v11631_v20  ;;  %v11624_v47 = vld [vmem:[#allocation3 + $0x7c] sm:$0x1] }
 0x402   : > { %14386 = vmatprep.subr.bf16.mxu1 %v15192_v2  ;;  %14898 = vmatprep.subr.bf16.mxu0 %v15194_v11  ;;  %v11625_v37 = vsel %vm20813_vm5, 0, %v11624_v47  ;;  %v15203_v23 = vld [vmem:[#allocation9 + $0x230] sm:$0xff]   ;;  %11577 = vst [vmem:[#allocation3 + $0x78] sm:$0x1] %v11576_v58  ;;  %v15204_v44 = vld [vmem:[#allocation9 + $0x78] sm:$0xff]   ;;  %v15207_v60 = vld [vmem:[#allocation9 + $0xc0] sm:$0xff]  }
 0x403   : > { %11626 = vst [vmem:[#allocation3 + $0x7c] sm:$0x1] %v11625_v37  ;;  %v11584_v50 = vld [vmem:[#allocation3 + $0x90] sm:$0x1]  ;;  %v11633_v13 = vld [vmem:[#allocation3 + $0x94] sm:$0x1] }
 0x404   : > { %v11585_v0 = vsel %vm20806_vm3, 0, %v11584_v50  ;;  %v11634_v55 = vsel %vm20813_vm5, 0, %v11633_v13  ;;  %v11578_v46 = vld [vmem:[#allocation3 + $0x80] sm:$0x1]  ;;  %v11627_v61 = vld [vmem:[#allocation3 + $0x84] sm:$0x1] }
 0x405   : > { %14387 = vmatpush3.bf16.msra.mxu1 %v15193_v30  ;;  %14899 = vmatpush3.bf16.msra.mxu0 %v15194_v11  ;;  %11586 = vst [vmem:[#allocation3 + $0x90] sm:$0x1] %v11585_v0  ;;  %11635 = vst [vmem:[#allocation3 + $0x94] sm:$0x1] %v11634_v55  ;;  %v11579_v32 = vsel %vm20806_vm3, 0, %v11578_v46  ;;  %v11628_v59 = vsel %vm20813_vm5, 0, %v11627_v61 }
 0x406   : > { %14388 = vmatprep.subr.bf16.mxu1 %v15195_v22  ;;  %14900 = vmatprep.subr.bf16.mxu0 %v15197_v16  ;;  %11580 = vst [vmem:[#allocation3 + $0x80] sm:$0x1] %v11579_v32  ;;  %11629 = vst [vmem:[#allocation3 + $0x84] sm:$0x1] %v11628_v59  ;;  %v15205_v8 = vld [vmem:[#allocation9 + $0x38] sm:$0xff]  }
 0x407   : > { %14885 = vmatmul.mubr.msk.bf16.gmra.mrb[16].mxu1 %vm6083_vm1, %v23669_v19  ;;  %14861 = vmatmul.mubr.msk.bf16.gmra.mrb[8].mxu0 %vm6083_vm1, %v11110_v12  ;;  %v11563_v12 = vld [vmem:[#allocation3 + $0x58] sm:$0x1]  ;;  %v11573_v19 = vsel %vm20806_vm3, 0, %v11572_v36  ;;  %v20887_v62 = vld [vmem:[#allocation3] sm:$0xf] }
 0x408   : > { %14888 = vmatprep.mubr.msk.bf16.mxu1 %vm6083_vm1, %v23670_v54  ;;  %14864 = vmatprep.mubr.msk.bf16.mxu0 %vm6083_vm1, %v11111_v21  ;;  %v11564_v43 = vsel %vm20806_vm3, 0, %v11563_v12  ;;  %v11613_v21 = vsel %vm20813_vm5, 0, %v11612_v39  ;;  %v15198_v54 = vld [vmem:[#allocation9 + $0x68] sm:$0xff]   ;;  %11574 = vst [vmem:[#allocation3 + $0x70] sm:$0x1] %v11573_v19  ;;  %v15206_v4 = vld [vmem:[#allocation9 + $0x238] sm:$0xff]  }
 0x409   : > { %14389 = vmatpush3.bf16.msra.mxu1 %v15196_v63  ;;  %14901 = vmatpush3.bf16.msra.mxu0 %v15197_v16  ;;  %11565 = vst [vmem:[#allocation3 + $0x58] sm:$0x1] %v11564_v43  ;;  %11614 = vst [vmem:[#allocation3 + $0x5c] sm:$0x1] %v11613_v21  ;;  %v11986_v5 = vshrl.u32 %v20887_v62, 16  ;;  %v11989_v33 = vshll.u32 %v20887_v62, 16 }
 0x40a   : > { %14390 = vmatprep.subr.bf16.mxu1 %v15198_v54  ;;  %14902 = vmatprep.subr.bf16.mxu0 %v15200_v25  ;;  %v11960_v40 = vld [vmem:[#allocation3 + $0x48] sm:$0xf]  ;;  %v11943_v63 = vld [vmem:[#allocation3 + $0x4] sm:$0x1]  ;;  %v11961_v49 = vld [vmem:[#allocation3 + $0x4c] sm:$0x1] }
 0x40b   : > { %v11988_v7 = vrot.slane %v11986_v5, 4  ;;  %v11991_v30 = vrot.slane %v11989_v33, 5  ;;  %v12349_v16 = vshrl.u32 %v11960_v40, 16  ;;  %v12352_v34 = vshll.u32 %v11960_v40, 16  ;;  %v20903_v12 = vld [vmem:[#allocation3 + $0x54] sm:$0x1] }
 0x40c   : > { %v11995_v38 = vshll.u32 %v11943_v63, 16  ;;  %v12107_v43 = vshll.u32 %v20903_v12, 16  ;;  %v20906_v21 = vld [vmem:[#allocation3 + $0x98] sm:$0xf]  ;;  %v11981_v36 = vld [vmem:[#allocation3 + $0x9c] sm:$0x1] }
 0x40d   : > { %14391 = vmatpush3.bf16.msra.mxu1 %v15199_v45  ;;  %14903 = vmatpush3.bf16.msra.mxu0 %v15200_v25  ;;  %v11992_v29 = vor.u32 %v11991_v30, %v11988_v7  ;;  %v20911_v19 = vld [vmem:[%s22030_s2] ss:$0 sm:$0xff]  ;;  %v12351_v6 = vrot.slane %v12349_v16, 4  ;;  %v12354_v54 = vrot.slane %v12352_v34, 5  ;;  %v12246_v57 = vrot.slane %v11943_v63, 5 }
 0x40e   : > { %14392 = vmatprep.subr.bf16.mxu1 %v15201_v1  ;;  %14904 = vmatprep.subr.bf16.mxu0 %v15203_v23  ;;  %v20916_v45 = vld [vmem:[%s22031_s3] ss:$0 sm:$0xff]  ;;  %v14104_v25 = vrot.slane %v11960_v40, 9  ;;  %v12382_v27 = vrot.slane %v11961_v49, 5  ;;  %v14105_v56 = vrot.slane %v20906_v21, 9  ;;  %v12386_v1 = vrot.slane %v11981_v36, 5 }
 0x40f   : > { %14889 = vmatmul.mubr.msk.bf16.gmra.mrb[20].mxu1 %vm6083_vm1, %v19837_v31  ;;  %14865 = vmatmul.mubr.msk.bf16.gmra.mrb[12].mxu0 %vm6083_vm1, %v11112_v18  ;;  %v11566_v18 = vld [vmem:[#allocation3 + $0x60] sm:$0x1]  ;;  %v20889_v31 = vld [vmem:[#allocation3 + $0x50] sm:$0xf]  ;;  %v20918_v10 = vrot.slane %v11992_v29, 4  ;;  %v20932_v47 = vrot.slane %v12107_v43, 5 }
 0x410   : > { %v11567_v17 = vsel %vm20806_vm3, 0, %v11566_v18  ;;  %v12098_v42 = vshrl.u32 %v20889_v31, 16  ;;  %v12101_v51 = vshll.u32 %v20889_v31, 16  ;;  %v20920_v18 = vrot.slane %v11995_v38, 5  ;;  %v11852_v5 = vld [vmem:[#allocation3 + $0x10] sm:$0xf] }
 0x411   : > { %11568 = vst [vmem:[#allocation3 + $0x60] sm:$0x1] %v11567_v17  ;;  %14393 = vmatpush3.bf16.msra.mxu1 %v15202_v3  ;;  %14905 = vmatpush3.bf16.msra.mxu0 %v15203_v23  ;;  %v14086_v58 = vrot.slane %v20887_v62, 9  ;;  %v12358_v50 = vshll.u32 %v11961_v49, 16  ;;  %v20952_v59 = vsel %vm20938_vm10, %v14104_v25, %v12382_v27  ;;  %v12363_v38 = vshrl.u32 %v20906_v21, 16 }
 0x412   : > { %14394 = vmatprep.subr.bf16.mxu1 %v15204_v44  ;;  %14906 = vmatprep.subr.bf16.mxu0 %v15206_v4  ;;  %v12100_v11 = vrot.slane %v12098_v42, 4  ;;  %v12103_v22 = vrot.slane %v12101_v51, 5  ;;  %v12355_v44 = vor.u32 %v12354_v54, %v12351_v6  ;;  %v11998_v46 = vsel %vm20924_vm9, %v20918_v10, %v20920_v18  ;;  %v15210_v18 = vld [vmem:[#allocation9 + $0xc8] sm:$0xff]  }
 0x413   : > { %v20965_v33 = vsel %vm20938_vm10, %v14086_v58, %v12246_v57  ;;  %v20970_v30 = vrot.slane %v12358_v50, 5  ;;  %v12366_v49 = vshll.u32 %v20906_v21, 16  ;;  %v11858_v57 = vld [vmem:[#allocation3 + $0x18] sm:$0xf]  ;;  %v11846_v58 = vld [vmem:[#allocation3 + $0x8] sm:$0xf] }
 0x414   : > { %v12104_v39 = vor.u32 %v12103_v22, %v12100_v11  ;;  %v20968_v7 = vrot.slane %v12355_v44, 4 }
 0x415   : > { %14395 = vmatpush3.bf16.msra.mxu1 %v15205_v8  ;;  %14907 = vmatpush3.bf16.msra.mxu0 %v15206_v4  ;;  %v20956_v8 = vsel %vm20938_vm10, %v14105_v56, %v12386_v1  ;;  %23681 = vst [vmem:[#allocation191_spill] sm:$0xff] %v20970_v30  ;;  %v15222_v30 = vld [vmem:[#allocation9 + $0xe8] sm:$0xff]  }
 0x416   : > { %14444 = vmatprep.subr.bf16.mxu1 %v15207_v60  ;;  %v20930_v28 = vrot.slane %v12104_v39, 4  ;;  %23680 = vst [vmem:[#allocation194_spill] sm:$0xff] %v20968_v7  ;;  %v15221_v7 = vld [vmem:[#allocation9 + $0xa0] sm:$0xff]  }
 0x4ba   : > { %v20879_v48 = vpop.f32.mrb[0].mxu1 }
 0x4bb   : > { %v20881_v26 = vpop.f32.mrb[1].mxu1 }
 0x4bc   : > { %v20883_v14 = vpop.f32.mrb[2].mxu1 }
 0x4bd   : > { %v20885_v9 = vpop.f32.mrb[3].mxu1 }
 0x4c2   : > { %v20893_v35 = vpop.f32.mrb[4].mxu1 }
 0x4c3   : > { %v20895_v2 = vpop.f32.mrb[5].mxu1 }
 0x4c4   : > { %v20899_v53 = vpop.f32.mrb[6].mxu1 }
 0x4c5   : > { %v20901_v41 = vpop.f32.mrb[7].mxu1 }
 0x4ca   : > { %v14854_v17 = vpop.f32.mrb[0].mxu0 }
 0x4cb   : > { %v11283_v52 = vmul.f32 %v14854_v17, %v20911_v19  ;;  %v11195_v20 = vpop.f32.mrb[1].mxu0  ;;  %v11861_v17 = vld [vmem:[#allocation3 + $0x1c] sm:$0x1] }
 0x4cc   : > { %v11281_v37 = vmul.f32 %v20911_v19, %v11195_v20  ;;  %v14855_v3 = vpop.f32.mrb[2].mxu0 }
 0x4cd   : > { %v11306_v13 = vadd.f32 %v20916_v45, %v11283_v52  ;;  %v11284_v0 = vmul.f32 %v14855_v3, %v20911_v19  ;;  %v11198_v55 = vpop.f32.mrb[3].mxu0 }
 0x4ce   : > { %v11304_v61 = vadd.f32 %v20916_v45, %v11281_v37  ;;  %v11282_v32 = vmul.f32 %v20911_v19, %v11198_v55  ;;  %v11849_v55 = vld [vmem:[#allocation3 + $0xc] sm:$0x1] }
 0x4cf   : > { %v11322_v4 = vmax.f32 %v11306_v13, 0.0  ;;  %v11307_v60 = vadd.f32 %v20916_v45, %v11284_v0 }
 0x4d0   : > { %v11320_v42 = vmax.f32 %v11304_v61, 0.0  ;;  %v11305_v51 = vadd.f32 %v20916_v45, %v11282_v32 }
 0x4d1   : > { %v14244_v40 = vpack.c.bf16 %v11322_v4, %v11322_v4  ;;  %v11323_v11 = vmax.f32 %v11307_v60, 0.0 }
 0x4d2   : > { %v14242_v16 = vpack.c.bf16 %v11320_v42, %v11320_v42  ;;  %v11321_v34 = vmax.f32 %v11305_v51, 0.0  ;;  %v14858_v29 = vpop.f32.mrb[4].mxu0 }
 0x4d3   : > { %v11701_v39 = vshrl.u32 %v14244_v40, 16  ;;  %v11704_v43 = vshll.u32 %v14244_v40, 16  ;;  %v14245_v36 = vpack.c.bf16 %v11323_v11, %v11323_v11  ;;  %v11287_v6 = vmul.f32 %v14858_v29, %v20911_v19  ;;  %v11211_v54 = vpop.f32.mrb[5].mxu0  ;;  %v11864_v40 = vld [vmem:[#allocation3 + $0x20] sm:$0xf] }
 0x4d4   : > { %v11685_v25 = vshrl.u32 %v14242_v16, 16  ;;  %v11688_v27 = vshll.u32 %v14242_v16, 16  ;;  %v14243_v56 = vpack.c.bf16 %v11321_v34, %v11321_v34  ;;  %v11285_v1 = vmul.f32 %v20911_v19, %v11211_v54  ;;  %v14859_v52 = vpop.f32.mrb[6].mxu0  ;;  %v11867_v29 = vld [vmem:[#allocation3 + $0x24] sm:$0x1] }
 0x4d5   : > { %v11703_v20 = vrot.slane %v11701_v39, 7  ;;  %v11709_v37 = vshrl.u32 %v14245_v36, 16  ;;  %v11712_v3 = vshll.u32 %v14245_v36, 16  ;;  %v11310_v44 = vadd.f32 %v20916_v45, %v11287_v6  ;;  %v11214_v50 = vpop.f32.mrb[7].mxu0 }
 0x4d6   : > { %v11687_v0 = vrot.slane %v11685_v25, 7  ;;  %v11693_v61 = vshrl.u32 %v14243_v56, 16  ;;  %v11696_v32 = vshll.u32 %v14243_v56, 16  ;;  %v11308_v4 = vadd.f32 %v20916_v45, %v11285_v1  ;;  %v11855_v1 = vld [vmem:[#allocation3 + $0x14] sm:$0x1] }
 0x4d7   : > { %v11706_v60 = vor.u32 %v11704_v43, %v11703_v20  ;;  %v11707_v42 = vrot.slane %v11703_v20, 4  ;;  %v11711_v51 = vrot.slane %v11709_v37, 7  ;;  %v11326_v11 = vmax.f32 %v11310_v44, 0.0 }
 0x4d8   : > { %v11690_v16 = vor.u32 %v11688_v27, %v11687_v0  ;;  %v11691_v34 = vrot.slane %v11687_v0, 4  ;;  %v11695_v39 = vrot.slane %v11693_v61, 7  ;;  %v11324_v36 = vmax.f32 %v11308_v4, 0.0 }
 0x4d9   : > { %v11859_v6 = vsel %vm20981_vm12, %v11706_v60, %v11858_v57  ;;  %v11862_v54 = vsel %vm20806_vm3, %v11707_v42, %v11861_v17  ;;  %v11714_v25 = vor.u32 %v11712_v3, %v11711_v51  ;;  %v11715_v56 = vrot.slane %v11711_v51, 4 }
 0x4da   : > { %11860 = vst [vmem:[#allocation3 + $0x18] sm:$0xf] %v11859_v6  ;;  %11863 = vst [vmem:[#allocation3 + $0x1c] sm:$0x1] %v11862_v54  ;;  %v11847_v43 = vsel %vm20981_vm12, %v11690_v16, %v11846_v58  ;;  %v11850_v27 = vsel %vm20806_vm3, %v11691_v34, %v11849_v55  ;;  %v11698_v20 = vor.u32 %v11696_v32, %v11695_v39  ;;  %v11699_v37 = vrot.slane %v11695_v39, 4  ;;  %v14862_v44 = vpop.f32.mrb[8].mxu0 }
 0x4db   : > { %11848 = vst [vmem:[#allocation3 + $0x8] sm:$0xf] %v11847_v43  ;;  %11851 = vst [vmem:[#allocation3 + $0xc] sm:$0x1] %v11850_v27  ;;  %v11865_v57 = vsel %vm20981_vm12, %v11714_v25, %v11864_v40  ;;  %v11868_v17 = vsel %vm20806_vm3, %v11715_v56, %v11867_v29  ;;  %v14248_v3 = vpack.c.bf16 %v11326_v11, %v11326_v11  ;;  %v11227_v61 = vpop.f32.mrb[9].mxu0 }
 0x4dc   : > { %v14246_v0 = vpack.c.bf16 %v11324_v36, %v11324_v36  ;;  %11866 = vst [vmem:[#allocation3 + $0x20] sm:$0xf] %v11865_v57  ;;  %11869 = vst [vmem:[#allocation3 + $0x24] sm:$0x1] %v11868_v17  ;;  %v11853_v58 = vsel %vm20981_vm12, %v11698_v20, %v11852_v5  ;;  %v11856_v55 = vsel %vm20806_vm3, %v11699_v37, %v11855_v1  ;;  %v14863_v60 = vpop.f32.mrb[10].mxu0 }
 0x4dd   : > { %v11288_v32 = vmul.f32 %v14859_v52, %v20911_v19  ;;  %v11286_v4 = vmul.f32 %v20911_v19, %v11214_v50  ;;  %11854 = vst [vmem:[#allocation3 + $0x10] sm:$0xf] %v11853_v58  ;;  %11857 = vst [vmem:[#allocation3 + $0x14] sm:$0x1] %v11856_v55  ;;  %v11733_v42 = vshrl.u32 %v14248_v3, 16  ;;  %v11736_v51 = vshll.u32 %v14248_v3, 16 }
 0x4de   : > { %v11717_v40 = vshrl.u32 %v14246_v0, 16  ;;  %v11720_v11 = vshll.u32 %v14246_v0, 16  ;;  %v11230_v16 = vpop.f32.mrb[11].mxu0  ;;  %v14932_v5 = vadd.f32 %v14862_v44, %v20879_v48  ;;  %v14933_v39 = vadd.f32 %v11227_v61, %v20881_v26  ;;  %v11882_v52 = vld [vmem:[#allocation3 + $0x38] sm:$0xf] }
 0x4df   : > { %v11311_v34 = vadd.f32 %v20916_v45, %v11288_v32  ;;  %v11309_v29 = vadd.f32 %v20916_v45, %v11286_v4  ;;  %v11735_v36 = vrot.slane %v11733_v42, 7  ;;  %v11885_v6 = vld [vmem:[#allocation3 + $0x3c] sm:$0x1]  ;;  %v14934_v54 = vadd.f32 %v14863_v60, %v20883_v14  ;;  %v11870_v56 = vld [vmem:[#allocation3 + $0x28] sm:$0xf] }
 0x4e0   : > { %v11719_v50 = vrot.slane %v11717_v40, 7  ;;  %v14935_v25 = vadd.f32 %v11230_v16, %v20885_v9  ;;  %v11873_v1 = vld [vmem:[#allocation3 + $0x2c] sm:$0x1]  ;;  %v11291_v20 = vmul.f32 %v14932_v5, %v20911_v19  ;;  %v11289_v37 = vmul.f32 %v14933_v39, %v20911_v19 }
 0x4e1   : > { %v11327_v43 = vmax.f32 %v11311_v34, 0.0  ;;  %v11325_v27 = vmax.f32 %v11309_v29, 0.0  ;;  %v11738_v57 = vor.u32 %v11736_v51, %v11735_v36  ;;  %v11739_v48 = vrot.slane %v11735_v36, 4 }
 0x4e2   : > { %v11722_v44 = vor.u32 %v11720_v11, %v11719_v50  ;;  %v11723_v26 = vrot.slane %v11719_v50, 4  ;;  %v11314_v0 = vadd.f32 %v20916_v45, %v11291_v20  ;;  %v11312_v14 = vadd.f32 %v20916_v45, %v11289_v37  ;;  %v14866_v61 = vpop.f32.mrb[12].mxu0 }
 0x4e3   : > { %v14249_v17 = vpack.c.bf16 %v11327_v43, %v11327_v43  ;;  %v14247_v3 = vpack.c.bf16 %v11325_v27, %v11325_v27  ;;  %v11883_v9 = vsel %vm20981_vm12, %v11738_v57, %v11882_v52  ;;  %v11886_v58 = vsel %vm20806_vm3, %v11739_v48, %v11885_v6  ;;  %v11243_v4 = vpop.f32.mrb[13].mxu0  ;;  %v11888_v52 = vld [vmem:[#allocation3 + $0x40] sm:$0xf]  ;;  %v11876_v43 = vld [vmem:[#allocation3 + $0x30] sm:$0xf] }
 0x4e4   : > { %v11871_v55 = vsel %vm20981_vm12, %v11722_v44, %v11870_v56  ;;  %v11874_v32 = vsel %vm20806_vm3, %v11723_v26, %v11873_v1  ;;  %11884 = vst [vmem:[#allocation3 + $0x38] sm:$0xf] %v11883_v9  ;;  %11887 = vst [vmem:[#allocation3 + $0x3c] sm:$0x1] %v11886_v58  ;;  %v14867_v11 = vpop.f32.mrb[14].mxu0  ;;  %v11330_v16 = vmax.f32 %v11314_v0, 0.0  ;;  %v11292_v29 = vmul.f32 %v14934_v54, %v20911_v19 }
 0x4e5   : > { %11872 = vst [vmem:[#allocation3 + $0x28] sm:$0xf] %v11871_v55  ;;  %11875 = vst [vmem:[#allocation3 + $0x2c] sm:$0x1] %v11874_v32  ;;  %v11741_v60 = vshrl.u32 %v14249_v17, 16  ;;  %v11744_v42 = vshll.u32 %v14249_v17, 16  ;;  %v11290_v5 = vmul.f32 %v14935_v25, %v20911_v19  ;;  %v14936_v50 = vadd.f32 %v14866_v61, %v20893_v35 }
 0x4e6   : > { %v11725_v51 = vshrl.u32 %v14247_v3, 16  ;;  %v11728_v40 = vshll.u32 %v14247_v3, 16  ;;  %v11328_v34 = vmax.f32 %v11312_v14, 0.0  ;;  %v11246_v39 = vpop.f32.mrb[15].mxu0  ;;  %v14937_v56 = vadd.f32 %v11243_v4, %v20895_v2  ;;  %v11891_v1 = vld [vmem:[#allocation3 + $0x44] sm:$0x1] }
 0x4e7   : > { %v11743_v36 = vrot.slane %v11741_v60, 7  ;;  %v11879_v27 = vld [vmem:[#allocation3 + $0x34] sm:$0x1]  ;;  %v14252_v20 = vpack.c.bf16 %v11330_v16, %v11330_v16  ;;  %v11315_v57 = vadd.f32 %v20916_v45, %v11292_v29  ;;  %v11313_v48 = vadd.f32 %v20916_v45, %v11290_v5  ;;  %v11906_v55 = vld [vmem:[#allocation3 + $0x68] sm:$0xf] }
 0x4e8   : > { %v11727_v6 = vrot.slane %v11725_v51, 7  ;;  %v14250_v37 = vpack.c.bf16 %v11328_v34, %v11328_v34  ;;  %v11894_v51 = vld [vmem:[#allocation3 + $0x58] sm:$0xf]  ;;  %v11295_v16 = vmul.f32 %v14936_v50, %v20911_v19  ;;  %v11293_v34 = vmul.f32 %v14937_v56, %v20911_v19 }
 0x4e9   : > { %v11746_v54 = vor.u32 %v11744_v42, %v11743_v36  ;;  %v11747_v44 = vrot.slane %v11743_v36, 4  ;;  %v11765_v17 = vshrl.u32 %v14252_v20, 16  ;;  %v11768_v3 = vshll.u32 %v14252_v20, 16  ;;  %v11909_v42 = vld [vmem:[#allocation3 + $0x6c] sm:$0x1] }
 0x4ea   : > { %v11730_v25 = vor.u32 %v11728_v40, %v11727_v6  ;;  %v11731_v26 = vrot.slane %v11727_v6, 4  ;;  %v11749_v0 = vshrl.u32 %v14250_v37, 16  ;;  %v11752_v14 = vshll.u32 %v14250_v37, 16  ;;  %v11897_v40 = vld [vmem:[#allocation3 + $0x5c] sm:$0x1] }
 0x4eb   : > { %v11889_v35 = vsel %vm20981_vm12, %v11746_v54, %v11888_v52  ;;  %v11892_v2 = vsel %vm20806_vm3, %v11747_v44, %v11891_v1  ;;  %v11767_v58 = vrot.slane %v11765_v17, 7  ;;  %v11331_v4 = vmax.f32 %v11315_v57, 0.0 }
 0x4ec   : > { %v11877_v61 = vsel %vm20981_vm12, %v11730_v25, %v11876_v43  ;;  %v11880_v9 = vsel %vm20806_vm3, %v11731_v26, %v11879_v27  ;;  %11890 = vst [vmem:[#allocation3 + $0x40] sm:$0xf] %v11889_v35  ;;  %11893 = vst [vmem:[#allocation3 + $0x44] sm:$0x1] %v11892_v2  ;;  %v11751_v32 = vrot.slane %v11749_v0, 7  ;;  %v11329_v60 = vmax.f32 %v11313_v48, 0.0 }
 0x4ed   : > { %11878 = vst [vmem:[#allocation3 + $0x30] sm:$0xf] %v11877_v61  ;;  %11881 = vst [vmem:[#allocation3 + $0x34] sm:$0x1] %v11880_v9  ;;  %v14938_v29 = vadd.f32 %v14867_v11, %v20899_v53  ;;  %v14939_v5 = vadd.f32 %v11246_v39, %v20901_v41  ;;  %v11770_v36 = vor.u32 %v11768_v3, %v11767_v58  ;;  %v11771_v52 = vrot.slane %v11767_v58, 4 }
 0x4ee   : > { %v11754_v6 = vor.u32 %v11752_v14, %v11751_v32  ;;  %v11755_v1 = vrot.slane %v11751_v32, 4  ;;  %v14253_v43 = vpack.c.bf16 %v11331_v4, %v11331_v4  ;;  %v14251_v27 = vpack.c.bf16 %v11329_v60, %v11329_v60  ;;  %v21050_v11 = vld [vmem:[#allocation3 + $0x10] sm:$0xf]  ;;  %v21052_v39 = vld [vmem:[#allocation3 + $0x14] sm:$0x1] }
 0x4ef   : > { %v11318_v20 = vadd.f32 %v20916_v45, %v11295_v16  ;;  %v11316_v37 = vadd.f32 %v20916_v45, %v11293_v34  ;;  %v11907_v57 = vsel %vm20981_vm12, %v11770_v36, %v11906_v55  ;;  %v11910_v50 = vsel %vm20806_vm3, %v11771_v52, %v11909_v42  ;;  %v11912_v14 = vld [vmem:[#allocation3 + $0x70] sm:$0xf]  ;;  %v11915_v9 = vld [vmem:[#allocation3 + $0x74] sm:$0x1]  ;;  %v11900_v58 = vld [vmem:[#allocation3 + $0x60] sm:$0xf] }
 0x4f0   : > { %v11895_v53 = vsel %vm20981_vm12, %v11754_v6, %v11894_v51  ;;  %v11898_v41 = vsel %vm20806_vm3, %v11755_v1, %v11897_v40  ;;  %11908 = vst [vmem:[#allocation3 + $0x68] sm:$0xf] %v11907_v57  ;;  %11911 = vst [vmem:[#allocation3 + $0x6c] sm:$0x1] %v11910_v50  ;;  %v11773_v56 = vshrl.u32 %v14253_v43, 16  ;;  %v11776_v48 = vshll.u32 %v14253_v43, 16 }
 0x4f1   : > { %11896 = vst [vmem:[#allocation3 + $0x58] sm:$0xf] %v11895_v53  ;;  %11899 = vst [vmem:[#allocation3 + $0x5c] sm:$0x1] %v11898_v41  ;;  %v11757_v54 = vshrl.u32 %v14251_v27, 16  ;;  %v11760_v44 = vshll.u32 %v14251_v27, 16  ;;  %v11296_v17 = vmul.f32 %v14938_v29, %v20911_v19  ;;  %v11294_v3 = vmul.f32 %v14939_v5, %v20911_v19 }
 0x4f2   : > { %v11334_v25 = vmax.f32 %v11318_v20, 0.0  ;;  %v11332_v26 = vmax.f32 %v11316_v37, 0.0  ;;  %v11775_v0 = vrot.slane %v11773_v56, 7  ;;  %v14088_v2 = vrot.slane %v21050_v11, 9  ;;  %v11903_v55 = vld [vmem:[#allocation3 + $0x64] sm:$0x1] }
 0x4f3   : > { %v11759_v35 = vrot.slane %v11757_v54, 7  ;;  %v12254_v61 = vrot.slane %v21052_v39, 5  ;;  %v11319_v60 = vadd.f32 %v20916_v45, %v11296_v17  ;;  %v11317_v42 = vadd.f32 %v20916_v45, %v11294_v3  ;;  %v21060_v34 = vld [vmem:[#allocation3 + $0x18] sm:$0xf]  ;;  %v21062_v29 = vld [vmem:[#allocation3 + $0x1c] sm:$0x1] }
 0x4f4   : > { %v14256_v32 = vpack.c.bf16 %v11334_v25, %v11334_v25  ;;  %v14254_v4 = vpack.c.bf16 %v11332_v26, %v11332_v26  ;;  %v11778_v51 = vor.u32 %v11776_v48, %v11775_v0  ;;  %v11779_v40 = vrot.slane %v11775_v0, 4  ;;  %v21064_v1 = vld [vmem:[#allocation3 + $0x8] sm:$0xf]  ;;  %v11933_v57 = vld [vmem:[#allocation3 + $0x8c] sm:$0x1] }
 0x4f5   : > { %v11762_v16 = vor.u32 %v11760_v44, %v11759_v35  ;;  %v11763_v19 = vrot.slane %v11759_v35, 4  ;;  %v11930_v37 = vld [vmem:[#allocation3 + $0x88] sm:$0xf]  ;;  %v11918_v41 = vld [vmem:[#allocation3 + $0x78] sm:$0xf]  ;;  %v11335_v56 = vmax.f32 %v11319_v60, 0.0 }
 0x4f6   : > { %v11797_v5 = vshrl.u32 %v14256_v32, 16  ;;  %v11800_v36 = vshll.u32 %v14256_v32, 16  ;;  %v11781_v52 = vshrl.u32 %v14254_v4, 16  ;;  %v11784_v6 = vshll.u32 %v14254_v4, 16  ;;  %v11921_v54 = vld [vmem:[#allocation3 + $0x7c] sm:$0x1] }
 0x4f7   : > { %v11913_v43 = vsel %vm20981_vm12, %v11778_v51, %v11912_v14  ;;  %v11916_v45 = vsel %vm20806_vm3, %v11779_v40, %v11915_v9  ;;  %v11901_v27 = vsel %vm20981_vm12, %v11762_v16, %v11900_v58  ;;  %v11904_v20 = vsel %vm20806_vm3, %v11763_v19, %v11903_v55  ;;  %v21085_v32 = vld [vmem:[#allocation3 + $0xc] sm:$0x1]  ;;  %v11936_v16 = vld [vmem:[#allocation3 + $0x90] sm:$0xf]  ;;  %v11939_v19 = vld [vmem:[#allocation3 + $0x94] sm:$0x1] }
 0x4f8   : > { %11914 = vst [vmem:[#allocation3 + $0x70] sm:$0xf] %v11913_v43  ;;  %11917 = vst [vmem:[#allocation3 + $0x74] sm:$0x1] %v11916_v45  ;;  %v11799_v50 = vrot.slane %v11797_v5, 7  ;;  %v11783_v53 = vrot.slane %v11781_v52, 7  ;;  %v14257_v9 = vpack.c.bf16 %v11335_v56, %v11335_v56  ;;  %v21083_v55 = vsel %vm20938_vm10, %v14088_v2, %v12254_v61 }
 0x4f9   : > { %11902 = vst [vmem:[#allocation3 + $0x60] sm:$0xf] %v11901_v27  ;;  %11905 = vst [vmem:[#allocation3 + $0x64] sm:$0x1] %v11904_v20  ;;  %v11333_v48 = vmax.f32 %v11317_v42, 0.0  ;;  %v14089_v44 = vrot.slane %v21060_v34, 9 }
 0x4fa   : > { %v12258_v25 = vrot.slane %v21062_v29, 5  ;;  %v12000_v26 = vshrl.u32 %v21064_v1, 16  ;;  %v21079_v17 = vrot.slane %v12363_v38, 4  ;;  %v11802_v3 = vor.u32 %v11800_v36, %v11799_v50  ;;  %v11924_v27 = vld [vmem:[#allocation3 + $0x80] sm:$0xf] }
 0x4fb   : > { %v11803_v0 = vrot.slane %v11799_v50, 4  ;;  %v11786_v14 = vor.u32 %v11784_v6, %v11783_v53  ;;  %v11787_v35 = vrot.slane %v11783_v53, 4  ;;  %v14255_v58 = vpack.c.bf16 %v11333_v48, %v11333_v48 }
 0x4fc   : > { %23684 = vst [vmem:[#allocation192_spill] sm:$0xff] %v21079_v17  ;;  %v21089_v4 = vrot.slane %v12366_v49, 5  ;;  %v11931_v38 = vsel %vm20981_vm12, %v11802_v3, %v11930_v37  ;;  %v11805_v2 = vshrl.u32 %v14257_v9, 16  ;;  %v21101_v49 = vsel %vm20938_vm10, %v14089_v44, %v12258_v25  ;;  %v11927_v37 = vld [vmem:[#allocation3 + $0x84] sm:$0x1] }
 0x4fd   : > { %v11934_v60 = vsel %vm20806_vm3, %v11803_v0, %v11933_v57  ;;  %v11919_v42 = vsel %vm20981_vm12, %v11786_v14, %v11918_v41  ;;  %v11922_v51 = vsel %vm20806_vm3, %v11787_v35, %v11921_v54  ;;  %11932 = vst [vmem:[#allocation3 + $0x88] sm:$0xf] %v11931_v38  ;;  %v11789_v21 = vshrl.u32 %v14255_v58, 16  ;;  %v21113_v25 = vld [vmem:[#allocation3 + $0x20] sm:$0xf] }
 0x4fe   : > { %23685 = vst [vmem:[#allocation201_spill] sm:$0xff] %v21089_v4  ;;  %11935 = vst [vmem:[#allocation3 + $0x8c] sm:$0x1] %v11934_v60  ;;  %v12002_v61 = vrot.slane %v12000_v26, 4  ;;  %v11808_v40 = vshll.u32 %v14257_v9, 16  ;;  %v21105_v5 = vcombine.low %v21083_v55, %v21101_v49  ;;  %v12003_v36 = vshll.u32 %v21064_v1, 16 }
 0x4ff   : > { %11920 = vst [vmem:[#allocation3 + $0x78] sm:$0xf] %v11919_v42  ;;  %11923 = vst [vmem:[#allocation3 + $0x7c] sm:$0x1] %v11922_v51  ;;  %v12009_v52 = vshll.u32 %v21085_v32, 16  ;;  %v11807_v6 = vrot.slane %v11805_v2, 7 }
 0x500   : > { %23686 = vst [vmem:[#allocation193_spill] sm:$0xff] %v21105_v5  ;;  %v11791_v43 = vrot.slane %v11789_v21, 7  ;;  %v11792_v45 = vshll.u32 %v14255_v58, 16  ;;  %v12014_v20 = vshrl.u32 %v21050_v11, 16  ;;  %14908 = vmatprep.mubr.bf16.mxu0 %v21105_v5  ;;  %v12005_v57 = vrot.slane %v12003_v36, 5 }
 0x501   : > { %v12011_v50 = vrot.slane %v12009_v52, 5  ;;  %v12017_v53 = vshll.u32 %v21050_v11, 16  ;;  %v12023_v41 = vshll.u32 %v21052_v39, 16  ;;  %v11810_v56 = vor.u32 %v11808_v40, %v11807_v6  ;;  %v21115_v26 = vld [vmem:[#allocation3 + $0x24] sm:$0x1] }
 0x502   : > { %v11811_v48 = vrot.slane %v11807_v6, 4  ;;  %v11794_v54 = vor.u32 %v11792_v45, %v11791_v43  ;;  %v11795_v44 = vrot.slane %v11791_v43, 4  ;;  %v12006_v3 = vor.u32 %v12005_v57, %v12002_v61  ;;  %v21117_v9 = vld [vmem:[#allocation3 + $0x28] sm:$0xf]  ;;  %v21127_v42 = vld [vmem:[#allocation3 + $0x2c] sm:$0x1] }
 0x503   : > { %v12016_v0 = vrot.slane %v12014_v20, 4  ;;  %v12019_v14 = vrot.slane %v12017_v53, 5  ;;  %v12025_v35 = vrot.slane %v12023_v41, 5  ;;  %v11937_v58 = vsel %vm20981_vm12, %v11810_v56, %v11936_v16  ;;  %v21131_v40 = vld [vmem:[#allocation3 + $0x30] sm:$0xf]  ;;  %v15209_v57 = vld [vmem:[#allocation9 + $0x80] sm:$0xff]  }
 0x504   : > { %v11940_v39 = vsel %vm20806_vm3, %v11811_v48, %v11939_v19  ;;  %v11925_v38 = vsel %vm20981_vm12, %v11794_v54, %v11924_v27  ;;  %v11928_v60 = vsel %vm20806_vm3, %v11795_v44, %v11927_v37  ;;  %11938 = vst [vmem:[#allocation3 + $0x90] sm:$0xf] %v11937_v58  ;;  %v12007_v51 = vrot.slane %v12006_v3, 4  ;;  %v21133_v16 = vld [vmem:[#allocation3 + $0x38] sm:$0xf]  ;;  %v15212_v58 = vld [vmem:[#allocation9 + $0x88] sm:$0xff]  }
 0x505   : > { %11941 = vst [vmem:[#allocation3 + $0x94] sm:$0x1] %v11940_v39  ;;  %11926 = vst [vmem:[#allocation3 + $0x80] sm:$0xf] %v11925_v38  ;;  %v12020_v2 = vor.u32 %v12019_v14, %v12016_v0  ;;  %v12028_v21 = vshrl.u32 %v21060_v34, 16  ;;  %v12031_v61 = vshll.u32 %v21060_v34, 16  ;;  %v14106_v37 = vcombine.low %v20887_v62, %v21064_v1 }
 0x506   : > { %11929 = vst [vmem:[#allocation3 + $0x84] sm:$0x1] %v11928_v60  ;;  %v12037_v13 = vshll.u32 %v21062_v29, 16  ;;  %v14090_v24 = vrot.slane %v21113_v25, 9  ;;  %v12262_v19 = vrot.slane %v21115_v26, 5  ;;  %v14091_v36 = vrot.slane %v21117_v9, 9 }
 0x507   : > { %v21139_v52 = vld [vmem:[#allocation3 + $0x34] sm:$0x1]  ;;  %v21143_v6 = vsel %vm20924_vm9, %v12007_v51, %v12011_v50  ;;  %v12021_v43 = vrot.slane %v12020_v2, 4  ;;  %v12030_v45 = vrot.slane %v12028_v21, 4  ;;  %v12033_v27 = vrot.slane %v12031_v61, 5 }
 0x508   : > { %23687 = vst [vmem:[#allocation200_spill] sm:$0xff] %v21143_v6  ;;  %v21145_v20 = vld [vmem:[#allocation3 + $0x3c] sm:$0x1]  ;;  %v14114_v29 = vcombine.low %v11998_v46, %v21143_v6  ;;  %v21157_v50 = vsel %vm20938_vm10, %v14090_v24, %v12262_v19  ;;  %v12266_v53 = vrot.slane %v21127_v42, 5  ;;  %v14092_v48 = vrot.slane %v21131_v40, 9  ;;  %v15213_v61 = vld [vmem:[#allocation9 + $0xd0] sm:$0xff]  }
 0x509   : > { %v21162_v41 = vsel %vm20924_vm9, %v12021_v43, %v12025_v35  ;;  %v12034_v56 = vor.u32 %v12033_v27, %v12030_v45  ;;  %v12270_v10 = vrot.slane %v21139_v52, 5  ;;  %v14093_v54 = vrot.slane %v21133_v16, 9  ;;  %v21182_v39 = vld [vmem:[#allocation3 + $0x40] sm:$0xf]  ;;  %v21191_v21 = vld [vmem:[#allocation3 + $0x44] sm:$0x1] }
 0x50a   : > { %23688 = vst [vmem:[#allocation203_spill] sm:$0xff] %v21162_v41  ;;  %13164 = vmatprep.mubr.bf16.mxu1 %v14114_v29  ;;  %v21170_v46 = vsel %vm20938_vm10, %v14091_v36, %v12266_v53  ;;  %v12274_v44 = vrot.slane %v21145_v20, 5  ;;  %v12039_v0 = vrot.slane %v12037_v13, 5  ;;  %v12042_v60 = vshrl.u32 %v21113_v25, 16  ;;  %23690 = vst [vmem:[#allocation215_spill] sm:$0xff] %v21191_v21 }
 0x50b   : > { %13165 = vmatmul.mubr.bf16.vlgmr.msra.gmra.mrb[24].mxu1 %v14106_v37  ;;  %v12035_v3 = vrot.slane %v12034_v56, 4  ;;  %v21176_v14 = vcombine.low %v21157_v50, %v21170_v46  ;;  %v21180_v35 = vsel %vm20938_vm10, %v14092_v48, %v12270_v10  ;;  %v12045_v51 = vshll.u32 %v21113_v25, 16  ;;  %v21204_v43 = vld [vmem:[#allocation3 + $0x60] sm:$0xf]  ;;  %v21218_v53 = vld [vmem:[#allocation3 + $0x6c] sm:$0x1] }
 0x50c   : > { %14445 = vmatpush3.bf16.msra.mxu1 %v15209_v57  ;;  %v21186_v38 = vsel %vm20938_vm10, %v14093_v54, %v12274_v44  ;;  %v12051_v2 = vshll.u32 %v21115_v26, 16  ;;  %v12056_v19 = vshrl.u32 %v21117_v9, 16  ;;  %v12059_v36 = vshll.u32 %v21117_v9, 16  ;;  %v21206_v26 = vld [vmem:[#allocation3 + $0x64] sm:$0x1] }
 0x50d   : > { %23689 = vst [vmem:[#allocation208_spill] sm:$0xff] %v21176_v14  ;;  %v21195_v13 = vsel %vm20924_vm9, %v12035_v3, %v12039_v0  ;;  %14909 = vmatmul.mubr.bf16.vlgmr.msra.gmra.mrb[16].mxu0 %v21176_v14  ;;  %v21200_v24 = vcombine.low %v21180_v35, %v21186_v38  ;;  %14446 = vmatprep.subr.bf16.mxu1 %v15210_v18  ;;  %v12044_v29 = vrot.slane %v12042_v60, 4  ;;  %v12047_v37 = vrot.slane %v12045_v51, 5  ;;  %v21216_v57 = vld [vmem:[#allocation3 + $0x68] sm:$0xf]  ;;  %v15215_v60 = vld [vmem:[#allocation9 + $0x90] sm:$0xff]  }
 0x50e   : > { %v21210_v45 = vcombine.low %v21162_v41, %v21195_v13  ;;  %v21214_v27 = vcombine.low %v21050_v11, %v21060_v34  ;;  %v12058_v56 = vrot.slane %v12056_v19, 4  ;;  %v12061_v48 = vrot.slane %v12059_v36, 5  ;;  %v21287_v14 = vld [vmem:[#allocation3 + $0x8c] sm:$0x1] }
 0x50f   : > { %23691 = vst [vmem:[#allocation213_spill] sm:$0xff] %v21200_v24  ;;  %14912 = vmatprep.mubr.bf16.mxu0 %v21200_v24  ;;  %v12065_v10 = vshll.u32 %v21127_v42, 16  ;;  %v14102_v18 = vrot.slane %v21182_v39, 9  ;;  %v12048_v54 = vor.u32 %v12047_v37, %v12044_v29  ;;  %v12342_v44 = vrot.slane %v21191_v21, 5  ;;  %v15216_v42 = vld [vmem:[#allocation9 + $0xd8] sm:$0xff]  }
 0x510   : > { %23692 = vst [vmem:[#allocation209_spill] sm:$0xff] %v21210_v45  ;;  %23693 = vst [vmem:[#allocation217_spill] sm:$0xff] %v21214_v27  ;;  %13172 = vmatprep.mubr.bf16.mxu1 %v21210_v45  ;;  %14447 = vmatpush3.bf16.msra.mxu1 %v15212_v58  ;;  %v14096_v3 = vrot.slane %v21204_v43, 9  ;;  %v12286_v0 = vrot.slane %v21206_v26, 5  ;;  %v12053_v51 = vrot.slane %v12051_v2, 5  ;;  %v12062_v62 = vor.u32 %v12061_v48, %v12058_v56  ;;  %v15218_v37 = vld [vmem:[#allocation9 + $0x98] sm:$0xff]  }
 0x511   : > { %v14097_v19 = vrot.slane %v21216_v57, 9  ;;  %v12290_v36 = vrot.slane %v21218_v53, 5  ;;  %14448 = vmatprep.subr.bf16.mxu1 %v15213_v61  ;;  %v12049_v22 = vrot.slane %v12048_v54, 4  ;;  %v12067_v63 = vrot.slane %v12065_v10, 5  ;;  %v21245_v10 = vld [vmem:[#allocation3 + $0x70] sm:$0xf] }
 0x512   : > { %v21231_v58 = vsel %vm20938_vm10, %v14102_v18, %v12342_v44  ;;  %v21235_v29 = vsel %vm20938_vm10, %v14096_v3, %v12286_v0  ;;  %v12063_v2 = vrot.slane %v12062_v62, 4  ;;  %v12070_v48 = vshrl.u32 %v21131_v40, 16  ;;  %v21247_v18 = vld [vmem:[#allocation3 + $0x74] sm:$0x1]  ;;  %v21259_v3 = vld [vmem:[#allocation3 + $0x78] sm:$0xf] }
 0x513   : > { %23694 = vst [vmem:[#allocation223_spill] sm:$0xff] %v21235_v29  ;;  %13173 = vmatmul.mubr.bf16.gmra.mrb[28].mxu1 %v21214_v27  ;;  %v14158_v56 = vcombine.low %v21231_v58, %v20952_v59  ;;  %v21242_v61 = vsel %vm20938_vm10, %v14097_v19, %v12290_v36  ;;  %v21251_v54 = vsel %vm20924_vm9, %v12049_v22, %v12053_v51  ;;  %v12073_v59 = vshll.u32 %v21131_v40, 16  ;;  %v21261_v0 = vld [vmem:[#allocation3 + $0x7c] sm:$0x1]  ;;  %v21269_v27 = vld [vmem:[#allocation3 + $0x88] sm:$0xf] }
 0x514   : > { %23695 = vst [vmem:[#allocation218_spill] sm:$0xff] %v21242_v61  ;;  %v21255_v62 = vcombine.low %v21235_v29, %v21242_v61  ;;  %14449 = vmatpush3.bf16.msra.mxu1 %v15215_v60  ;;  %v12079_v44 = vshll.u32 %v21139_v52, 16  ;;  %v21265_v19 = vsel %vm20924_vm9, %v12063_v2, %v12067_v63  ;;  %v12072_v22 = vrot.slane %v12070_v48, 4  ;;  %v15219_v60 = vld [vmem:[#allocation9 + $0xe0] sm:$0xff]   ;;  %v21298_v29 = vld [vmem:[#allocation3 + $0x58] sm:$0xf] }
 0x515   : > { %14913 = vmatmul.mubr.bf16.gmra.mrb[20].mxu0 %v14158_v56  ;;  %v12084_v51 = vshrl.u32 %v21133_v16, 16  ;;  %v12087_v36 = vshll.u32 %v21133_v16, 16  ;;  %14450 = vmatprep.subr.bf16.mxu1 %v15216_v42  ;;  %v21273_v52 = vcombine.low %v21251_v54, %v21265_v19  ;;  %v21278_v63 = vcombine.low %v21113_v25, %v21117_v9  ;;  %v21281_v48 = vld [vmem:[#allocation3 + $0x80] sm:$0xf]  ;;  %v21283_v45 = vld [vmem:[#allocation3 + $0x84] sm:$0x1] }
 0x516   : > { %23696 = vst [vmem:[#allocation219_spill] sm:$0xff] %v21255_v62  ;;  %14916 = vmatprep.mubr.bf16.mxu0 %v21255_v62  ;;  %v12075_v2 = vrot.slane %v12073_v59, 5  ;;  %v12093_v56 = vshll.u32 %v21145_v20, 16  ;;  %v14098_v6 = vrot.slane %v21245_v10, 9  ;;  %v12294_v24 = vrot.slane %v21247_v18, 5 }
 0x517   : > { %23697 = vst [vmem:[#allocation227_spill] sm:$0xff] %v21273_v52  ;;  %23698 = vst [vmem:[#allocation226_spill] sm:$0xff] %v21278_v63  ;;  %v12086_v41 = vrot.slane %v12084_v51, 4  ;;  %v12089_v42 = vrot.slane %v12087_v36, 5  ;;  %13180 = vmatprep.mubr.bf16.mxu1 %v21273_v52  ;;  %v12081_v5 = vrot.slane %v12079_v44, 5  ;;  %v14099_v59 = vrot.slane %v21259_v3, 9 }
 0x518   : > { %v12076_v62 = vor.u32 %v12075_v2, %v12072_v22  ;;  %v12298_v20 = vrot.slane %v21261_v0, 5  ;;  %14451 = vmatpush3.bf16.msra.mxu1 %v15218_v37  ;;  %v21294_v51 = vsel %vm20938_vm10, %v14098_v6, %v12294_v24  ;;  %v14100_v36 = vrot.slane %v21281_v48, 9  ;;  %v21300_v22 = vld [vmem:[#allocation3 + $0x5c] sm:$0x1]  ;;  %v21308_v6 = vld [vmem:[#allocation3 + $0x90] sm:$0xf] }
 0x519   : > { %v12090_v21 = vor.u32 %v12089_v42, %v12086_v41  ;;  %v12302_v61 = vrot.slane %v21283_v45, 5  ;;  %14452 = vmatprep.subr.bf16.mxu1 %v15219_v60  ;;  %v14101_v41 = vrot.slane %v21269_v27, 9  ;;  %v12306_v2 = vrot.slane %v21287_v14, 5  ;;  %v21319_v60 = vld [vmem:[#allocation3 + $0x94] sm:$0x1] }
 0x51a   : > { %v12077_v44 = vrot.slane %v12076_v62, 4  ;;  %v21304_v37 = vsel %vm20938_vm10, %v14099_v59, %v12298_v20  ;;  %v12095_v42 = vrot.slane %v12093_v56, 5  ;;  %23702 = vst [vmem:[#allocation122_spill] sm:$0xff] %v21319_v60  ;;  %v12115_v56 = vshll.u32 %v21298_v29, 16 }
 0x51b   : > { %23699 = vst [vmem:[#allocation220_spill] sm:$0xff] %v21304_v37  ;;  %13181 = vmatmul.mubr.bf16.gmra.mrb[32].mxu1 %v21278_v63  ;;  %v12091_v24 = vrot.slane %v12090_v21, 4  ;;  %v21313_v52 = vcombine.low %v21294_v51, %v21304_v37  ;;  %v21317_v62 = vsel %vm20938_vm10, %v14100_v36, %v12302_v61  ;;  %v21327_v20 = vsel %vm20938_vm10, %v14101_v41, %v12306_v2  ;;  %v15224_v63 = vld [vmem:[#allocation9 + $0xa8] sm:$0xff]   ;;  %v15225_v41 = vld [vmem:[#allocation9 + $0xf0] sm:$0xff]   ;;  %v23720_v23 = vld [vmem:[#allocation218_spill] sm:$0xff] }
 0x51c   : > { %23701 = vst [vmem:[#allocation119_spill] sm:$0xff] %v21317_v62  ;;  %v21323_v59 = vsel %vm20924_vm9, %v12077_v44, %v12081_v5  ;;  %23703 = vst [vmem:[#allocation207_spill] sm:$0xff] %v21327_v20  ;;  %v12112_v21 = vshrl.u32 %v21298_v29, 16  ;;  %14453 = vmatpush3.bf16.msra.mxu1 %v15221_v7  ;;  %v21338_v5 = vcombine.low %v21317_v62, %v21327_v20  ;;  %v12121_v36 = vshll.u32 %v21300_v22, 16 }
 0x51d   : > { %23700 = vst [vmem:[#allocation20_spill] sm:$0xff] %v21313_v52  ;;  %v21333_v61 = vsel %vm20924_vm9, %v12091_v24, %v12095_v42  ;;  %14917 = vmatmul.mubr.bf16.gmra.mrb[24].mxu0 %v21313_v52  ;;  %v14103_v44 = vrot.slane %v21308_v6, 9  ;;  %14454 = vmatprep.subr.bf16.mxu1 %v15222_v30  ;;  %v12117_v37 = vrot.slane %v12115_v56, 5  ;;  %v12346_v24 = vrot.slane %v21319_v60, 5 }
 0x51e   : > { %23704 = vst [vmem:[#allocation125_spill] sm:$0xff] %v21333_v61  ;;  %23705 = vst [vmem:[#allocation126_spill] sm:$0xff] %v21338_v5  ;;  %v21344_v7 = vcombine.low %v21323_v59, %v21333_v61  ;;  %v12114_v2 = vrot.slane %v12112_v21, 4  ;;  %14920 = vmatprep.mubr.bf16.mxu0 %v21338_v5  ;;  %v12126_v42 = vshrl.u32 %v21204_v43, 16  ;;  %v12129_v52 = vshll.u32 %v21204_v43, 16 }
 0x51f   : > { %v23707_v20 = vrot.slane %v20903_v12, 5  ;;  %v23708_v62 = vrot.slane %v20889_v31, 9  ;;  %v21363_v5 = vsel %vm20938_vm10, %v14103_v44, %v12346_v24  ;;  %v12135_v61 = vshll.u32 %v21206_v26, 16  ;;  %v15227_v31 = vld [vmem:[#allocation9 + $0xb0] sm:$0xff]  }
 0x520   : > { %23706 = vst [vmem:[#allocation133_spill] sm:$0xff] %v21344_v7  ;;  %13188 = vmatprep.mubr.bf16.mxu1 %v21344_v7  ;;  %v12118_v56 = vor.u32 %v12117_v37, %v12114_v2  ;;  %23709 = vst [vmem:[#allocation228_spill] sm:$0xff] %v21363_v5  ;;  %v12140_v12 = vshrl.u32 %v21216_v57, 16  ;;  %14455 = vmatpush3.bf16.msra.mxu1 %v15224_v63  ;;  %v12131_v60 = vrot.slane %v12129_v52, 5  ;;  %v12143_v21 = vshll.u32 %v21216_v57, 16  ;;  %v15228_v37 = vld [vmem:[#allocation9 + $0xf8] sm:$0xff]  }
 0x521   : > { %v21356_v30 = vsel %vm20938_vm10, %v23708_v62, %v23707_v20  ;;  %v21369_v62 = vcombine.low %v21131_v40, %v21133_v16  ;;  %v12128_v20 = vrot.slane %v12126_v42, 4  ;;  %14456 = vmatprep.subr.bf16.mxu1 %v15225_v41  ;;  %v12123_v7 = vrot.slane %v12121_v36, 5  ;;  %v15230_v36 = vld [vmem:[#allocation9 + $0xb8] sm:$0xff]  }
 0x522   : > { %v12119_v2 = vrot.slane %v12118_v56, 4  ;;  %v12142_v44 = vrot.slane %v12140_v12, 4  ;;  %v12149_v24 = vshll.u32 %v21218_v53, 16  ;;  %v14159_v26 = vcombine.low %v21363_v5, %v20956_v8  ;;  %v21382_v56 = vld [vmem:[#allocation3 + $0x9c] sm:$0x1] }
 0x523   : > { %23710 = vst [vmem:[#allocation134_spill] sm:$0xff] %v21369_v62  ;;  %13189 = vmatmul.mubr.bf16.gmra.mrb[36].mxu1 %v21369_v62  ;;  %v12132_v63 = vor.u32 %v12131_v60, %v12128_v20  ;;  %v12145_v17 = vrot.slane %v12143_v21, 5  ;;  %v12154_v4 = vshrl.u32 %v21245_v10, 16  ;;  %v12137_v41 = vrot.slane %v12135_v61, 5  ;;  %23711 = vst [vmem:[#allocation137_spill] sm:$0xff] %v21382_v56  ;;  %v15232_v61 = vld [vmem:[#allocation9 + $0x140] sm:$0xff]  }
 0x524   : > { %v21379_v52 = vsel %vm20924_vm9, %v12119_v2, %v12123_v7  ;;  %v12157_v42 = vshll.u32 %v21245_v10, 16  ;;  %14457 = vmatpush3.bf16.msra.mxu1 %v15227_v31  ;;  %v23712_v8 = vsel %vm20924_vm9, %v20930_v28, %v20932_v47  ;;  %v12151_v20 = vrot.slane %v12149_v24, 5 }
 0x525   : > { %v14118_v60 = vcombine.low %v23712_v8, %v21379_v52  ;;  %14921 = vmatmul.mubr.bf16.gmra.mrb[28].mxu0 %v14159_v26  ;;  %v12133_v21 = vrot.slane %v12132_v63, 4  ;;  %v12146_v7 = vor.u32 %v12145_v17, %v12142_v44  ;;  %v12156_v12 = vrot.slane %v12154_v4, 4  ;;  %14458 = vmatprep.subr.bf16.mxu1 %v15228_v37  ;;  %v15276_v26 = vld [vmem:[#allocation3 + $0x50] sm:$0xf] }
 0x526   : > { %v12159_v31 = vrot.slane %v12157_v42, 5  ;;  %v12168_v2 = vshrl.u32 %v21259_v3, 16  ;;  %v12171_v62 = vshll.u32 %v21259_v3, 16  ;;  %v12163_v28 = vshll.u32 %v21247_v18, 16 }
 0x527   : > { %13196 = vmatprep.mubr.bf16.mxu1 %v14118_v60  ;;  %v21395_v53 = vsel %vm20924_vm9, %v12133_v21, %v12137_v41  ;;  %v12147_v56 = vrot.slane %v12146_v7, 4  ;;  %v12177_v47 = vshll.u32 %v21261_v0, 16  ;;  %v12182_v44 = vshrl.u32 %v21281_v48, 16 }
 0x528   : > { %v12160_v17 = vor.u32 %v12159_v31, %v12156_v12  ;;  %v12170_v4 = vrot.slane %v12168_v2, 4  ;;  %v12173_v37 = vrot.slane %v12171_v62, 5  ;;  %14459 = vmatpush3.bf16.msra.mxu1 %v15230_v36  ;;  %v12250_v24 = vrot.slane %v21085_v32, 5 }
 0x529   : > { %v14110_v63 = vcombine.low %v15276_v26, %v21298_v29  ;;  %v21404_v41 = vsel %vm20924_vm9, %v12147_v56, %v12151_v20  ;;  %v12185_v42 = vshll.u32 %v21281_v48, 16  ;;  %14508 = vmatprep.subr.bf16.mxu1 %v15232_v61  ;;  %v12184_v62 = vrot.slane %v12182_v44, 4 }
 0x52a   : > { %v21409_v18 = vcombine.low %v21395_v53, %v21404_v41  ;;  %v12174_v0 = vor.u32 %v12173_v37, %v12170_v4  ;;  %v12191_v36 = vshll.u32 %v21283_v45, 16  ;;  %v12161_v32 = vrot.slane %v12160_v17, 4  ;;  %v23725_v45 = vld [vmem:[#allocation191_spill] sm:$0xff] }
 0x52b   : > { %13197 = vmatmul.mubr.bf16.gmra.mrb[40].mxu1 %v14110_v63  ;;  %v12187_v8 = vrot.slane %v12185_v42, 5  ;;  %v12196_v60 = vshrl.u32 %v21269_v27, 16  ;;  %v12199_v21 = vshll.u32 %v21269_v27, 16  ;;  %v21417_v56 = vcombine.low %v21204_v43, %v21216_v57 }
 0x52c   : > { %23713 = vst [vmem:[#allocation19_spill] sm:$0xff] %v21409_v18  ;;  %13204 = vmatprep.mubr.bf16.mxu1 %v21409_v18  ;;  %v12165_v7 = vrot.slane %v12163_v28, 5  ;;  %v12175_v12 = vrot.slane %v12174_v0, 4  ;;  %v12179_v61 = vrot.slane %v12177_v47, 5  ;;  %v12193_v4 = vrot.slane %v12191_v36, 5  ;;  %v23723_v0 = vld [vmem:[#allocation220_spill] sm:$0xff] }
 0x52d   : > { %23714 = vst [vmem:[#allocation229_spill] sm:$0xff] %v21417_v56  ;;  %v12188_v20 = vor.u32 %v12187_v8, %v12184_v62  ;;  %v12198_v31 = vrot.slane %v12196_v60, 4  ;;  %v12201_v2 = vrot.slane %v12199_v21, 5  ;;  %v14087_v37 = vrot.slane %v21064_v1, 9  ;;  %v23722_v62 = vld [vmem:[#allocation119_spill] sm:$0xff]  ;;  %v23726_v21 = vld [vmem:[#allocation194_spill] sm:$0xff] }
 0x52e   : > { %v21423_v17 = vsel %vm20924_vm9, %v12175_v12, %v12179_v61  ;;  %v21430_v28 = vsel %vm20924_vm9, %v12161_v32, %v12165_v7  ;;  %v12205_v26 = vshll.u32 %v21287_v14, 16  ;;  %v14095_v36 = vrot.slane %v21298_v29, 9 }
 0x52f   : > { %23715 = vst [vmem:[#allocation127_spill] sm:$0xff] %v21423_v17  ;;  %v12189_v47 = vrot.slane %v12188_v20, 4  ;;  %v21437_v42 = vsel %vm20938_vm10, %v14087_v37, %v12250_v24  ;;  %v21446_v32 = vcombine.low %v21430_v28, %v21423_v17  ;;  %v12202_v14 = vor.u32 %v12201_v2, %v12198_v31  ;;  %v23721_v37 = vld [vmem:[#allocation215_spill] sm:$0xff] }
 0x530   : > { %v12282_v60 = vrot.slane %v21300_v22, 5  ;;  %v12207_v61 = vrot.slane %v12205_v26, 5  ;;  %v12309_v22 = vshrl.u32 %v21182_v39, 16  ;;  %v12318_v31 = vshll.u32 %v23721_v37, 16 }
 0x531   : > { %23716 = vst [vmem:[#allocation138_spill] sm:$0xff] %v21446_v32  ;;  %v21471_v2 = vsel %vm20924_vm9, %v12189_v47, %v12193_v4  ;;  %v12312_v4 = vshll.u32 %v21182_v39, 16  ;;  %v23719_v47 = vld [vmem:[#allocation223_spill] sm:$0xff]  ;;  %v12323_v7 = vshrl.u32 %v21308_v6, 16  ;;  %v12361_v26 = vsel %vm20924_vm9, %v23726_v21, %v23725_v45  ;;  %v23730_v21 = vld [vmem:[#allocation137_spill] sm:$0xff] }
 0x532   : > { %v21462_v20 = vsel %vm20938_vm10, %v14095_v36, %v12282_v60  ;;  %23717 = vst [vmem:[#allocation130_spill] sm:$0xff] %v21471_v2  ;;  %v21479_v36 = vpop.f32.mrb[8].mxu1  ;;  %v12203_v60 = vrot.slane %v12202_v14, 4  ;;  %v12311_v14 = vrot.slane %v12309_v22, 4  ;;  %v21507_v22 = vcombine.low %v21245_v10, %v21259_v3 }
 0x533   : > { %13205 = vmatmul.mubr.bf16.gmra.mrb[44].mxu1 %v21417_v56  ;;  %23718 = vst [vmem:[#allocation128_spill] sm:$0xff] %v21479_v36  ;;  %v12314_v24 = vrot.slane %v12312_v4, 5  ;;  %v12326_v44 = vshll.u32 %v21308_v6, 16  ;;  %v12325_v63 = vrot.slane %v12323_v7, 4  ;;  %v23727_v36 = vld [vmem:[#allocation201_spill] sm:$0xff]  ;;  %v23731_v18 = vshll.u32 %v23730_v21, 16 }
 0x534   : > { %13212 = vmatprep.mubr.bf16.mxu1 %v21446_v32  ;;  %v21511_v37 = vsel %vm20924_vm9, %v12203_v60, %v12207_v61  ;;  %v23728_v32 = vld [vmem:[#allocation192_spill] sm:$0xff]  ;;  %v12320_v61 = vrot.slane %v12318_v31, 5  ;;  %v21524_v60 = vpop.f32.mrb[9].mxu1  ;;  %v23733_v7 = vld [vmem:[#allocation125_spill] sm:$0xff] }
 0x535   : > { %v12315_v4 = vor.u32 %v12314_v24, %v12311_v14  ;;  %v21516_v8 = vcombine.low %v21471_v2, %v21511_v37  ;;  %v23729_v56 = vor.u32 %v23727_v36, %v23728_v32  ;;  %v12374_v5 = vrot.slane %v23731_v18, 5  ;;  %v23732_v14 = vld [vmem:[#allocation122_spill] sm:$0xff]  ;;  %v21528_v2 = vpop.f32.mrb[10].mxu1 }
 0x536   : > { %v12328_v24 = vrot.slane %v12326_v44, 5  ;;  %v12332_v17 = vshll.u32 %v23732_v14, 16 }
 0x537   : > { %v12370_v45 = vrot.slane %v23729_v56, 4  ;;  %v12316_v12 = vrot.slane %v12315_v4, 4  ;;  %v21534_v56 = vpop.f32.mrb[11].mxu1 }
 0x538   : > { %v12329_v18 = vor.u32 %v12328_v24, %v12325_v63  ;;  %v21538_v31 = vpop.f32.mrb[12].mxu1  ;;  %v12334_v21 = vrot.slane %v12332_v17, 5 }
 0x539   : > { %v21532_v32 = vsel %vm20924_vm9, %v12316_v12, %v12320_v61  ;;  %v12375_v14 = vsel %vm20924_vm9, %v12370_v45, %v12374_v5  ;;  %v21547_v12 = vcombine.low %v21281_v48, %v21269_v27  ;;  %v21559_v17 = vpop.f32.mrb[13].mxu1  ;;  %v23734_v5 = vcombine.low %v21064_v1, %v21050_v11  ;;  %v15236_v11 = vld [vmem:[#allocation9 + $0x108] sm:$0xff]  }
 0x53a   : > { %v21541_v44 = vcombine.low %v21532_v32, %v12361_v26  ;;  %v12330_v4 = vrot.slane %v12329_v18, 4  ;;  %v21564_v26 = vpop.f32.mrb[14].mxu1  ;;  %v15233_v18 = vld [vmem:[#allocation9 + $0x100] sm:$0xff]   ;;  %v23738_v61 = vcombine.low %v21060_v34, %v21113_v25  ;;  %v23742_v34 = vcombine.low %v21117_v9, %v21131_v40  ;;  %v15242_v25 = vld [vmem:[#allocation9 + $0x118] sm:$0xff]   ;;  %v15248_v9 = vld [vmem:[#allocation9 + $0x128] sm:$0xff]  }
 0x53b   : > { %13213 = vmatmul.mubr.bf16.gmra.mrb[48].mxu1 %v21507_v22  ;;  %23735 = vst [vmem:[#allocation146_spill] sm:$0xff] %v21564_v26  ;;  %v21566_v45 = vpop.f32.mrb[15].mxu1  ;;  %v15239_v26 = vld [vmem:[#allocation9 + $0x110] sm:$0xff]  }
 0x53c   : > { %13220 = vmatprep.mubr.bf16.mxu1 %v21516_v8  ;;  %v21551_v63 = vsel %vm20924_vm9, %v12330_v4, %v12334_v21  ;;  %v21568_v15 = vpop.f32.mrb[16].mxu1  ;;  %v15235_v4 = vld [vmem:[#allocation9 + $0x148] sm:$0xff]   ;;  %v23737_v21 = vcombine.low %v20965_v33, %v21437_v42  ;;  %v15241_v33 = vld [vmem:[#allocation9 + $0x158] sm:$0xff]   ;;  %v15250_v40 = vld [vmem:[#allocation9 + $0x170] sm:$0xff]  }
 0x53d   : > { %v21556_v24 = vcombine.low %v21551_v63, %v12375_v14  ;;  %23736 = vst [vmem:[#allocation148_spill] sm:$0xff] %v21568_v15  ;;  %v21573_v14 = vpop.f32.mrb[17].mxu1 }
 0x53e   : > { %v21578_v1 = vpop.f32.mrb[18].mxu1 }
 0x53f   : > { %23739 = vst [vmem:[#allocation131_spill] sm:$0xff] %v21578_v1  ;;  %v21580_v36 = vpop.f32.mrb[19].mxu1 }
 0x540   : > { %v21582_v15 = vpop.f32.mrb[20].mxu1 }
 0x541   : > { %23740 = vst [vmem:[#allocation135_spill] sm:$0xff] %v21582_v15  ;;  %v23743_v15 = vld [vmem:[#allocation208_spill] sm:$0xff] }
 0x543   : > { %13221 = vmatmul.mubr.bf16.gmra.mrb[52].mxu1 %v21547_v12 }
 0x544   : > { %13261 = vmatprep.mubr.bf16.mxu1 %v23734_v5  ;;  %v15238_v5 = vld [vmem:[#allocation9 + $0x150] sm:$0xff]  }
 0x54b   : > { %13262 = vmatmul.mubr.bf16.vlgmr.msra.gmra.mrb[56].mxu1 %v23737_v21  ;;  %v23741_v21 = vld [vmem:[#allocation193_spill] sm:$0xff] }
 0x54c   : > { %14509 = vmatpush3.bf16.msra.mxu1 %v15233_v18  ;;  %13269 = vmatprep.mubr.bf16.mxu1 %v23738_v61  ;;  %v21585_v18 = vpop.f32.mrb[21].mxu1 }
 0x54d   : > { %14510 = vmatprep.subr.bf16.mxu1 %v15235_v4  ;;  %v21590_v61 = vpop.f32.mrb[22].mxu1  ;;  %v15244_v4 = vld [vmem:[#allocation9 + $0x160] sm:$0xff]  }
 0x54e   : > { %v21592_v1 = vpop.f32.mrb[23].mxu1 }
 0x550   : > { %14511 = vmatpush3.bf16.msra.mxu1 %v15236_v11  ;;  %v15245_v11 = vld [vmem:[#allocation9 + $0x120] sm:$0xff]  }
 0x551   : > { %14512 = vmatprep.subr.bf16.mxu1 %v15238_v5  ;;  %v15247_v5 = vld [vmem:[#allocation9 + $0x168] sm:$0xff]  }
 0x553   : > { %13270 = vmatmul.mubr.bf16.gmra.mrb[60].mxu1 %v23741_v21  ;;  %v23744_v21 = vcombine.low %v21133_v16, %v21182_v39  ;;  %v23747_v16 = vcombine.low %v21356_v30, %v21462_v20  ;;  %v23754_v30 = vcombine.low %v21437_v42, %v21083_v55  ;;  %v23759_v55 = vcombine.low %v21195_v13, %v21251_v54  ;;  %v15266_v54 = vld [vmem:[#allocation9 + $0x1a8] sm:$0xff]  }
 0x554   : > { %13277 = vmatprep.mubr.bf16.mxu1 %v23742_v34  ;;  %14513 = vmatpush3.bf16.msra.mxu1 %v15239_v26  ;;  %v15251_v26 = vld [vmem:[#allocation9 + $0x130] sm:$0xff]   ;;  %v23760_v42 = vcombine.low %v21170_v46, %v21180_v35  ;;  %v23762_v13 = vcombine.low %v21186_v38, %v21231_v58  ;;  %v23765_v38 = vcombine.low %v21379_v52, %v21395_v53 }
 0x555   : > { %14514 = vmatprep.subr.bf16.mxu1 %v15241_v33  ;;  %v15253_v33 = vld [vmem:[#allocation9 + $0x178] sm:$0xff]   ;;  %v23745_v34 = vld [vmem:[#allocation213_spill] sm:$0xff]  ;;  %v23766_v58 = vcombine.low %v23720_v23, %v21294_v51  ;;  %v23775_v51 = vcombine.low %v21511_v37, %v21551_v63 }
 0x556   : > { %v15267_v46 = vld [vmem:[#allocation9 + $0x1f0] sm:$0xff]   ;;  %v23781_v23 = vld [vmem:[#allocation134_spill] sm:$0xff] }
 0x557   : > { %v15268_v35 = vld [vmem:[#allocation9 + $0x1b0] sm:$0xff]  }
 0x558   : > { %14515 = vmatpush3.bf16.msra.mxu1 %v15242_v25  ;;  %v23746_v25 = vcombine.low %v21298_v29, %v21204_v43  ;;  %v23750_v43 = vcombine.low %v21259_v3, %v21281_v48  ;;  %v23751_v29 = vld [vmem:[#allocation20_spill] sm:$0xff]  ;;  %v23758_v3 = vcombine.low %v21101_v49, %v21157_v50  ;;  %v15263_v49 = vld [vmem:[#allocation9 + $0x1e0] sm:$0xff]   ;;  %v23776_v53 = vld [vmem:[#allocation209_spill] sm:$0xff] }
 0x559   : > { %14516 = vmatprep.subr.bf16.mxu1 %v15244_v4  ;;  %v15255_v4 = vld [vmem:[#allocation9 + $0x1c0] sm:$0xff]   ;;  %v15258_v48 = vld [vmem:[#allocation9 + $0x188] sm:$0xff]  }
 0x55a   : > { %v15264_v50 = vld [vmem:[#allocation9 + $0x1a0] sm:$0xff]  }
 0x55b   : > { %13278 = vmatmul.mubr.bf16.gmra.mrb[64].mxu1 %v23743_v15  ;;  %v15254_v15 = vld [vmem:[#allocation9 + $0x138] sm:$0xff]  }
 0x55c   : > { %13285 = vmatprep.mubr.bf16.mxu1 %v23744_v21  ;;  %14517 = vmatpush3.bf16.msra.mxu1 %v15245_v11  ;;  %v23748_v11 = vcombine.low %v21216_v57, %v21245_v10  ;;  %v23752_v21 = vcombine.low %v21269_v27, %v21308_v6  ;;  %v15256_v57 = vld [vmem:[#allocation9 + $0x180] sm:$0xff]   ;;  %v15257_v10 = vld [vmem:[#allocation9 + $0x1c8] sm:$0xff]   ;;  %v15259_v27 = vld [vmem:[#allocation9 + $0x1d0] sm:$0xff]  }
 0x55d   : > { %14518 = vmatprep.subr.bf16.mxu1 %v15247_v5  ;;  %v23749_v5 = vld [vmem:[#allocation219_spill] sm:$0xff] }
 0x560   : > { %14519 = vmatpush3.bf16.msra.mxu1 %v15248_v9  ;;  %v23753_v9 = vld [vmem:[#allocation126_spill] sm:$0xff] }
 0x561   : > { %14520 = vmatprep.subr.bf16.mxu1 %v15250_v40  ;;  %v23755_v40 = vld [vmem:[#allocation200_spill] sm:$0xff] }
 0x563   : > { %13286 = vmatmul.mubr.bf16.gmra.mrb[68].mxu1 %v23745_v34  ;;  %v15260_v34 = vld [vmem:[#allocation9 + $0x190] sm:$0xff]  }
 0x564   : > { %13293 = vmatprep.mubr.bf16.mxu1 %v23746_v25  ;;  %14521 = vmatpush3.bf16.msra.mxu1 %v15251_v26  ;;  %v23756_v26 = vld [vmem:[#allocation203_spill] sm:$0xff]  ;;  %v15261_v25 = vld [vmem:[#allocation9 + $0x1d8] sm:$0xff]  }
 0x565   : > { %14522 = vmatprep.subr.bf16.mxu1 %v15253_v33  ;;  %v23757_v33 = vcombine.low %v23755_v40, %v23756_v26  ;;  %v15277_v26 = vld [vmem:[#allocation3 + $0x48] sm:$0xf] }
 0x568   : > { %14523 = vmatpush3.bf16.msra.mxu1 %v15254_v15  ;;  %v15262_v15 = vld [vmem:[#allocation9 + $0x198] sm:$0xff]  }
 0x569   : > { %14572 = vmatprep.subr.bf16.mxu1 %v15255_v4  ;;  %v15265_v4 = vld [vmem:[#allocation9 + $0x1e8] sm:$0xff]  }
 0x56b   : > { %13294 = vmatmul.mubr.bf16.gmra.mrb[72].mxu1 %v23747_v16  ;;  %v23761_v16 = vcombine.low %v21265_v19, %v21323_v59  ;;  %v23764_v19 = vcombine.low %v21462_v20, %v23719_v47  ;;  %v15270_v59 = vld [vmem:[#allocation9 + $0x1b8] sm:$0xff]   ;;  %v23768_v20 = vcombine.low %v23723_v0, %v23722_v62  ;;  %v23769_v47 = vld [vmem:[#allocation127_spill] sm:$0xff]  ;;  %v23780_v62 = vld [vmem:[#allocation133_spill] sm:$0xff] }
 0x56c   : > { %13301 = vmatprep.mubr.bf16.mxu1 %v23748_v11  ;;  %v15269_v11 = vld [vmem:[#allocation9 + $0x1f8] sm:$0xff]  }
 0x56d   : > { %v23779_v0 = vld [vmem:[#allocation226_spill] sm:$0xff] }
 0x573   : > { %13302 = vmatmul.mubr.bf16.gmra.mrb[76].mxu1 %v23749_v5  ;;  %v23763_v5 = vcombine.low %v23733_v7, %v21532_v32  ;;  %v23767_v32 = vcombine.low %v21404_v41, %v21430_v28  ;;  %v23770_v7 = vld [vmem:[#allocation130_spill] sm:$0xff]  ;;  %v23777_v41 = vld [vmem:[#allocation217_spill] sm:$0xff]  ;;  %v23778_v28 = vld [vmem:[#allocation227_spill] sm:$0xff] }
 0x574   : > { %13309 = vmatprep.mubr.bf16.mxu1 %v23750_v43  ;;  %v23771_v43 = vcombine.low %v23769_v47, %v23770_v7 }
 0x57b   : > { %13310 = vmatmul.mubr.bf16.gmra.mrb[80].mxu1 %v23751_v29  ;;  %v23772_v29 = vld [vmem:[#allocation207_spill] sm:$0xff] }
 0x57c   : > { %13317 = vmatprep.mubr.bf16.mxu1 %v23752_v21  ;;  %v23773_v21 = vld [vmem:[#allocation228_spill] sm:$0xff] }
 0x57d   : > { %v23774_v52 = vcombine.low %v23772_v29, %v23773_v21 }
 0x583   : > { %13318 = vmatmul.mubr.bf16.gmra.mrb[84].mxu1 %v23753_v9 }
 0x584   : > { %13358 = vmatprep.mubr.bf16.mxu1 %v23754_v30 }
 0x58b   : > { %13359 = vmatmul.mubr.bf16.vlgmr.msra.gmra.mrb[88].mxu1 %v23757_v33  ;;  %v14154_v33 = vcombine.low %v21182_v39, %v15277_v26 }
 0x58c   : > { %14573 = vmatpush3.bf16.msra.mxu1 %v15256_v57  ;;  %13366 = vmatprep.mubr.bf16.mxu1 %v23758_v3 }
 0x58d   : > { %14574 = vmatprep.subr.bf16.mxu1 %v15257_v10 }
 0x590   : > { %14575 = vmatpush3.bf16.msra.mxu1 %v15258_v48 }
 0x591   : > { %14576 = vmatprep.subr.bf16.mxu1 %v15259_v27 }
 0x593   : > { %13367 = vmatmul.mubr.bf16.gmra.mrb[92].mxu1 %v23759_v55 }
 0x594   : > { %13374 = vmatprep.mubr.bf16.mxu1 %v23760_v42  ;;  %14577 = vmatpush3.bf16.msra.mxu1 %v15260_v34 }
 0x595   : > { %14578 = vmatprep.subr.bf16.mxu1 %v15261_v25 }
 0x598   : > { %14579 = vmatpush3.bf16.msra.mxu1 %v15262_v15 }
 0x599   : > { %14580 = vmatprep.subr.bf16.mxu1 %v15263_v49 }
 0x59b   : > { %13375 = vmatmul.mubr.bf16.gmra.mrb[96].mxu1 %v23761_v16 }
 0x59c   : > { %13382 = vmatprep.mubr.bf16.mxu1 %v23762_v13  ;;  %14581 = vmatpush3.bf16.msra.mxu1 %v15264_v50  ;;  %v23783_v13 = vld [vmem:[#allocation229_spill] sm:$0xff] }
 0x59d   : > { %14582 = vmatprep.subr.bf16.mxu1 %v15265_v4 }
 0x5a0   : > { %14583 = vmatpush3.bf16.msra.mxu1 %v15266_v54  ;;  %v23784_v54 = vld [vmem:[#allocation138_spill] sm:$0xff] }
 0x5a1   : > { %14584 = vmatprep.subr.bf16.mxu1 %v15267_v46 }
 0x5a3   : > { %13383 = vmatmul.mubr.bf16.gmra.mrb[100].mxu1 %v23763_v5 }
 0x5a4   : > { %13390 = vmatprep.mubr.bf16.mxu1 %v23764_v19  ;;  %14585 = vmatpush3.bf16.msra.mxu1 %v15268_v35 }
 0x5a5   : > { %14586 = vmatprep.subr.bf16.mxu1 %v15269_v11 }
 0x5a8   : > { %14587 = vmatpush3.bf16.msra.mxu1 %v15270_v59 }
 0x5ab   : > { %13391 = vmatmul.mubr.bf16.gmra.mrb[104].mxu1 %v23765_v38 }
 0x5ac   : > { %13398 = vmatprep.mubr.bf16.mxu1 %v23766_v58 }
 0x5b3   : > { %13399 = vmatmul.mubr.bf16.gmra.mrb[108].mxu1 %v23767_v32 }
 0x5b4   : > { %13406 = vmatprep.mubr.bf16.mxu1 %v23768_v20 }
 0x5bb   : > { %13407 = vmatmul.mubr.bf16.gmra.mrb[112].mxu1 %v23771_v43 }
 0x5bc   : > { %13414 = vmatprep.mubr.bf16.mxu1 %v23774_v52 }
 0x5c3   : > { %13415 = vmatmul.mubr.bf16.gmra.mrb[116].mxu1 %v23775_v51 }
 0x5c4   : > { %13455 = vmatprep.mubr.bf16.mxu1 %v23776_v53 }
 0x5cb   : > { %13456 = vmatmul.mubr.bf16.vlgmr.msra.gmra.mrb[120].mxu1 %v23777_v41 }
 0x5cc   : > { %13463 = vmatprep.mubr.bf16.mxu1 %v23778_v28 }
 0x5d3   : > { %13464 = vmatmul.mubr.bf16.gmra.mrb[124].mxu1 %v23779_v0 }
 0x5d4   : > { %13471 = vmatprep.mubr.bf16.mxu1 %v23780_v62 }
 0x5db   : > { %13472 = vmatmul.mubr.bf16.gmra.mrb[128].mxu1 %v23781_v23 }
 0x5dc   : > { %13479 = vmatprep.mubr.bf16.mxu1 %v21541_v44  ;;  %v23782_v44 = vld [vmem:[#allocation19_spill] sm:$0xff] }
 0x5de   : > { %v14396_v9 = vpop.f32.mrb[24].mxu1 }
 0x5df   : > { %v14397_v30 = vpop.f32.mrb[25].mxu1 }
 0x5e0   : > { %v21672_v57 = vadd.f32 %v14397_v30, %v14396_v9  ;;  %v21674_v37 = vpop.f32.mrb[16].mxu0  ;;  %v14399_v63 = vpop.f32.mrb[26].mxu1  ;;  %v15278_v9 = vld [vmem:[#allocation3 + $0x98] sm:$0xf] }
 0x5e1   : > { %v21676_v10 = vpop.f32.mrb[17].mxu0  ;;  %v14400_v40 = vpop.f32.mrb[27].mxu1  ;;  %v14155_v30 = vcombine.low %v21308_v6, %v15278_v9 }
 0x5e2   : > { %v21679_v3 = vadd.f32 %v14400_v40, %v14399_v63  ;;  %v21681_v48 = vpop.f32.mrb[18].mxu0 }
 0x5e3   : > { %v21683_v27 = vpop.f32.mrb[19].mxu0  ;;  %13480 = vmatmul.mubr.bf16.gmra.mrb[132].mxu1 %v14154_v33 }
 0x5e4   : > { %13487 = vmatprep.mubr.bf16.mxu1 %v23782_v44 }
 0x5e6   : > { %v14402_v34 = vpop.f32.mrb[28].mxu1 }
 0x5e7   : > { %v14403_v25 = vpop.f32.mrb[29].mxu1 }
 0x5e8   : > { %v21686_v55 = vadd.f32 %v14403_v25, %v14402_v34  ;;  %v21688_v42 = vpop.f32.mrb[20].mxu0  ;;  %v14405_v15 = vpop.f32.mrb[30].mxu1 }
 0x5e9   : > { %v21690_v49 = vpop.f32.mrb[21].mxu0  ;;  %v14406_v50 = vpop.f32.mrb[31].mxu1 }
 0x5ea   : > { %v21692_v39 = vadd.f32 %v14406_v50, %v14405_v15  ;;  %v21694_v4 = vpop.f32.mrb[22].mxu0 }
 0x5eb   : > { %v21696_v16 = vpop.f32.mrb[23].mxu0  ;;  %13488 = vmatmul.mubr.bf16.gmra.mrb[136].mxu1 %v23783_v13 }
 0x5ec   : > { %13495 = vmatprep.mubr.bf16.mxu1 %v23784_v54 }
 0x5ee   : > { %v14408_v46 = vpop.f32.mrb[32].mxu1 }
 0x5ef   : > { %v14409_v35 = vpop.f32.mrb[33].mxu1 }
 0x5f0   : > { %v21700_v11 = vadd.f32 %v14409_v35, %v14408_v46  ;;  %v14411_v5 = vpop.f32.mrb[34].mxu1  ;;  %v21702_v19 = vpop.f32.mrb[24].mxu0 }
 0x5f1   : > { %v14412_v59 = vpop.f32.mrb[35].mxu1  ;;  %v21704_v38 = vpop.f32.mrb[25].mxu0 }
 0x5f2   : > { %v21706_v58 = vadd.f32 %v14412_v59, %v14411_v5  ;;  %v21708_v32 = vpop.f32.mrb[26].mxu0 }
 0x5f3   : > { %13496 = vmatmul.mubr.bf16.gmra.mrb[140].mxu1 %v21507_v22  ;;  %v21711_v20 = vpop.f32.mrb[27].mxu0 }
 0x5f4   : > { %13503 = vmatprep.mubr.bf16.mxu1 %v21516_v8 }
 0x5f6   : > { %v14414_v47 = vpop.f32.mrb[36].mxu1 }
 0x5f7   : > { %v14415_v7 = vpop.f32.mrb[37].mxu1 }
 0x5f8   : > { %v21714_v43 = vadd.f32 %v14415_v7, %v14414_v47  ;;  %v14417_v29 = vpop.f32.mrb[38].mxu1  ;;  %v21716_v21 = vpop.f32.mrb[28].mxu0 }
 0x5f9   : > { %v14418_v52 = vpop.f32.mrb[39].mxu1  ;;  %v21718_v51 = vpop.f32.mrb[29].mxu0 }
 0x5fa   : > { %v21720_v53 = vadd.f32 %v14418_v52, %v14417_v29  ;;  %v21722_v41 = vpop.f32.mrb[30].mxu0 }
 0x5fb   : > { %13504 = vmatmul.mubr.bf16.gmra.mrb[144].mxu1 %v21547_v12  ;;  %v21725_v22 = vpop.f32.mrb[31].mxu0 }
 0x5fc   : > { %13511 = vmatprep.mubr.bf16.mxu1 %v21556_v24 }
 0x5fe   : > { %v14420_v8 = vpop.f32.mrb[40].mxu1 }
 0x5ff   : > { %v14421_v28 = vpop.f32.mrb[41].mxu1 }
 0x600   : > { %v14422_v0 = vadd.f32 %v14421_v28, %v14420_v8  ;;  %v14423_v62 = vpop.f32.mrb[42].mxu1 }
 0x601   : > { %v14424_v23 = vpop.f32.mrb[43].mxu1 }
 0x602   : > { %v14425_v63 = vadd.f32 %v14424_v23, %v14423_v62 }
 0x603   : > { %13512 = vmatmul.mubr.bf16.gmra.mrb[148].mxu1 %v14155_v30 }
 0x606   : > { %v14426_v40 = vpop.f32.mrb[44].mxu1 }
 0x607   : > { %v14427_v26 = vpop.f32.mrb[45].mxu1 }
 0x608   : > { %v14428_v33 = vadd.f32 %v14427_v26, %v14426_v40  ;;  %v14429_v44 = vpop.f32.mrb[46].mxu1 }
 0x609   : > { %v14430_v34 = vpop.f32.mrb[47].mxu1 }
 0x60a   : > { %v14431_v12 = vadd.f32 %v14430_v34, %v14429_v44 }
 0x60e   : > { %v14432_v25 = vpop.f32.mrb[48].mxu1 }
 0x60f   : > { %v14433_v15 = vpop.f32.mrb[49].mxu1 }
 0x610   : > { %v21729_v50 = vadd.f32 %v14433_v15, %v14432_v25  ;;  %v14435_v24 = vpop.f32.mrb[50].mxu1 }
 0x611   : > { %v14436_v13 = vpop.f32.mrb[51].mxu1 }
 0x612   : > { %v14437_v54 = vadd.f32 %v14436_v13, %v14435_v24 }
 0x616   : > { %v14438_v46 = vpop.f32.mrb[52].mxu1 }
 0x617   : > { %v14439_v35 = vpop.f32.mrb[53].mxu1 }
 0x618   : > { %v21731_v5 = vadd.f32 %v14439_v35, %v14438_v46  ;;  %v14441_v6 = vpop.f32.mrb[54].mxu1 }
 0x619   : > { %v14442_v59 = vpop.f32.mrb[55].mxu1 }
 0x61a   : > { %v21733_v47 = vadd.f32 %v14442_v59, %v14441_v6 }
 0x61e   : > { %v14460_v7 = vpop.f32.mrb[56].mxu1 }
 0x61f   : > { %v14461_v29 = vpop.f32.mrb[57].mxu1 }
 0x620   : > { %v14462_v52 = vadd.f32 %v14461_v29, %v14460_v7  ;;  %v14463_v8 = vpop.f32.mrb[58].mxu1 }
 0x621   : > { %v14464_v28 = vpop.f32.mrb[59].mxu1 }
 0x622   : > { %v21736_v62 = vadd.f32 %v14462_v52, %v21672_v57  ;;  %v14465_v23 = vadd.f32 %v14464_v28, %v14463_v8 }
 0x624   : > { %v21739_v9 = vadd.f32 %v14465_v23, %v21679_v3 }
 0x626   : > { %v14466_v30 = vpop.f32.mrb[60].mxu1 }
 0x627   : > { %v14467_v40 = vpop.f32.mrb[61].mxu1 }
 0x628   : > { %v14468_v26 = vadd.f32 %v14467_v40, %v14466_v30  ;;  %v14469_v44 = vpop.f32.mrb[62].mxu1 }
 0x629   : > { %v14470_v34 = vpop.f32.mrb[63].mxu1 }
 0x62a   : > { %v21742_v25 = vadd.f32 %v14468_v26, %v21686_v55  ;;  %v14471_v15 = vadd.f32 %v14470_v34, %v14469_v44 }
 0x62c   : > { %v21745_v24 = vadd.f32 %v14471_v15, %v21692_v39 }
 0x62e   : > { %v14472_v13 = vpop.f32.mrb[64].mxu1 }
 0x62f   : > { %v14473_v46 = vpop.f32.mrb[65].mxu1 }
 0x630   : > { %v14474_v57 = vadd.f32 %v14473_v46, %v14472_v13  ;;  %v14475_v35 = vpop.f32.mrb[66].mxu1 }
 0x631   : > { %v14476_v6 = vpop.f32.mrb[67].mxu1 }
 0x632   : > { %v21748_v3 = vadd.f32 %v14474_v57, %v21700_v11  ;;  %v14477_v59 = vadd.f32 %v14476_v6, %v14475_v35 }
 0x634   : > { %v21751_v7 = vadd.f32 %v14477_v59, %v21706_v58 }
 0x636   : > { %v14478_v29 = vpop.f32.mrb[68].mxu1 }
 0x637   : > { %v14479_v52 = vpop.f32.mrb[69].mxu1 }
 0x638   : > { %v14480_v55 = vadd.f32 %v14479_v52, %v14478_v29  ;;  %v14481_v8 = vpop.f32.mrb[70].mxu1 }
 0x639   : > { %v14482_v28 = vpop.f32.mrb[71].mxu1 }
 0x63a   : > { %v21754_v39 = vadd.f32 %v14480_v55, %v21714_v43  ;;  %v14483_v23 = vadd.f32 %v14482_v28, %v14481_v8 }
 0x63c   : > { %v21757_v30 = vadd.f32 %v14483_v23, %v21720_v53 }
 0x63e   : > { %v14484_v40 = vpop.f32.mrb[72].mxu1 }
 0x63f   : > { %v14485_v26 = vpop.f32.mrb[73].mxu1 }
 0x640   : > { %v14486_v11 = vadd.f32 %v14485_v26, %v14484_v40  ;;  %v14487_v44 = vpop.f32.mrb[74].mxu1 }
 0x641   : > { %v14488_v34 = vpop.f32.mrb[75].mxu1 }
 0x642   : > { %v21759_v15 = vadd.f32 %v14486_v11, %v14422_v0  ;;  %v14489_v58 = vadd.f32 %v14488_v34, %v14487_v44 }
 0x644   : > { %v21761_v13 = vadd.f32 %v14489_v58, %v14425_v63 }
 0x646   : > { %v14490_v46 = vpop.f32.mrb[76].mxu1 }
 0x647   : > { %v14491_v57 = vpop.f32.mrb[77].mxu1 }
 0x648   : > { %v14492_v35 = vadd.f32 %v14491_v57, %v14490_v46  ;;  %v14493_v6 = vpop.f32.mrb[78].mxu1 }
 0x649   : > { %v14494_v43 = vpop.f32.mrb[79].mxu1 }
 0x64a   : > { %v21763_v59 = vadd.f32 %v14492_v35, %v14428_v33  ;;  %v14495_v29 = vadd.f32 %v14494_v43, %v14493_v6 }
 0x64c   : > { %v21765_v53 = vadd.f32 %v14495_v29, %v14431_v12 }
 0x64e   : > { %v14496_v52 = vpop.f32.mrb[80].mxu1 }
 0x64f   : > { %v14497_v55 = vpop.f32.mrb[81].mxu1 }
 0x650   : > { %v14498_v8 = vadd.f32 %v14497_v55, %v14496_v52  ;;  %v14499_v28 = vpop.f32.mrb[82].mxu1 }
 0x651   : > { %v14500_v23 = vpop.f32.mrb[83].mxu1 }
 0x652   : > { %v21768_v0 = vadd.f32 %v14498_v8, %v21729_v50  ;;  %v14501_v63 = vadd.f32 %v14500_v23, %v14499_v28 }
 0x654   : > { %v21770_v40 = vadd.f32 %v14501_v63, %v14437_v54 }
 0x656   : > { %v14502_v26 = vpop.f32.mrb[84].mxu1 }
 0x657   : > { %v14503_v11 = vpop.f32.mrb[85].mxu1 }
 0x658   : > { %v14504_v44 = vadd.f32 %v14503_v11, %v14502_v26  ;;  %v14505_v34 = vpop.f32.mrb[86].mxu1 }
 0x659   : > { %v14506_v33 = vpop.f32.mrb[87].mxu1 }
 0x65a   : > { %v21773_v58 = vadd.f32 %v14504_v44, %v21731_v5  ;;  %v14507_v12 = vadd.f32 %v14506_v33, %v14505_v34 }
 0x65c   : > { %v21776_v46 = vadd.f32 %v14507_v12, %v21733_v47 }
 0x65e   : > { %v14524_v57 = vpop.f32.mrb[88].mxu1 }
 0x65f   : > { %v14525_v35 = vpop.f32.mrb[89].mxu1 }
 0x660   : > { %v14526_v6 = vadd.f32 %v14525_v35, %v14524_v57  ;;  %v14527_v50 = vpop.f32.mrb[90].mxu1 }
 0x661   : > { %v14528_v43 = vpop.f32.mrb[91].mxu1 }
 0x662   : > { %v21779_v54 = vadd.f32 %v14526_v6, %v21736_v62  ;;  %v14529_v29 = vadd.f32 %v14528_v43, %v14527_v50 }
 0x664   : > { %v21782_v52 = vadd.f32 %v14529_v29, %v21739_v9 }
 0x666   : > { %v14530_v55 = vpop.f32.mrb[92].mxu1 }
 0x667   : > { %v14531_v8 = vpop.f32.mrb[93].mxu1 }
 0x668   : > { %v14532_v5 = vadd.f32 %v14531_v8, %v14530_v55  ;;  %v14533_v28 = vpop.f32.mrb[94].mxu1 }
 0x669   : > { %v14534_v23 = vpop.f32.mrb[95].mxu1 }
 0x66a   : > { %v21785_v47 = vadd.f32 %v14532_v5, %v21742_v25  ;;  %v14535_v63 = vadd.f32 %v14534_v23, %v14533_v28 }
 0x66c   : > { %v21788_v26 = vadd.f32 %v14535_v63, %v21745_v24 }
 0x66e   : > { %v14536_v11 = vpop.f32.mrb[96].mxu1 }
 0x66f   : > { %v14537_v44 = vpop.f32.mrb[97].mxu1 }
 0x670   : > { %v14538_v62 = vadd.f32 %v14537_v44, %v14536_v11  ;;  %v14539_v34 = vpop.f32.mrb[98].mxu1 }
 0x671   : > { %v14540_v33 = vpop.f32.mrb[99].mxu1 }
 0x672   : > { %v21791_v9 = vadd.f32 %v14538_v62, %v21748_v3  ;;  %v14541_v12 = vadd.f32 %v14540_v33, %v14539_v34 }
 0x674   : > { %v21794_v57 = vadd.f32 %v14541_v12, %v21751_v7 }
 0x676   : > { %v14542_v35 = vpop.f32.mrb[100].mxu1 }
 0x677   : > { %v14543_v6 = vpop.f32.mrb[101].mxu1 }
 0x678   : > { %v14544_v25 = vadd.f32 %v14543_v6, %v14542_v35  ;;  %v14545_v50 = vpop.f32.mrb[102].mxu1 }
 0x679   : > { %v14546_v43 = vpop.f32.mrb[103].mxu1 }
 0x67a   : > { %v21797_v24 = vadd.f32 %v14544_v25, %v21754_v39  ;;  %v14547_v29 = vadd.f32 %v14546_v43, %v14545_v50 }
 0x67c   : > { %v21800_v55 = vadd.f32 %v14547_v29, %v21757_v30 }
 0x67e   : > { %v14548_v8 = vpop.f32.mrb[104].mxu1 }
 0x67f   : > { %v14549_v5 = vpop.f32.mrb[105].mxu1 }
 0x680   : > { %v14550_v3 = vadd.f32 %v14549_v5, %v14548_v8  ;;  %v14551_v28 = vpop.f32.mrb[106].mxu1 }
 0x681   : > { %v14552_v23 = vpop.f32.mrb[107].mxu1 }
 0x682   : > { %v21803_v7 = vadd.f32 %v14550_v3, %v21759_v15  ;;  %v14553_v63 = vadd.f32 %v14552_v23, %v14551_v28 }
 0x684   : > { %v21806_v11 = vadd.f32 %v14553_v63, %v21761_v13 }
 0x686   : > { %v14554_v44 = vpop.f32.mrb[108].mxu1 }
 0x687   : > { %v14555_v62 = vpop.f32.mrb[109].mxu1 }
 0x688   : > { %v14556_v39 = vadd.f32 %v14555_v62, %v14554_v44  ;;  %v14557_v34 = vpop.f32.mrb[110].mxu1 }
 0x689   : > { %v14558_v33 = vpop.f32.mrb[111].mxu1 }
 0x68a   : > { %v21809_v30 = vadd.f32 %v14556_v39, %v21763_v59  ;;  %v14559_v12 = vadd.f32 %v14558_v33, %v14557_v34 }
 0x68c   : > { %v21812_v35 = vadd.f32 %v14559_v12, %v21765_v53 }
 0x68e   : > { %v14560_v6 = vpop.f32.mrb[112].mxu1 }
 0x68f   : > { %v14561_v25 = vpop.f32.mrb[113].mxu1 }
 0x690   : > { %v14562_v15 = vadd.f32 %v14561_v25, %v14560_v6  ;;  %v14563_v50 = vpop.f32.mrb[114].mxu1 }
 0x691   : > { %v14564_v43 = vpop.f32.mrb[115].mxu1 }
 0x692   : > { %v21815_v13 = vadd.f32 %v14562_v15, %v21768_v0  ;;  %v14565_v29 = vadd.f32 %v14564_v43, %v14563_v50  ;;  %v21844_v50 = vld [vmem:[%s22037_s9] ss:$0 sm:$0xff] }
 0x693   : > { %v21851_v43 = vld [vmem:[%s23785_s23] ss:$0 sm:$0xff] }
 0x694   : > { %v21818_v8 = vadd.f32 %v14565_v29, %v21770_v40  ;;  %v21829_v40 = vld [vmem:[%s22036_s8] ss:$0 sm:$0xff] }
 0x696   : > { %v14566_v5 = vpop.f32.mrb[116].mxu1 }
 0x697   : > { %v14567_v3 = vpop.f32.mrb[117].mxu1 }
 0x698   : > { %v14568_v59 = vadd.f32 %v14567_v3, %v14566_v5  ;;  %v14569_v28 = vpop.f32.mrb[118].mxu1 }
 0x699   : > { %v14570_v23 = vpop.f32.mrb[119].mxu1 }
 0x69a   : > { %v21821_v53 = vadd.f32 %v14568_v59, %v21773_v58  ;;  %v14571_v63 = vadd.f32 %v14570_v23, %v14569_v28  ;;  %v21835_v58 = vld [vmem:[%s22033_s5] ss:$0 sm:$0xff] }
 0x69c   : > { %v21824_v44 = vadd.f32 %v14571_v63, %v21776_v46  ;;  %v11472_v46 = vmul.f32 %v21829_v40, %v21524_v60 }
 0x69e   : > { %v14588_v62 = vpop.f32.mrb[120].mxu1 }
 0x69f   : > { %v14589_v39 = vpop.f32.mrb[121].mxu1 }
 0x6a0   : > { %v14590_v0 = vadd.f32 %v14589_v39, %v14588_v62  ;;  %v14591_v34 = vpop.f32.mrb[122].mxu1 }
 0x6a1   : > { %v14592_v33 = vpop.f32.mrb[123].mxu1 }
 0x6a2   : > { %v13458_v12 = vadd.f32 %v14590_v0, %v21779_v54  ;;  %v14593_v6 = vadd.f32 %v14592_v33, %v14591_v34  ;;  %v11473_v54 = vmul.f32 %v21829_v40, %v21534_v56  ;;  %v23786_v34 = vld [vmem:[#allocation128_spill] sm:$0xff] }
 0x6a3   : > { %v11474_v33 = vmul.f32 %v23786_v34, %v21829_v40  ;;  %v11477_v34 = vmul.f32 %v21829_v40, %v21566_v45 }
 0x6a4   : > { %v13555_v25 = vadd.f32 %v21676_v10, %v13458_v12  ;;  %v13461_v15 = vadd.f32 %v14593_v6, %v21782_v52  ;;  %v11495_v52 = vadd.f32 %v21844_v50, %v11472_v46  ;;  %v11496_v23 = vadd.f32 %v21844_v50, %v11473_v54 }
 0x6a5   : > { %v11500_v45 = vadd.f32 %v21844_v50, %v11477_v34 }
 0x6a6   : > { %v13624_v29 = vmul.f32 %v21835_v58, %v13555_v25  ;;  %v13558_v60 = vadd.f32 %v21683_v27, %v13461_v15  ;;  %v14594_v10 = vpop.f32.mrb[124].mxu1  ;;  %v11475_v15 = vmul.f32 %v21528_v2, %v21829_v40 }
 0x6a7   : > { %v14595_v5 = vpop.f32.mrb[125].mxu1 }
 0x6a8   : > { %v13647_v3 = vadd.f32 %v21851_v43, %v13624_v29  ;;  %v13625_v59 = vmul.f32 %v21835_v58, %v13558_v60  ;;  %v14596_v28 = vadd.f32 %v14595_v5, %v14594_v10  ;;  %v14597_v56 = vpop.f32.mrb[126].mxu1  ;;  %v11497_v5 = vadd.f32 %v21844_v50, %v11474_v33 }
 0x6a9   : > { %v14598_v63 = vpop.f32.mrb[127].mxu1 }
 0x6aa   : > { %v13663_v62 = vadd.f32 %v13647_v3, %v11495_v52  ;;  %v13648_v39 = vadd.f32 %v21851_v43, %v13625_v59  ;;  %v13466_v0 = vadd.f32 %v14596_v28, %v21785_v47  ;;  %v14599_v27 = vadd.f32 %v14598_v63, %v14597_v56 }
 0x6ab   : > { %v11498_v3 = vadd.f32 %v21844_v50, %v11475_v15  ;;  %v11476_v63 = vmul.f32 %v21829_v40, %v21559_v17 }
 0x6ac   : > { %v13679_v12 = vmax.f32 %v13663_v62, 0.0  ;;  %v13664_v6 = vadd.f32 %v13648_v39, %v11496_v23  ;;  %v13563_v46 = vadd.f32 %v21674_v37, %v13466_v0  ;;  %v13469_v25 = vadd.f32 %v14599_v27, %v21788_v26 }
 0x6ae   : > { %13695 = vst [vmem:[%s21868_s19] sm:$0xff] %v13679_v12  ;;  %v13680_v54 = vmax.f32 %v13664_v6, 0.0  ;;  %v13626_v47 = vmul.f32 %v21835_v58, %v13563_v46  ;;  %v13566_v29 = vadd.f32 %v21681_v48, %v13469_v25  ;;  %v14600_v60 = vpop.f32.mrb[128].mxu1  ;;  %v11499_v25 = vadd.f32 %v21844_v50, %v11476_v63 }
 0x6af   : > { %v14601_v10 = vpop.f32.mrb[129].mxu1 }
 0x6b0   : > { %13696 = vst [vmem:[%s21868_s19 + $0x8] sm:$0xff] %v13680_v54  ;;  %v13649_v37 = vadd.f32 %v21851_v43, %v13626_v47  ;;  %v13627_v2 = vmul.f32 %v21835_v58, %v13566_v29  ;;  %v14602_v26 = vadd.f32 %v14601_v10, %v14600_v60  ;;  %v14603_v52 = vpop.f32.mrb[130].mxu1  ;;  %v11478_v10 = vmul.f32 %v21538_v31, %v21829_v40 }
 0x6b1   : > { %v14604_v59 = vpop.f32.mrb[131].mxu1 }
 0x6b2   : > { %v13665_v28 = vadd.f32 %v13649_v37, %v11497_v5  ;;  %v13650_v56 = vadd.f32 %v21851_v43, %v13627_v2  ;;  %v13474_v48 = vadd.f32 %v14602_v26, %v21791_v9  ;;  %v14605_v23 = vadd.f32 %v14604_v59, %v14603_v52  ;;  %v23787_v52 = vld [vmem:[#allocation146_spill] sm:$0xff] }
 0x6b4   : > { %v13681_v62 = vmax.f32 %v13665_v28, 0.0  ;;  %v13666_v39 = vadd.f32 %v13650_v56, %v11498_v3  ;;  %v13571_v0 = vadd.f32 %v21690_v49, %v13474_v48  ;;  %v13477_v27 = vadd.f32 %v14605_v23, %v21794_v57 }
 0x6b5   : > { %v11479_v3 = vmul.f32 %v23787_v52, %v21829_v40  ;;  %v11501_v23 = vadd.f32 %v21844_v50, %v11478_v10  ;;  %v23788_v10 = vld [vmem:[#allocation148_spill] sm:$0xff] }
 0x6b6   : > { %13697 = vst [vmem:[%s21868_s19 + $0x10] sm:$0xff] %v13681_v62  ;;  %v13682_v33 = vmax.f32 %v13666_v39, 0.0  ;;  %v13628_v12 = vmul.f32 %v21835_v58, %v13571_v0  ;;  %v13574_v6 = vadd.f32 %v21696_v16, %v13477_v27  ;;  %v14606_v9 = vpop.f32.mrb[132].mxu1 }
 0x6b7   : > { %v14607_v46 = vpop.f32.mrb[133].mxu1  ;;  %v11502_v62 = vadd.f32 %v21844_v50, %v11479_v3  ;;  %v23789_v3 = vld [vmem:[#allocation131_spill] sm:$0xff] }
 0x6b8   : > { %13698 = vst [vmem:[%s21868_s19 + $0x18] sm:$0xff] %v13682_v33  ;;  %v13651_v17 = vadd.f32 %v21851_v43, %v13628_v12  ;;  %v13629_v49 = vmul.f32 %v21835_v58, %v13574_v6  ;;  %v14608_v57 = vadd.f32 %v14607_v46, %v14606_v9  ;;  %v14609_v15 = vpop.f32.mrb[134].mxu1  ;;  %v11480_v33 = vmul.f32 %v21829_v40, %v21573_v14 }
 0x6b9   : > { %v14610_v54 = vpop.f32.mrb[135].mxu1 }
 0x6ba   : > { %v13667_v47 = vadd.f32 %v13651_v17, %v11499_v25  ;;  %v13652_v29 = vadd.f32 %v21851_v43, %v13629_v49  ;;  %v13482_v16 = vadd.f32 %v14608_v57, %v21797_v24  ;;  %v14611_v60 = vadd.f32 %v14610_v54, %v14609_v15 }
 0x6bb   : > { %v11481_v25 = vmul.f32 %v21829_v40, %v21580_v36 }
 0x6bc   : > { %v13683_v5 = vmax.f32 %v13667_v47, 0.0  ;;  %v13668_v37 = vadd.f32 %v13652_v29, %v11500_v45  ;;  %v13579_v2 = vadd.f32 %v21688_v42, %v13482_v16  ;;  %v13485_v26 = vadd.f32 %v14611_v60, %v21800_v55 }
 0x6bd   : > { %v11503_v45 = vadd.f32 %v21844_v50, %v11480_v33  ;;  %v11504_v36 = vadd.f32 %v21844_v50, %v11481_v25 }
 0x6be   : > { %13699 = vst [vmem:[%s21868_s19 + $0x20] sm:$0xff] %v13683_v5  ;;  %v13684_v59 = vmax.f32 %v13668_v37, 0.0  ;;  %v13630_v28 = vmul.f32 %v21835_v58, %v13579_v2  ;;  %v13582_v56 = vadd.f32 %v21694_v4, %v13485_v26  ;;  %v14612_v24 = vpop.f32.mrb[136].mxu1  ;;  %v11482_v5 = vmul.f32 %v23788_v10, %v21829_v40 }
 0x6bf   : > { %v14613_v48 = vpop.f32.mrb[137].mxu1 }
 0x6c0   : > { %13700 = vst [vmem:[%s21868_s19 + $0x28] sm:$0xff] %v13684_v59  ;;  %v13653_v31 = vadd.f32 %v21851_v43, %v13630_v28  ;;  %v13631_v42 = vmul.f32 %v21835_v58, %v13582_v56  ;;  %v14614_v55 = vadd.f32 %v14613_v48, %v14612_v24  ;;  %v14615_v63 = vpop.f32.mrb[138].mxu1  ;;  %v11483_v59 = vmul.f32 %v23789_v3, %v21829_v40 }
 0x6c1   : > { %v14616_v39 = vpop.f32.mrb[139].mxu1 }
 0x6c2   : > { %v13669_v0 = vadd.f32 %v13653_v31, %v11501_v23  ;;  %v13654_v27 = vadd.f32 %v21851_v43, %v13631_v42  ;;  %v13490_v4 = vadd.f32 %v14614_v55, %v21803_v7  ;;  %v14617_v34 = vadd.f32 %v14616_v39, %v14615_v63 }
 0x6c3   : > { %v11505_v23 = vadd.f32 %v21844_v50, %v11482_v5  ;;  %v11506_v55 = vadd.f32 %v21844_v50, %v11483_v59 }
 0x6c4   : > { %v13685_v12 = vmax.f32 %v13669_v0, 0.0  ;;  %v13670_v6 = vadd.f32 %v13654_v27, %v11502_v62  ;;  %v13587_v9 = vadd.f32 %v21704_v38, %v13490_v4  ;;  %v13493_v46 = vadd.f32 %v14617_v34, %v21806_v11 }
 0x6c5   : > { %v11484_v27 = vmul.f32 %v21829_v40, %v21585_v18 }
 0x6c6   : > { %13701 = vst [vmem:[%s21868_s19 + $0x30] sm:$0xff] %v13685_v12  ;;  %v13686_v17 = vmax.f32 %v13670_v6, 0.0  ;;  %v13632_v49 = vmul.f32 %v21835_v58, %v13587_v9  ;;  %v13590_v57 = vadd.f32 %v21711_v20, %v13493_v46  ;;  %v14618_v7 = vpop.f32.mrb[140].mxu1  ;;  %v11485_v6 = vmul.f32 %v21829_v40, %v21592_v1 }
 0x6c7   : > { %v14619_v15 = vpop.f32.mrb[141].mxu1 }
 0x6c8   : > { %13702 = vst [vmem:[%s21868_s19 + $0x38] sm:$0xff] %v13686_v17  ;;  %v13655_v14 = vadd.f32 %v21851_v43, %v13632_v49  ;;  %v13633_v38 = vmul.f32 %v21835_v58, %v13590_v57  ;;  %v14620_v11 = vadd.f32 %v14619_v15, %v14618_v7  ;;  %v14621_v54 = vpop.f32.mrb[142].mxu1  ;;  %v11507_v49 = vadd.f32 %v21844_v50, %v11484_v27 }
 0x6c9   : > { %v14622_v47 = vpop.f32.mrb[143].mxu1  ;;  %v11508_v1 = vadd.f32 %v21844_v50, %v11485_v6 }
 0x6ca   : > { %v13671_v29 = vadd.f32 %v13655_v14, %v11503_v45  ;;  %v13656_v16 = vadd.f32 %v21851_v43, %v13633_v38  ;;  %v13498_v20 = vadd.f32 %v14620_v11, %v21809_v30  ;;  %v14623_v60 = vadd.f32 %v14622_v47, %v14621_v54  ;;  %v23790_v38 = vld [vmem:[#allocation135_spill] sm:$0xff] }
 0x6cb   : > { %v11486_v11 = vmul.f32 %v23790_v38, %v21829_v40 }
 0x6cc   : > { %v13687_v37 = vmax.f32 %v13671_v29, 0.0  ;;  %v13672_v2 = vadd.f32 %v13656_v16, %v11504_v36  ;;  %v13595_v26 = vadd.f32 %v21702_v19, %v13498_v20  ;;  %v13501_v52 = vadd.f32 %v14623_v60, %v21812_v35 }
 0x6cd   : > { %v11487_v16 = vmul.f32 %v21590_v61, %v21829_v40  ;;  %v11509_v10 = vadd.f32 %v21844_v50, %v11486_v11 }
 0x6ce   : > { %13703 = vst [vmem:[%s21868_s19 + $0x40] sm:$0xff] %v13687_v37  ;;  %v13688_v28 = vmax.f32 %v13672_v2, 0.0  ;;  %v13634_v56 = vmul.f32 %v21835_v58, %v13595_v26  ;;  %v13598_v24 = vadd.f32 %v21708_v32, %v13501_v52  ;;  %v14624_v30 = vpop.f32.mrb[144].mxu1 }
 0x6cf   : > { %v14625_v48 = vpop.f32.mrb[145].mxu1 }
 0x6d0   : > { %13704 = vst [vmem:[%s21868_s19 + $0x48] sm:$0xff] %v13688_v28  ;;  %v13657_v31 = vadd.f32 %v21851_v43, %v13634_v56  ;;  %v13635_v19 = vmul.f32 %v21835_v58, %v13598_v24  ;;  %v14626_v35 = vadd.f32 %v14625_v48, %v14624_v30  ;;  %v14627_v42 = vpop.f32.mrb[146].mxu1 }
 0x6d1   : > { %v14628_v63 = vpop.f32.mrb[147].mxu1 }
 0x6d2   : > { %v13673_v62 = vadd.f32 %v13657_v31, %v11505_v23  ;;  %v13658_v39 = vadd.f32 %v21851_v43, %v13635_v19  ;;  %v13506_v32 = vadd.f32 %v14626_v35, %v21815_v13  ;;  %v14629_v0 = vadd.f32 %v14628_v63, %v14627_v42 }
 0x6d4   : > { %v13689_v4 = vmax.f32 %v13673_v62, 0.0  ;;  %v13674_v34 = vadd.f32 %v13658_v39, %v11506_v55  ;;  %v13603_v33 = vadd.f32 %v21718_v51, %v13506_v32  ;;  %v13509_v12 = vadd.f32 %v14629_v0, %v21818_v8 }
 0x6d6   : > { %13705 = vst [vmem:[%s21868_s19 + $0x50] sm:$0xff] %v13689_v4  ;;  %v13690_v9 = vmax.f32 %v13674_v34, 0.0  ;;  %v13636_v46 = vmul.f32 %v21835_v58, %v13603_v33  ;;  %v13606_v25 = vadd.f32 %v21725_v22, %v13509_v12  ;;  %v14630_v13 = vpop.f32.mrb[148].mxu1 }
 0x6d7   : > { %v14631_v17 = vpop.f32.mrb[149].mxu1 }
 0x6d8   : > { %13706 = vst [vmem:[%s21868_s19 + $0x58] sm:$0xff] %v13690_v9  ;;  %v13659_v18 = vadd.f32 %v21851_v43, %v13636_v46  ;;  %v13637_v51 = vmul.f32 %v21835_v58, %v13606_v25  ;;  %v14632_v8 = vadd.f32 %v14631_v17, %v14630_v13  ;;  %v14633_v57 = vpop.f32.mrb[150].mxu1 }
 0x6d9   : > { %v14634_v7 = vpop.f32.mrb[151].mxu1 }
 0x6da   : > { %v13675_v15 = vadd.f32 %v13659_v18, %v11507_v49  ;;  %v13660_v45 = vadd.f32 %v21851_v43, %v13637_v51  ;;  %v13514_v22 = vadd.f32 %v14632_v8, %v21821_v53  ;;  %v14635_v14 = vadd.f32 %v14634_v7, %v14633_v57 }
 0x6dc   : > { %v13691_v54 = vmax.f32 %v13675_v15, 0.0  ;;  %v13676_v36 = vadd.f32 %v13660_v45, %v11508_v1  ;;  %v13611_v47 = vadd.f32 %v21716_v21, %v13514_v22  ;;  %v13517_v29 = vadd.f32 %v14635_v14, %v21824_v44 }
 0x6dd   : > { %v11510_v44 = vadd.f32 %v21844_v50, %v11487_v16 }
 0x6de   : > { %13707 = vst [vmem:[%s21868_s19 + $0x60] sm:$0xff] %v13691_v54  ;;  %v13692_v20 = vmax.f32 %v13676_v36, 0.0  ;;  %v13638_v53 = vmul.f32 %v21835_v58, %v13611_v47  ;;  %v13614_v60 = vadd.f32 %v21722_v41, %v13517_v29 }
 0x6e0   : > { %13708 = vst [vmem:[%s21868_s19 + $0x68] sm:$0xff] %v13692_v20  ;;  %v13661_v5 = vadd.f32 %v21851_v43, %v13638_v53  ;;  %v13639_v21 = vmul.f32 %v21835_v58, %v13614_v60 }
 0x6e2   : > { %v13677_v61 = vadd.f32 %v13661_v5, %v11509_v10  ;;  %v13662_v40 = vadd.f32 %v21851_v43, %v13639_v21 }
 0x6e4   : > { %v13693_v37 = vmax.f32 %v13677_v61, 0.0  ;;  %v13678_v2 = vadd.f32 %v13662_v40, %v11510_v44 }
 0x6e6   : > { %13709 = vst [vmem:[%s21868_s19 + $0x70] sm:$0xff] %v13693_v37  ;;  %v13694_v41 = vmax.f32 %v13678_v2, 0.0 }
 0x6e8   : > { %13710 = vst [vmem:[%s21868_s19 + $0x78] sm:$0xff] %v13694_v41 }
 0x6e9   : > { %15406 = shalt.err (!%p15403_p4)
}
 0x6ea   : > { %s15407_s25 = scalar_lea.hbm %s21980_s6, 2048  ;;  %s15411_s19 = scalar_lea.hbm %s23791_s26, 4096 }
 0x6eb   : > { %p15408_p9 = scmp.ne.s32.totalorder %s21980_s6, %s15407_s25  ;;  %p15412_p8 = scmp.lt.u32.totalorder %s21980_s6, %s23791_s26 }
 0x6ec   : > { %p15413_p13 = scmp.lt.u32.totalorder %s15411_s19, %s15407_s25  ;;  %p15415_p10 = scmp.lt.u32.totalorder %s15407_s25, %s21980_s6 }
 0x6ed   : > { %p15409_p0 = pnand %p15408_p9, %p15689_p5 }
 0x6ee   : > { %p15414_p6 = por %p15413_p13, %p15412_p8 }
 0x6ef   : > { %p15410_p11 = pneg %p15409_p0 }
 0x6f0   : > { %p15416_p3 = por %p15415_p10, %p15414_p6 }
 0x6f2   : > { %p15417_p7 = pnand %p15416_p3, %p15410_p11 }
 0x6f4   : > { %15420 = shalt.err (!%p15417_p7)
}
 0x6f5   : > { %s15478_s29 = smov 128   ;;  %s15479_s18 = smov 8  }
 0x6f6   : > { %15074 = dma.vmem_to_hbm [thread:$0]  (%p15689_p5), %s21982_s30, 2048, %s21980_s6, %s13712_s24, %s15478_s29, %s15478_s29, %s15479_s18  }
 0x6f7 PF: > { %s23792_s17 = sld [smem:[#allocation17_spill]]  ;;  %s23793_s28 = sld [smem:[#allocation18_spill]] }
 0x6f8   : > { %p23795_p1 = scmp.ge.s32.totalorder %s15467_s16, 2 }
 0x6fd   : > { %s13741_s27 = sand.u32 1, %s23792_s17   ;;  %p23794_p12 = scmp.ne.s32.totalorder %s23793_s28, 0 }
 0x6fe   : > { %s13742_s25 = scalar_lea.sflag [#allocation6], %s13741_s27 }
 0x6ff   : > { %p15091_p2 = pnand %p23795_p1, %p23794_p12 }
 0x701   : > { %15450 = dma.done.wait (!%p15091_p2), %s13742_s25, 2048  }
 0x702   : > { %15452 = vsyncadd (!%p15091_p2), %s13742_s25, 4294965248  ;;  %s23796_s23 = smov %s15685_s13  ;;  %p25_p4 = scmp.ge.s32.totalorder %s15675_s22, 4  }
 0x703   : > { %s23797_s13 = smov %s15459_s14  ;;  %s23798_s14 = smov %s15463_s15 }
 0x704   : > { %s23799_s15 = smov %s23796_s23  ;;  %s23800_s16 = smov %s15675_s22 }
 0x705   :  { %27 = sbr.rel (!%p25_p4) target bundleno = 10 (0xa), region = 129 }
 0x70c   :  { %13747 = vsyncpa [#allocation5], 1 }
 0x70d   :  { %13749 = vsyncpa [#allocation5 + $0x1], 1 }
 0x70e   :  { %13750 = vsyncpa [#allocation8], 1 }
 0x70f   :  { %13751 = vsyncpa [#allocation11], 1 }
 0x710   :  { %13752 = vsyncpa [#allocation6], 1 }
 0x711   :  { %13754 = vsyncpa [#allocation6 + $0x1], 1 }

</bundles_post_ra>
